<compile_context>
chip_gen: v5e
topology: v5e:2x2
jax: 0.10.0
libtpu: 0.0.40
codegen_flags: <defaults>
</compile_context>

<pallas_src>
import functools
import math

import jax
import jax.numpy as jnp
from jax import lax
from jax.experimental import pallas as pl
from jax.experimental.pallas import tpu as pltpu


# ----------------------------- in-kernel helpers -----------------------------

def _ln(x, g, b, eps):
    # Annotated-Transformer LayerNorm: unbiased variance (N-1), eps added to std.
    mean = jnp.mean(x, axis=-1, keepdims=True)
    d = x - mean
    var = jnp.sum(d * d, axis=-1, keepdims=True) / (x.shape[-1] - 1)
    return g * d / (jnp.sqrt(var) + eps) + b


# ----------------------------- small generic linear -----------------------------

def _linear_kernel(x_ref, w_ref, b_ref, o_ref, *, activation, scale):
    y = jnp.dot(x_ref[...], w_ref[...], preferred_element_type=jnp.float32) + b_ref[...]
    if scale is not None:
        y = y * scale
    if activation == "relu":
        y = jnp.maximum(y, 0.0)
    o_ref[...] = y


def pallas_linear(x, w, b, activation=None, scale=None):
    """y = act((x @ w + b) * scale). Full-extent blocks (no padding), single step."""
    M, K = x.shape
    N = w.shape[1]
    return pl.pallas_call(
        functools.partial(_linear_kernel, activation=activation, scale=scale),
        out_shape=jax.ShapeDtypeStruct((M, N), jnp.float32),
        grid=(1,),
        in_specs=[
            pl.BlockSpec((M, K), lambda i: (0, 0)),
            pl.BlockSpec((K, N), lambda i: (0, 0)),
            pl.BlockSpec((1, N), lambda i: (0, 0)),
        ],
        out_specs=pl.BlockSpec((M, N), lambda i: (0, 0)),
    )(x, w, b.reshape(1, N))


# ----------------------------- fused encoder layer -----------------------------

def _encoder_layer_kernel(x_ref, m_ref,
                          ln1g_ref, ln1b_ref, wqkv_ref, bqkv_ref, wo_ref, bo_ref,
                          ln2g_ref, ln2b_ref, w1_ref, b1_ref, w2_ref, b2_ref,
                          o_ref, *, h, eps):
    x = x_ref[0]                       # (S, D) activations stay in VMEM
    S, D = x.shape
    dk = D // h
    scale = 1.0 / math.sqrt(dk)
    mask = m_ref[0]                    # (1, S) key mask, broadcast over query rows

    # --- self-attention sublayer (pre-norm residual) ---
    xn = _ln(x, ln1g_ref[...], ln1b_ref[...], eps)
    qkv = jnp.dot(xn, wqkv_ref[...], preferred_element_type=jnp.float32) + bqkv_ref[...]
    q, k, v = qkv[:, :D], qkv[:, D:2 * D], qkv[:, 2 * D:]

    heads = []
    for hd in range(h):                # static unroll over heads
        sl = slice(hd * dk, (hd + 1) * dk)
        qh, kh, vh = q[:, sl], k[:, sl], v[:, sl]
        # contract last dims: no explicit transpose of K materialized
        s = lax.dot_general(qh, kh, (((1,), (1,)), ((), ())),
                            preferred_element_type=jnp.float32) * scale
        s = jnp.where(mask == 0.0, jnp.float32(-1e9), s)
        s = s - jnp.max(s, axis=-1, keepdims=True)
        p = jnp.exp(s)
        p = p * pl.reciprocal(jnp.sum(p, axis=-1, keepdims=True), approx=True)
        heads.append(jnp.dot(p, vh, preferred_element_type=jnp.float32))
    attn = jnp.concatenate(heads, axis=-1)                         # (S, D)
    x = x + jnp.dot(attn, wo_ref[...], preferred_element_type=jnp.float32) + bo_ref[...]

    # --- feed-forward sublayer (pre-norm residual) ---
    xn = _ln(x, ln2g_ref[...], ln2b_ref[...], eps)
    ff = jnp.maximum(
        jnp.dot(xn, w1_ref[...], preferred_element_type=jnp.float32) + b1_ref[...], 0.0)
    x = x + jnp.dot(ff, w2_ref[...], preferred_element_type=jnp.float32) + b2_ref[...]
    o_ref[0] = x


def encoder_layer(x, lp, mask, h, eps=1e-6):
    B, S, D = x.shape
    d_ff = lp["w1"].shape[1]
    full2 = lambda shape: pl.BlockSpec(shape, lambda b: (0, 0))
    return pl.pallas_call(
        functools.partial(_encoder_layer_kernel, h=h, eps=eps),
        out_shape=jax.ShapeDtypeStruct((B, S, D), jnp.float32),
        grid=(B,),
        in_specs=[
            pl.BlockSpec((1, S, D), lambda b: (b, 0, 0)),
            pl.BlockSpec((1, 1, S), lambda b: (b, 0, 0)),
            full2((1, D)), full2((1, D)),
            full2((D, 3 * D)), full2((1, 3 * D)),
            full2((D, D)), full2((1, D)),
            full2((1, D)), full2((1, D)),
            full2((D, d_ff)), full2((1, d_ff)),
            full2((d_ff, D)), full2((1, D)),
        ],
        out_specs=pl.BlockSpec((1, S, D), lambda b: (b, 0, 0)),
        compiler_params=pltpu.CompilerParams(dimension_semantics=("parallel",)),
    )(x, mask,
      lp["ln1_g"].reshape(1, D), lp["ln1_b"].reshape(1, D),
      lp["w_qkv"], lp["b_qkv"].reshape(1, 3 * D),
      lp["wo"], lp["bo"].reshape(1, D),
      lp["ln2_g"].reshape(1, D), lp["ln2_b"].reshape(1, D),
      lp["w1"], lp["b1"].reshape(1, d_ff),
      lp["w2"], lp["b2"].reshape(1, D))


# ----------------------------- fused final LayerNorm + fc -----------------------------

def _final_kernel(x_ref, g_ref, b_ref, wfc_ref, bfc_ref, enc_ref, logit_ref, *, eps):
    B, S, D = x_ref.shape
    y = _ln(x_ref[...].reshape(B * S, D), g_ref[...], b_ref[...], eps).reshape(B, S, D)
    enc_ref[...] = y
    logit_ref[...] = (jnp.dot(y[:, 0, :], wfc_ref[...],
                              preferred_element_type=jnp.float32) + bfc_ref[...])


def final_norm_fc(x, g, b, wfc, bfc, eps=1e-6):
    B, S, D = x.shape
    L = wfc.shape[1]
    enc, logit = pl.pallas_call(
        functools.partial(_final_kernel, eps=eps),
        out_shape=(jax.ShapeDtypeStruct((B, S, D), jnp.float32),
                   jax.ShapeDtypeStruct((B, L), jnp.float32)),
        grid=(1,),
        in_specs=[
            pl.BlockSpec((B, S, D), lambda i: (0, 0, 0)),
            pl.BlockSpec((1, D), lambda i: (0, 0)),
            pl.BlockSpec((1, D), lambda i: (0, 0)),
            pl.BlockSpec((D, L), lambda i: (0, 0)),
            pl.BlockSpec((1, L), lambda i: (0, 0)),
        ],
        out_specs=(pl.BlockSpec((B, S, D), lambda i: (0, 0, 0)),
                   pl.BlockSpec((B, L), lambda i: (0, 0))),
    )(x, g.reshape(1, D), b.reshape(1, D), wfc, bfc.reshape(1, L))
    return enc, logit


# ----------------------------- fused map encoder -----------------------------

def _map_encoder_kernel(patch_ref, traj_ref, wc_ref, bc_ref,
                        w1_ref, b1_ref, w2_ref, b2_ref, o_ref):
    nb, hw, kc = patch_ref.shape
    p = patch_ref[...].reshape(nb * hw, kc)
    # conv-as-matmul + ReLU + global average pool, all in VMEM (no HBM roundtrip
    # of the lane-sparse (HW, 8) conv activations).
    f = jnp.maximum(
        jnp.dot(p, wc_ref[...], preferred_element_type=jnp.float32) + bc_ref[...], 0.0)
    pooled = jnp.mean(f.reshape(nb, hw, -1), axis=1)               # (nb, conv_out)
    z = jnp.concatenate([pooled, traj_ref[...]], axis=-1)
    z = jnp.maximum(
        jnp.dot(z, w1_ref[...], preferred_element_type=jnp.float32) + b1_ref[...], 0.0)
    o_ref[...] = (jnp.dot(z, w2_ref[...], preferred_element_type=jnp.float32)
                  + b2_ref[...])


def map_encoder_forward(mp, traj, maps_nchw):
    # TODO(synk): real map_encoder is a torch.load()'d checkpoint; synthetic
    # conv3x3 -> ReLU -> avgpool -> MLP with the same interface is used instead.
    N, C, H, W = maps_nchw.shape
    # layout glue: NCHW -> NHWC, 3x3 'same' im2col in plain JAX.
    x = jnp.transpose(maps_nchw, (0, 2, 3, 1))
    xp = jnp.pad(x, ((0, 0), (1, 1), (1, 1), (0, 0)))
    cols = [xp[:, i:i + H, j:j + W, :] for i in range(3) for j in range(3)]
    patches = jnp.concatenate(cols, axis=-1).reshape(N, H * W, 9 * C)

    img_blk = 8 if N % 8 == 0 else N
    cout = mp["w_conv"].shape[1]
    f_traj = traj.shape[1]
    dmid = mp["w1"].shape[1]
    dlat = mp["w2"].shape[1]
    full2 = lambda shape: pl.BlockSpec(shape, lambda i: (0, 0))
    return pl.pallas_call(
        _map_encoder_kernel,
        out_shape=jax.ShapeDtypeStruct((N, dlat), jnp.float32),
        grid=(N // img_blk,),
        in_specs=[
            pl.BlockSpec((img_blk, H * W, 9 * C), lambda i: (i, 0, 0)),
            pl.BlockSpec((img_blk, f_traj), lambda i: (i, 0)),
            full2((9 * C, cout)), full2((1, cout)),
            full2((cout + f_traj, dmid)), full2((1, dmid)),
            full2((dmid, dlat)), full2((1, dlat)),
        ],
        out_specs=pl.BlockSpec((img_blk, dlat), lambda i: (i, 0)),
        compiler_params=pltpu.CompilerParams(dimension_semantics=("parallel",)),
    )(patches, traj, mp["w_conv"], mp["b_conv"].reshape(1, cout),
      mp["w1"], mp["b1"].reshape(1, dmid),
      mp["w2"], mp["b2"].reshape(1, dlat))


# ----------------------------- model forward -----------------------------

def make_pe(max_len, d):
    pos = jnp.arange(max_len, dtype=jnp.float32)[:, None]
    div = jnp.exp(jnp.arange(0, d, 2, dtype=jnp.float32) * (-math.log(10000.0) / d))
    pe = jnp.zeros((max_len, d), jnp.float32)
    pe = pe.at[:, 0::2].set(jnp.sin(pos * div))
    pe = pe.at[:, 1::2].set(jnp.cos(pos * div))
    return pe


def encoder_y_forward(params, src_trg, src_trg_mask, map_imgs, logit_token, *, h):
    B, T, F = src_trg.shape
    d_e = params["w_emb"].shape[1]                 # d_model - d_map_latent (static)
    d_map = params["map_enc"]["w2"].shape[1]

    # map features for each of the trajectory points (fused single kernel)
    map_feat = map_encoder_forward(
        params["map_enc"],
        src_trg.reshape(-1, F),
        map_imgs.reshape((-1,) + map_imgs.shape[2:]),
    ).reshape(B, T, d_map)

    # LinearEmbedding * sqrt(d_model - d_map_latent) + PositionalEncoding
    emb = pallas_linear(src_trg.reshape(-1, F), params["w_emb"], params["b_emb"],
                        scale=math.sqrt(d_e))
    emb = emb.reshape(B, T, d_e) + params["pe"][:T][None]

    src_trg_emb = jnp.concatenate([emb, map_feat], axis=-1)        # (B, T, d_model)
    x = jnp.concatenate([logit_token, src_trg_emb], axis=1)        # (B, T+1, d_model)

    for lp in params["layers"]:
        x = encoder_layer(x, lp, src_trg_mask, h)

    enc_out, logit = final_norm_fc(x, params["ln_f_g"], params["ln_f_b"],
                                   params["w_fc"], params["b_fc"])
    return enc_out[:, 1:], logit


# ----------------------------- parameters -----------------------------

def xavier(key, shape):
    fin, fout = shape
    lim = math.sqrt(6.0 / (fin + fout))
    return jax.random.uniform(key, shape, jnp.float32, -lim, lim)


def make_params(key, *, enc_inp_size, d_latent, N, d_model, d_ff, h,
                d_map_latent, map_c, max_len=100):
    keys = iter(jax.random.split(key, 256))
    d_e = d_model - d_map_latent
    p = {}
    p["w_emb"] = xavier(next(keys), (enc_inp_size, d_e))
    p["b_emb"] = jnp.zeros((d_e,), jnp.float32)
    p["pe"] = make_pe(max_len, d_e)
    layers = []
    for _ in range(N):
        lp = {
            "ln1_g": jnp.ones((d_model,), jnp.float32),
            "ln1_b": jnp.zeros((d_model,), jnp.float32),
            "ln2_g": jnp.ones((d_model,), jnp.float32),
            "ln2_b": jnp.zeros((d_model,), jnp.float32),
        }
        wq = xavier(next(keys), (d_model, d_model))
        wk = xavier(next(keys), (d_model, d_model))
        wv = xavier(next(keys), (d_model, d_model))
        lp["w_qkv"] = jnp.concatenate([wq, wk, wv], axis=1)        # fused QKV weight
        lp["b_qkv"] = jnp.zeros((3 * d_model,), jnp.float32)
        lp["wo"] = xavier(next(keys), (d_model, d_model))
        lp["bo"] = jnp.zeros((d_model,), jnp.float32)
        lp["w1"] = xavier(next(keys), (d_model, d_ff))
        lp["b1"] = jnp.zeros((d_ff,), jnp.float32)
        lp["w2"] = xavier(next(keys), (d_ff, d_model))
        lp["b2"] = jnp.zeros((d_model,), jnp.float32)
        layers.append(lp)
    p["layers"] = layers
    p["ln_f_g"] = jnp.ones((d_model,), jnp.float32)
    p["ln_f_b"] = jnp.zeros((d_model,), jnp.float32)
    p["w_fc"] = xavier(next(keys), (d_model, d_latent))
    p["b_fc"] = jnp.zeros((d_latent,), jnp.float32)
    # synthetic map encoder (see TODO at top of file)
    conv_out = 8
    p["map_enc"] = {
        "w_conv": xavier(next(keys), (9 * map_c, conv_out)),
        "b_conv": jnp.zeros((conv_out,), jnp.float32),
        "w1": xavier(next(keys), (conv_out + enc_inp_size, 16)),
        "b1": jnp.zeros((16,), jnp.float32),
        "w2": xavier(next(keys), (16, d_map_latent)),
        "b2": jnp.zeros((d_map_latent,), jnp.float32),
    }
    return p


# ----------------------------- main -----------------------------

if __name__ == "__main__":
    key = jax.random.PRNGKey(0)
    B, T, F = 2, 20, 3            # T = 20 is hard-coded in EncoderY.forward's reshape
    C, H, W = 3, 16, 16           # map image (NCHW per sample)
    d_model, d_ff, h, N = 64, 128, 4, 2
    d_latent, d_map_latent = 16, 8

    kp, kx, km, kt = jax.random.split(key, 4)
    params = make_params(kp, enc_inp_size=F, d_latent=d_latent, N=N,
                         d_model=d_model, d_ff=d_ff, h=h,
                         d_map_latent=d_map_latent, map_c=C)

    src_trg = jax.random.normal(kx, (B, T, F), jnp.float32)
    map_imgs = jax.random.uniform(km, (B, T, C, H, W), jnp.float32)
    src_trg_mask = jnp.ones((B, 1, T + 1), jnp.float32)
    # deterministic stand-in for np.random.rand(B, 1, d_model) logit token
    logit_token = jax.random.uniform(kt, (B, 1, d_model), jnp.float32)

    forward = jax.jit(functools.partial(encoder_y_forward, h=h))
    enc_out, logit = forward(params, src_trg, src_trg_mask, map_imgs, logit_token)
    jax.block_until_ready((enc_out, logit))
    assert enc_out.shape == (B, T, d_model), enc_out.shape
    assert logit.shape == (B, d_latent), logit.shape
    print("KERNEL_OK")
</pallas_src>

<mosaic_0001>
module attributes {stable_mosaic.version = 11 : i64} {
  func.func @_linear_kernel(%arg0: i32, %arg1: memref<40x3xf32, #tpu.memory_space<vmem>>, %arg2: memref<3x56xf32, #tpu.memory_space<vmem>>, %arg3: memref<1x56xf32, #tpu.memory_space<vmem>>, %arg4: memref<40x56xf32, #tpu.memory_space<vmem>>) attributes {dimension_semantics = [#tpu.dimension_semantics<arbitrary>], iteration_bounds = array<i64: 1>, scalar_prefetch = 0 : i64, scratch_operands = 0 : i64, tpu.core_type = #tpu.core_type<tc>, window_params = [{pipeline_mode = #tpu.pipeline_mode<synchronous>, transform_indices = @transform_0, window_bounds = array<i64: 40, 3>}, {pipeline_mode = #tpu.pipeline_mode<synchronous>, transform_indices = @transform_1, window_bounds = array<i64: 3, 56>}, {pipeline_mode = #tpu.pipeline_mode<synchronous>, transform_indices = @transform_2, window_bounds = array<i64: 1, 56>}, {pipeline_mode = #tpu.pipeline_mode<synchronous>, transform_indices = @transform_3, window_bounds = array<i64: 40, 56>}]} {
    %c0 = arith.constant 0 : index
    %c0_0 = arith.constant 0 : index
    %0 = vector.load %arg1[%c0, %c0_0] : memref<40x3xf32, #tpu.memory_space<vmem>>, vector<40x3xf32>
    %c0_1 = arith.constant 0 : index
    %c0_2 = arith.constant 0 : index
    %1 = vector.load %arg2[%c0_1, %c0_2] : memref<3x56xf32, #tpu.memory_space<vmem>>, vector<3x56xf32>
    %cst = arith.constant dense<0.000000e+00> : vector<40x56xf32>
    %2 = tpu.matmul %0, %1, %cst {dimension_numbers = #tpu.dot_dimension_numbers<[1], [0], [0], [1], [0, 0, 1, 1], [], []>} : vector<40x3xf32>, vector<3x56xf32>, vector<40x56xf32> -> vector<40x56xf32>
    %c0_3 = arith.constant 0 : index
    %c0_4 = arith.constant 0 : index
    %3 = vector.load %arg3[%c0_3, %c0_4] : memref<1x56xf32, #tpu.memory_space<vmem>>, vector<1x56xf32>
    %4 = vector.broadcast %3 : vector<1x56xf32> to vector<40x56xf32>
    %5 = arith.addf %2, %4 : vector<40x56xf32>
    %cst_5 = arith.constant 7.48331499 : f32
    %6 = vector.broadcast %cst_5 : f32 to vector<40x56xf32>
    %7 = arith.mulf %5, %6 : vector<40x56xf32>
    %c0_6 = arith.constant 0 : index
    %c0_7 = arith.constant 0 : index
    %8 = vector.load %arg4[%c0_6, %c0_7] : memref<40x56xf32, #tpu.memory_space<vmem>>, vector<40x56xf32>
    tpu.vector_store %arg4[%c0_6, %c0_7], %7 {strides = array<i32>} : memref<40x56xf32, #tpu.memory_space<vmem>>, vector<40x56xf32>,
    return
  }
  func.func @transform_0(%arg0: i32) -> (i32, i32) {
    %c0_i32 = arith.constant 0 : i32
    %c0_i32_0 = arith.constant 0 : i32
    %c0_i32_1 = arith.constant 0 : i32
    return %c0_i32, %c0_i32_0 : i32, i32
  }
  func.func @transform_1(%arg0: i32) -> (i32, i32) {
    %c0_i32 = arith.constant 0 : i32
    %c0_i32_0 = arith.constant 0 : i32
    %c0_i32_1 = arith.constant 0 : i32
    return %c0_i32, %c0_i32_0 : i32, i32
  }
  func.func @transform_2(%arg0: i32) -> (i32, i32) {
    %c0_i32 = arith.constant 0 : i32
    %c0_i32_0 = arith.constant 0 : i32
    %c0_i32_1 = arith.constant 0 : i32
    return %c0_i32, %c0_i32_0 : i32, i32
  }
  func.func @transform_3(%arg0: i32) -> (i32, i32) {
    %c0_i32 = arith.constant 0 : i32
    %c0_i32_0 = arith.constant 0 : i32
    %c0_i32_1 = arith.constant 0 : i32
    return %c0_i32, %c0_i32_0 : i32, i32
  }
}

module attributes {stable_mosaic.version = 11 : i64} {
  func.func @_map_encoder_kernel(%arg0: i32, %arg1: memref<8x256x27xf32, #tpu.memory_space<vmem>>, %arg2: memref<8x3xf32, #tpu.memory_space<vmem>>, %arg3: memref<27x8xf32, #tpu.memory_space<vmem>>, %arg4: memref<1x8xf32, #tpu.memory_space<vmem>>, %arg5: memref<11x16xf32, #tpu.memory_space<vmem>>, %arg6: memref<1x16xf32, #tpu.memory_space<vmem>>, %arg7: memref<16x8xf32, #tpu.memory_space<vmem>>, %arg8: memref<1x8xf32, #tpu.memory_space<vmem>>, %arg9: memref<8x8xf32, #tpu.memory_space<vmem>>) attributes {dimension_semantics = [#tpu.dimension_semantics<parallel>], iteration_bounds = array<i64: 5>, scalar_prefetch = 0 : i64, scratch_operands = 0 : i64, tpu.core_type = #tpu.core_type<tc>, window_params = [{transform_indices = @transform_0, window_bounds = array<i64: 8, 256, 27>}, {transform_indices = @transform_1, window_bounds = array<i64: 8, 3>}, {pipeline_mode = #tpu.pipeline_mode<synchronous>, transform_indices = @transform_2, window_bounds = array<i64: 27, 8>}, {pipeline_mode = #tpu.pipeline_mode<synchronous>, transform_indices = @transform_3, window_bounds = array<i64: 1, 8>}, {pipeline_mode = #tpu.pipeline_mode<synchronous>, transform_indices = @transform_4, window_bounds = array<i64: 11, 16>}, {pipeline_mode = #tpu.pipeline_mode<synchronous>, transform_indices = @transform_5, window_bounds = array<i64: 1, 16>}, {pipeline_mode = #tpu.pipeline_mode<synchronous>, transform_indices = @transform_6, window_bounds = array<i64: 16, 8>}, {pipeline_mode = #tpu.pipeline_mode<synchronous>, transform_indices = @transform_7, window_bounds = array<i64: 1, 8>}, {transform_indices = @transform_8, window_bounds = array<i64: 8, 8>}]} {
    %c0 = arith.constant 0 : index
    %c0_0 = arith.constant 0 : index
    %c0_1 = arith.constant 0 : index
    %0 = vector.load %arg1[%c0, %c0_0, %c0_1] : memref<8x256x27xf32, #tpu.memory_space<vmem>>, vector<8x256x27xf32>
    %1 = vector.shape_cast %0 : vector<8x256x27xf32> to vector<2048x27xf32>
    %c0_2 = arith.constant 0 : index
    %c0_3 = arith.constant 0 : index
    %2 = vector.load %arg3[%c0_2, %c0_3] : memref<27x8xf32, #tpu.memory_space<vmem>>, vector<27x8xf32>
    %cst = arith.constant dense<0.000000e+00> : vector<2048x8xf32>
    %3 = tpu.matmul %1, %2, %cst {dimension_numbers = #tpu.dot_dimension_numbers<[1], [0], [0], [1], [0, 0, 1, 1], [], []>} : vector<2048x27xf32>, vector<27x8xf32>, vector<2048x8xf32> -> vector<2048x8xf32>
    %c0_4 = arith.constant 0 : index
    %c0_5 = arith.constant 0 : index
    %4 = vector.load %arg4[%c0_4, %c0_5] : memref<1x8xf32, #tpu.memory_space<vmem>>, vector<1x8xf32>
    %5 = vector.broadcast %4 : vector<1x8xf32> to vector<2048x8xf32>
    %6 = arith.addf %3, %5 : vector<2048x8xf32>
    %cst_6 = arith.constant 0.000000e+00 : f32
    %7 = vector.broadcast %cst_6 : f32 to vector<2048x8xf32>
    %8 = arith.maximumf %6, %7 : vector<2048x8xf32>
    %9 = vector.shape_cast %8 : vector<2048x8xf32> to vector<8x256x8xf32>
    %cst_7 = arith.constant dense<0.000000e+00> : vector<8x8xf32>
    %10 = vector.multi_reduction <add>, %9, %cst_7 [1] : vector<8x256x8xf32> to vector<8x8xf32>
    %cst_8 = arith.constant 2.560000e+02 : f32
    %11 = vector.broadcast %cst_8 : f32 to vector<8x8xf32>
    %12 = arith.divf %10, %11 : vector<8x8xf32>
    %c0_9 = arith.constant 0 : index
    %c0_10 = arith.constant 0 : index
    %13 = vector.load %arg2[%c0_9, %c0_10] : memref<8x3xf32, #tpu.memory_space<vmem>>, vector<8x3xf32>
    %14 = tpu.concatenate %12, %13 in 1 : vector<8x8xf32>, vector<8x3xf32> -> vector<8x11xf32>
    %c0_11 = arith.constant 0 : index
    %c0_12 = arith.constant 0 : index
    %15 = vector.load %arg5[%c0_11, %c0_12] : memref<11x16xf32, #tpu.memory_space<vmem>>, vector<11x16xf32>
    %cst_13 = arith.constant dense<0.000000e+00> : vector<8x16xf32>
    %16 = tpu.matmul %14, %15, %cst_13 {dimension_numbers = #tpu.dot_dimension_numbers<[1], [0], [0], [1], [0, 0, 1, 1], [], []>} : vector<8x11xf32>, vector<11x16xf32>, vector<8x16xf32> -> vector<8x16xf32>
    %c0_14 = arith.constant 0 : index
    %c0_15 = arith.constant 0 : index
    %17 = vector.load %arg6[%c0_14, %c0_15] : memref<1x16xf32, #tpu.memory_space<vmem>>, vector<1x16xf32>
    %18 = vector.broadcast %17 : vector<1x16xf32> to vector<8x16xf32>
    %19 = arith.addf %16, %18 : vector<8x16xf32>
    %cst_16 = arith.constant 0.000000e+00 : f32
    %20 = vector.broadcast %cst_16 : f32 to vector<8x16xf32>
    %21 = arith.maximumf %19, %20 : vector<8x16xf32>
    %c0_17 = arith.constant 0 : index
    %c0_18 = arith.constant 0 : index
    %22 = vector.load %arg7[%c0_17, %c0_18] : memref<16x8xf32, #tpu.memory_space<vmem>>, vector<16x8xf32>
    %cst_19 = arith.constant dense<0.000000e+00> : vector<8x8xf32>
    %23 = tpu.matmul %21, %22, %cst_19 {dimension_numbers = #tpu.dot_dimension_numbers<[1], [0], [0], [1], [0, 0, 1, 1], [], []>} : vector<8x16xf32>, vector<16x8xf32>, vector<8x8xf32> -> vector<8x8xf32>
    %c0_20 = arith.constant 0 : index
    %c0_21 = arith.constant 0 : index
    %24 = vector.load %arg8[%c0_20, %c0_21] : memref<1x8xf32, #tpu.memory_space<vmem>>, vector<1x8xf32>
    %25 = vector.broadcast %24 : vector<1x8xf32> to vector<8x8xf32>
    %26 = arith.addf %23, %25 : vector<8x8xf32>
    %c0_22 = arith.constant 0 : index
    %c0_23 = arith.constant 0 : index
    %27 = vector.load %arg9[%c0_22, %c0_23] : memref<8x8xf32, #tpu.memory_space<vmem>>, vector<8x8xf32>
    tpu.vector_store %arg9[%c0_22, %c0_23], %26 {strides = array<i32>} : memref<8x8xf32, #tpu.memory_space<vmem>>, vector<8x8xf32>,
    return
  }
  func.func @transform_0(%arg0: i32) -> (i32, i32, i32) {
    %c0_i32 = arith.constant 0 : i32
    %c0_i32_0 = arith.constant 0 : i32
    %c0_i32_1 = arith.constant 0 : i32
    return %arg0, %c0_i32, %c0_i32_0 : i32, i32, i32
  }
  func.func @transform_1(%arg0: i32) -> (i32, i32) {
    %c0_i32 = arith.constant 0 : i32
    %c0_i32_0 = arith.constant 0 : i32
    return %arg0, %c0_i32 : i32, i32
  }
  func.func @transform_2(%arg0: i32) -> (i32, i32) {
    %c0_i32 = arith.constant 0 : i32
    %c0_i32_0 = arith.constant 0 : i32
    %c0_i32_1 = arith.constant 0 : i32
    return %c0_i32, %c0_i32_0 : i32, i32
  }
  func.func @transform_3(%arg0: i32) -> (i32, i32) {
    %c0_i32 = arith.constant 0 : i32
    %c0_i32_0 = arith.constant 0 : i32
    %c0_i32_1 = arith.constant 0 : i32
    return %c0_i32, %c0_i32_0 : i32, i32
  }
  func.func @transform_4(%arg0: i32) -> (i32, i32) {
    %c0_i32 = arith.constant 0 : i32
    %c0_i32_0 = arith.constant 0 : i32
    %c0_i32_1 = arith.constant 0 : i32
    return %c0_i32, %c0_i32_0 : i32, i32
  }
  func.func @transform_5(%arg0: i32) -> (i32, i32) {
    %c0_i32 = arith.constant 0 : i32
    %c0_i32_0 = arith.constant 0 : i32
    %c0_i32_1 = arith.constant 0 : i32
    return %c0_i32, %c0_i32_0 : i32, i32
  }
  func.func @transform_6(%arg0: i32) -> (i32, i32) {
    %c0_i32 = arith.constant 0 : i32
    %c0_i32_0 = arith.constant 0 : i32
    %c0_i32_1 = arith.constant 0 : i32
    return %c0_i32, %c0_i32_0 : i32, i32
  }
  func.func @transform_7(%arg0: i32) -> (i32, i32) {
    %c0_i32 = arith.constant 0 : i32
    %c0_i32_0 = arith.constant 0 : i32
    %c0_i32_1 = arith.constant 0 : i32
    return %c0_i32, %c0_i32_0 : i32, i32
  }
  func.func @transform_8(%arg0: i32) -> (i32, i32) {
    %c0_i32 = arith.constant 0 : i32
    %c0_i32_0 = arith.constant 0 : i32
    return %arg0, %c0_i32 : i32, i32
  }
}

module attributes {stable_mosaic.version = 11 : i64} {
  func.func @_encoder_layer_kernel(%arg0: i32, %arg1: memref<1x21x64xf32, #tpu.memory_space<vmem>>, %arg2: memref<1x1x21xf32, #tpu.memory_space<vmem>>, %arg3: memref<1x64xf32, #tpu.memory_space<vmem>>, %arg4: memref<1x64xf32, #tpu.memory_space<vmem>>, %arg5: memref<64x192xf32, #tpu.memory_space<vmem>>, %arg6: memref<1x192xf32, #tpu.memory_space<vmem>>, %arg7: memref<64x64xf32, #tpu.memory_space<vmem>>, %arg8: memref<1x64xf32, #tpu.memory_space<vmem>>, %arg9: memref<1x64xf32, #tpu.memory_space<vmem>>, %arg10: memref<1x64xf32, #tpu.memory_space<vmem>>, %arg11: memref<64x128xf32, #tpu.memory_space<vmem>>, %arg12: memref<1x128xf32, #tpu.memory_space<vmem>>, %arg13: memref<128x64xf32, #tpu.memory_space<vmem>>, %arg14: memref<1x64xf32, #tpu.memory_space<vmem>>, %arg15: memref<1x21x64xf32, #tpu.memory_space<vmem>>) attributes {dimension_semantics = [#tpu.dimension_semantics<parallel>], iteration_bounds = array<i64: 2>, scalar_prefetch = 0 : i64, scratch_operands = 0 : i64, tpu.core_type = #tpu.core_type<tc>, window_params = [{transform_indices = @transform_0, window_bounds = array<i64: 1, 21, 64>}, {transform_indices = @transform_1, window_bounds = array<i64: 1, 1, 21>}, {pipeline_mode = #tpu.pipeline_mode<synchronous>, transform_indices = @transform_2, window_bounds = array<i64: 1, 64>}, {pipeline_mode = #tpu.pipeline_mode<synchronous>, transform_indices = @transform_3, window_bounds = array<i64: 1, 64>}, {pipeline_mode = #tpu.pipeline_mode<synchronous>, transform_indices = @transform_4, window_bounds = array<i64: 64, 192>}, {pipeline_mode = #tpu.pipeline_mode<synchronous>, transform_indices = @transform_5, window_bounds = array<i64: 1, 192>}, {pipeline_mode = #tpu.pipeline_mode<synchronous>, transform_indices = @transform_6, window_bounds = array<i64: 64, 64>}, {pipeline_mode = #tpu.pipeline_mode<synchronous>, transform_indices = @transform_7, window_bounds = array<i64: 1, 64>}, {pipeline_mode = #tpu.pipeline_mode<synchronous>, transform_indices = @transform_8, window_bounds = array<i64: 1, 64>}, {pipeline_mode = #tpu.pipeline_mode<synchronous>, transform_indices = @transform_9, window_bounds = array<i64: 1, 64>}, {pipeline_mode = #tpu.pipeline_mode<synchronous>, transform_indices = @transform_10, window_bounds = array<i64: 64, 128>}, {pipeline_mode = #tpu.pipeline_mode<synchronous>, transform_indices = @transform_11, window_bounds = array<i64: 1, 128>}, {pipeline_mode = #tpu.pipeline_mode<synchronous>, transform_indices = @transform_12, window_bounds = array<i64: 128, 64>}, {pipeline_mode = #tpu.pipeline_mode<synchronous>, transform_indices = @transform_13, window_bounds = array<i64: 1, 64>}, {transform_indices = @transform_14, window_bounds = array<i64: 1, 21, 64>}]} {
    %c0 = arith.constant 0 : index
    %c0_0 = arith.constant 0 : index
    %c0_1 = arith.constant 0 : index
    %0 = vector.load %arg1[%c0, %c0_0, %c0_1] : memref<1x21x64xf32, #tpu.memory_space<vmem>>, vector<1x21x64xf32>
    %1 = vector.shape_cast %0 : vector<1x21x64xf32> to vector<21x64xf32>
    %c0_2 = arith.constant 0 : index
    %c0_3 = arith.constant 0 : index
    %c0_4 = arith.constant 0 : index
    %2 = vector.load %arg2[%c0_2, %c0_3, %c0_4] : memref<1x1x21xf32, #tpu.memory_space<vmem>>, vector<1x1x21xf32>
    %3 = vector.shape_cast %2 : vector<1x1x21xf32> to vector<1x21xf32>
    %c0_5 = arith.constant 0 : index
    %c0_6 = arith.constant 0 : index
    %4 = vector.load %arg3[%c0_5, %c0_6] : memref<1x64xf32, #tpu.memory_space<vmem>>, vector<1x64xf32>
    %c0_7 = arith.constant 0 : index
    %c0_8 = arith.constant 0 : index
    %5 = vector.load %arg4[%c0_7, %c0_8] : memref<1x64xf32, #tpu.memory_space<vmem>>, vector<1x64xf32>
    %cst = arith.constant dense<0.000000e+00> : vector<21xf32>
    %6 = vector.multi_reduction <add>, %1, %cst [1] : vector<21x64xf32> to vector<21xf32>
    %7 = vector.shape_cast %6 : vector<21xf32> to vector<21x1xf32>
    %cst_9 = arith.constant 6.400000e+01 : f32
    %8 = vector.broadcast %cst_9 : f32 to vector<21x1xf32>
    %9 = arith.divf %7, %8 : vector<21x1xf32>
    %10 = vector.broadcast %9 : vector<21x1xf32> to vector<21x64xf32>
    %11 = arith.subf %1, %10 : vector<21x64xf32>
    %12 = arith.mulf %11, %11 : vector<21x64xf32>
    %cst_10 = arith.constant dense<0.000000e+00> : vector<21xf32>
    %13 = vector.multi_reduction <add>, %12, %cst_10 [1] : vector<21x64xf32> to vector<21xf32>
    %14 = vector.shape_cast %13 : vector<21xf32> to vector<21x1xf32>
    %cst_11 = arith.constant 6.300000e+01 : f32
    %15 = vector.broadcast %cst_11 : f32 to vector<21x1xf32>
    %16 = arith.divf %14, %15 : vector<21x1xf32>
    %17 = vector.broadcast %4 : vector<1x64xf32> to vector<21x64xf32>
    %18 = arith.mulf %17, %11 : vector<21x64xf32>
    %19 = math.sqrt %16 : vector<21x1xf32>
    %cst_12 = arith.constant 9.99999997E-7 : f32
    %20 = vector.broadcast %cst_12 : f32 to vector<21x1xf32>
    %21 = arith.addf %19, %20 : vector<21x1xf32>
    %22 = vector.broadcast %21 : vector<21x1xf32> to vector<21x64xf32>
    %23 = arith.divf %18, %22 : vector<21x64xf32>
    %24 = vector.broadcast %5 : vector<1x64xf32> to vector<21x64xf32>
    %25 = arith.addf %23, %24 : vector<21x64xf32>
    %c0_13 = arith.constant 0 : index
    %c0_14 = arith.constant 0 : index
    %26 = vector.load %arg5[%c0_13, %c0_14] : memref<64x192xf32, #tpu.memory_space<vmem>>, vector<64x192xf32>
    %cst_15 = arith.constant dense<0.000000e+00> : vector<21x192xf32>
    %27 = tpu.matmul %25, %26, %cst_15 {dimension_numbers = #tpu.dot_dimension_numbers<[1], [0], [0], [1], [0, 0, 1, 1], [], []>} : vector<21x64xf32>, vector<64x192xf32>, vector<21x192xf32> -> vector<21x192xf32>
    %c0_16 = arith.constant 0 : index
    %c0_17 = arith.constant 0 : index
    %28 = vector.load %arg6[%c0_16, %c0_17] : memref<1x192xf32, #tpu.memory_space<vmem>>, vector<1x192xf32>
    %29 = vector.broadcast %28 : vector<1x192xf32> to vector<21x192xf32>
    %30 = arith.addf %27, %29 : vector<21x192xf32>
    %31 = vector.extract_strided_slice %30 {offsets = [0, 0], sizes = [21, 64], strides = [1, 1]} : vector<21x192xf32> to vector<21x64xf32>
    %32 = vector.extract_strided_slice %30 {offsets = [0, 64], sizes = [21, 64], strides = [1, 1]} : vector<21x192xf32> to vector<21x64xf32>
    %33 = vector.extract_strided_slice %30 {offsets = [0, 128], sizes = [21, 64], strides = [1, 1]} : vector<21x192xf32> to vector<21x64xf32>
    %34 = vector.extract_strided_slice %31 {offsets = [0, 0], sizes = [21, 16], strides = [1, 1]} : vector<21x64xf32> to vector<21x16xf32>
    %35 = vector.extract_strided_slice %32 {offsets = [0, 0], sizes = [21, 16], strides = [1, 1]} : vector<21x64xf32> to vector<21x16xf32>
    %36 = vector.extract_strided_slice %33 {offsets = [0, 0], sizes = [21, 16], strides = [1, 1]} : vector<21x64xf32> to vector<21x16xf32>
    %cst_18 = arith.constant dense<0.000000e+00> : vector<21x21xf32>
    %37 = tpu.matmul %34, %35, %cst_18 {dimension_numbers = #tpu.dot_dimension_numbers<[1], [1], [0], [0], [0, 0, 1, 0], [], []>} : vector<21x16xf32>, vector<21x16xf32>, vector<21x21xf32> -> vector<21x21xf32>
    %cst_19 = arith.constant 2.500000e-01 : f32
    %38 = vector.broadcast %cst_19 : f32 to vector<21x21xf32>
    %39 = arith.mulf %37, %38 : vector<21x21xf32>
    %cst_20 = arith.constant 0.000000e+00 : f32
    %40 = vector.broadcast %cst_20 : f32 to vector<1x21xf32>
    %41 = arith.cmpf oeq, %3, %40 : vector<1x21xf32>
    %cst_21 = arith.constant -1.000000e+09 : f32
    %42 = vector.shape_cast %41 : vector<1x21xi1> to vector<1x21xi1>
    %43 = vector.broadcast %42 : vector<1x21xi1> to vector<21x21xi1>
    %44 = vector.broadcast %cst_21 : f32 to vector<21x21xf32>
    %45 = arith.select %43, %44, %39 : vector<21x21xi1>, vector<21x21xf32>
    %cst_22 = arith.constant dense<0xFF800000> : vector<21xf32>
    %46 = vector.multi_reduction <maximumf>, %45, %cst_22 [1] : vector<21x21xf32> to vector<21xf32>
    %47 = vector.shape_cast %46 : vector<21xf32> to vector<21x1xf32>
    %48 = vector.broadcast %47 : vector<21x1xf32> to vector<21x21xf32>
    %49 = arith.subf %45, %48 : vector<21x21xf32>
    %50 = math.exp %49 : vector<21x21xf32>
    %cst_23 = arith.constant dense<0.000000e+00> : vector<21xf32>
    %51 = vector.multi_reduction <add>, %50, %cst_23 [1] : vector<21x21xf32> to vector<21xf32>
    %52 = vector.shape_cast %51 : vector<21xf32> to vector<21x1xf32>
    %53 = tpu.reciprocal %52 {approx = true} : vector<21x1xf32> -> vector<21x1xf32>
    %54 = vector.broadcast %53 : vector<21x1xf32> to vector<21x21xf32>
    %55 = arith.mulf %50, %54 : vector<21x21xf32>
    %cst_24 = arith.constant dense<0.000000e+00> : vector<21x16xf32>
    %56 = tpu.matmul %55, %36, %cst_24 {dimension_numbers = #tpu.dot_dimension_numbers<[1], [0], [0], [1], [0, 0, 1, 1], [], []>} : vector<21x21xf32>, vector<21x16xf32>, vector<21x16xf32> -> vector<21x16xf32>
    %57 = vector.extract_strided_slice %31 {offsets = [0, 16], sizes = [21, 16], strides = [1, 1]} : vector<21x64xf32> to vector<21x16xf32>
    %58 = vector.extract_strided_slice %32 {offsets = [0, 16], sizes = [21, 16], strides = [1, 1]} : vector<21x64xf32> to vector<21x16xf32>
    %59 = vector.extract_strided_slice %33 {offsets = [0, 16], sizes = [21, 16], strides = [1, 1]} : vector<21x64xf32> to vector<21x16xf32>
    %cst_25 = arith.constant dense<0.000000e+00> : vector<21x21xf32>
    %60 = tpu.matmul %57, %58, %cst_25 {dimension_numbers = #tpu.dot_dimension_numbers<[1], [1], [0], [0], [0, 0, 1, 0], [], []>} : vector<21x16xf32>, vector<21x16xf32>, vector<21x21xf32> -> vector<21x21xf32>
    %cst_26 = arith.constant 2.500000e-01 : f32
    %61 = vector.broadcast %cst_26 : f32 to vector<21x21xf32>
    %62 = arith.mulf %60, %61 : vector<21x21xf32>
    %cst_27 = arith.constant 0.000000e+00 : f32
    %63 = vector.broadcast %cst_27 : f32 to vector<1x21xf32>
    %64 = arith.cmpf oeq, %3, %63 : vector<1x21xf32>
    %cst_28 = arith.constant -1.000000e+09 : f32
    %65 = vector.shape_cast %64 : vector<1x21xi1> to vector<1x21xi1>
    %66 = vector.broadcast %65 : vector<1x21xi1> to vector<21x21xi1>
    %67 = vector.broadcast %cst_28 : f32 to vector<21x21xf32>
    %68 = arith.select %66, %67, %62 : vector<21x21xi1>, vector<21x21xf32>
    %cst_29 = arith.constant dense<0xFF800000> : vector<21xf32>
    %69 = vector.multi_reduction <maximumf>, %68, %cst_29 [1] : vector<21x21xf32> to vector<21xf32>
    %70 = vector.shape_cast %69 : vector<21xf32> to vector<21x1xf32>
    %71 = vector.broadcast %70 : vector<21x1xf32> to vector<21x21xf32>
    %72 = arith.subf %68, %71 : vector<21x21xf32>
    %73 = math.exp %72 : vector<21x21xf32>
    %cst_30 = arith.constant dense<0.000000e+00> : vector<21xf32>
    %74 = vector.multi_reduction <add>, %73, %cst_30 [1] : vector<21x21xf32> to vector<21xf32>
    %75 = vector.shape_cast %74 : vector<21xf32> to vector<21x1xf32>
    %76 = tpu.reciprocal %75 {approx = true} : vector<21x1xf32> -> vector<21x1xf32>
    %77 = vector.broadcast %76 : vector<21x1xf32> to vector<21x21xf32>
    %78 = arith.mulf %73, %77 : vector<21x21xf32>
    %cst_31 = arith.constant dense<0.000000e+00> : vector<21x16xf32>
    %79 = tpu.matmul %78, %59, %cst_31 {dimension_numbers = #tpu.dot_dimension_numbers<[1], [0], [0], [1], [0, 0, 1, 1], [], []>} : vector<21x21xf32>, vector<21x16xf32>, vector<21x16xf32> -> vector<21x16xf32>
    %80 = vector.extract_strided_slice %31 {offsets = [0, 32], sizes = [21, 16], strides = [1, 1]} : vector<21x64xf32> to vector<21x16xf32>
    %81 = vector.extract_strided_slice %32 {offsets = [0, 32], sizes = [21, 16], strides = [1, 1]} : vector<21x64xf32> to vector<21x16xf32>
    %82 = vector.extract_strided_slice %33 {offsets = [0, 32], sizes = [21, 16], strides = [1, 1]} : vector<21x64xf32> to vector<21x16xf32>
    %cst_32 = arith.constant dense<0.000000e+00> : vector<21x21xf32>
    %83 = tpu.matmul %80, %81, %cst_32 {dimension_numbers = #tpu.dot_dimension_numbers<[1], [1], [0], [0], [0, 0, 1, 0], [], []>} : vector<21x16xf32>, vector<21x16xf32>, vector<21x21xf32> -> vector<21x21xf32>
    %cst_33 = arith.constant 2.500000e-01 : f32
    %84 = vector.broadcast %cst_33 : f32 to vector<21x21xf32>
    %85 = arith.mulf %83, %84 : vector<21x21xf32>
    %cst_34 = arith.constant 0.000000e+00 : f32
    %86 = vector.broadcast %cst_34 : f32 to vector<1x21xf32>
    %87 = arith.cmpf oeq, %3, %86 : vector<1x21xf32>
    %cst_35 = arith.constant -1.000000e+09 : f32
    %88 = vector.shape_cast %87 : vector<1x21xi1> to vector<1x21xi1>
    %89 = vector.broadcast %88 : vector<1x21xi1> to vector<21x21xi1>
    %90 = vector.broadcast %cst_35 : f32 to vector<21x21xf32>
    %91 = arith.select %89, %90, %85 : vector<21x21xi1>, vector<21x21xf32>
    %cst_36 = arith.constant dense<0xFF800000> : vector<21xf32>
    %92 = vector.multi_reduction <maximumf>, %91, %cst_36 [1] : vector<21x21xf32> to vector<21xf32>
    %93 = vector.shape_cast %92 : vector<21xf32> to vector<21x1xf32>
    %94 = vector.broadcast %93 : vector<21x1xf32> to vector<21x21xf32>
    %95 = arith.subf %91, %94 : vector<21x21xf32>
    %96 = math.exp %95 : vector<21x21xf32>
    %cst_37 = arith.constant dense<0.000000e+00> : vector<21xf32>
    %97 = vector.multi_reduction <add>, %96, %cst_37 [1] : vector<21x21xf32> to vector<21xf32>
    %98 = vector.shape_cast %97 : vector<21xf32> to vector<21x1xf32>
    %99 = tpu.reciprocal %98 {approx = true} : vector<21x1xf32> -> vector<21x1xf32>
    %100 = vector.broadcast %99 : vector<21x1xf32> to vector<21x21xf32>
    %101 = arith.mulf %96, %100 : vector<21x21xf32>
    %cst_38 = arith.constant dense<0.000000e+00> : vector<21x16xf32>
    %102 = tpu.matmul %101, %82, %cst_38 {dimension_numbers = #tpu.dot_dimension_numbers<[1], [0], [0], [1], [0, 0, 1, 1], [], []>} : vector<21x21xf32>, vector<21x16xf32>, vector<21x16xf32> -> vector<21x16xf32>
    %103 = vector.extract_strided_slice %31 {offsets = [0, 48], sizes = [21, 16], strides = [1, 1]} : vector<21x64xf32> to vector<21x16xf32>
    %104 = vector.extract_strided_slice %32 {offsets = [0, 48], sizes = [21, 16], strides = [1, 1]} : vector<21x64xf32> to vector<21x16xf32>
    %105 = vector.extract_strided_slice %33 {offsets = [0, 48], sizes = [21, 16], strides = [1, 1]} : vector<21x64xf32> to vector<21x16xf32>
    %cst_39 = arith.constant dense<0.000000e+00> : vector<21x21xf32>
    %106 = tpu.matmul %103, %104, %cst_39 {dimension_numbers = #tpu.dot_dimension_numbers<[1], [1], [0], [0], [0, 0, 1, 0], [], []>} : vector<21x16xf32>, vector<21x16xf32>, vector<21x21xf32> -> vector<21x21xf32>
    %cst_40 = arith.constant 2.500000e-01 : f32
    %107 = vector.broadcast %cst_40 : f32 to vector<21x21xf32>
    %108 = arith.mulf %106, %107 : vector<21x21xf32>
    %cst_41 = arith.constant 0.000000e+00 : f32
    %109 = vector.broadcast %cst_41 : f32 to vector<1x21xf32>
    %110 = arith.cmpf oeq, %3, %109 : vector<1x21xf32>
    %cst_42 = arith.constant -1.000000e+09 : f32
    %111 = vector.shape_cast %110 : vector<1x21xi1> to vector<1x21xi1>
    %112 = vector.broadcast %111 : vector<1x21xi1> to vector<21x21xi1>
    %113 = vector.broadcast %cst_42 : f32 to vector<21x21xf32>
    %114 = arith.select %112, %113, %108 : vector<21x21xi1>, vector<21x21xf32>
    %cst_43 = arith.constant dense<0xFF800000> : vector<21xf32>
    %115 = vector.multi_reduction <maximumf>, %114, %cst_43 [1] : vector<21x21xf32> to vector<21xf32>
    %116 = vector.shape_cast %115 : vector<21xf32> to vector<21x1xf32>
    %117 = vector.broadcast %116 : vector<21x1xf32> to vector<21x21xf32>
    %118 = arith.subf %114, %117 : vector<21x21xf32>
    %119 = math.exp %118 : vector<21x21xf32>
    %cst_44 = arith.constant dense<0.000000e+00> : vector<21xf32>
    %120 = vector.multi_reduction <add>, %119, %cst_44 [1] : vector<21x21xf32> to vector<21xf32>
    %121 = vector.shape_cast %120 : vector<21xf32> to vector<21x1xf32>
    %122 = tpu.reciprocal %121 {approx = true} : vector<21x1xf32> -> vector<21x1xf32>
    %123 = vector.broadcast %122 : vector<21x1xf32> to vector<21x21xf32>
    %124 = arith.mulf %119, %123 : vector<21x21xf32>
    %cst_45 = arith.constant dense<0.000000e+00> : vector<21x16xf32>
    %125 = tpu.matmul %124, %105, %cst_45 {dimension_numbers = #tpu.dot_dimension_numbers<[1], [0], [0], [1], [0, 0, 1, 1], [], []>} : vector<21x21xf32>, vector<21x16xf32>, vector<21x16xf32> -> vector<21x16xf32>
    %126 = tpu.concatenate %56, %79, %102, %125 in 1 : vector<21x16xf32>, vector<21x16xf32>, vector<21x16xf32>, vector<21x16xf32> -> vector<21x64xf32>
    %c0_46 = arith.constant 0 : index
    %c0_47 = arith.constant 0 : index
    %127 = vector.load %arg7[%c0_46, %c0_47] : memref<64x64xf32, #tpu.memory_space<vmem>>, vector<64x64xf32>
    %cst_48 = arith.constant dense<0.000000e+00> : vector<21x64xf32>
    %128 = tpu.matmul %126, %127, %cst_48 {dimension_numbers = #tpu.dot_dimension_numbers<[1], [0], [0], [1], [0, 0, 1, 1], [], []>} : vector<21x64xf32>, vector<64x64xf32>, vector<21x64xf32> -> vector<21x64xf32>
    %129 = arith.addf %1, %128 : vector<21x64xf32>
    %c0_49 = arith.constant 0 : index
    %c0_50 = arith.constant 0 : index
    %130 = vector.load %arg8[%c0_49, %c0_50] : memref<1x64xf32, #tpu.memory_space<vmem>>, vector<1x64xf32>
    %131 = vector.broadcast %130 : vector<1x64xf32> to vector<21x64xf32>
    %132 = arith.addf %129, %131 : vector<21x64xf32>
    %c0_51 = arith.constant 0 : index
    %c0_52 = arith.constant 0 : index
    %133 = vector.load %arg9[%c0_51, %c0_52] : memref<1x64xf32, #tpu.memory_space<vmem>>, vector<1x64xf32>
    %c0_53 = arith.constant 0 : index
    %c0_54 = arith.constant 0 : index
    %134 = vector.load %arg10[%c0_53, %c0_54] : memref<1x64xf32, #tpu.memory_space<vmem>>, vector<1x64xf32>
    %cst_55 = arith.constant dense<0.000000e+00> : vector<21xf32>
    %135 = vector.multi_reduction <add>, %132, %cst_55 [1] : vector<21x64xf32> to vector<21xf32>
    %136 = vector.shape_cast %135 : vector<21xf32> to vector<21x1xf32>
    %cst_56 = arith.constant 6.400000e+01 : f32
    %137 = vector.broadcast %cst_56 : f32 to vector<21x1xf32>
    %138 = arith.divf %136, %137 : vector<21x1xf32>
    %139 = vector.broadcast %138 : vector<21x1xf32> to vector<21x64xf32>
    %140 = arith.subf %132, %139 : vector<21x64xf32>
    %141 = arith.mulf %140, %140 : vector<21x64xf32>
    %cst_57 = arith.constant dense<0.000000e+00> : vector<21xf32>
    %142 = vector.multi_reduction <add>, %141, %cst_57 [1] : vector<21x64xf32> to vector<21xf32>
    %143 = vector.shape_cast %142 : vector<21xf32> to vector<21x1xf32>
    %cst_58 = arith.constant 6.300000e+01 : f32
    %144 = vector.broadcast %cst_58 : f32 to vector<21x1xf32>
    %145 = arith.divf %143, %144 : vector<21x1xf32>
    %146 = vector.broadcast %133 : vector<1x64xf32> to vector<21x64xf32>
    %147 = arith.mulf %146, %140 : vector<21x64xf32>
    %148 = math.sqrt %145 : vector<21x1xf32>
    %cst_59 = arith.constant 9.99999997E-7 : f32
    %149 = vector.broadcast %cst_59 : f32 to vector<21x1xf32>
    %150 = arith.addf %148, %149 : vector<21x1xf32>
    %151 = vector.broadcast %150 : vector<21x1xf32> to vector<21x64xf32>
    %152 = arith.divf %147, %151 : vector<21x64xf32>
    %153 = vector.broadcast %134 : vector<1x64xf32> to vector<21x64xf32>
    %154 = arith.addf %152, %153 : vector<21x64xf32>
    %c0_60 = arith.constant 0 : index
    %c0_61 = arith.constant 0 : index
    %155 = vector.load %arg11[%c0_60, %c0_61] : memref<64x128xf32, #tpu.memory_space<vmem>>, vector<64x128xf32>
    %cst_62 = arith.constant dense<0.000000e+00> : vector<21x128xf32>
    %156 = tpu.matmul %154, %155, %cst_62 {dimension_numbers = #tpu.dot_dimension_numbers<[1], [0], [0], [1], [0, 0, 1, 1], [], []>} : vector<21x64xf32>, vector<64x128xf32>, vector<21x128xf32> -> vector<21x128xf32>
    %c0_63 = arith.constant 0 : index
    %c0_64 = arith.constant 0 : index
    %157 = vector.load %arg12[%c0_63, %c0_64] : memref<1x128xf32, #tpu.memory_space<vmem>>, vector<1x128xf32>
    %158 = vector.broadcast %157 : vector<1x128xf32> to vector<21x128xf32>
    %159 = arith.addf %156, %158 : vector<21x128xf32>
    %cst_65 = arith.constant 0.000000e+00 : f32
    %160 = vector.broadcast %cst_65 : f32 to vector<21x128xf32>
    %161 = arith.maximumf %159, %160 : vector<21x128xf32>
    %c0_66 = arith.constant 0 : index
    %c0_67 = arith.constant 0 : index
    %162 = vector.load %arg13[%c0_66, %c0_67] : memref<128x64xf32, #tpu.memory_space<vmem>>, vector<128x64xf32>
    %cst_68 = arith.constant dense<0.000000e+00> : vector<21x64xf32>
    %163 = tpu.matmul %161, %162, %cst_68 {dimension_numbers = #tpu.dot_dimension_numbers<[1], [0], [0], [1], [0, 0, 1, 1], [], []>} : vector<21x128xf32>, vector<128x64xf32>, vector<21x64xf32> -> vector<21x64xf32>
    %164 = arith.addf %132, %163 : vector<21x64xf32>
    %c0_69 = arith.constant 0 : index
    %c0_70 = arith.constant 0 : index
    %165 = vector.load %arg14[%c0_69, %c0_70] : memref<1x64xf32, #tpu.memory_space<vmem>>, vector<1x64xf32>
    %166 = vector.broadcast %165 : vector<1x64xf32> to vector<21x64xf32>
    %167 = arith.addf %164, %166 : vector<21x64xf32>
    %c0_71 = arith.constant 0 : index
    %c0_72 = arith.constant 0 : index
    %c0_73 = arith.constant 0 : index
    %168 = vector.load %arg15[%c0_71, %c0_72, %c0_73] : memref<1x21x64xf32, #tpu.memory_space<vmem>>, vector<1x21x64xf32>
    %169 = vector.shape_cast %168 : vector<1x21x64xf32> to vector<21x64xf32>
    %170 = vector.shape_cast %167 : vector<21x64xf32> to vector<1x21x64xf32>
    tpu.vector_store %arg15[%c0_71, %c0_72, %c0_73], %170 {strides = array<i32>} : memref<1x21x64xf32, #tpu.memory_space<vmem>>, vector<1x21x64xf32>,
    return
  }
  func.func @transform_0(%arg0: i32) -> (i32, i32, i32) {
    %c0_i32 = arith.constant 0 : i32
    %c0_i32_0 = arith.constant 0 : i32
    %c0_i32_1 = arith.constant 0 : i32
    return %arg0, %c0_i32, %c0_i32_0 : i32, i32, i32
  }
  func.func @transform_1(%arg0: i32) -> (i32, i32, i32) {
    %c0_i32 = arith.constant 0 : i32
    %c0_i32_0 = arith.constant 0 : i32
    %c0_i32_1 = arith.constant 0 : i32
    return %arg0, %c0_i32, %c0_i32_0 : i32, i32, i32
  }
  func.func @transform_2(%arg0: i32) -> (i32, i32) {
    %c0_i32 = arith.constant 0 : i32
    %c0_i32_0 = arith.constant 0 : i32
    %c0_i32_1 = arith.constant 0 : i32
    return %c0_i32, %c0_i32_0 : i32, i32
  }
  func.func @transform_3(%arg0: i32) -> (i32, i32) {
    %c0_i32 = arith.constant 0 : i32
    %c0_i32_0 = arith.constant 0 : i32
    %c0_i32_1 = arith.constant 0 : i32
    return %c0_i32, %c0_i32_0 : i32, i32
  }
  func.func @transform_4(%arg0: i32) -> (i32, i32) {
    %c0_i32 = arith.constant 0 : i32
    %c0_i32_0 = arith.constant 0 : i32
    %c0_i32_1 = arith.constant 0 : i32
    return %c0_i32, %c0_i32_0 : i32, i32
  }
  func.func @transform_5(%arg0: i32) -> (i32, i32) {
    %c0_i32 = arith.constant 0 : i32
    %c0_i32_0 = arith.constant 0 : i32
    %c0_i32_1 = arith.constant 0 : i32
    return %c0_i32, %c0_i32_0 : i32, i32
  }
  func.func @transform_6(%arg0: i32) -> (i32, i32) {
    %c0_i32 = arith.constant 0 : i32
    %c0_i32_0 = arith.constant 0 : i32
    %c0_i32_1 = arith.constant 0 : i32
    return %c0_i32, %c0_i32_0 : i32, i32
  }
  func.func @transform_7(%arg0: i32) -> (i32, i32) {
    %c0_i32 = arith.constant 0 : i32
    %c0_i32_0 = arith.constant 0 : i32
    %c0_i32_1 = arith.constant 0 : i32
    return %c0_i32, %c0_i32_0 : i32, i32
  }
  func.func @transform_8(%arg0: i32) -> (i32, i32) {
    %c0_i32 = arith.constant 0 : i32
    %c0_i32_0 = arith.constant 0 : i32
    %c0_i32_1 = arith.constant 0 : i32
    return %c0_i32, %c0_i32_0 : i32, i32
  }
  func.func @transform_9(%arg0: i32) -> (i32, i32) {
    %c0_i32 = arith.constant 0 : i32
    %c0_i32_0 = arith.constant 0 : i32
    %c0_i32_1 = arith.constant 0 : i32
    return %c0_i32, %c0_i32_0 : i32, i32
  }
  func.func @transform_10(%arg0: i32) -> (i32, i32) {
    %c0_i32 = arith.constant 0 : i32
    %c0_i32_0 = arith.constant 0 : i32
    %c0_i32_1 = arith.constant 0 : i32
    return %c0_i32, %c0_i32_0 : i32, i32
  }
  func.func @transform_11(%arg0: i32) -> (i32, i32) {
    %c0_i32 = arith.constant 0 : i32
    %c0_i32_0 = arith.constant 0 : i32
    %c0_i32_1 = arith.constant 0 : i32
    return %c0_i32, %c0_i32_0 : i32, i32
  }
  func.func @transform_12(%arg0: i32) -> (i32, i32) {
    %c0_i32 = arith.constant 0 : i32
    %c0_i32_0 = arith.constant 0 : i32
    %c0_i32_1 = arith.constant 0 : i32
    return %c0_i32, %c0_i32_0 : i32, i32
  }
  func.func @transform_13(%arg0: i32) -> (i32, i32) {
    %c0_i32 = arith.constant 0 : i32
    %c0_i32_0 = arith.constant 0 : i32
    %c0_i32_1 = arith.constant 0 : i32
    return %c0_i32, %c0_i32_0 : i32, i32
  }
  func.func @transform_14(%arg0: i32) -> (i32, i32, i32) {
    %c0_i32 = arith.constant 0 : i32
    %c0_i32_0 = arith.constant 0 : i32
    %c0_i32_1 = arith.constant 0 : i32
    return %arg0, %c0_i32, %c0_i32_0 : i32, i32, i32
  }
}

module attributes {stable_mosaic.version = 11 : i64} {
  func.func @_final_kernel(%arg0: i32, %arg1: memref<2x21x64xf32, #tpu.memory_space<vmem>>, %arg2: memref<1x64xf32, #tpu.memory_space<vmem>>, %arg3: memref<1x64xf32, #tpu.memory_space<vmem>>, %arg4: memref<64x16xf32, #tpu.memory_space<vmem>>, %arg5: memref<1x16xf32, #tpu.memory_space<vmem>>, %arg6: memref<2x21x64xf32, #tpu.memory_space<vmem>>, %arg7: memref<2x16xf32, #tpu.memory_space<vmem>>) attributes {dimension_semantics = [#tpu.dimension_semantics<arbitrary>], iteration_bounds = array<i64: 1>, scalar_prefetch = 0 : i64, scratch_operands = 0 : i64, tpu.core_type = #tpu.core_type<tc>, window_params = [{pipeline_mode = #tpu.pipeline_mode<synchronous>, transform_indices = @transform_0, window_bounds = array<i64: 2, 21, 64>}, {pipeline_mode = #tpu.pipeline_mode<synchronous>, transform_indices = @transform_1, window_bounds = array<i64: 1, 64>}, {pipeline_mode = #tpu.pipeline_mode<synchronous>, transform_indices = @transform_2, window_bounds = array<i64: 1, 64>}, {pipeline_mode = #tpu.pipeline_mode<synchronous>, transform_indices = @transform_3, window_bounds = array<i64: 64, 16>}, {pipeline_mode = #tpu.pipeline_mode<synchronous>, transform_indices = @transform_4, window_bounds = array<i64: 1, 16>}, {pipeline_mode = #tpu.pipeline_mode<synchronous>, transform_indices = @transform_5, window_bounds = array<i64: 2, 21, 64>}, {pipeline_mode = #tpu.pipeline_mode<synchronous>, transform_indices = @transform_6, window_bounds = array<i64: 2, 16>}]} {
    %c0 = arith.constant 0 : index
    %c0_0 = arith.constant 0 : index
    %c0_1 = arith.constant 0 : index
    %0 = vector.load %arg1[%c0, %c0_0, %c0_1] : memref<2x21x64xf32, #tpu.memory_space<vmem>>, vector<2x21x64xf32>
    %1 = vector.shape_cast %0 : vector<2x21x64xf32> to vector<42x64xf32>
    %c0_2 = arith.constant 0 : index
    %c0_3 = arith.constant 0 : index
    %2 = vector.load %arg2[%c0_2, %c0_3] : memref<1x64xf32, #tpu.memory_space<vmem>>, vector<1x64xf32>
    %c0_4 = arith.constant 0 : index
    %c0_5 = arith.constant 0 : index
    %3 = vector.load %arg3[%c0_4, %c0_5] : memref<1x64xf32, #tpu.memory_space<vmem>>, vector<1x64xf32>
    %cst = arith.constant dense<0.000000e+00> : vector<42xf32>
    %4 = vector.multi_reduction <add>, %1, %cst [1] : vector<42x64xf32> to vector<42xf32>
    %5 = vector.shape_cast %4 : vector<42xf32> to vector<42x1xf32>
    %cst_6 = arith.constant 6.400000e+01 : f32
    %6 = vector.broadcast %cst_6 : f32 to vector<42x1xf32>
    %7 = arith.divf %5, %6 : vector<42x1xf32>
    %8 = vector.broadcast %7 : vector<42x1xf32> to vector<42x64xf32>
    %9 = arith.subf %1, %8 : vector<42x64xf32>
    %10 = arith.mulf %9, %9 : vector<42x64xf32>
    %cst_7 = arith.constant dense<0.000000e+00> : vector<42xf32>
    %11 = vector.multi_reduction <add>, %10, %cst_7 [1] : vector<42x64xf32> to vector<42xf32>
    %12 = vector.shape_cast %11 : vector<42xf32> to vector<42x1xf32>
    %cst_8 = arith.constant 6.300000e+01 : f32
    %13 = vector.broadcast %cst_8 : f32 to vector<42x1xf32>
    %14 = arith.divf %12, %13 : vector<42x1xf32>
    %15 = vector.broadcast %2 : vector<1x64xf32> to vector<42x64xf32>
    %16 = arith.mulf %15, %9 : vector<42x64xf32>
    %17 = math.sqrt %14 : vector<42x1xf32>
    %cst_9 = arith.constant 9.99999997E-7 : f32
    %18 = vector.broadcast %cst_9 : f32 to vector<42x1xf32>
    %19 = arith.addf %17, %18 : vector<42x1xf32>
    %20 = vector.broadcast %19 : vector<42x1xf32> to vector<42x64xf32>
    %21 = arith.divf %16, %20 : vector<42x64xf32>
    %22 = vector.broadcast %3 : vector<1x64xf32> to vector<42x64xf32>
    %23 = arith.addf %21, %22 : vector<42x64xf32>
    %24 = vector.shape_cast %23 : vector<42x64xf32> to vector<2x21x64xf32>
    %c0_10 = arith.constant 0 : index
    %c0_11 = arith.constant 0 : index
    %c0_12 = arith.constant 0 : index
    %25 = vector.load %arg6[%c0_10, %c0_11, %c0_12] : memref<2x21x64xf32, #tpu.memory_space<vmem>>, vector<2x21x64xf32>
    tpu.vector_store %arg6[%c0_10, %c0_11, %c0_12], %24 {strides = array<i32>} : memref<2x21x64xf32, #tpu.memory_space<vmem>>, vector<2x21x64xf32>,
    %26 = vector.extract_strided_slice %24 {offsets = [0, 0, 0], sizes = [2, 1, 64], strides = [1, 1, 1]} : vector<2x21x64xf32> to vector<2x1x64xf32>
    %27 = vector.shape_cast %26 : vector<2x1x64xf32> to vector<2x64xf32>
    %c0_13 = arith.constant 0 : index
    %c0_14 = arith.constant 0 : index
    %28 = vector.load %arg4[%c0_13, %c0_14] : memref<64x16xf32, #tpu.memory_space<vmem>>, vector<64x16xf32>
    %cst_15 = arith.constant dense<0.000000e+00> : vector<2x16xf32>
    %29 = tpu.matmul %27, %28, %cst_15 {dimension_numbers = #tpu.dot_dimension_numbers<[1], [0], [0], [1], [0, 0, 1, 1], [], []>} : vector<2x64xf32>, vector<64x16xf32>, vector<2x16xf32> -> vector<2x16xf32>
    %c0_16 = arith.constant 0 : index
    %c0_17 = arith.constant 0 : index
    %30 = vector.load %arg5[%c0_16, %c0_17] : memref<1x16xf32, #tpu.memory_space<vmem>>, vector<1x16xf32>
    %31 = vector.broadcast %30 : vector<1x16xf32> to vector<2x16xf32>
    %32 = arith.addf %29, %31 : vector<2x16xf32>
    %c0_18 = arith.constant 0 : index
    %c0_19 = arith.constant 0 : index
    %33 = vector.load %arg7[%c0_18, %c0_19] : memref<2x16xf32, #tpu.memory_space<vmem>>, vector<2x16xf32>
    tpu.vector_store %arg7[%c0_18, %c0_19], %32 {strides = array<i32>} : memref<2x16xf32, #tpu.memory_space<vmem>>, vector<2x16xf32>,
    return
  }
  func.func @transform_0(%arg0: i32) -> (i32, i32, i32) {
    %c0_i32 = arith.constant 0 : i32
    %c0_i32_0 = arith.constant 0 : i32
    %c0_i32_1 = arith.constant 0 : i32
    %c0_i32_2 = arith.constant 0 : i32
    return %c0_i32, %c0_i32_0, %c0_i32_1 : i32, i32, i32
  }
  func.func @transform_1(%arg0: i32) -> (i32, i32) {
    %c0_i32 = arith.constant 0 : i32
    %c0_i32_0 = arith.constant 0 : i32
    %c0_i32_1 = arith.constant 0 : i32
    return %c0_i32, %c0_i32_0 : i32, i32
  }
  func.func @transform_2(%arg0: i32) -> (i32, i32) {
    %c0_i32 = arith.constant 0 : i32
    %c0_i32_0 = arith.constant 0 : i32
    %c0_i32_1 = arith.constant 0 : i32
    return %c0_i32, %c0_i32_0 : i32, i32
  }
  func.func @transform_3(%arg0: i32) -> (i32, i32) {
    %c0_i32 = arith.constant 0 : i32
    %c0_i32_0 = arith.constant 0 : i32
    %c0_i32_1 = arith.constant 0 : i32
    return %c0_i32, %c0_i32_0 : i32, i32
  }
  func.func @transform_4(%arg0: i32) -> (i32, i32) {
    %c0_i32 = arith.constant 0 : i32
    %c0_i32_0 = arith.constant 0 : i32
    %c0_i32_1 = arith.constant 0 : i32
    return %c0_i32, %c0_i32_0 : i32, i32
  }
  func.func @transform_5(%arg0: i32) -> (i32, i32, i32) {
    %c0_i32 = arith.constant 0 : i32
    %c0_i32_0 = arith.constant 0 : i32
    %c0_i32_1 = arith.constant 0 : i32
    %c0_i32_2 = arith.constant 0 : i32
    return %c0_i32, %c0_i32_0, %c0_i32_1 : i32, i32, i32
  }
  func.func @transform_6(%arg0: i32) -> (i32, i32) {
    %c0_i32 = arith.constant 0 : i32
    %c0_i32_0 = arith.constant 0 : i32
    %c0_i32_1 = arith.constant 0 : i32
    return %c0_i32, %c0_i32_0 : i32, i32
  }
}

</mosaic_0001>

<bundles_post_ra>
// kernel: encoder_y_forward.6
= control target key start
LH: loop header
LB: loop body
LE: loop exit
PB: predicated region body
PF: predicated region fallthrough
CT: control target
= control target key end

     0   :  { %vm40_vm0 = vcmask 1042432   ;;  %vm24_vm1 = vcmask 23552   ;;  %vm81_vm2 = vcmask 457728   ;;  %s162_s1 = inlined_call_operand.vmem [shape: f32[3,56], index: 1, kind: input, shape index: {}]   ;;  %s163_s0 = inlined_call_operand.vmem [shape: f32[40,3], index: 0, kind: input, shape index: {}]   ;;  %s164_s2 = inlined_call_operand.vmem [shape: f32[1,56], index: 2, kind: input, shape index: {}]   ;;  %s165_s3 = inlined_call_operand.vmem [shape: f32[40,56], index: 3, kind: output, shape index: {}]  }
   0x1   :  { %v19_v0 = vld [vmem:[%s162_s1] sm:$0x7]  ;;  %v16_v1 = vld [vmem:[%s163_s0 + $0x10] sm:$0xff]  ;;  %v15_v4 = vld [vmem:[%s163_s0 + $0x8] sm:$0xff] }
   0x2   :  { %98 = vmatpush.msk.msra.mxu2 %vm40_vm0, %v19_v0  ;;  %99 = vmatpush.msk.msra.mxu3 %vm40_vm0, %v19_v0  ;;  %v18_v2 = vld [vmem:[%s163_s0 + $0x20] sm:$0xff]  ;;  %v17_v5 = vld [vmem:[%s163_s0 + $0x18] sm:$0xff] }
   0x3   :  { %v14_v3 = vld [vmem:[%s163_s0] sm:$0xff]  ;;  %94 = vmatmul.msk.f32.vlgmr.msra.gmra.mxu2 %vm24_vm1, %v16_v1  ;;  %96 = vmatmul.msk.f32.vlgmr.msra.gmra.mxu3 %vm24_vm1, %v18_v2 }
   0x4   :  { %91 = vmatpush.msk.msra.mxu0 %vm40_vm0, %v19_v0  ;;  %97 = vmatpush.msk.msra.mxu1 %vm40_vm0, %v19_v0  ;;  %v100_v6 = vld [vmem:[%s164_s2] ss:$0 sm:$0xff] }
   0x5   :  { %92 = vmatmul.msk.f32.vlgmr.msra.gmra.mxu0 %vm24_vm1, %v14_v3  ;;  %93 = vmatmul.msk.f32.vlgmr.msra.gmra.mxu1 %vm24_vm1, %v15_v4 }
   0xb   :  { %95 = vmatmul.msk.f32.gmra.mxu2 %vm24_vm1, %v17_v5 }
  0x82   :  { %v61_v7 = vpop.f32.mrf.mxu0  ;;  %v64_v8 = vpop.f32.mrf.mxu1 }
  0x83   :  { %v62_v9 = vadd.f32 %v100_v6, %v61_v7  ;;  %v65_v10 = vadd.f32 %v100_v6, %v64_v8 }
  0x85   :  { %v76_v11 = vmul.f32 7.483315, %v62_v9  ;;  %v77_v12 = vmul.f32 7.483315, %v65_v10 }
  0x86   :  { %v67_v13 = vpop.f32.mrf.mxu2  ;;  %v73_v14 = vpop.f32.mrf.mxu3 }
  0x87   :  { %v68_v15 = vadd.f32 %v100_v6, %v67_v13  ;;  %82 = vst.msk [vmem:[%s165_s3] sm:$0xff] %vm81_vm2, %v76_v11  ;;  %v74_v16 = vadd.f32 %v100_v6, %v73_v14 }
  0x88   :  { %83 = vst.msk [vmem:[%s165_s3 + $0x8] sm:$0xff] %vm81_vm2, %v77_v12 }
  0x89   :  { %v78_v17 = vmul.f32 7.483315, %v68_v15  ;;  %v80_v18 = vmul.f32 7.483315, %v74_v16 }
  0x8b   :  { %84 = vst.msk [vmem:[%s165_s3 + $0x10] sm:$0xff] %vm81_vm2, %v78_v17 }
  0x8c   :  { %86 = vst.msk [vmem:[%s165_s3 + $0x20] sm:$0xff] %vm81_vm2, %v80_v18 }
  0x8e   :  { %v70_v19 = vpop.f32.mrf.mxu2 }
  0x8f   :  { %v71_v20 = vadd.f32 %v100_v6, %v70_v19 }
  0x91   :  { %v79_v21 = vmul.f32 7.483315, %v71_v20 }
  0x93   :  { %85 = vst.msk [vmem:[%s165_s3 + $0x18] sm:$0xff] %vm81_vm2, %v79_v21 }

// kernel: encoder_y_forward.7
= control target key start
LH: loop header
LB: loop body
LE: loop exit
PB: predicated region body
PF: predicated region fallthrough
CT: control target
= control target key end

     0   :  { %s1926_s29 = smov 0   ;;  %s2455_s0 = inlined_call_operand.vmem [shape: f32[2,21,64], index: 0, kind: input, shape index: {}]   ;;  %s2456_s1 = inlined_call_operand.vmem [shape: f32[2,1,21], index: 1, kind: input, shape index: {}]   ;;  %s2457_s2 = inlined_call_operand.vmem [shape: f32[1,64], index: 2, kind: input, shape index: {}]   ;;  %s2458_s3 = inlined_call_operand.vmem [shape: f32[1,64], index: 3, kind: input, shape index: {}]   ;;  %s2459_s4 = inlined_call_operand.vmem [shape: f32[64,192], index: 4, kind: input, shape index: {}]   ;;  %s2460_s5 = inlined_call_operand.vmem [shape: f32[1,192], index: 5, kind: input, shape index: {}]   ;;  %s2461_s6 = inlined_call_operand.vmem [shape: f32[64,64], index: 6, kind: input, shape index: {}]   ;;  %s2462_s7 = inlined_call_operand.vmem [shape: f32[1,64], index: 7, kind: input, shape index: {}]   ;;  %s2463_s8 = inlined_call_operand.vmem [shape: f32[1,64], index: 8, kind: input, shape index: {}]   ;;  %s2464_s9 = inlined_call_operand.vmem [shape: f32[1,64], index: 9, kind: input, shape index: {}]   ;;  %s2465_s10 = inlined_call_operand.vmem [shape: f32[64,128], index: 10, kind: input, shape index: {}]   ;;  %s2466_s11 = inlined_call_operand.vmem [shape: f32[1,128], index: 11, kind: input, shape index: {}]   ;;  %s2467_s12 = inlined_call_operand.vmem [shape: f32[128,64], index: 12, kind: input, shape index: {}]   ;;  %s2468_s13 = inlined_call_operand.vmem [shape: f32[1,64], index: 13, kind: input, shape index: {}]   ;;  %s2469_s14 = inlined_call_operand.vmem [shape: f32[2,21,64], index: 14, kind: output, shape index: {}]  }
   0x1 LB: > { %s1646_s30 = sadd.s32 4294967295, %s1839_s29   ;;  %p1650_p0 = scmp.ge.s32.totalorder %s1839_s29, 1  ;;  %s1839_s29 = sphi %s1926_s29, %s24_s29  }
   0x2   : > { %p420_p1 = scmp.lt.s32.totalorder %s1839_s29, 3 }
   0x4   : > { %p421_p2 = pnand %p1650_p0, %p420_p1 }
   0x5   : > { %p469_p3 = scmp.lt.s32.totalorder (!%p421_p2), %s1646_s30, 1  ;;  %s1843_s21 = smov (!%p421_p2), 64  }
   0x6   : > { %424 = sbr.rel (%p421_p2) target bundleno = 2422 (0x976), region = 76  ;;  %s1844_s22 = smov (!%p421_p2), 48  }
   0x7   : > { %s1845_s23 = smov (!%p421_p2), 16   ;;  %s1847_s27 = smov (!%p421_p2), 112  }
   0x8   : > { %s1848_s28 = smov (!%p421_p2), 80   ;;  %s1849_s16 = smov (!%p421_p2), 32  }
   0x9   : > { %s1850_s17 = smov (!%p421_p2), 96  }
   0xb   : > { %s2473_s30 = smov (!%p469_p3, %s1646_s30), 1  ;;  %vm488_vm0 = vcmask 523264   ;;  %vm495_vm1 = vcmask 520192   ;;  %v1841_v6 = vmov 64.0   ;;  %v1842_v28 = vmov 63.0   ;;  %v644_v35 = vld [vmem:[%s2459_s4 + $0x70] sm:$0xff] }
   0xc   : > { %s1713_s15 = smul.u32 24, %s2473_s30  ;;  %1754 = vrcp.f32 %v1841_v6  ;;  %v645_v36 = vld [vmem:[%s2459_s4 + $0x78] sm:$0xff]  ;;  %669 = vmatpush.msra.mxu0 %v644_v35  ;;  %v642_v39 = vld [vmem:[%s2459_s4 + $0x60] sm:$0xff]  ;;  %v643_v40 = vld [vmem:[%s2459_s4 + $0x68] sm:$0xff]  ;;  %s476_s26 = scalar_lea.vmem %s2456_s1, %s2473_s30 }
   0xd   : > { %1756 = vrcp.f32 %v1842_v28  ;;  %695 = vmatpush.msra.mxu1 %v645_v36  ;;  %v640_v41 = vld [vmem:[%s2459_s4 + $0x50] sm:$0xff]  ;;  %v641_v42 = vld [vmem:[%s2459_s4 + $0x58] sm:$0xff]  ;;  %v638_v43 = vld [vmem:[%s2459_s4 + $0x40] sm:$0xff] }
   0xe   : > { %s1942_s18 = scalar_lea.vmem %s2455_s0, %s1713_s15  ;;  %670 = vmatpush.msra.mxu0 %v642_v39  ;;  %v639_v44 = vld [vmem:[%s2459_s4 + $0x48] sm:$0xff]  ;;  %v636_v45 = vld [vmem:[%s2459_s4 + $0x30] sm:$0xff]  ;;  %v637_v46 = vld [vmem:[%s2459_s4 + $0x38] sm:$0xff] }
   0xf   : > { %v482_v0 = vld [vmem:[%s1942_s18] sm:$0xff]  ;;  %v484_v1 = vld [vmem:[%s1942_s18 + $0x10] sm:$0x1f]  ;;  %v483_v4 = vld [vmem:[%s1942_s18 + $0x8] sm:$0xff]  ;;  %696 = vmatpush.msra.mxu1 %v643_v40 }
  0x10   : > { %v489_v2 = vsel %vm488_vm0, %v482_v0, 0.0  ;;  %v496_v3 = vsel %vm495_vm1, %v484_v1, 0.0  ;;  %v492_v5 = vsel %vm488_vm0, %v483_v4, 0.0  ;;  %671 = vmatpush.msra.mxu0 %v640_v41  ;;  %v634_v47 = vld [vmem:[%s2459_s4 + $0x20] sm:$0xff]  ;;  %v635_v48 = vld [vmem:[%s2459_s4 + $0x28] sm:$0xff]  ;;  %v632_v52 = vld [vmem:[%s2459_s4 + $0x10] sm:$0xff] }
  0x11   : > { %490 = vadd.xlane.f32.xlu0 %v489_v2  ;;  %497 = vadd.xlane.f32.xlu1 %v496_v3  ;;  %v633_v53 = vld [vmem:[%s2459_s4 + $0x18] sm:$0xff]  ;;  %v630_v55 = vld [vmem:[%s2459_s4] sm:$0xff]  ;;  %v631_v56 = vld [vmem:[%s2459_s4 + $0x8] sm:$0xff] }
  0x12   : > { %v1755_v7 = vpop.eup %1754  ;;  %697 = vmatpush.msra.mxu1 %v641_v42  ;;  %672 = vmatpush.msra.mxu0 %v638_v43  ;;  %v1748_v43 = vld [vmem:[%s2458_s3] ss:$0 sm:$0xff] }
  0x13   : > { %v500_v8 = vmul.f32 64.0, %v1755_v7  ;;  %vm504_vm2 = vweird.f32 %v1755_v7  ;;  %v1757_v29 = vpop.eup %1756 }
  0x14   : > { %v525_v30 = vmul.f32 63.0, %v1757_v29  ;;  %vm529_vm3 = vweird.f32 %v1757_v29  ;;  %698 = vmatpush.msra.mxu1 %v639_v44  ;;  %673 = vmatpush.msra.mxu0 %v636_v45 }
  0x15   : > { %v501_v9 = vsub.f32 1.0, %v500_v8 }
  0x16   : > { %v526_v31 = vsub.f32 1.0, %v525_v30  ;;  %699 = vmatpush.msra.mxu1 %v637_v46  ;;  %674 = vmatpush.msra.mxu0 %v634_v47  ;;  %v1747_v30 = vld [vmem:[%s2457_s2] ss:$0 sm:$0xff] }
  0x17   : > { %v502_v10 = vmul.f32 %v1755_v7, %v501_v9 }
  0x18   : > { %v527_v32 = vmul.f32 %v1757_v29, %v526_v31  ;;  %700 = vmatpush.msra.mxu1 %v635_v48  ;;  %675 = vmatpush.msra.mxu0 %v632_v52 }
  0x19   : > { %493 = vadd.xlane.f32.xlu0 %v492_v5  ;;  %v503_v11 = vadd.f32 %v1755_v7, %v502_v10 }
  0x1a   : > { %v528_v33 = vadd.f32 %v1757_v29, %v527_v32  ;;  %701 = vmatpush.msra.mxu1 %v633_v53  ;;  %676 = vmatpush.msra.mxu0 %v630_v55 }
  0x1b   : > { %v1950_v12 = vsel %vm504_vm2, %v1755_v7, %v503_v11 }
  0x1c   : > { %v1970_v34 = vsel %vm529_vm3, %v1757_v29, %v528_v33  ;;  %702 = vmatpush.msra.mxu1 %v631_v56 }
  0x84   : > { %v491_v13 = vpop.xlane.xlu0 %490  ;;  %v498_v17 = vpop.xlane.xlu1 %497 }
  0x85   : > { %v506_v14 = vmul.f32 %v1950_v12, %v491_v13  ;;  %v508_v21 = vmul.f32 %v1950_v12, %v498_v17 }
  0x87   : > { %v1953_v15 = vsub.f32 %v482_v0, %v506_v14  ;;  %v1962_v23 = vsub.f32 %v484_v1, %v508_v21 }
  0x89   : > { %v512_v16 = vmul.f32 %v1953_v15, %v1953_v15  ;;  %v514_v26 = vmul.f32 %v1962_v23, %v1962_v23  ;;  %v537_v41 = vmul.f32 %v1747_v30, %v1953_v15 }
  0x8b   : > { %v515_v18 = vsel %vm488_vm0, %v512_v16, 0.0  ;;  %v521_v27 = vsel %vm495_vm1, %v514_v26, 0.0 }
  0x8c   : > { %516 = vadd.xlane.f32.xlu1 %v515_v18  ;;  %v494_v19 = vpop.xlane.xlu0 %493 }
  0x8d   : > { %v507_v20 = vmul.f32 %v1950_v12, %v494_v19 }
  0x8f   : > { %v1960_v22 = vsub.f32 %v483_v4, %v507_v20 }
  0x91   : > { %v513_v24 = vmul.f32 %v1960_v22, %v1960_v22 }
  0x93   : > { %v518_v25 = vsel %vm488_vm0, %v513_v24, 0.0 }
  0x94   : > { %519 = vadd.xlane.f32.xlu2 %v518_v25 }
  0x9c   : > { %522 = vadd.xlane.f32.xlu2 %v521_v27 }
  0xff   : > { %v517_v37 = vpop.xlane.xlu1 %516 }
 0x100   : > { %v531_v38 = vmul.f32 %v1970_v34, %v517_v37 }
 0x102   : > { %1758 = vrsqrt.f32 %v531_v38  ;;  %vm547_vm4 = vcmp.eq.f32.partialorder %v531_v38, inf  ;;  %v550_v3 = vand.u32 2147483648, %v531_v38  ;;  %vm549_vm5 = vcmp.eq.f32.partialorder %v531_v38, 0.0 }
 0x107   : > { %v520_v49 = vpop.xlane.xlu2 %519 }
 0x108   : > { %v1759_v50 = vpop.eup %1758  ;;  %v532_v51 = vmul.f32 %v1970_v34, %v520_v49 }
 0x109   : > { %v541_v54 = vmul.f32 %v1759_v50, %v531_v38 }
 0x10a   : > { %1760 = vrsqrt.f32 %v532_v51  ;;  %vm559_vm6 = vcmp.eq.f32.partialorder %v532_v51, inf  ;;  %v562_v16 = vand.u32 2147483648, %v532_v51  ;;  %vm561_vm7 = vcmp.eq.f32.partialorder %v532_v51, 0.0 }
 0x10b   : > { %v542_v57 = vmul.f32 %v1759_v50, %v541_v54  ;;  %v538_v54 = vmul.f32 %v1747_v30, %v1960_v22  ;;  %v539_v22 = vmul.f32 %v1747_v30, %v1962_v23 }
 0x10d   : > { %v543_v58 = vmul.f32 0.5, %v542_v57 }
 0x10f   : > { %v544_v59 = vsub.f32 1.5, %v543_v58  ;;  %v523_v60 = vpop.xlane.xlu2 %522 }
 0x110   : > { %v1761_v61 = vpop.eup %1760  ;;  %v533_v62 = vmul.f32 %v1970_v34, %v523_v60 }
 0x111   : > { %v545_v63 = vmul.f32 %v1759_v50, %v544_v59  ;;  %v553_v0 = vmul.f32 %v1761_v61, %v532_v51 }
 0x112   : > { %1762 = vrsqrt.f32 %v533_v62  ;;  %vm571_vm8 = vcmp.eq.f32.partialorder %v533_v62, inf  ;;  %v574_v31 = vand.u32 2147483648, %v533_v62  ;;  %vm573_vm10 = vcmp.eq.f32.partialorder %v533_v62, 0.0 }
 0x113   : > { %v546_v1 = vmul.f32 %v545_v63, %v531_v38  ;;  %v554_v2 = vmul.f32 %v1761_v61, %v553_v0 }
 0x115   : > { %v555_v4 = vmul.f32 0.5, %v554_v2  ;;  %v548_v5 = vsel %vm547_vm4, %v531_v38, %v546_v1 }
 0x116   : > { %v551_v6 = vsel %vm549_vm5, %v550_v3, %v548_v5 }
 0x117   : > { %v556_v7 = vsub.f32 1.5, %v555_v4  ;;  %v576_v8 = vadd.f32 1e-06, %v551_v6  ;;  %v646_v6 = vld [vmem:[%s2460_s5] sm:$0x3] }
 0x118   : > { %v1763_v9 = vpop.eup %1762 }
 0x119   : > { %v557_v10 = vmul.f32 %v1761_v61, %v556_v7  ;;  %v565_v11 = vmul.f32 %v1763_v9, %v533_v62  ;;  %1764 = vrcp.f32 %v576_v8  ;;  %v590_v29 = vand.u32 2147483648, %v576_v8 }
 0x11a   : > { %v588_v33 = vand.u32 2147483647, %v576_v8  ;;  %vm584_vm11 = vweird.f32 %v576_v8  ;;  %v648_v7 = vperm.slane %v646_v6, 0 }
 0x11b   : > { %v558_v13 = vmul.f32 %v557_v10, %v532_v51  ;;  %v566_v14 = vmul.f32 %v1763_v9, %v565_v11  ;;  %v591_v39 = vor.u32 1.1754944e-38, %v590_v29  ;;  %v1846_v29 = vmov 0  }
 0x11c   : > { %vm589_vm13 = vcmp.eq.f32.partialorder %v588_v33, 8.507059e+37 }
 0x11d   : > { %v567_v17 = vmul.f32 0.5, %v566_v14  ;;  %v560_v18 = vsel %vm559_vm6, %v532_v51, %v558_v13  ;;  %v649_v14 = vperm.slane %v646_v6, 1 }
 0x11e   : > { %v563_v19 = vsel %vm561_vm7, %v562_v16, %v560_v18 }
 0x11f   : > { %v1765_v20 = vpop.eup %1764  ;;  %v568_v21 = vsub.f32 1.5, %v567_v17  ;;  %v577_v24 = vadd.f32 1e-06, %v563_v19 }
 0x120   : > { %v580_v25 = vmul.f32 %v1765_v20, %v576_v8  ;;  %vm585_vm9 = vweird.f32 %v1765_v20 }
 0x121   : > { %v569_v26 = vmul.f32 %v1763_v9, %v568_v21  ;;  %1766 = vrcp.f32 %v577_v24  ;;  %vm586_vm12 = vmor %vm584_vm11, %vm585_vm9  ;;  %v605_v48 = vand.u32 2147483648, %v577_v24  ;;  %v603_v51 = vand.u32 2147483647, %v577_v24 }
 0x122   : > { %v581_v27 = vsub.f32 1.0, %v580_v25  ;;  %vm599_vm15 = vweird.f32 %v577_v24  ;;  %vm722_vm9 = vcmask 130048  }
 0x123   : > { %v570_v28 = vmul.f32 %v569_v26, %v533_v62  ;;  %v606_v53 = vor.u32 1.1754944e-38, %v605_v48  ;;  %vm604_vm3 = vcmp.eq.f32.partialorder %v603_v51, 8.507059e+37 }
 0x124   : > { %v582_v32 = vmul.f32 %v1765_v20, %v581_v27  ;;  %v485_v27 = vld [vmem:[%s476_s26] sm:$0x1] }
 0x125   : > { %v572_v35 = vsel %vm571_vm8, %v533_v62, %v570_v28  ;;  %vm815_vm8 = vcmask 1044480  }
 0x126   : > { %v583_v36 = vadd.f32 %v1765_v20, %v582_v32  ;;  %v575_v37 = vsel %vm573_vm10, %v574_v31, %v572_v35  ;;  %vm764_vm10 = vcmp.eq.f32.partialorder %v485_v27, 0.0 }
 0x127   : > { %v1767_v38 = vpop.eup %1766  ;;  %v578_v40 = vadd.f32 1e-06, %v575_v37  ;;  %v765_v30 = vsel %vm764_vm10, 1, %v1846_v29 }
 0x128   : > { %v587_v42 = vsel %vm586_vm12, %v1765_v20, %v583_v36  ;;  %v595_v44 = vmul.f32 %v1767_v38, %v577_v24  ;;  %vm600_vm14 = vweird.f32 %v1767_v38  ;;  %v766_v31 = vperm.slane %v765_v30, 0 }
 0x129   : > { %v592_v45 = vsel %vm589_vm13, %v591_v39, %v587_v42  ;;  %1768 = vrcp.f32 %v578_v40  ;;  %vm601_vm2 = vmor %vm599_vm15, %vm600_vm14  ;;  %v620_v60 = vand.u32 2147483648, %v578_v40  ;;  %v618_v63 = vand.u32 2147483647, %v578_v40 }
 0x12a   : > { %v593_v46 = vmul.f32 %v592_v45, %v537_v41  ;;  %v596_v47 = vsub.f32 1.0, %v595_v44  ;;  %vm614_vm5 = vweird.f32 %v578_v40  ;;  %vm2081_vm11 = vcmp.eq.s32.totalorder %v766_v31, 1 }
 0x12b   : > { %v621_v1 = vor.u32 1.1754944e-38, %v620_v60  ;;  %vm619_vm7 = vcmp.eq.f32.partialorder %v618_v63, 8.507059e+37  ;;  %vm771_vm12 = vcmask 171008   ;;  %vm778_vm13 = vcmask 167936  }
 0x12c   : > { %v627_v49 = vadd.f32 %v1748_v43, %v593_v46  ;;  %v597_v50 = vmul.f32 %v1767_v38, %v596_v47  ;;  %vm1292_vm14 = vcmask 392192   ;;  %vm1288_vm15 = vcmask 261120  }
 0x12e   : > { %1653 = vmatmul.msk.f32.vlgmr.msra.gmra.mxu0 %vm488_vm0, %v627_v49  ;;  %1656 = vmatmul.msk.f32.vlgmr.msra.gmra.mxu1 %vm488_vm0, %v627_v49  ;;  %v598_v15 = vadd.f32 %v1767_v38, %v597_v50 }
 0x12f   : > { %v1769_v52 = vpop.eup %1768 }
 0x130   : > { %v602_v55 = vsel %vm601_vm2, %v1767_v38, %v598_v15  ;;  %v610_v56 = vmul.f32 %v1769_v52, %v578_v40  ;;  %vm615_vm4 = vweird.f32 %v1769_v52 }
 0x131   : > { %v607_v57 = vsel %vm604_vm3, %v606_v53, %v602_v55  ;;  %vm616_vm6 = vmor %vm614_vm5, %vm615_vm4 }
 0x132   : > { %v608_v58 = vmul.f32 %v607_v57, %v538_v54  ;;  %v611_v59 = vsub.f32 1.0, %v610_v56 }
 0x134   : > { %v628_v61 = vadd.f32 %v1748_v43, %v608_v58  ;;  %v612_v62 = vmul.f32 %v1769_v52, %v611_v59 }
 0x136   : > { %1654 = vmatmul.msk.f32.gmra.mxu0 %vm488_vm0, %v628_v61  ;;  %1657 = vmatmul.msk.f32.gmra.mxu1 %vm488_vm0, %v628_v61  ;;  %v613_v0 = vadd.f32 %v1769_v52, %v612_v62 }
 0x138   : > { %v617_v2 = vsel %vm616_vm6, %v1769_v52, %v613_v0 }
 0x139   : > { %v622_v3 = vsel %vm619_vm7, %v621_v1, %v617_v2 }
 0x13a   : > { %v623_v4 = vmul.f32 %v622_v3, %v539_v22 }
 0x13c   : > { %v629_v5 = vadd.f32 %v1748_v43, %v623_v4 }
 0x13e   : > { %1655 = vmatmul.msk.f32.gmra.mxu0 %vm488_vm0, %v629_v5  ;;  %1658 = vmatmul.msk.f32.gmra.mxu1 %vm488_vm0, %v629_v5 }
 0x1ab   : > { %v678_v8 = vpop.f32.mrf.mxu0  ;;  %v704_v9 = vpop.f32.mrf.mxu1 }
 0x1ac   : > { %v2041_v10 = vadd.f32 %v678_v8, %v648_v7  ;;  %v2058_v21 = vadd.f32 %v704_v9, %v649_v14 }
 0x1ae   : > { %716 = vrot.lane.b32.xlu2 %v2041_v10, %s1843_s21 }
 0x1b3   : > { %v681_v23 = vpop.f32.mrf.mxu0  ;;  %v707_v11 = vpop.f32.mrf.mxu1 }
 0x1b4   : > { %v2044_v13 = vadd.f32 %v681_v23, %v648_v7  ;;  %v2051_v20 = vadd.f32 %v707_v11, %v649_v14 }
 0x1b6   : > { %718 = vrot.lane.b32.xlu1 %v2044_v13, %s1843_s21 }
 0x1bb   : > { %v684_v16 = vpop.f32.mrf.mxu0  ;;  %v710_v17 = vpop.f32.mrf.mxu1 }
 0x1bc   : > { %v2047_v18 = vadd.f32 %v684_v16, %v648_v7  ;;  %v2049_v19 = vadd.f32 %v710_v17, %v649_v14 }
 0x1be   : > { %853 = vrot.lane.b32.xlu1 %v2044_v13, %s1844_s22  ;;  %1707 = vmatpush.msk.msra.mxu3 %vm815_vm8, %v2049_v19 }
 0x1bf   : > { %720 = vrot.lane.b32.xlu0 %v2047_v18, %s1843_s21 }
 0x1c0   : > { %1708 = vmatpush.msra.mxu3 %v2051_v20 }
 0x1c2   : > { %1709 = vmatpush.msra.mxu3 %v2058_v21 }
 0x1c6   : > { %1125 = vrot.lane.b32.xlu1 %v2047_v18, %s1845_s23 }
 0x208   : > { %v717_v26 = vpop.permute.xlu2 %716 }
 0x228   : > { %v719_v25 = vpop.permute.xlu1 %718 }
 0x230   : > { %v854_v54 = vpop.permute.xlu1 %853 }
 0x231   : > { %v721_v24 = vpop.permute.xlu0 %720 }
 0x232   : > { %1659 = vmatpush.xpose.msk.msra.mxu2 %vm722_vm9, %v721_v24 }
 0x236   : > { %1660 = vmatpush.xpose.msk.msra.mxu2 %vm722_vm9, %v719_v25 }
 0x238   : > { %v1126_v2 = vpop.permute.xlu1 %1125 }
 0x23a   : > { %1661 = vmatpush.xpose.msk.msra.mxu2 %vm722_vm9, %v717_v26 }
 0x23d   : > { %1662 = vmatmul.msk.f32.vlgmr.msra.gmra.mxu2 %vm722_vm9, %v2041_v10 }
 0x23e   : > { %1665 = vmatpush.msk.msrb.mxu2 %vm815_vm8, %v2049_v19 }
 0x240   : > { %833 = vmatpush.msrb.mxu2 %v2051_v20 }
 0x242   : > { %834 = vmatpush.msrb.mxu2 %v2058_v21 }
 0x245   : > { %1663 = vmatmul.msk.f32.gmra.mxu2 %vm722_vm9, %v2044_v13 }
 0x24d   : > { %1664 = vmatmul.msk.f32.gmra.mxu2 %vm722_vm9, %v2047_v18 }
 0x2c0   : > { %v752_v28 = vpop.f32.mrf.mxu2 }
 0x2c1   : > { %v761_v42 = vmul.f32 0.25, %v752_v28 }
 0x2c3   : > { %v768_v43 = vsel %vm2081_vm11, -1e+09, %v761_v42 }
 0x2c4   : > { %v772_v44 = vsel %vm771_vm12, %v768_v43, -inf }
 0x2c8   : > { %v755_v32 = vpop.f32.mrf.mxu2 }
 0x2c9   : > { %v762_v33 = vmul.f32 0.25, %v755_v32 }
 0x2cb   : > { %v769_v36 = vsel %vm2081_vm11, -1e+09, %v762_v33 }
 0x2cc   : > { %v775_v37 = vsel %vm771_vm12, %v769_v36, -inf }
 0x2cd   : > { %776 = vmax.xlane.f32.xlu0 %v775_v37 }
 0x2d0   : > { %v758_v38 = vpop.f32.mrf.mxu2 }
 0x2d1   : > { %v763_v39 = vmul.f32 0.25, %v758_v38 }
 0x2d3   : > { %v770_v40 = vsel %vm2081_vm11, -1e+09, %v763_v39 }
 0x2d4   : > { %v779_v41 = vsel %vm778_vm13, %v770_v40, -inf }
 0x2d5   : > { %780 = vmax.xlane.f32.xlu2 %v779_v41 }
 0x2e1   : > { %851 = vrot.lane.b32.xlu0 %v2041_v10, %s1844_s22 }
 0x2e9   : > { %847 = vrot.lane.b32.xlu0 %v2044_v13, %s1847_s27 }
 0x2ed   : > { %855 = vrot.lane.b32.xlu2 %v2047_v18, %s1844_s22 }
 0x2f1   : > { %1123 = vrot.lane.b32.xlu0 %v2044_v13, %s1845_s23 }
 0x2f5   : > { %845 = vrot.lane.b32.xlu2 %v2041_v10, %s1847_s27 }
 0x2f9   : > { %1115 = vrot.lane.b32.xlu0 %v2041_v10, %s1848_s28 }
 0x2fd   : > { %849 = vrot.lane.b32.xlu2 %v2047_v18, %s1847_s27 }
 0x305   : > { %991 = vrot.lane.b32.xlu2 %v2047_v18, %s1849_s16 }
 0x30d   : > { %987 = vrot.lane.b32.xlu2 %v2041_v10, %s1849_s16 }
 0x315   : > { %1119 = vrot.lane.b32.xlu2 %v2047_v18, %s1848_s28 }
 0x33e   : > { %773 = vmax.xlane.f32.xlu2 %v772_v44 }
 0x340   : > { %v777_v45 = vpop.xlane.xlu0 %776 }
 0x341   : > { %v783_v46 = vsub.f32 %v769_v36, %v777_v45 }
 0x343   : > { %v787_v47 = vmul.f32 1.442695, %v783_v46 }
 0x345   : > { %1770 = vpow2.f32 %v787_v47 }
 0x348   : > { %v781_v48 = vpop.xlane.xlu2 %780 }
 0x349   : > { %v784_v49 = vsub.f32 %v770_v40, %v781_v48 }
 0x34b   : > { %v1771_v50 = vpop.eup %1770  ;;  %v789_v51 = vmul.f32 1.442695, %v784_v49 }
 0x34c   : > { %v794_v15 = vsel %vm771_vm12, %v1771_v50, 0.0 }
 0x34d   : > { %1772 = vpow2.f32 %v789_v51  ;;  %795 = vadd.xlane.f32.xlu1 %v794_v15 }
 0x350   : > { %v856_v52 = vpop.permute.xlu2 %855 }
 0x351   : > { %1669 = vmatpush.xpose.msk.msrb.mxu1 %vm722_vm9, %v856_v52  ;;  %1710 = vmatpush.xpose.msk.msrb.mxu3 %vm722_vm9, %v856_v52 }
 0x353   : > { %v1773_v53 = vpop.eup %1772  ;;  %v852_v56 = vpop.permute.xlu0 %851 }
 0x354   : > { %v797_v55 = vsel %vm778_vm13, %v1773_v53, 0.0 }
 0x355   : > { %798 = vadd.xlane.f32.xlu0 %v797_v55  ;;  %1670 = vmatpush.xpose.msk.msrb.mxu1 %vm722_vm9, %v854_v54 }
 0x356   : > { %1711 = vmatpush.xpose.msk.msrb.mxu3 %vm722_vm9, %v854_v54 }
 0x358   : > { %v846_v57 = vpop.permute.xlu2 %845 }
 0x359   : > { %1671 = vmatpush.xpose.msk.msrb.mxu1 %vm722_vm9, %v852_v56 }
 0x35a   : > { %1712 = vmatpush.xpose.msk.msrb.mxu3 %vm722_vm9, %v852_v56 }
 0x35b   : > { %v848_v62 = vpop.permute.xlu0 %847 }
 0x35c   : > { %1672 = vmatmul.msk.f32.vlgmr.msrb.gmra.mxu1 %vm722_vm9, %v846_v57 }
 0x360   : > { %v850_v58 = vpop.permute.xlu2 %849 }
 0x363   : > { %v1124_v22 = vpop.permute.xlu0 %1123 }
 0x366   : > { %1121 = vrot.lane.b32.xlu1 %v2041_v10, %s1845_s23 }
 0x368   : > { %v992_v59 = vpop.permute.xlu2 %991 }
 0x369   : > { %1117 = vrot.lane.b32.xlu0 %v2044_v13, %s1848_s28  ;;  %1679 = vmatpush.xpose.msk.msrb.mxu0 %vm722_vm9, %v992_v59 }
 0x36b   : > { %v1116_v5 = vpop.permute.xlu0 %1115 }
 0x36e   : > { %989 = vrot.lane.b32.xlu1 %v2044_v13, %s1849_s16 }
 0x370   : > { %v988_v60 = vpop.permute.xlu2 %987 }
 0x371   : > { %983 = vrot.lane.b32.xlu0 %v2044_v13, %s1850_s17 }
 0x376   : > { %981 = vrot.lane.b32.xlu1 %v2041_v10, %s1850_s17 }
 0x378   : > { %v1120_v61 = vpop.permute.xlu2 %1119 }
 0x37e   : > { %985 = vrot.lane.b32.xlu1 %v2047_v18, %s1850_s17 }
 0x3b1   : > { %v774_v63 = vpop.xlane.xlu2 %773 }
 0x3b2   : > { %v782_v0 = vsub.f32 %v768_v43, %v774_v63 }
 0x3b4   : > { %v785_v1 = vmul.f32 1.442695, %v782_v0 }
 0x3b6   : > { %1774 = vpow2.f32 %v785_v1 }
 0x3bc   : > { %v1775_v3 = vpop.eup %1774 }
 0x3bd   : > { %v791_v4 = vsel %vm771_vm12, %v1775_v3, 0.0 }
 0x3be   : > { %792 = vadd.xlane.f32.xlu2 %v791_v4 }
 0x3c0   : > { %v796_v6 = vpop.xlane.xlu1 %795 }
 0x3c1   : > { %1776 = vrcp.f32 %v796_v6 }
 0x3c7   : > { %v1777_v7 = vpop.eup %1776 }
 0x3c8   : > { %v799_v8 = vpop.xlane.xlu0 %798  ;;  %v804_v9 = vmul.f32 %v1777_v7, %v1771_v50 }
 0x3c9   : > { %1778 = vrcp.f32 %v799_v8 }
 0x3ca   : > { %1667 = vmatmul.msk.f32.vlgmr.msra.gmra.mxu3 %vm771_vm12, %v804_v9 }
 0x3cb   : > { %1689 = vmatpush.xpose.msk.msra.mxu3 %vm722_vm9, %v1126_v2 }
 0x3cf   : > { %v1779_v10 = vpop.eup %1778  ;;  %1690 = vmatpush.xpose.msk.msra.mxu3 %vm722_vm9, %v1124_v22 }
 0x3d0   : > { %v805_v23 = vmul.f32 %v1779_v10, %v1773_v53 }
 0x3d2   : > { %1668 = vmatmul.msk.f32.gmra.mxu3 %vm771_vm12, %v805_v23 }
 0x3d6   : > { %940 = vrot.lane.b32.xlu2 %v2049_v19, %s1847_s27 }
 0x3d8   : > { %v1122_v11 = vpop.permute.xlu1 %1121 }
 0x3d9   : > { %v886_v13 = vpop.f32.mrf.mxu1  ;;  %1691 = vmatpush.xpose.msk.msra.mxu3 %vm722_vm9, %v1122_v11 }
 0x3da   : > { %v895_v14 = vmul.f32 0.25, %v886_v13  ;;  %1673 = vmatmul.msk.f32.vlgmr.msrb.gmra.mxu3 %vm722_vm9, %v848_v62 }
 0x3db   : > { %v1118_v24 = vpop.permute.xlu0 %1117 }
 0x3dc   : > { %v898_v16 = vsel %vm2081_vm11, -1e+09, %v895_v14 }
 0x3dd   : > { %v901_v17 = vsel %vm771_vm12, %v898_v16, -inf }
 0x3de   : > { %902 = vmax.xlane.f32.xlu0 %v901_v17 }
 0x3e0   : > { %v990_v18 = vpop.permute.xlu1 %989 }
 0x3e1   : > { %1680 = vmatpush.xpose.msk.msrb.mxu0 %vm722_vm9, %v990_v18 }
 0x3e2   : > { %1674 = vmatmul.msk.f32.gmra.mxu3 %vm722_vm9, %v850_v58 }
 0x3e3   : > { %v984_v26 = vpop.permute.xlu0 %983 }
 0x3e5   : > { %1681 = vmatpush.xpose.msk.msrb.mxu0 %vm722_vm9, %v988_v60 }
 0x3e8   : > { %v982_v25 = vpop.permute.xlu1 %981 }
 0x3e9   : > { %1682 = vmatmul.msk.f32.vlgmr.msrb.gmra.mxu0 %vm722_vm9, %v982_v25 }
 0x3ea   : > { %1692 = vmatmul.msk.f32.vlgmr.msra.gmra.mxu3 %vm722_vm9, %v1116_v5 }
 0x3f0   : > { %v986_v27 = vpop.permute.xlu1 %985 }
 0x3f1   : > { %1683 = vmatmul.msk.f32.gmra.mxu0 %vm722_vm9, %v984_v26 }
 0x3f2   : > { %1693 = vmatmul.msk.f32.gmra.mxu3 %vm722_vm9, %v1118_v24 }
 0x3f9   : > { %1684 = vmatmul.msk.f32.gmra.mxu0 %vm722_vm9, %v986_v27 }
 0x3fa   : > { %1694 = vmatmul.msk.f32.gmra.mxu3 %vm722_vm9, %v1120_v61 }
 0x431   : > { %v793_v28 = vpop.xlane.xlu2 %792 }
 0x432   : > { %1780 = vrcp.f32 %v793_v28 }
 0x438   : > { %v1781_v29 = vpop.eup %1780 }
 0x439   : > { %v941_v30 = vpop.permute.xlu2 %940  ;;  %v803_v31 = vmul.f32 %v1781_v29, %v1775_v3  ;;  %v2195_v3 = vpack.i.bf16 %v2058_v21, %v2051_v20 }
 0x43a   : > { %1675 = vmatpush.msk.msra.mxu2 %vm815_vm8, %v941_v30 }
 0x43b   : > { %1666 = vmatmul.msk.f32.vlgmr.msrb.gmra.mxu2 %vm771_vm12, %v803_v31 }
 0x44d   : > { %v2159_v32 = vpop.f32.mrf.mxu3 }
 0x451   : > { %v903_v37 = vpop.xlane.xlu0 %902 }
 0x452   : > { %v910_v38 = vsub.f32 %v898_v16, %v903_v37 }
 0x454   : > { %v913_v39 = vmul.f32 1.442695, %v910_v38 }
 0x455   : > { %v2161_v33 = vpop.f32.mrf.mxu3 }
 0x456   : > { %1782 = vpow2.f32 %v913_v39 }
 0x45c   : > { %v2172_v50 = vpop.eup %1782 }
 0x45d   : > { %v889_v36 = vpop.f32.mrf.mxu3  ;;  %v919_v52 = vsel %vm771_vm12, %v2172_v50, 0.0 }
 0x45e   : > { %v896_v54 = vmul.f32 0.25, %v889_v36 }
 0x460   : > { %v899_v59 = vsel %vm2081_vm11, -1e+09, %v896_v54 }
 0x461   : > { %v904_v63 = vsel %vm771_vm12, %v899_v59, -inf }
 0x465   : > { %v892_v40 = vpop.f32.mrf.mxu3 }
 0x466   : > { %v897_v41 = vmul.f32 0.25, %v892_v40  ;;  %v1022_v42 = vpop.f32.mrf.mxu0 }
 0x467   : > { %v1031_v43 = vmul.f32 0.25, %v1022_v42 }
 0x468   : > { %v2165_v44 = vsel %vm2081_vm11, -1e+09, %v897_v41 }
 0x469   : > { %v907_v45 = vsel %vm778_vm13, %v2165_v44, -inf  ;;  %v1034_v46 = vsel %vm2081_vm11, -1e+09, %v1031_v43 }
 0x46a   : > { %908 = vmax.xlane.f32.xlu2 %v907_v45  ;;  %v1037_v47 = vsel %vm771_vm12, %v1034_v46, -inf }
 0x46b   : > { %1038 = vmax.xlane.f32.xlu1 %v1037_v47 }
 0x46d   : > { %v1156_v48 = vpop.f32.mrf.mxu3 }
 0x46e   : > { %v1025_v49 = vpop.f32.mrf.mxu0  ;;  %v1165_v1 = vmul.f32 0.25, %v1156_v48 }
 0x46f   : > { %v1032_v51 = vmul.f32 0.25, %v1025_v49 }
 0x470   : > { %v1168_v22 = vsel %vm2081_vm11, -1e+09, %v1165_v1 }
 0x471   : > { %v1035_v15 = vsel %vm2081_vm11, -1e+09, %v1032_v51  ;;  %v1171_v2 = vsel %vm771_vm12, %v1168_v22, -inf }
 0x472   : > { %v1040_v53 = vsel %vm771_vm12, %v1035_v15, -inf }
 0x473   : > { %920 = vadd.xlane.f32.xlu1 %v919_v52  ;;  %1041 = vmax.xlane.f32.xlu0 %v1040_v53 }
 0x475   : > { %v1159_v55 = vpop.f32.mrf.mxu3 }
 0x476   : > { %v1166_v56 = vmul.f32 0.25, %v1159_v55  ;;  %v1028_v57 = vpop.f32.mrf.mxu0 }
 0x477   : > { %v1033_v58 = vmul.f32 0.25, %v1028_v57 }
 0x478   : > { %v1169_v60 = vsel %vm2081_vm11, -1e+09, %v1166_v56 }
 0x479   : > { %v1174_v61 = vsel %vm771_vm12, %v1169_v60, -inf  ;;  %v1036_v62 = vsel %vm2081_vm11, -1e+09, %v1033_v58 }
 0x47a   : > { %1175 = vmax.xlane.f32.xlu2 %v1174_v61  ;;  %v1043_v0 = vsel %vm778_vm13, %v1036_v62, -inf }
 0x47b   : > { %905 = vmax.xlane.f32.xlu1 %v904_v63  ;;  %1044 = vmax.xlane.f32.xlu0 %v1043_v0 }
 0x47d   : > { %v1162_v4 = vpop.f32.mrf.mxu3 }
 0x47e   : > { %v1167_v5 = vmul.f32 0.25, %v1162_v4 }
 0x480   : > { %v2203_v6 = vsel %vm2081_vm11, -1e+09, %v1167_v5 }
 0x481   : > { %v1177_v7 = vsel %vm778_vm13, %v2203_v6, -inf }
 0x483   : > { %1172 = vmax.xlane.f32.xlu0 %v1171_v2 }
 0x492   : > { %1208 = vrot.lane.b32.xlu2 %v2049_v19, %s1848_s28 }
 0x494   : > { %1738 = vrot.lane.b32.xlu1 %v2195_v3, %s1848_s28 }
 0x497   : > { %1733 = vrot.lane.b32.xlu0 %v2195_v3, %s1847_s27 }
 0x4be   : > { %1178 = vmax.xlane.f32.xlu1 %v1177_v7 }
 0x4dd   : > { %v909_v21 = vpop.xlane.xlu2 %908 }
 0x4de   : > { %v1039_v8 = vpop.xlane.xlu1 %1038  ;;  %v912_v29 = vsub.f32 %v2165_v44, %v909_v21 }
 0x4df   : > { %v1046_v9 = vsub.f32 %v1034_v46, %v1039_v8  ;;  %v2239_v8 = vpop.f32.mrf.mxu2 }
 0x4e0   : > { %v917_v37 = vmul.f32 1.442695, %v912_v29 }
 0x4e1   : > { %v1049_v20 = vmul.f32 1.442695, %v1046_v9 }
 0x4e3   : > { %1784 = vpow2.f32 %v1049_v20 }
 0x4e6   : > { %v921_v10 = vpop.xlane.xlu1 %920  ;;  %v1042_v23 = vpop.xlane.xlu0 %1041 }
 0x4e7   : > { %v1047_v11 = vsub.f32 %v1035_v15, %v1042_v23 }
 0x4e9   : > { %v2207_v13 = vpop.eup %1784  ;;  %v1051_v14 = vmul.f32 1.442695, %v1047_v11 }
 0x4ea   : > { %v1055_v35 = vsel %vm771_vm12, %v2207_v13, 0.0 }
 0x4eb   : > { %1786 = vpow2.f32 %v1051_v14  ;;  %1056 = vadd.xlane.f32.xlu0 %v1055_v35 }
 0x4ed   : > { %v1176_v16 = vpop.xlane.xlu2 %1175 }
 0x4ee   : > { %v1181_v17 = vsub.f32 %v1169_v60, %v1176_v16  ;;  %v906_v18 = vpop.xlane.xlu1 %905  ;;  %v1045_v24 = vpop.xlane.xlu0 %1044 }
 0x4ef   : > { %v911_v25 = vsub.f32 %v899_v59, %v906_v18  ;;  %v1048_v26 = vsub.f32 %v1036_v62, %v1045_v24 }
 0x4f0   : > { %v1185_v27 = vmul.f32 1.442695, %v1181_v17 }
 0x4f1   : > { %v2211_v28 = vpop.eup %1786  ;;  %v915_v30 = vmul.f32 1.442695, %v911_v25  ;;  %v1053_v31 = vmul.f32 1.442695, %v1048_v26 }
 0x4f2   : > { %1788 = vpow2.f32 %v1185_v27  ;;  %v1058_v36 = vsel %vm771_vm12, %v2211_v28, 0.0 }
 0x4f3   : > { %1790 = vpow2.f32 %v915_v30  ;;  %1059 = vadd.xlane.f32.xlu0 %v1058_v36 }
 0x4f4   : > { %1792 = vpow2.f32 %v1053_v31 }
 0x4f5   : > { %1794 = vpow2.f32 %v917_v37  ;;  %v1209_v57 = vpop.permute.xlu2 %1208 }
 0x4f6   : > { %v1173_v38 = vpop.xlane.xlu0 %1172 }
 0x4f7   : > { %v1180_v41 = vsub.f32 %v1168_v22, %v1173_v38 }
 0x4f8   : > { %v2216_v39 = vpop.eup %1788 }
 0x4f9   : > { %v1791_v40 = vpop.eup %1790  ;;  %v1192_v42 = vsel %vm771_vm12, %v2216_v39, 0.0  ;;  %v1183_v46 = vmul.f32 1.442695, %v1180_v41 }
 0x4fa   : > { %v2220_v43 = vpop.eup %1792  ;;  %1193 = vadd.xlane.f32.xlu2 %v1192_v42  ;;  %v922_v44 = vsel %vm771_vm12, %v1791_v40, 0.0 }
 0x4fb   : > { %v1061_v45 = vsel %vm778_vm13, %v2220_v43, 0.0  ;;  %923 = vadd.xlane.f32.xlu1 %v922_v44  ;;  %v1795_v47 = vpop.eup %1794  ;;  %1796 = vpow2.f32 %v1183_v46  ;;  %v1302_v44 = vld [vmem:[%s2461_s6 + $0x30] sm:$0xff]  ;;  %v1300_v46 = vld [vmem:[%s2461_s6 + $0x20] sm:$0xff] }
 0x4fc   : > { %1062 = vadd.xlane.f32.xlu0 %v1061_v45  ;;  %v925_v48 = vsel %vm778_vm13, %v1795_v47, 0.0  ;;  %1798 = vrcp.f32 %v921_v10  ;;  %v1301_v45 = vld [vmem:[%s2461_s6 + $0x28] sm:$0xff] }
 0x501   : > { %v1797_v49 = vpop.eup %1796 }
 0x502   : > { %v1799_v15 = vpop.eup %1798  ;;  %v1189_v53 = vsel %vm771_vm12, %v1797_v49, 0.0 }
 0x503   : > { %926 = vadd.xlane.f32.xlu1 %v925_v48  ;;  %v931_v55 = vmul.f32 %v1799_v15, %v2172_v50  ;;  %v1298_v48 = vld [vmem:[%s2461_s6 + $0x10] sm:$0xff] }
 0x506   : > { %v1739_v56 = vpop.permute.xlu1 %1738 }
 0x507   : > { %v1740_v58 = vunpack.i.l.bf16 %v1739_v56  ;;  %v1741_v59 = vunpack.i.h.bf16 %v1739_v56 }
 0x509   : > { %v1734_v51 = vpop.permute.xlu0 %1733 }
 0x50a   : > { %v1735_v52 = vunpack.i.l.bf16 %v1734_v51  ;;  %v1736_v54 = vunpack.i.h.bf16 %v1734_v51  ;;  %v1296_v51 = vld [vmem:[%s2461_s6] sm:$0xff] }
 0x50b   : > { %1190 = vadd.xlane.f32.xlu1 %v1189_v53 }
 0x50c   : > { %969 = vmatpush.msra.mxu2 %v1735_v52 }
 0x50e   : > { %970 = vmatpush.msra.mxu2 %v1736_v54 }
 0x50f   : > { %1676 = vmatmul.msk.f32.vlgmr.msra.gmra.mxu2 %vm771_vm12, %v931_v55 }
 0x510   : > { %1695 = vmatpush.msk.msrb.mxu2 %vm815_vm8, %v1209_v57 }
 0x512   : > { %1237 = vmatpush.msrb.mxu2 %v1740_v58 }
 0x514   : > { %1238 = vmatpush.msrb.mxu2 %v1741_v59 }
 0x524   : > { %1074 = vrot.lane.b32.xlu1 %v2049_v19, %s1850_s17 }
 0x52c   : > { %1743 = vrot.lane.b32.xlu1 %v2195_v3, %s1850_s17  ;;  %s481_s17 = scalar_lea.vmem %s2469_s14, %s1713_s15 }
 0x531   : > { %v1179_v60 = vpop.xlane.xlu1 %1178 }
 0x532   : > { %v1182_v50 = vsub.f32 %v2203_v6, %v1179_v60 }
 0x534   : > { %v1187_v61 = vmul.f32 1.442695, %v1182_v50 }
 0x536   : > { %1800 = vpow2.f32 %v1187_v61 }
 0x53c   : > { %v1801_v62 = vpop.eup %1800 }
 0x53d   : > { %v1195_v63 = vsel %vm778_vm13, %v1801_v62, 0.0 }
 0x556   : > { %1196 = vadd.xlane.f32.xlu1 %v1195_v63 }
 0x55e   : > { %v1057_v21 = vpop.xlane.xlu0 %1056 }
 0x566   : > { %v1060_v11 = vpop.xlane.xlu0 %1059 }
 0x56d   : > { %v1194_v5 = vpop.xlane.xlu2 %1193 }
 0x56e   : > { %v924_v0 = vpop.xlane.xlu1 %923 }
 0x56f   : > { %1802 = vrcp.f32 %v924_v0  ;;  %v1063_v24 = vpop.xlane.xlu0 %1062 }
 0x575   : > { %v1803_v1 = vpop.eup %1802 }
 0x576   : > { %v927_v22 = vpop.xlane.xlu1 %926  ;;  %v932_v2 = vmul.f32 %v1803_v1, %v1791_v40 }
 0x577   : > { %1804 = vrcp.f32 %v927_v22 }
 0x578   : > { %1677 = vmatmul.msk.f32.gmra.mxu2 %vm771_vm12, %v932_v2 }
 0x57d   : > { %v1805_v19 = vpop.eup %1804 }
 0x57e   : > { %v1191_v4 = vpop.xlane.xlu1 %1190  ;;  %v933_v3 = vmul.f32 %v1805_v19, %v1795_v47  ;;  %v1299_v47 = vld [vmem:[%s2461_s6 + $0x18] sm:$0xff] }
 0x57f   : > { %1806 = vrcp.f32 %v1191_v4  ;;  %v1830_v4 = vld [vmem:[%s1942_s18] sm:$0xff] }
 0x580   : > { %1678 = vmatmul.msk.f32.gmra.mxu2 %vm771_vm12, %v933_v3  ;;  %1808 = vrcp.f32 %v1194_v5 }
 0x581   : > { %1810 = vrcp.f32 %v1057_v21 }
 0x582   : > { %1812 = vrcp.f32 %v1060_v11 }
 0x583   : > { %1814 = vrcp.f32 %v1063_v24 }
 0x585   : > { %v1807_v6 = vpop.eup %1806 }
 0x586   : > { %v1201_v7 = vmul.f32 %v1807_v6, %v1797_v49  ;;  %v1809_v9 = vpop.eup %1808  ;;  %v1297_v49 = vld [vmem:[%s2461_s6 + $0x8] sm:$0xff] }
 0x587   : > { %v1202_v20 = vmul.f32 %v1809_v9, %v2216_v39  ;;  %v1811_v35 = vpop.eup %1810 }
 0x588   : > { %1696 = vmatmul.msk.f32.vlgmr.msrb.gmra.mxu2 %vm771_vm12, %v1201_v7  ;;  %v1067_v18 = vmul.f32 %v1811_v35, %v2207_v13  ;;  %v1813_v25 = vpop.eup %1812  ;;  %v1831_v7 = vld [vmem:[%s1942_s18 + $0x8] sm:$0xff] }
 0x589   : > { %v1068_v26 = vmul.f32 %v1813_v25, %v2211_v28  ;;  %v1815_v27 = vpop.eup %1814 }
 0x58a   : > { %v1069_v29 = vmul.f32 %v1815_v27, %v2220_v43  ;;  %v1303_v43 = vld [vmem:[%s2461_s6 + $0x38] sm:$0xff] }
 0x58b   : > { %1321 = vmatpush.msra.mxu0 %v1303_v43  ;;  %v1480_v43 = vld [vmem:[%s2465_s10 + $0x18] sm:$0xff] }
 0x58d   : > { %1322 = vmatpush.msra.mxu0 %v1302_v44  ;;  %v1479_v44 = vld [vmem:[%s2465_s10 + $0x10] sm:$0xff] }
 0x58f   : > { %1323 = vmatpush.msra.mxu0 %v1301_v45 }
 0x590   : > { %1697 = vmatmul.msk.f32.gmra.mxu2 %vm771_vm12, %v1202_v20 }
 0x591   : > { %1324 = vmatpush.msra.mxu0 %v1300_v46 }
 0x592   : > { %v972_v10 = vpop.f32.mrf.mxu2 }
 0x593   : > { %1252 = vrot.lane.b32.xlu2 %v972_v10, %s1845_s23  ;;  %1325 = vmatpush.msra.mxu0 %v1299_v47  ;;  %v1832_v10 = vld [vmem:[%s1942_s18 + $0x10] sm:$0x1f]  ;;  %v1478_v47 = vld [vmem:[%s2465_s10 + $0x8] sm:$0xff] }
 0x595   : > { %1326 = vmatpush.msra.mxu0 %v1298_v48 }
 0x596   : > { %v1075_v23 = vpop.permute.xlu1 %1074 }
 0x597   : > { %1685 = vmatpush.msk.msra.mxu1 %vm815_vm8, %v1075_v23  ;;  %1327 = vmatpush.msra.mxu0 %v1297_v49  ;;  %v1477_v49 = vld [vmem:[%s2465_s10] sm:$0xff] }
 0x599   : > { %1328 = vmatpush.msra.mxu0 %v1296_v51 }
 0x59e   : > { %v1744_v14 = vpop.permute.xlu1 %1743 }
 0x59f   : > { %v1745_v16 = vunpack.i.l.bf16 %v1744_v14  ;;  %v1746_v17 = vunpack.i.h.bf16 %v1744_v14 }
 0x5a1   : > { %1103 = vmatpush.msra.mxu1 %v1745_v16 }
 0x5a3   : > { %1104 = vmatpush.msra.mxu1 %v1746_v17 }
 0x5a4   : > { %1686 = vmatmul.msk.f32.vlgmr.msra.gmra.mxu1 %vm771_vm12, %v1067_v18 }
 0x5ac   : > { %1687 = vmatmul.msk.f32.gmra.mxu1 %vm771_vm12, %v1068_v26 }
 0x5b4   : > { %1688 = vmatmul.msk.f32.gmra.mxu1 %vm771_vm12, %v1069_v29 }
 0x5c9   : > { %v1197_v30 = vpop.xlane.xlu1 %1196 }
 0x5ca   : > { %1816 = vrcp.f32 %v1197_v30 }
 0x5d0   : > { %v1817_v31 = vpop.eup %1816 }
 0x5d1   : > { %v1203_v36 = vmul.f32 %v1817_v31, %v1801_v62 }
 0x5d3   : > { %1698 = vmatmul.msk.f32.gmra.mxu2 %vm771_vm12, %v1203_v36 }
 0x5ed   : > { %v1253_v15 = vpop.permute.xlu2 %1252 }
 0x5ee   : > { %v1285_v52 = vsel %vm722_vm9, %v2239_v8, %v1253_v15 }
 0x5fb   : > { %v975_v13 = vpop.f32.mrf.mxu2 }
 0x603   : > { %v978_v37 = vpop.f32.mrf.mxu2 }
 0x604   : > { %1256 = vrot.lane.b32.xlu1 %v978_v37, %s1845_s23 }
 0x60b   : > { %v1240_v38 = vpop.f32.mrf.mxu2 }
 0x60c   : > { %1276 = vrot.lane.b32.xlu2 %v1240_v38, %s1844_s22 }
 0x613   : > { %v1243_v40 = vpop.f32.mrf.mxu2 }
 0x621   : > { %v1106_v28 = vpop.f32.mrf.mxu1 }
 0x622   : > { %1264 = vrot.lane.b32.xlu0 %v1106_v28, %s1849_s16 }
 0x629   : > { %v1109_v39 = vpop.f32.mrf.mxu1 }
 0x62a   : > { %1254 = vrot.lane.b32.xlu0 %v975_v13, %s1845_s23  ;;  %1266 = vrot.lane.b32.xlu2 %v1109_v39, %s1849_s16  ;;  %v1484_v39 = vld [vmem:[%s2465_s10 + $0x38] sm:$0xff] }
 0x62b   : > { %1506 = vmatpush.msrb.mxu1 %v1484_v39 }
 0x631   : > { %v1112_v41 = vpop.f32.mrf.mxu1 }
 0x632   : > { %1268 = vrot.lane.b32.xlu2 %v1112_v41, %s1849_s16  ;;  %1278 = vrot.lane.b32.xlu0 %v1243_v40, %s1844_s22  ;;  %v1482_v41 = vld [vmem:[%s2465_s10 + $0x28] sm:$0xff] }
 0x656   : > { %v1246_v42 = vpop.f32.mrf.mxu2 }
 0x657   : > { %1280 = vrot.lane.b32.xlu0 %v1246_v42, %s1844_s22  ;;  %v1481_v42 = vld [vmem:[%s2465_s10 + $0x20] sm:$0xff] }
 0x666   : > { %v1277_v54 = vpop.permute.xlu2 %1276 }
 0x676   : > { %v1257_v62 = vpop.permute.xlu1 %1256 }
 0x677   : > { %v1287_v0 = vsel %vm722_vm9, %v2161_v33, %v1257_v62 }
 0x684   : > { %v1267_v59 = vpop.permute.xlu2 %1266 }
 0x68c   : > { %v1269_v63 = vpop.permute.xlu2 %1268 }
 0x68d   : > { %v1291_v1 = vsel %vm1288_vm15, %v1287_v0, %v1269_v63 }
 0x694   : > { %v1265_v53 = vpop.permute.xlu0 %1264 }
 0x695   : > { %v1289_v55 = vsel %vm1288_vm15, %v1285_v52, %v1265_v53 }
 0x696   : > { %v1293_v56 = vsel %vm1292_vm14, %v1289_v55, %v1277_v54 }
 0x697   : > { %1699 = vmatmul.msk.f32.vlgmr.msra.gmra.mxu0 %vm488_vm0, %v1293_v56 }
 0x69c   : > { %v1255_v57 = vpop.permute.xlu0 %1254 }
 0x69d   : > { %v1286_v58 = vsel %vm722_vm9, %v2159_v32, %v1255_v57  ;;  %v1749_v32 = vld [vmem:[%s2462_s7] ss:$0 sm:$0xff] }
 0x69e   : > { %v1290_v50 = vsel %vm1288_vm15, %v1286_v58, %v1267_v59 }
 0x6a4   : > { %v1279_v60 = vpop.permute.xlu0 %1278 }
 0x6a5   : > { %v1294_v61 = vsel %vm1292_vm14, %v1290_v50, %v1279_v60 }
 0x6a6   : > { %1700 = vmatmul.msk.f32.gmra.mxu0 %vm488_vm0, %v1294_v61 }
 0x6c9   : > { %v1281_v22 = vpop.permute.xlu0 %1280 }
 0x6ca   : > { %v1295_v2 = vsel %vm1292_vm14, %v1291_v1, %v1281_v22 }
 0x6cb   : > { %1701 = vmatmul.msk.f32.gmra.mxu0 %vm488_vm0, %v1295_v2 }
 0x714   : > { %v1330_v19 = vpop.f32.mrf.mxu0 }
 0x715   : > { %v1339_v3 = vadd.f32 %v1830_v4, %v1330_v19 }
 0x717   : > { %v2303_v5 = vadd.f32 %v1749_v32, %v1339_v3  ;;  %v2367_v3 = vld [vmem:[%s2463_s8] ss:$0 sm:$0xff] }
 0x719   : > { %v1351_v33 = vsel %vm488_vm0, %v2303_v5, 0.0 }
 0x71a   : > { %1352 = vadd.xlane.f32.xlu2 %v1351_v33 }
 0x723   : > { %v1333_v6 = vpop.f32.mrf.mxu0 }
 0x724   : > { %v1340_v8 = vadd.f32 %v1831_v7, %v1333_v6 }
 0x726   : > { %v2308_v9 = vadd.f32 %v1749_v32, %v1340_v8 }
 0x728   : > { %v1354_v20 = vsel %vm488_vm0, %v2308_v9, 0.0 }
 0x729   : > { %1355 = vadd.xlane.f32.xlu0 %v1354_v20 }
 0x748   : > { %v1336_v21 = vpop.f32.mrf.mxu0 }
 0x749   : > { %v1341_v23 = vadd.f32 %v1832_v10, %v1336_v21 }
 0x74b   : > { %v2313_v11 = vadd.f32 %v1749_v32, %v1341_v23 }
 0x74d   : > { %v1357_v14 = vsel %vm495_vm1, %v2313_v11, 0.0 }
 0x74e   : > { %1358 = vadd.xlane.f32.xlu1 %v1357_v14 }
 0x78d   : > { %v1353_v35 = vpop.xlane.xlu2 %1352 }
 0x78e   : > { %v1360_v16 = vmul.f32 %v1353_v35, %v1950_v12  ;;  %v2374_v35 = vld [vmem:[%s2464_s9] ss:$0 sm:$0xff] }
 0x790   : > { %v2319_v17 = vsub.f32 %v2303_v5, %v1360_v16 }
 0x792   : > { %v1366_v18 = vmul.f32 %v2319_v17, %v2319_v17  ;;  %v1384_v23 = vmul.f32 %v2367_v3, %v2319_v17 }
 0x794   : > { %v1369_v24 = vsel %vm488_vm0, %v1366_v18, 0.0 }
 0x795   : > { %1370 = vadd.xlane.f32.xlu2 %v1369_v24 }
 0x79c   : > { %v1356_v25 = vpop.xlane.xlu0 %1355 }
 0x79d   : > { %v1361_v26 = vmul.f32 %v1356_v25, %v1950_v12 }
 0x79f   : > { %v2326_v27 = vsub.f32 %v2308_v9, %v1361_v26 }
 0x7a1   : > { %v1367_v29 = vmul.f32 %v2326_v27, %v2326_v27  ;;  %v1385_v39 = vmul.f32 %v2367_v3, %v2326_v27  ;;  %v1541_v27 = vld [vmem:[%s2467_s12 + $0x70] sm:$0xff] }
 0x7a3   : > { %v1372_v30 = vsel %vm488_vm0, %v1367_v29, 0.0 }
 0x7a4   : > { %1373 = vadd.xlane.f32.xlu0 %v1372_v30 }
 0x7c1   : > { %v1359_v31 = vpop.xlane.xlu1 %1358 }
 0x7c2   : > { %v1362_v36 = vmul.f32 %v1359_v31, %v1950_v12  ;;  %v1483_v12 = vld [vmem:[%s2465_s10 + $0x30] sm:$0xff] }
 0x7c3   : > { %1507 = vmatpush.msrb.mxu1 %v1483_v12 }
 0x7c4   : > { %v2333_v13 = vsub.f32 %v2313_v11, %v1362_v36 }
 0x7c5   : > { %1508 = vmatpush.msrb.mxu1 %v1482_v41 }
 0x7c6   : > { %v1368_v37 = vmul.f32 %v2333_v13, %v2333_v13 }
 0x7c7   : > { %1509 = vmatpush.msrb.mxu1 %v1481_v42 }
 0x7c8   : > { %v1375_v38 = vsel %vm495_vm1, %v1368_v37, 0.0 }
 0x7c9   : > { %1376 = vadd.xlane.f32.xlu2 %v1375_v38  ;;  %1510 = vmatpush.msrb.mxu1 %v1480_v43 }
 0x7cb   : > { %1511 = vmatpush.msrb.mxu1 %v1479_v44 }
 0x7cd   : > { %1512 = vmatpush.msrb.mxu1 %v1478_v47 }
 0x7cf   : > { %1513 = vmatpush.msrb.mxu1 %v1477_v49 }
 0x808   : > { %v1371_v28 = vpop.xlane.xlu2 %1370 }
 0x809   : > { %v1378_v40 = vmul.f32 %v1371_v28, %v1970_v34 }
 0x80b   : > { %1818 = vrsqrt.f32 %v1378_v40  ;;  %vm1394_vm2 = vcmp.eq.f32.partialorder %v1378_v40, inf  ;;  %v1397_v56 = vand.u32 2147483648, %v1378_v40  ;;  %vm1396_vm3 = vcmp.eq.f32.partialorder %v1378_v40, 0.0 }
 0x811   : > { %v1819_v45 = vpop.eup %1818 }
 0x812   : > { %v1388_v46 = vmul.f32 %v1819_v45, %v1378_v40 }
 0x814   : > { %v1389_v48 = vmul.f32 %v1819_v45, %v1388_v46  ;;  %v1542_v46 = vld [vmem:[%s2467_s12 + $0x78] sm:$0xff] }
 0x815   : > { %1543 = vmatpush.msrb.mxu3 %v1542_v46 }
 0x816   : > { %v1390_v51 = vmul.f32 0.5, %v1389_v48  ;;  %v1540_v48 = vld [vmem:[%s2467_s12 + $0x68] sm:$0xff] }
 0x817   : > { %v1374_v15 = vpop.xlane.xlu0 %1373  ;;  %1544 = vmatpush.msrb.mxu3 %v1541_v27 }
 0x818   : > { %v1391_v52 = vsub.f32 1.5, %v1390_v51  ;;  %v1379_v53 = vmul.f32 %v1374_v15, %v1970_v34  ;;  %v1539_v51 = vld [vmem:[%s2467_s12 + $0x60] sm:$0xff] }
 0x819   : > { %1545 = vmatpush.msrb.mxu3 %v1540_v48 }
 0x81a   : > { %v1392_v54 = vmul.f32 %v1819_v45, %v1391_v52  ;;  %1820 = vrsqrt.f32 %v1379_v53  ;;  %vm1406_vm4 = vcmp.eq.f32.partialorder %v1379_v53, inf  ;;  %v1409_v19 = vand.u32 2147483648, %v1379_v53 }
 0x81b   : > { %vm1408_vm5 = vcmp.eq.f32.partialorder %v1379_v53, 0.0  ;;  %1546 = vmatpush.msrb.mxu3 %v1539_v51 }
 0x81c   : > { %v1393_v55 = vmul.f32 %v1392_v54, %v1378_v40 }
 0x81e   : > { %v1395_v57 = vsel %vm1394_vm2, %v1378_v40, %v1393_v55 }
 0x81f   : > { %v1398_v58 = vsel %vm1396_vm3, %v1397_v56, %v1395_v57  ;;  %v1537_v56 = vld [vmem:[%s2467_s12 + $0x50] sm:$0xff] }
 0x820   : > { %v1821_v59 = vpop.eup %1820  ;;  %v1423_v60 = vadd.f32 1e-06, %v1398_v58  ;;  %v1536_v58 = vld [vmem:[%s2467_s12 + $0x48] sm:$0xff] }
 0x821   : > { %v1400_v50 = vmul.f32 %v1821_v59, %v1379_v53 }
 0x822   : > { %1822 = vrcp.f32 %v1423_v60  ;;  %v1437_v4 = vand.u32 2147483648, %v1423_v60  ;;  %v1435_v6 = vand.u32 2147483647, %v1423_v60  ;;  %vm1431_vm7 = vweird.f32 %v1423_v60 }
 0x823   : > { %v1401_v61 = vmul.f32 %v1821_v59, %v1400_v50  ;;  %v1533_v50 = vld [vmem:[%s2467_s12 + $0x30] sm:$0xff] }
 0x824   : > { %v1438_v10 = vor.u32 1.1754944e-38, %v1437_v4  ;;  %vm1436_vm9 = vcmp.eq.f32.partialorder %v1435_v6, 8.507059e+37  ;;  %v1386_v6 = vmul.f32 %v2367_v3, %v2333_v13  ;;  %v1527_v13 = vld [vmem:[%s2467_s12] sm:$0xff] }
 0x825   : > { %v1402_v62 = vmul.f32 0.5, %v1401_v61  ;;  %v1752_v3 = vld [vmem:[%s2466_s11] ss:$0 sm:$0xff] }
 0x827   : > { %v1403_v63 = vsub.f32 1.5, %v1402_v62 }
 0x828   : > { %v1823_v0 = vpop.eup %1822 }
 0x829   : > { %v1404_v1 = vmul.f32 %v1821_v59, %v1403_v63  ;;  %v1427_v22 = vmul.f32 %v1823_v0, %v1423_v60  ;;  %vm1432_vm6 = vweird.f32 %v1823_v0  ;;  %v1535_v59 = vld [vmem:[%s2467_s12 + $0x40] sm:$0xff]  ;;  %v1534_v60 = vld [vmem:[%s2467_s12 + $0x38] sm:$0xff]  ;;  %v1532_v63 = vld [vmem:[%s2467_s12 + $0x28] sm:$0xff] }
 0x82a   : > { %vm1433_vm8 = vmor %vm1431_vm7, %vm1432_vm6 }
 0x82b   : > { %v1405_v2 = vmul.f32 %v1404_v1, %v1379_v53  ;;  %v1428_v32 = vsub.f32 1.0, %v1427_v22  ;;  %v1531_v1 = vld [vmem:[%s2467_s12 + $0x20] sm:$0xff] }
 0x82d   : > { %v1429_v33 = vmul.f32 %v1823_v0, %v1428_v32  ;;  %v1407_v7 = vsel %vm1406_vm4, %v1379_v53, %v1405_v2  ;;  %v1538_v53 = vld [vmem:[%s2467_s12 + $0x58] sm:$0xff] }
 0x82e   : > { %v1410_v8 = vsel %vm1408_vm5, %v1409_v19, %v1407_v7  ;;  %1547 = vmatpush.msrb.mxu3 %v1538_v53  ;;  %v1530_v19 = vld [vmem:[%s2467_s12 + $0x18] sm:$0xff] }
 0x82f   : > { %v1430_v20 = vadd.f32 %v1823_v0, %v1429_v33  ;;  %v1424_v21 = vadd.f32 1e-06, %v1410_v8 }
 0x830   : > { %1548 = vmatpush.msrb.mxu3 %v1537_v56 }
 0x831   : > { %v1434_v14 = vsel %vm1433_vm8, %v1823_v0, %v1430_v20  ;;  %1824 = vrcp.f32 %v1424_v21  ;;  %v1452_v30 = vand.u32 2147483648, %v1424_v21  ;;  %v1450_v36 = vand.u32 2147483647, %v1424_v21 }
 0x832   : > { %v1439_v16 = vsel %vm1436_vm9, %v1438_v10, %v1434_v14  ;;  %vm1446_vm11 = vweird.f32 %v1424_v21  ;;  %1549 = vmatpush.msrb.mxu3 %v1536_v58  ;;  %v1529_v10 = vld [vmem:[%s2467_s12 + $0x10] sm:$0xff] }
 0x833   : > { %v1440_v18 = vmul.f32 %v1439_v16, %v1384_v23  ;;  %v1453_v28 = vor.u32 1.1754944e-38, %v1452_v30  ;;  %vm1451_vm13 = vcmp.eq.f32.partialorder %v1450_v36, 8.507059e+37  ;;  %v1528_v23 = vld [vmem:[%s2467_s12 + $0x8] sm:$0xff] }
 0x834   : > { %1550 = vmatpush.msrb.mxu3 %v1535_v59 }
 0x835   : > { %v1474_v24 = vadd.f32 %v2374_v35, %v1440_v18 }
 0x836   : > { %1551 = vmatpush.msrb.mxu3 %v1534_v60 }
 0x837   : > { %v1825_v25 = vpop.eup %1824  ;;  %1702 = vmatmul.msk.f32.vlgmr.msrb.gmra.mxu1 %vm488_vm0, %v1474_v24 }
 0x838   : > { %v1442_v26 = vmul.f32 %v1825_v25, %v1424_v21  ;;  %vm1447_vm10 = vweird.f32 %v1825_v25  ;;  %1552 = vmatpush.msrb.mxu3 %v1533_v50 }
 0x839   : > { %vm1448_vm12 = vmor %vm1446_vm11, %vm1447_vm10 }
 0x83a   : > { %v1443_v29 = vsub.f32 1.0, %v1442_v26  ;;  %1553 = vmatpush.msrb.mxu3 %v1532_v63 }
 0x83c   : > { %v1377_v31 = vpop.xlane.xlu2 %1376  ;;  %v1444_v17 = vmul.f32 %v1825_v25, %v1443_v29  ;;  %1554 = vmatpush.msrb.mxu3 %v1531_v1 }
 0x83d   : > { %v1380_v37 = vmul.f32 %v1377_v31, %v1970_v34  ;;  %v1753_v31 = vld [vmem:[%s2468_s13] ss:$0 sm:$0xff] }
 0x83e   : > { %v1445_v38 = vadd.f32 %v1825_v25, %v1444_v17  ;;  %1555 = vmatpush.msrb.mxu3 %v1530_v19 }
 0x83f   : > { %1826 = vrsqrt.f32 %v1380_v37  ;;  %vm1418_vm14 = vcmp.eq.f32.partialorder %v1380_v37, inf  ;;  %v1421_v52 = vand.u32 2147483648, %v1380_v37  ;;  %vm1420_vm15 = vcmp.eq.f32.partialorder %v1380_v37, 0.0 }
 0x840   : > { %v1449_v40 = vsel %vm1448_vm12, %v1825_v25, %v1445_v38  ;;  %1556 = vmatpush.msrb.mxu3 %v1529_v10 }
 0x841   : > { %v1454_v12 = vsel %vm1451_vm13, %v1453_v28, %v1449_v40 }
 0x842   : > { %v1455_v41 = vmul.f32 %v1454_v12, %v1385_v39  ;;  %1557 = vmatpush.msrb.mxu3 %v1528_v23 }
 0x844   : > { %v1475_v42 = vadd.f32 %v2374_v35, %v1455_v41  ;;  %1558 = vmatpush.msrb.mxu3 %v1527_v13 }
 0x845   : > { %v1827_v43 = vpop.eup %1826 }
 0x846   : > { %v1412_v44 = vmul.f32 %v1827_v43, %v1380_v37  ;;  %1703 = vmatmul.msk.f32.gmra.mxu1 %vm488_vm0, %v1475_v42 }
 0x848   : > { %v1413_v45 = vmul.f32 %v1827_v43, %v1412_v44 }
 0x84a   : > { %v1414_v34 = vmul.f32 0.5, %v1413_v45 }
 0x84c   : > { %v1415_v47 = vsub.f32 1.5, %v1414_v34 }
 0x84e   : > { %v1416_v49 = vmul.f32 %v1827_v43, %v1415_v47 }
 0x850   : > { %v1417_v15 = vmul.f32 %v1416_v49, %v1380_v37 }
 0x852   : > { %v1419_v54 = vsel %vm1418_vm14, %v1380_v37, %v1417_v15 }
 0x853   : > { %v1422_v55 = vsel %vm1420_vm15, %v1421_v52, %v1419_v54 }
 0x854   : > { %v1425_v57 = vadd.f32 1e-06, %v1422_v55 }
 0x856   : > { %1828 = vrcp.f32 %v1425_v57  ;;  %v1467_v22 = vand.u32 2147483648, %v1425_v57  ;;  %v1465_v32 = vand.u32 2147483647, %v1425_v57  ;;  %vm1461_vm3 = vweird.f32 %v1425_v57 }
 0x858   : > { %v1468_v33 = vor.u32 1.1754944e-38, %v1467_v22  ;;  %vm1466_vm5 = vcmp.eq.f32.partialorder %v1465_v32, 8.507059e+37 }
 0x85c   : > { %v1829_v61 = vpop.eup %1828 }
 0x85d   : > { %v1457_v62 = vmul.f32 %v1829_v61, %v1425_v57  ;;  %vm1462_vm2 = vweird.f32 %v1829_v61 }
 0x85e   : > { %vm1463_vm4 = vmor %vm1461_vm3, %vm1462_vm2 }
 0x85f   : > { %v1458_v0 = vsub.f32 1.0, %v1457_v62 }
 0x861   : > { %v1459_v2 = vmul.f32 %v1829_v61, %v1458_v0 }
 0x863   : > { %v1460_v4 = vadd.f32 %v1829_v61, %v1459_v2 }
 0x865   : > { %v1464_v7 = vsel %vm1463_vm4, %v1829_v61, %v1460_v4 }
 0x866   : > { %v1469_v8 = vsel %vm1466_vm5, %v1468_v33, %v1464_v7 }
 0x867   : > { %v1470_v20 = vmul.f32 %v1469_v8, %v1386_v6 }
 0x869   : > { %v1476_v21 = vadd.f32 %v2374_v35, %v1470_v20 }
 0x86b   : > { %1704 = vmatmul.msk.f32.gmra.mxu1 %vm488_vm0, %v1476_v21 }
 0x8b4   : > { %v1515_v14 = vpop.f32.mrf.mxu1 }
 0x8b5   : > { %v1516_v35 = vadd.f32 %v1752_v3, %v1515_v14 }
 0x8b7   : > { %v1524_v16 = vmax.f32 %v1516_v35, 0.0 }
 0x8b9   : > { %1559 = vmatmul.f32.vlgmr.msrb.gmra.mxu3 %v1524_v16 }
 0x8c3   : > { %v1518_v18 = vpop.f32.mrf.mxu1 }
 0x8c4   : > { %v1519_v24 = vadd.f32 %v1752_v3, %v1518_v18 }
 0x8c6   : > { %v1525_v25 = vmax.f32 %v1519_v24, 0.0 }
 0x8c8   : > { %1562 = vmatmul.f32.gmra.mxu3 %v1525_v25 }
 0x8e8   : > { %v1521_v26 = vpop.f32.mrf.mxu1 }
 0x8e9   : > { %v1522_v29 = vadd.f32 %v1752_v3, %v1521_v26 }
 0x8eb   : > { %v1526_v30 = vmax.f32 %v1522_v29, 0.0 }
 0x8ed   : > { %1565 = vmatmul.f32.gmra.mxu3 %v1526_v30 }
 0x93c   : > { %v1560_v17 = vpop.f32.mrf.mxu3 }
 0x93d   : > { %v1569_v36 = vadd.f32 %v1560_v17, %v2303_v5 }
 0x93f   : > { %v1576_v37 = vadd.f32 %v1753_v31, %v1569_v36 }
 0x941   : > { %1579 = vst.msk [vmem:[%s481_s17] sm:$0xff] %vm488_vm0, %v1576_v37 }
 0x94b   : > { %v1563_v38 = vpop.f32.mrf.mxu3 }
 0x94c   : > { %v1570_v28 = vadd.f32 %v1563_v38, %v2308_v9 }
 0x94e   : > { %v1577_v39 = vadd.f32 %v1753_v31, %v1570_v28 }
 0x950   : > { %1580 = vst.msk [vmem:[%s481_s17 + $0x8] sm:$0xff] %vm488_vm0, %v1577_v39 }
 0x970   : > { %v1566_v40 = vpop.f32.mrf.mxu3 }
 0x971   : > { %v1571_v12 = vadd.f32 %v1566_v40, %v2313_v11 }
 0x973   : > { %v1578_v41 = vadd.f32 %v1753_v31, %v1571_v12 }
 0x975   : > { %1581 = vst.msk [vmem:[%s481_s17 + $0x10] sm:$0x1f] %vm495_vm1, %v1578_v41 }
 0x976 PF: > { %s24_s29 = sadd.s32 1, %s1839_s29  }
 0x977   : > { %p21_p4 = scmp.ge.s32.totalorder %s24_s29, 4  }
 0x979   :  { %23 = sbr.rel (!%p21_p4) target bundleno = 1 (0x1), region = 109 }

// kernel: encoder_y_forward.9
= control target key start
LH: loop header
LB: loop body
LE: loop exit
PB: predicated region body
PF: predicated region fallthrough
CT: control target
= control target key end

     0   :  { %s1733_s0 = inlined_call_operand.vmem [shape: f32[2,21,64], index: 0, kind: input, shape index: {}]   ;;  %s1734_s1 = inlined_call_operand.vmem [shape: f32[1,64], index: 1, kind: input, shape index: {}]   ;;  %s1735_s2 = inlined_call_operand.vmem [shape: f32[1,64], index: 2, kind: input, shape index: {}]   ;;  %s1736_s3 = inlined_call_operand.vmem [shape: f32[64,16], index: 3, kind: input, shape index: {}]   ;;  %s1737_s4 = inlined_call_operand.vmem [shape: f32[1,16], index: 4, kind: input, shape index: {}]   ;;  %s1738_s5 = inlined_call_operand.vmem [shape: f32[2,21,64], index: 5, kind: output, shape index: {0}]   ;;  %s1739_s6 = inlined_call_operand.hbm [shape: f32[2,16], index: 6, kind: output, shape index: {1}]  }
   0x1   :  { %v1072_v0 = vld [vmem:[%s1733_s0] sm:$0xff] }
   0x2   :  { %v35_v1 = vrot.slane %v1072_v0, 1  ;;  %v36_v2 = vrot.slane %v1072_v0, 2  ;;  %v37_v3 = vrot.slane %v1072_v0, 3  ;;  %109 = vst [vmem:[#allocation1] ss:$9 sm:$0xff] %v1072_v0  ;;  %v38_v4 = vrot.slane %v1072_v0, 4 }
   0x3   :  { %v39_v5 = vrot.slane %v1072_v0, 5  ;;  %v40_v6 = vrot.slane %v1072_v0, 6  ;;  %v41_v7 = vrot.slane %v1072_v0, 7 }
   0x4   :  { %111 = vst [vmem:[#allocation1 + $0x1] ss:$9 sm:$0xff] %v35_v1 }
   0x5   :  { %113 = vst [vmem:[#allocation1 + $0x2] ss:$9 sm:$0xff] %v36_v2 }
   0x6   :  { %115 = vst [vmem:[#allocation1 + $0x3] ss:$9 sm:$0xff] %v37_v3 }
   0x7   :  { %117 = vst [vmem:[#allocation1 + $0x4] ss:$9 sm:$0xff] %v38_v4 }
   0x8   :  { %119 = vst [vmem:[#allocation1 + $0x5] ss:$9 sm:$0xff] %v39_v5 }
   0x9   :  { %12 = vsyncpa [#allocation3], 0  ;;  %121 = vst [vmem:[#allocation1 + $0x6] ss:$9 sm:$0xff] %v40_v6  ;;  %v1099_v8 = vld [vmem:[%s1733_s0 + $0x8] sm:$0xff]  ;;  %vm170_vm0 = vcmask 523264  }
   0xa   :  { %123 = vst [vmem:[#allocation1 + $0x7] ss:$9 sm:$0xff] %v41_v7  ;;  %v42_v9 = vrot.slane %v1099_v8, 1  ;;  %v43_v10 = vrot.slane %v1099_v8, 2  ;;  %v44_v12 = vrot.slane %v1099_v8, 3  ;;  %v45_v14 = vrot.slane %v1099_v8, 4 }
   0xb   :  { %v46_v15 = vrot.slane %v1099_v8, 5  ;;  %v47_v16 = vrot.slane %v1099_v8, 6  ;;  %v48_v17 = vrot.slane %v1099_v8, 7  ;;  %v1127_v18 = vld [vmem:[%s1733_s0 + $0x10] sm:$0x1f]  ;;  %v1134_v22 = vld [vmem:[%s1733_s0 + $0x18] sm:$0xff] }
   0xc   :  { %v49_v19 = vrot.slane %v1127_v18, 1  ;;  %v50_v20 = vrot.slane %v1127_v18, 2  ;;  %v51_v23 = vrot.slane %v1127_v18, 3  ;;  %v52_v25 = vrot.slane %v1127_v18, 4  ;;  %v1161_v32 = vld [vmem:[%s1733_s0 + $0x20] sm:$0xff]  ;;  %s1033_s12 = smov [#allocation2]  }
   0xd   :  { %v53_v26 = vrot.slane %v1134_v22, 1  ;;  %v54_v27 = vrot.slane %v1134_v22, 2  ;;  %v55_v28 = vrot.slane %v1134_v22, 3  ;;  %v56_v29 = vrot.slane %v1134_v22, 4  ;;  %v1189_v42 = vld [vmem:[%s1733_s0 + $0x28] sm:$0x1f] }
   0xe   :  { %v57_v30 = vrot.slane %v1134_v22, 5  ;;  %v58_v33 = vrot.slane %v1134_v22, 6  ;;  %v59_v35 = vrot.slane %v1134_v22, 7  ;;  %v60_v36 = vrot.slane %v1161_v32, 1  ;;  %s957_s13 = sshll.u32 %s1033_s12, 4  ;;  %s959_s16 = sshll.u32 %s1739_s6, 4  ;;  %s958_s13 = int_to_ptr.vmem [resolvable:$true] %s957_s13  ;;  %s960_s16 = int_to_ptr.hbm [resolvable:$true] %s959_s16 }
   0xf   :  { %v61_v37 = vrot.slane %v1161_v32, 2  ;;  %v62_v38 = vrot.slane %v1161_v32, 3  ;;  %v63_v39 = vrot.slane %v1161_v32, 4  ;;  %v64_v40 = vrot.slane %v1161_v32, 5 }
  0x10   :  { %v65_v43 = vrot.slane %v1161_v32, 6  ;;  %v66_v45 = vrot.slane %v1161_v32, 7  ;;  %v67_v46 = vrot.slane %v1189_v42, 1  ;;  %v68_v47 = vrot.slane %v1189_v42, 2 }
  0x11   :  { %v124_v11 = vld [vmem:[#allocation1] sm:$0xff]  ;;  %v69_v48 = vrot.slane %v1189_v42, 3  ;;  %v70_v49 = vrot.slane %v1189_v42, 4  ;;  %vm186_vm1 = vcmask 517120   ;;  %v1031_v54 = vmov 64.0  }
  0x12   :  { %v171_v13 = vsel %vm170_vm0, %v124_v11, 0.0  ;;  %125 = vst [vmem:[#allocation1] ss:$9 sm:$0xff] %v1099_v8  ;;  %977 = vrcp.f32 %v1031_v54 }
  0x13   :  { %172 = vadd.xlane.f32.xlu0 %v171_v13  ;;  %126 = vst [vmem:[#allocation1 + $0x1] ss:$9 sm:$0xff] %v42_v9 }
  0x14   :  { %127 = vst [vmem:[#allocation1 + $0x2] ss:$9 sm:$0xff] %v43_v10 }
  0x15   :  { %128 = vst [vmem:[#allocation1 + $0x3] ss:$9 sm:$0xff] %v44_v12 }
  0x16   :  { %129 = vst [vmem:[#allocation1 + $0x4] ss:$9 sm:$0xff] %v45_v14 }
  0x17   :  { %130 = vst [vmem:[#allocation1 + $0x5] ss:$9 sm:$0xff] %v46_v15 }
  0x18   :  { %131 = vst [vmem:[#allocation1 + $0x6] ss:$9 sm:$0xff] %v47_v16  ;;  %v978_v55 = vpop.eup %977 }
  0x19   :  { %132 = vst [vmem:[#allocation1 + $0x7] ss:$9 sm:$0xff] %v48_v17  ;;  %v191_v56 = vmul.f32 64.0, %v978_v55  ;;  %vm195_vm2 = vweird.f32 %v978_v55 }
  0x1b   :  { %v192_v57 = vsub.f32 1.0, %v191_v56 }
  0x1d   :  { %v193_v58 = vmul.f32 %v978_v55, %v192_v57 }
  0x1f   :  { %v194_v59 = vadd.f32 %v978_v55, %v193_v58 }
  0x20   :  { %v133_v21 = vld [vmem:[#allocation1] sm:$0xff] }
  0x21   :  { %v174_v24 = vsel %vm170_vm0, %v133_v21, 0.0  ;;  %134 = vst [vmem:[#allocation1] ss:$9 sm:$0xff] %v1127_v18  ;;  %v1219_v60 = vsel %vm195_vm2, %v978_v55, %v194_v59 }
  0x22   :  { %175 = vadd.xlane.f32.xlu0 %v174_v24  ;;  %135 = vst [vmem:[#allocation1 + $0x1] ss:$9 sm:$0xff] %v49_v19 }
  0x23   :  { %136 = vst [vmem:[#allocation1 + $0x2] ss:$9 sm:$0xff] %v50_v20 }
  0x24   :  { %137 = vst [vmem:[#allocation1 + $0x3] ss:$9 sm:$0xff] %v51_v23 }
  0x25   :  { %138 = vst [vmem:[#allocation1 + $0x4] ss:$9 sm:$0xff] %v52_v25 }
  0x26   :  { %139 = vst [vmem:[#allocation1 + $0x5] ss:$9 sm:$0xff] %v1134_v22 }
  0x27   :  { %140 = vst [vmem:[#allocation1 + $0x6] ss:$9 sm:$0xff] %v53_v26 }
  0x28   :  { %141 = vst [vmem:[#allocation1 + $0x7] ss:$9 sm:$0xff] %v54_v27 }
  0x2f   :  { %v142_v31 = vld [vmem:[#allocation1] sm:$0xff] }
  0x30   :  { %v177_v34 = vsel %vm170_vm0, %v142_v31, 0.0  ;;  %143 = vst [vmem:[#allocation1] ss:$9 sm:$0xff] %v55_v28 }
  0x31   :  { %178 = vadd.xlane.f32.xlu1 %v177_v34  ;;  %144 = vst [vmem:[#allocation1 + $0x1] ss:$9 sm:$0xff] %v56_v29 }
  0x32   :  { %145 = vst [vmem:[#allocation1 + $0x2] ss:$9 sm:$0xff] %v57_v30 }
  0x33   :  { %146 = vst [vmem:[#allocation1 + $0x3] ss:$9 sm:$0xff] %v58_v33 }
  0x34   :  { %147 = vst [vmem:[#allocation1 + $0x4] ss:$9 sm:$0xff] %v59_v35 }
  0x35   :  { %148 = vst [vmem:[#allocation1 + $0x5] ss:$9 sm:$0xff] %v1161_v32 }
  0x36   :  { %149 = vst [vmem:[#allocation1 + $0x6] ss:$9 sm:$0xff] %v60_v36 }
  0x37   :  { %150 = vst [vmem:[#allocation1 + $0x7] ss:$9 sm:$0xff] %v61_v37 }
  0x3e   :  { %v151_v41 = vld [vmem:[#allocation1] sm:$0xff] }
  0x3f   :  { %v180_v44 = vsel %vm170_vm0, %v151_v41, 0.0  ;;  %152 = vst [vmem:[#allocation1] ss:$9 sm:$0xff] %v62_v38 }
  0x40   :  { %181 = vadd.xlane.f32.xlu1 %v180_v44  ;;  %153 = vst [vmem:[#allocation1 + $0x1] ss:$9 sm:$0xff] %v63_v39 }
  0x41   :  { %154 = vst [vmem:[#allocation1 + $0x2] ss:$9 sm:$0xff] %v64_v40 }
  0x42   :  { %155 = vst [vmem:[#allocation1 + $0x3] ss:$9 sm:$0xff] %v65_v43 }
  0x43   :  { %156 = vst [vmem:[#allocation1 + $0x4] ss:$9 sm:$0xff] %v66_v45 }
  0x44   :  { %157 = vst [vmem:[#allocation1 + $0x5] ss:$9 sm:$0xff] %v1189_v42 }
  0x45   :  { %158 = vst [vmem:[#allocation1 + $0x6] ss:$9 sm:$0xff] %v67_v46 }
  0x46   :  { %159 = vst [vmem:[#allocation1 + $0x7] ss:$9 sm:$0xff] %v68_v47 }
  0x4d   :  { %v160_v50 = vld [vmem:[#allocation1] sm:$0xff] }
  0x4e   :  { %v183_v51 = vsel %vm170_vm0, %v160_v50, 0.0  ;;  %161 = vst [vmem:[#allocation1] ss:$9 sm:$0xff] %v69_v48 }
  0x4f   :  { %184 = vadd.xlane.f32.xlu2 %v183_v51  ;;  %162 = vst [vmem:[#allocation1 + $0x1] ss:$9 sm:$0xff] %v70_v49 }
  0x56   :  { %v163_v52 = vld [vmem:[#allocation1] sm:$0xff] }
  0x57   :  { %v187_v53 = vsel %vm186_vm1, %v163_v52, 0.0 }
  0x58   :  { %188 = vadd.xlane.f32.xlu2 %v187_v53 }
  0x86   :  { %v173_v61 = vpop.xlane.xlu0 %172 }
  0x87   :  { %v197_v62 = vmul.f32 %v1219_v60, %v173_v61 }
  0x89   :  { %v209_v63 = vperm.slane %v197_v62, 0  ;;  %v210_v11 = vperm.slane %v197_v62, 1  ;;  %v211_v13 = vperm.slane %v197_v62, 2  ;;  %v212_v21 = vperm.slane %v197_v62, 3 }
  0x8a   :  { %v213_v24 = vperm.slane %v197_v62, 4  ;;  %v214_v31 = vperm.slane %v197_v62, 5  ;;  %v215_v34 = vperm.slane %v197_v62, 6  ;;  %v216_v41 = vperm.slane %v197_v62, 7 }
  0x8b   :  { %v1223_v44 = vsub.f32 %v1072_v0, %v209_v63  ;;  %v1227_v50 = vsub.f32 %v35_v1, %v210_v11  ;;  %v1231_v51 = vsub.f32 %v36_v2, %v211_v13  ;;  %v1235_v52 = vsub.f32 %v37_v3, %v212_v21 }
  0x8c   :  { %v1239_v53 = vsub.f32 %v38_v4, %v213_v24  ;;  %v1243_v54 = vsub.f32 %v39_v5, %v214_v31  ;;  %v1247_v1 = vsub.f32 %v40_v6, %v215_v34  ;;  %v1257_v4 = vsub.f32 %v41_v7, %v216_v41 }
  0x8d   :  { %v335_v2 = vmul.f32 %v1223_v44, %v1223_v44  ;;  %v336_v55 = vmul.f32 %v1227_v50, %v1227_v50  ;;  %v337_v3 = vmul.f32 %v1231_v51, %v1231_v51  ;;  %v338_v5 = vmul.f32 %v1235_v52, %v1235_v52 }
  0x8e   :  { %v339_v6 = vmul.f32 %v1239_v53, %v1239_v53  ;;  %v340_v56 = vmul.f32 %v1243_v54, %v1243_v54  ;;  %v341_v57 = vmul.f32 %v1247_v1, %v1247_v1  ;;  %v342_v0 = vmul.f32 %v1257_v4, %v1257_v4 }
  0x8f   :  { %419 = vst [vmem:[#allocation1] ss:$9 sm:$0xff] %v335_v2 }
  0x90   :  { %421 = vst [vmem:[#allocation1 + $0x1] ss:$9 sm:$0xff] %v336_v55 }
  0x91   :  { %423 = vst [vmem:[#allocation1 + $0x2] ss:$9 sm:$0xff] %v337_v3 }
  0x92   :  { %425 = vst [vmem:[#allocation1 + $0x3] ss:$9 sm:$0xff] %v338_v5 }
  0x93   :  { %427 = vst [vmem:[#allocation1 + $0x4] ss:$9 sm:$0xff] %v339_v6 }
  0x94   :  { %429 = vst [vmem:[#allocation1 + $0x5] ss:$9 sm:$0xff] %v340_v56 }
  0x95   :  { %431 = vst [vmem:[#allocation1 + $0x6] ss:$9 sm:$0xff] %v341_v57  ;;  %v176_v7 = vpop.xlane.xlu0 %175 }
  0x96   :  { %433 = vst [vmem:[#allocation1 + $0x7] ss:$9 sm:$0xff] %v342_v0  ;;  %v198_v58 = vmul.f32 %v1219_v60, %v176_v7 }
  0x98   :  { %v217_v59 = vperm.slane %v198_v58, 0  ;;  %v218_v61 = vperm.slane %v198_v58, 1  ;;  %v219_v62 = vperm.slane %v198_v58, 2  ;;  %v220_v63 = vperm.slane %v198_v58, 3 }
  0x99   :  { %v221_v11 = vperm.slane %v198_v58, 4  ;;  %v222_v13 = vperm.slane %v198_v58, 5  ;;  %v223_v21 = vperm.slane %v198_v58, 6  ;;  %v224_v24 = vperm.slane %v198_v58, 7 }
  0x9a   :  { %v1271_v31 = vsub.f32 %v1099_v8, %v217_v59  ;;  %v1275_v34 = vsub.f32 %v42_v9, %v218_v61  ;;  %v1279_v41 = vsub.f32 %v43_v10, %v219_v62  ;;  %v1283_v2 = vsub.f32 %v44_v12, %v220_v63 }
  0x9b   :  { %v1287_v55 = vsub.f32 %v45_v14, %v221_v11  ;;  %v1291_v3 = vsub.f32 %v46_v15, %v222_v13  ;;  %v1295_v9 = vsub.f32 %v47_v16, %v223_v21  ;;  %v1305_v14 = vsub.f32 %v48_v17, %v224_v24 }
  0x9c   :  { %v343_v10 = vmul.f32 %v1271_v31, %v1271_v31  ;;  %v344_v5 = vmul.f32 %v1275_v34, %v1275_v34  ;;  %v345_v12 = vmul.f32 %v1279_v41, %v1279_v41  ;;  %v346_v15 = vmul.f32 %v1283_v2, %v1283_v2 }
  0x9d   :  { %v434_v6 = vld [vmem:[#allocation1] sm:$0xff]  ;;  %v347_v16 = vmul.f32 %v1287_v55, %v1287_v55  ;;  %v348_v57 = vmul.f32 %v1291_v3, %v1291_v3  ;;  %v349_v0 = vmul.f32 %v1295_v9, %v1295_v9  ;;  %v350_v8 = vmul.f32 %v1305_v14, %v1305_v14 }
  0x9e   :  { %435 = vst [vmem:[#allocation1] ss:$9 sm:$0xff] %v343_v10  ;;  %v480_v56 = vsel %vm170_vm0, %v434_v6, 0.0 }
  0x9f   :  { %436 = vst [vmem:[#allocation1 + $0x1] ss:$9 sm:$0xff] %v344_v5  ;;  %481 = vadd.xlane.f32.xlu0 %v480_v56 }
  0xa0   :  { %437 = vst [vmem:[#allocation1 + $0x2] ss:$9 sm:$0xff] %v345_v12 }
  0xa1   :  { %438 = vst [vmem:[#allocation1 + $0x3] ss:$9 sm:$0xff] %v346_v15 }
  0xa2   :  { %439 = vst [vmem:[#allocation1 + $0x4] ss:$9 sm:$0xff] %v347_v16 }
  0xa3   :  { %440 = vst [vmem:[#allocation1 + $0x5] ss:$9 sm:$0xff] %v348_v57 }
  0xa4   :  { %441 = vst [vmem:[#allocation1 + $0x6] ss:$9 sm:$0xff] %v349_v0  ;;  %v179_v17 = vpop.xlane.xlu1 %178 }
  0xa5   :  { %442 = vst [vmem:[#allocation1 + $0x7] ss:$9 sm:$0xff] %v350_v8  ;;  %v199_v7 = vmul.f32 %v1219_v60, %v179_v17 }
  0xa7   :  { %v225_v58 = vperm.slane %v199_v7, 0  ;;  %v226_v59 = vperm.slane %v199_v7, 1  ;;  %v227_v61 = vperm.slane %v199_v7, 2  ;;  %v228_v62 = vperm.slane %v199_v7, 3 }
  0xa8   :  { %v229_v63 = vperm.slane %v199_v7, 4  ;;  %v230_v11 = vperm.slane %v199_v7, 5  ;;  %v231_v13 = vperm.slane %v199_v7, 6  ;;  %v232_v21 = vperm.slane %v199_v7, 7 }
  0xa9   :  { %v1320_v24 = vsub.f32 %v1127_v18, %v225_v58  ;;  %v1324_v10 = vsub.f32 %v49_v19, %v226_v59  ;;  %v1328_v5 = vsub.f32 %v50_v20, %v227_v61  ;;  %v1332_v12 = vsub.f32 %v51_v23, %v228_v62 }
  0xaa   :  { %v1336_v6 = vsub.f32 %v52_v25, %v229_v63  ;;  %v1339_v15 = vsub.f32 %v1134_v22, %v230_v11  ;;  %v1343_v16 = vsub.f32 %v53_v26, %v231_v13  ;;  %v1353_v18 = vsub.f32 %v54_v27, %v232_v21 }
  0xab   :  { %v351_v19 = vmul.f32 %v1320_v24, %v1320_v24  ;;  %v352_v20 = vmul.f32 %v1324_v10, %v1324_v10  ;;  %v353_v23 = vmul.f32 %v1328_v5, %v1328_v5  ;;  %v354_v25 = vmul.f32 %v1332_v12, %v1332_v12 }
  0xac   :  { %v443_v56 = vld [vmem:[#allocation1] sm:$0xff]  ;;  %v355_v26 = vmul.f32 %v1336_v6, %v1336_v6  ;;  %v356_v0 = vmul.f32 %v1339_v15, %v1339_v15  ;;  %v357_v8 = vmul.f32 %v1343_v16, %v1343_v16  ;;  %v358_v27 = vmul.f32 %v1353_v18, %v1353_v18 }
  0xad   :  { %444 = vst [vmem:[#allocation1] ss:$9 sm:$0xff] %v351_v19  ;;  %v483_v57 = vsel %vm170_vm0, %v443_v56, 0.0 }
  0xae   :  { %445 = vst [vmem:[#allocation1 + $0x1] ss:$9 sm:$0xff] %v352_v20  ;;  %484 = vadd.xlane.f32.xlu1 %v483_v57 }
  0xaf   :  { %446 = vst [vmem:[#allocation1 + $0x2] ss:$9 sm:$0xff] %v353_v23 }
  0xb0   :  { %447 = vst [vmem:[#allocation1 + $0x3] ss:$9 sm:$0xff] %v354_v25 }
  0xb1   :  { %448 = vst [vmem:[#allocation1 + $0x4] ss:$9 sm:$0xff] %v355_v26 }
  0xb2   :  { %449 = vst [vmem:[#allocation1 + $0x5] ss:$9 sm:$0xff] %v356_v0 }
  0xb3   :  { %450 = vst [vmem:[#allocation1 + $0x6] ss:$9 sm:$0xff] %v357_v8  ;;  %v182_v17 = vpop.xlane.xlu1 %181 }
  0xb4   :  { %451 = vst [vmem:[#allocation1 + $0x7] ss:$9 sm:$0xff] %v358_v27  ;;  %v200_v7 = vmul.f32 %v1219_v60, %v182_v17 }
  0xb6   :  { %v233_v58 = vperm.slane %v200_v7, 0  ;;  %v234_v59 = vperm.slane %v200_v7, 1  ;;  %v235_v61 = vperm.slane %v200_v7, 2  ;;  %v236_v62 = vperm.slane %v200_v7, 3 }
  0xb7   :  { %v237_v63 = vperm.slane %v200_v7, 4  ;;  %v238_v11 = vperm.slane %v200_v7, 5  ;;  %v239_v13 = vperm.slane %v200_v7, 6  ;;  %v240_v21 = vperm.slane %v200_v7, 7 }
  0xb8   :  { %v1369_v19 = vsub.f32 %v55_v28, %v233_v58  ;;  %v1373_v20 = vsub.f32 %v56_v29, %v234_v59  ;;  %v1377_v23 = vsub.f32 %v57_v30, %v235_v61  ;;  %v1381_v56 = vsub.f32 %v58_v33, %v236_v62 }
  0xb9   :  { %v1385_v25 = vsub.f32 %v59_v35, %v237_v63  ;;  %v1388_v26 = vsub.f32 %v1161_v32, %v238_v11  ;;  %v1392_v28 = vsub.f32 %v60_v36, %v239_v13  ;;  %v1402_v22 = vsub.f32 %v61_v37, %v240_v21 }
  0xba   :  { %v359_v29 = vmul.f32 %v1369_v19, %v1369_v19  ;;  %v360_v30 = vmul.f32 %v1373_v20, %v1373_v20  ;;  %v361_v33 = vmul.f32 %v1377_v23, %v1377_v23  ;;  %v362_v35 = vmul.f32 %v1381_v56, %v1381_v56 }
  0xbb   :  { %v452_v57 = vld [vmem:[#allocation1] sm:$0xff]  ;;  %v363_v36 = vmul.f32 %v1385_v25, %v1385_v25  ;;  %v364_v8 = vmul.f32 %v1388_v26, %v1388_v26  ;;  %v365_v27 = vmul.f32 %v1392_v28, %v1392_v28  ;;  %v366_v37 = vmul.f32 %v1402_v22, %v1402_v22 }
  0xbc   :  { %453 = vst [vmem:[#allocation1] ss:$9 sm:$0xff] %v359_v29  ;;  %v486_v0 = vsel %vm170_vm0, %v452_v57, 0.0 }
  0xbd   :  { %454 = vst [vmem:[#allocation1 + $0x1] ss:$9 sm:$0xff] %v360_v30  ;;  %487 = vadd.xlane.f32.xlu2 %v486_v0 }
  0xbe   :  { %455 = vst [vmem:[#allocation1 + $0x2] ss:$9 sm:$0xff] %v361_v33 }
  0xbf   :  { %456 = vst [vmem:[#allocation1 + $0x3] ss:$9 sm:$0xff] %v362_v35 }
  0xc0   :  { %457 = vst [vmem:[#allocation1 + $0x4] ss:$9 sm:$0xff] %v363_v36 }
  0xc1   :  { %458 = vst [vmem:[#allocation1 + $0x5] ss:$9 sm:$0xff] %v364_v8 }
  0xc2   :  { %459 = vst [vmem:[#allocation1 + $0x6] ss:$9 sm:$0xff] %v365_v27  ;;  %v185_v17 = vpop.xlane.xlu2 %184 }
  0xc3   :  { %460 = vst [vmem:[#allocation1 + $0x7] ss:$9 sm:$0xff] %v366_v37  ;;  %v201_v7 = vmul.f32 %v1219_v60, %v185_v17 }
  0xc5   :  { %v241_v58 = vperm.slane %v201_v7, 0  ;;  %v242_v59 = vperm.slane %v201_v7, 1  ;;  %v243_v61 = vperm.slane %v201_v7, 2  ;;  %v244_v62 = vperm.slane %v201_v7, 3 }
  0xc6   :  { %v245_v63 = vperm.slane %v201_v7, 4  ;;  %v246_v11 = vperm.slane %v201_v7, 5  ;;  %v247_v13 = vperm.slane %v201_v7, 6  ;;  %v248_v21 = vperm.slane %v201_v7, 7 }
  0xc7   :  { %v1418_v29 = vsub.f32 %v62_v38, %v241_v58  ;;  %v1422_v30 = vsub.f32 %v63_v39, %v242_v59  ;;  %v1426_v33 = vsub.f32 %v64_v40, %v243_v61  ;;  %v1430_v57 = vsub.f32 %v65_v43, %v244_v62 }
  0xc8   :  { %v1434_v35 = vsub.f32 %v66_v45, %v245_v63  ;;  %v1437_v36 = vsub.f32 %v1189_v42, %v246_v11  ;;  %v1441_v38 = vsub.f32 %v67_v46, %v247_v13  ;;  %v1451_v32 = vsub.f32 %v68_v47, %v248_v21 }
  0xc9   :  { %v367_v39 = vmul.f32 %v1418_v29, %v1418_v29  ;;  %v368_v40 = vmul.f32 %v1422_v30, %v1422_v30  ;;  %v369_v43 = vmul.f32 %v1426_v33, %v1426_v33  ;;  %v370_v45 = vmul.f32 %v1430_v57, %v1430_v57 }
  0xca   :  { %v461_v0 = vld [vmem:[#allocation1] sm:$0xff]  ;;  %v371_v46 = vmul.f32 %v1434_v35, %v1434_v35  ;;  %v372_v27 = vmul.f32 %v1437_v36, %v1437_v36  ;;  %v373_v17 = vmul.f32 %v1441_v38, %v1441_v38  ;;  %v374_v47 = vmul.f32 %v1451_v32, %v1451_v32 }
  0xcb   :  { %462 = vst [vmem:[#allocation1] ss:$9 sm:$0xff] %v367_v39  ;;  %v189_v8 = vpop.xlane.xlu2 %188  ;;  %v489_v63 = vsel %vm170_vm0, %v461_v0, 0.0 }
  0xcc   :  { %463 = vst [vmem:[#allocation1 + $0x1] ss:$9 sm:$0xff] %v368_v40  ;;  %v202_v37 = vmul.f32 %v1219_v60, %v189_v8  ;;  %490 = vadd.xlane.f32.xlu0 %v489_v63 }
  0xcd   :  { %464 = vst [vmem:[#allocation1 + $0x2] ss:$9 sm:$0xff] %v369_v43 }
  0xce   :  { %465 = vst [vmem:[#allocation1 + $0x3] ss:$9 sm:$0xff] %v370_v45  ;;  %v249_v7 = vperm.slane %v202_v37, 0  ;;  %v250_v58 = vperm.slane %v202_v37, 1 }
  0xcf   :  { %466 = vst [vmem:[#allocation1 + $0x4] ss:$9 sm:$0xff] %v371_v46 }
  0xd0   :  { %467 = vst [vmem:[#allocation1 + $0x5] ss:$9 sm:$0xff] %v372_v27  ;;  %v1466_v59 = vsub.f32 %v69_v48, %v249_v7  ;;  %v1470_v60 = vsub.f32 %v70_v49, %v250_v58  ;;  %v1553_v27 = vld [vmem:[%s1735_s2] ss:$0 sm:$0xff] }
  0xd1   :  { %468 = vst [vmem:[#allocation1 + $0x6] ss:$9 sm:$0xff] %v373_v17 }
  0xd2   :  { %469 = vst [vmem:[#allocation1 + $0x7] ss:$9 sm:$0xff] %v374_v47  ;;  %v375_v61 = vmul.f32 %v1466_v59, %v1466_v59  ;;  %v376_v62 = vmul.f32 %v1470_v60, %v1470_v60 }
  0xd9   :  { %v470_v11 = vld [vmem:[#allocation1] sm:$0xff] }
  0xda   :  { %471 = vst [vmem:[#allocation1] ss:$9 sm:$0xff] %v375_v61  ;;  %v492_v13 = vsel %vm170_vm0, %v470_v11, 0.0 }
  0xdb   :  { %472 = vst [vmem:[#allocation1 + $0x1] ss:$9 sm:$0xff] %v376_v62  ;;  %493 = vadd.xlane.f32.xlu1 %v492_v13 }
  0xe2   :  { %v473_v48 = vld [vmem:[#allocation1] sm:$0xff] }
  0xe3   :  { %556 = vst [vmem:[#allocation1] ss:$9 sm:$0xff] %v1223_v44  ;;  %v495_v42 = vsel %vm186_vm1, %v473_v48, 0.0 }
  0xe4   :  { %558 = vst [vmem:[#allocation1 + $0x1] ss:$9 sm:$0xff] %v1227_v50  ;;  %496 = vadd.xlane.f32.xlu2 %v495_v42 }
  0xe5   :  { %560 = vst [vmem:[#allocation1 + $0x2] ss:$9 sm:$0xff] %v1231_v51  ;;  %v1032_v51 = vmov 63.0  }
  0xe6   :  { %562 = vst [vmem:[#allocation1 + $0x3] ss:$9 sm:$0xff] %v1235_v52  ;;  %979 = vrcp.f32 %v1032_v51 }
  0xe7   :  { %564 = vst [vmem:[#allocation1 + $0x4] ss:$9 sm:$0xff] %v1239_v53 }
  0xe8   :  { %566 = vst [vmem:[#allocation1 + $0x5] ss:$9 sm:$0xff] %v1243_v54 }
  0xe9   :  { %568 = vst [vmem:[#allocation1 + $0x6] ss:$9 sm:$0xff] %v1247_v1 }
  0xea   :  { %570 = vst [vmem:[#allocation1 + $0x7] ss:$9 sm:$0xff] %v1257_v4 }
  0xec   :  { %v980_v52 = vpop.eup %979 }
  0xed   :  { %v499_v54 = vmul.f32 63.0, %v980_v52  ;;  %vm503_vm3 = vweird.f32 %v980_v52 }
  0xef   :  { %v500_v1 = vsub.f32 1.0, %v499_v54 }
  0xf1   :  { %v1487_v49 = vld [vmem:[#allocation1] sm:$0xff]  ;;  %v501_v4 = vmul.f32 %v980_v52, %v500_v1 }
  0xf2   :  { %572 = vst [vmem:[#allocation1] ss:$9 sm:$0xff] %v1271_v31 }
  0xf3   :  { %573 = vst [vmem:[#allocation1 + $0x1] ss:$9 sm:$0xff] %v1275_v34  ;;  %v502_v31 = vadd.f32 %v980_v52, %v501_v4 }
  0xf4   :  { %574 = vst [vmem:[#allocation1 + $0x2] ss:$9 sm:$0xff] %v1279_v41 }
  0xf5   :  { %575 = vst [vmem:[#allocation1 + $0x3] ss:$9 sm:$0xff] %v1283_v2  ;;  %v1527_v41 = vsel %vm503_vm3, %v980_v52, %v502_v31 }
  0xf6   :  { %576 = vst [vmem:[#allocation1 + $0x4] ss:$9 sm:$0xff] %v1287_v55 }
  0xf7   :  { %577 = vst [vmem:[#allocation1 + $0x5] ss:$9 sm:$0xff] %v1291_v3 }
  0xf8   :  { %578 = vst [vmem:[#allocation1 + $0x6] ss:$9 sm:$0xff] %v1295_v9 }
  0xf9   :  { %579 = vst [vmem:[#allocation1 + $0x7] ss:$9 sm:$0xff] %v1305_v14 }
 0x100   :  { %v1497_v44 = vld [vmem:[#allocation1] sm:$0xff] }
 0x101   :  { %581 = vst [vmem:[#allocation1] ss:$9 sm:$0xff] %v1320_v24 }
 0x102   :  { %582 = vst [vmem:[#allocation1 + $0x1] ss:$9 sm:$0xff] %v1324_v10 }
 0x103   :  { %583 = vst [vmem:[#allocation1 + $0x2] ss:$9 sm:$0xff] %v1328_v5 }
 0x104   :  { %584 = vst [vmem:[#allocation1 + $0x3] ss:$9 sm:$0xff] %v1332_v12 }
 0x105   :  { %585 = vst [vmem:[#allocation1 + $0x4] ss:$9 sm:$0xff] %v1336_v6 }
 0x106   :  { %586 = vst [vmem:[#allocation1 + $0x5] ss:$9 sm:$0xff] %v1339_v15 }
 0x107   :  { %587 = vst [vmem:[#allocation1 + $0x6] ss:$9 sm:$0xff] %v1343_v16 }
 0x108   :  { %588 = vst [vmem:[#allocation1 + $0x7] ss:$9 sm:$0xff] %v1353_v18 }
 0x10f   :  { %v1507_v50 = vld [vmem:[#allocation1] sm:$0xff] }
 0x110   :  { %590 = vst [vmem:[#allocation1] ss:$9 sm:$0xff] %v1369_v19 }
 0x111   :  { %591 = vst [vmem:[#allocation1 + $0x1] ss:$9 sm:$0xff] %v1373_v20 }
 0x112   :  { %592 = vst [vmem:[#allocation1 + $0x2] ss:$9 sm:$0xff] %v1377_v23  ;;  %v482_v34 = vpop.xlane.xlu0 %481 }
 0x113   :  { %593 = vst [vmem:[#allocation1 + $0x3] ss:$9 sm:$0xff] %v1381_v56  ;;  %v505_v2 = vmul.f32 %v1527_v41, %v482_v34 }
 0x114   :  { %594 = vst [vmem:[#allocation1 + $0x4] ss:$9 sm:$0xff] %v1385_v25 }
 0x115   :  { %595 = vst [vmem:[#allocation1 + $0x5] ss:$9 sm:$0xff] %v1388_v26  ;;  %981 = vrsqrt.f32 %v505_v2  ;;  %vm630_vm4 = vcmp.eq.f32.partialorder %v505_v2, inf  ;;  %v633_v6 = vand.u32 2147483648, %v505_v2  ;;  %vm632_vm5 = vcmp.eq.f32.partialorder %v505_v2, 0.0 }
 0x116   :  { %596 = vst [vmem:[#allocation1 + $0x6] ss:$9 sm:$0xff] %v1392_v28 }
 0x117   :  { %597 = vst [vmem:[#allocation1 + $0x7] ss:$9 sm:$0xff] %v1402_v22 }
 0x11b   :  { %v982_v3 = vpop.eup %981 }
 0x11c   :  { %v624_v9 = vmul.f32 %v982_v3, %v505_v2 }
 0x11e   :  { %v1517_v53 = vld [vmem:[#allocation1] sm:$0xff]  ;;  %v625_v14 = vmul.f32 %v982_v3, %v624_v9 }
 0x11f   :  { %599 = vst [vmem:[#allocation1] ss:$9 sm:$0xff] %v1418_v29 }
 0x120   :  { %600 = vst [vmem:[#allocation1 + $0x1] ss:$9 sm:$0xff] %v1422_v30  ;;  %v626_v24 = vmul.f32 0.5, %v625_v14 }
 0x121   :  { %601 = vst [vmem:[#allocation1 + $0x2] ss:$9 sm:$0xff] %v1426_v33  ;;  %v485_v15 = vpop.xlane.xlu1 %484  ;;  %v1542_v33 = vld [vmem:[%s1734_s1] ss:$0 sm:$0xff] }
 0x122   :  { %602 = vst [vmem:[#allocation1 + $0x3] ss:$9 sm:$0xff] %v1430_v57  ;;  %v627_v10 = vsub.f32 1.5, %v626_v24  ;;  %v506_v18 = vmul.f32 %v1527_v41, %v485_v15  ;;  %v617_v46 = vmul.f32 %v1542_v33, %v1487_v49 }
 0x123   :  { %603 = vst [vmem:[#allocation1 + $0x4] ss:$9 sm:$0xff] %v1434_v35 }
 0x124   :  { %604 = vst [vmem:[#allocation1 + $0x5] ss:$9 sm:$0xff] %v1437_v36  ;;  %v628_v5 = vmul.f32 %v982_v3, %v627_v10  ;;  %983 = vrsqrt.f32 %v506_v18  ;;  %vm642_vm10 = vcmp.eq.f32.partialorder %v506_v18, inf  ;;  %v645_v58 = vand.u32 2147483648, %v506_v18 }
 0x125   :  { %605 = vst [vmem:[#allocation1 + $0x6] ss:$9 sm:$0xff] %v1441_v38  ;;  %vm644_vm11 = vcmp.eq.f32.partialorder %v506_v18, 0.0 }
 0x126   :  { %606 = vst [vmem:[#allocation1 + $0x7] ss:$9 sm:$0xff] %v1451_v32  ;;  %v629_v12 = vmul.f32 %v628_v5, %v505_v2 }
 0x128   :  { %v631_v16 = vsel %vm630_vm4, %v505_v2, %v629_v12 }
 0x129   :  { %v634_v19 = vsel %vm632_vm5, %v633_v6, %v631_v16 }
 0x12a   :  { %v695_v20 = vadd.f32 1e-06, %v634_v19  ;;  %v984_v56 = vpop.eup %983 }
 0x12b   :  { %v636_v26 = vmul.f32 %v984_v56, %v506_v18 }
 0x12c   :  { %985 = vrcp.f32 %v695_v20  ;;  %v710_v57 = vand.u32 2147483647, %v695_v20  ;;  %v712_v35 = vand.u32 2147483648, %v695_v20  ;;  %vm706_vm7 = vweird.f32 %v695_v20 }
 0x12d   :  { %v1530_v55 = vld [vmem:[#allocation1] sm:$0xff]  ;;  %v637_v21 = vmul.f32 %v984_v56, %v636_v26 }
 0x12e   :  { %608 = vst [vmem:[#allocation1] ss:$9 sm:$0xff] %v1466_v59  ;;  %vm711_vm9 = vcmp.eq.f32.partialorder %v710_v57, 8.507059e+37  ;;  %v713_v8 = vor.u32 1.1754944e-38, %v712_v35 }
 0x12f   :  { %609 = vst [vmem:[#allocation1 + $0x1] ss:$9 sm:$0xff] %v1470_v60  ;;  %v638_v30 = vmul.f32 0.5, %v637_v21 }
 0x130   :  { %v488_v23 = vpop.xlane.xlu2 %487 }
 0x131   :  { %v1536_v25 = vmul.f32 %v1527_v41, %v488_v23  ;;  %v639_v38 = vsub.f32 1.5, %v638_v30 }
 0x132   :  { %v986_v28 = vpop.eup %985 }
 0x133   :  { %987 = vrsqrt.f32 %v1536_v25  ;;  %v702_v22 = vmul.f32 %v986_v28, %v695_v20  ;;  %vm707_vm6 = vweird.f32 %v986_v28  ;;  %v640_v32 = vmul.f32 %v984_v56, %v639_v38 }
 0x134   :  { %vm708_vm8 = vmor %vm706_vm7, %vm707_vm6  ;;  %vm654_vm12 = vcmp.eq.f32.partialorder %v1536_v25, inf  ;;  %v657_v24 = vand.u32 2147483648, %v1536_v25  ;;  %vm656_vm13 = vcmp.eq.f32.partialorder %v1536_v25, 0.0 }
 0x135   :  { %v703_v29 = vsub.f32 1.0, %v702_v22  ;;  %v641_v17 = vmul.f32 %v640_v32, %v506_v18 }
 0x136   :  { %v1561_v42 = vld [vmem:[#allocation1] sm:$0xff] }
 0x137   :  { %v704_v36 = vmul.f32 %v986_v28, %v703_v29  ;;  %v643_v60 = vsel %vm642_vm10, %v506_v18, %v641_v17  ;;  %v618_v29 = vmul.f32 %v1542_v33, %v1497_v44 }
 0x138   :  { %v646_v62 = vsel %vm644_vm11, %v645_v58, %v643_v60 }
 0x139   :  { %v988_v40 = vpop.eup %987  ;;  %v705_v0 = vadd.f32 %v986_v28, %v704_v36  ;;  %v1559_v11 = vadd.f32 1e-06, %v646_v62 }
 0x13a   :  { %v648_v45 = vmul.f32 %v988_v40, %v1536_v25 }
 0x13b   :  { %v709_v37 = vsel %vm708_vm8, %v986_v28, %v705_v0  ;;  %vm721_vm15 = vweird.f32 %v1559_v11 }
 0x13c   :  { %v649_v47 = vmul.f32 %v988_v40, %v648_v45  ;;  %v714_v7 = vsel %vm711_vm9, %v713_v8, %v709_v37 }
 0x13d   :  { %v715_v59 = vmul.f32 %v714_v7, %v617_v46 }
 0x13e   :  { %v650_v61 = vmul.f32 0.5, %v649_v47 }
 0x13f   :  { %v491_v39 = vpop.xlane.xlu0 %490  ;;  %v1557_v63 = vadd.f32 %v1553_v27, %v715_v59 }
 0x140   :  { %v1545_v43 = vmul.f32 %v1527_v41, %v491_v39  ;;  %v651_v13 = vsub.f32 1.5, %v650_v61 }
 0x141   :  { %v806_v52 = vrot.slane %v1557_v63, 1  ;;  %v807_v54 = vrot.slane %v1557_v63, 2  ;;  %v808_v1 = vrot.slane %v1557_v63, 3  ;;  %842 = vst [vmem:[#allocation1] ss:$9 sm:$0xff] %v1557_v63  ;;  %v809_v4 = vrot.slane %v1557_v63, 4 }
 0x142   :  { %989 = vrsqrt.f32 %v1545_v43  ;;  %v810_v31 = vrot.slane %v1557_v63, 5  ;;  %v652_v34 = vmul.f32 %v988_v40, %v651_v13  ;;  %v811_v2 = vrot.slane %v1557_v63, 6 }
 0x143   :  { %991 = vrcp.f32 %v1559_v11  ;;  %844 = vst [vmem:[#allocation1 + $0x1] ss:$9 sm:$0xff] %v806_v52  ;;  %v812_v9 = vrot.slane %v1557_v63, 7  ;;  %vm666_vm1 = vcmp.eq.f32.partialorder %v1545_v43, inf  ;;  %v669_v36 = vand.u32 2147483648, %v1545_v43 }
 0x144   :  { %846 = vst [vmem:[#allocation1 + $0x2] ss:$9 sm:$0xff] %v807_v54  ;;  %v653_v14 = vmul.f32 %v652_v34, %v1536_v25  ;;  %vm668_vm3 = vcmp.eq.f32.partialorder %v1545_v43, 0.0  ;;  %v619_v13 = vmul.f32 %v1542_v33, %v1507_v50 }
 0x145   :  { %848 = vst [vmem:[#allocation1 + $0x3] ss:$9 sm:$0xff] %v808_v1 }
 0x146   :  { %850 = vst [vmem:[#allocation1 + $0x4] ss:$9 sm:$0xff] %v809_v4  ;;  %v655_v5 = vsel %vm654_vm12, %v1536_v25, %v653_v14  ;;  %v727_v25 = vand.u32 2147483648, %v1559_v11 }
 0x147   :  { %852 = vst [vmem:[#allocation1 + $0x5] ss:$9 sm:$0xff] %v810_v31  ;;  %v658_v15 = vsel %vm656_vm13, %v657_v24, %v655_v5 }
 0x148   :  { %v990_v51 = vpop.eup %989  ;;  %854 = vst [vmem:[#allocation1 + $0x6] ss:$9 sm:$0xff] %v811_v2  ;;  %v1586_v20 = vadd.f32 1e-06, %v658_v15  ;;  %v728_v40 = vor.u32 1.1754944e-38, %v727_v25 }
 0x149   :  { %v660_v3 = vmul.f32 %v990_v51, %v1545_v43  ;;  %v992_v6 = vpop.eup %991  ;;  %856 = vst [vmem:[#allocation1 + $0x7] ss:$9 sm:$0xff] %v812_v9 }
 0x14a   :  { %v717_v19 = vmul.f32 %v992_v6, %v1559_v11  ;;  %vm722_vm14 = vweird.f32 %v992_v6  ;;  %v742_v61 = vand.u32 2147483648, %v1586_v20  ;;  %vm736_vm7 = vweird.f32 %v1586_v20 }
 0x14b   :  { %v661_v10 = vmul.f32 %v990_v51, %v660_v3  ;;  %vm723_vm2 = vmor %vm721_vm15, %vm722_vm14 }
 0x14c   :  { %v718_v26 = vsub.f32 1.0, %v717_v19  ;;  %v743_v50 = vor.u32 1.1754944e-38, %v742_v61  ;;  %v916_v19 = vld [vmem:[%s1736_s3 + $0x30] sm:$0xff] }
 0x14d   :  { %v662_v16 = vmul.f32 0.5, %v661_v10 }
 0x14e   :  { %v494_v48 = vpop.xlane.xlu1 %493  ;;  %v719_v21 = vmul.f32 %v992_v6, %v718_v26 }
 0x14f   :  { %v1564_v49 = vmul.f32 %v1527_v41, %v494_v48  ;;  %v663_v56 = vsub.f32 1.5, %v662_v16  ;;  %v917_v16 = vld [vmem:[%s1736_s3 + $0x38] sm:$0xff] }
 0x150   :  { %v720_v35 = vadd.f32 %v992_v6, %v719_v21  ;;  %v857_v39 = vld [vmem:[#allocation1] sm:$0xff]  ;;  %936 = vmatpush.msra.mxu0 %v917_v16 }
 0x151   :  { %993 = vrsqrt.f32 %v1564_v49  ;;  %v664_v28 = vmul.f32 %v990_v51, %v663_v56  ;;  %903 = vst.msk [vmem:[%s1738_s5] sm:$0xff] %vm170_vm0, %v857_v39  ;;  %v740_v51 = vand.u32 2147483647, %v1586_v20  ;;  %vm678_vm6 = vcmp.eq.f32.partialorder %v1564_v49, inf  ;;  %v912_v39 = vld [vmem:[%s1736_s3 + $0x10] sm:$0xff] }
 0x152   :  { %v724_v45 = vsel %vm723_vm2, %v992_v6, %v720_v35  ;;  %vm680_vm8 = vcmp.eq.f32.partialorder %v1564_v49, 0.0  ;;  %v681_v10 = vand.u32 2147483648, %v1564_v49  ;;  %937 = vmatpush.msra.mxu0 %v916_v19 }
 0x153   :  { %v665_v30 = vmul.f32 %v664_v28, %v1545_v43  ;;  %vm741_vm10 = vcmp.eq.f32.partialorder %v740_v51, 8.507059e+37  ;;  %v915_v28 = vld [vmem:[%s1736_s3 + $0x28] sm:$0xff] }
 0x154   :  { %938 = vmatpush.msra.mxu0 %v915_v28 }
 0x155   :  { %v667_v0 = vsel %vm666_vm1, %v1545_v43, %v665_v30  ;;  %v913_v30 = vld [vmem:[%s1736_s3 + $0x18] sm:$0xff] }
 0x156   :  { %v670_v46 = vsel %vm668_vm3, %v669_v36, %v667_v0 }
 0x157   :  { %v497_v12 = vpop.xlane.xlu2 %496  ;;  %v994_v23 = vpop.eup %993  ;;  %v1607_v47 = vadd.f32 1e-06, %v670_v46 }
 0x158   :  { %v1583_v18 = vmul.f32 %v1527_v41, %v497_v12  ;;  %v672_v22 = vmul.f32 %v994_v23, %v1564_v49  ;;  %v725_v41 = vand.u32 2147483647, %v1559_v11 }
 0x159   :  { %v757_v36 = vand.u32 2147483648, %v1607_v47  ;;  %vm751_vm14 = vweird.f32 %v1607_v47 }
 0x15a   :  { %995 = vrsqrt.f32 %v1583_v18  ;;  %v673_v57 = vmul.f32 %v994_v23, %v672_v22  ;;  %vm726_vm4 = vcmp.eq.f32.partialorder %v725_v41, 8.507059e+37  ;;  %vm690_vm11 = vcmp.eq.f32.partialorder %v1583_v18, inf }
 0x15b   :  { %997 = vrcp.f32 %v1586_v20  ;;  %v729_v37 = vsel %vm726_vm4, %v728_v40, %v724_v45  ;;  %vm692_vm13 = vcmp.eq.f32.partialorder %v1583_v18, 0.0  ;;  %v755_v40 = vand.u32 2147483647, %v1607_v47  ;;  %v911_v45 = vld [vmem:[%s1736_s3 + $0x8] sm:$0xff] }
 0x15c   :  { %v674_v32 = vmul.f32 0.5, %v673_v57  ;;  %v730_v7 = vmul.f32 %v729_v37, %v618_v29  ;;  %999 = vrcp.f32 %v1607_v47  ;;  %v693_v29 = vand.u32 2147483648, %v1583_v18 }
 0x15d   :  { %vm756_vm1 = vcmp.eq.f32.partialorder %v755_v40, 8.507059e+37 }
 0x15e   :  { %v675_v58 = vsub.f32 1.5, %v674_v32  ;;  %v795_v60 = vadd.f32 %v1553_v27, %v730_v7  ;;  %v758_v7 = vor.u32 1.1754944e-38, %v757_v36 }
 0x160   :  { %v996_v38 = vpop.eup %995  ;;  %v676_v62 = vmul.f32 %v994_v23, %v675_v58  ;;  %v813_v52 = vrot.slane %v795_v60, 1  ;;  %v814_v54 = vrot.slane %v795_v60, 2  ;;  %v815_v1 = vrot.slane %v795_v60, 3  ;;  %858 = vst [vmem:[#allocation1] ss:$9 sm:$0xff] %v795_v60  ;;  %v910_v58 = vld [vmem:[%s1736_s3] sm:$0xff] }
 0x161   :  { %v998_v44 = vpop.eup %997  ;;  %v684_v8 = vmul.f32 %v996_v38, %v1583_v18  ;;  %v816_v4 = vrot.slane %v795_v60, 4  ;;  %v817_v34 = vrot.slane %v795_v60, 5  ;;  %v818_v14 = vrot.slane %v795_v60, 6 }
 0x162   :  { %v732_v17 = vmul.f32 %v998_v44, %v1586_v20  ;;  %vm737_vm5 = vweird.f32 %v998_v44  ;;  %859 = vst [vmem:[#allocation1 + $0x1] ss:$9 sm:$0xff] %v813_v52  ;;  %v677_v2 = vmul.f32 %v676_v62, %v1564_v49  ;;  %v1619_v9 = vpop.eup %999  ;;  %v819_v5 = vrot.slane %v795_v60, 7 }
 0x163   :  { %v685_v43 = vmul.f32 %v996_v38, %v684_v8  ;;  %vm738_vm9 = vmor %vm736_vm7, %vm737_vm5  ;;  %860 = vst [vmem:[#allocation1 + $0x2] ss:$9 sm:$0xff] %v814_v54  ;;  %v747_v6 = vmul.f32 %v1619_v9, %v1607_v47  ;;  %vm752_vm12 = vweird.f32 %v1619_v9  ;;  %v620_v62 = vmul.f32 %v1542_v33, %v1517_v53 }
 0x164   :  { %v733_v59 = vsub.f32 1.0, %v732_v17  ;;  %861 = vst [vmem:[#allocation1 + $0x3] ss:$9 sm:$0xff] %v815_v1  ;;  %v679_v15 = vsel %vm678_vm6, %v1564_v49, %v677_v2  ;;  %v914_v49 = vld [vmem:[%s1736_s3 + $0x20] sm:$0xff]  ;;  %vm1667_vm15 = vmor %vm751_vm14, %vm752_vm12 }
 0x165   :  { %v686_v11 = vmul.f32 0.5, %v685_v43  ;;  %862 = vst [vmem:[#allocation1 + $0x4] ss:$9 sm:$0xff] %v816_v4  ;;  %v682_v20 = vsel %vm680_vm8, %v681_v10, %v679_v15  ;;  %v748_v26 = vsub.f32 1.0, %v747_v6  ;;  %939 = vmatpush.msra.mxu0 %v914_v49  ;;  %v621_v4 = vmul.f32 %v1542_v33, %v1530_v55 }
 0x166   :  { %v734_v48 = vmul.f32 %v998_v44, %v733_v59  ;;  %863 = vst [vmem:[#allocation1 + $0x5] ss:$9 sm:$0xff] %v817_v34  ;;  %v1635_v25 = vadd.f32 1e-06, %v682_v20  ;;  %v622_v20 = vmul.f32 %v1542_v33, %v1561_v42 }
 0x167   :  { %v687_v3 = vsub.f32 1.5, %v686_v11  ;;  %864 = vst [vmem:[#allocation1 + $0x6] ss:$9 sm:$0xff] %v818_v14  ;;  %v749_v21 = vmul.f32 %v1619_v9, %v748_v26  ;;  %940 = vmatpush.msra.mxu0 %v913_v30 }
 0x168   :  { %v735_v31 = vadd.f32 %v998_v44, %v734_v48  ;;  %865 = vst [vmem:[#allocation1 + $0x7] ss:$9 sm:$0xff] %v819_v5  ;;  %1001 = vrcp.f32 %v1635_v25  ;;  %v772_v61 = vand.u32 2147483648, %v1635_v25  ;;  %vm766_vm3 = vweird.f32 %v1635_v25 }
 0x169   :  { %v688_v23 = vmul.f32 %v996_v38, %v687_v3  ;;  %v750_v57 = vadd.f32 %v1619_v9, %v749_v21  ;;  %941 = vmatpush.msra.mxu0 %v912_v39 }
 0x16a   :  { %v739_v24 = vsel %vm738_vm9, %v998_v44, %v735_v31  ;;  %v773_v54 = vor.u32 1.1754944e-38, %v772_v61 }
 0x16b   :  { %v744_v12 = vsel %vm741_vm10, %v743_v50, %v739_v24  ;;  %v689_v22 = vmul.f32 %v688_v23, %v1583_v18  ;;  %v754_v37 = vsel %vm1667_vm15, %v1619_v9, %v750_v57  ;;  %942 = vmatpush.msra.mxu0 %v911_v45  ;;  %vm905_vm10 = vcmask 520192  }
 0x16c   :  { %v745_v56 = vmul.f32 %v744_v12, %v619_v13  ;;  %v759_v60 = vsel %vm756_vm1, %v758_v7, %v754_v37  ;;  %v770_v13 = vand.u32 2147483647, %v1635_v25 }
 0x16d   :  { %v691_v35 = vsel %vm690_vm11, %v1583_v18, %v689_v22  ;;  %943 = vmatpush.msra.mxu0 %v910_v58  ;;  %v760_v51 = vmul.f32 %v759_v60, %v620_v62  ;;  %vm948_vm11 = vcmask 123904  }
 0x16e   :  { %v1647_v41 = vadd.f32 %v1553_v27, %v745_v56  ;;  %v694_v38 = vsel %vm692_vm13, %v693_v29, %v691_v35  ;;  %v1002_v32 = vpop.eup %1001  ;;  %vm771_vm5 = vcmp.eq.f32.partialorder %v770_v13, 8.507059e+37 }
 0x16f   :  { %v1664_v0 = vadd.f32 1e-06, %v694_v38  ;;  %v866_v46 = vld [vmem:[#allocation1] sm:$0xff]  ;;  %v762_v17 = vmul.f32 %v1002_v32, %v1635_v25  ;;  %vm767_vm2 = vweird.f32 %v1002_v32  ;;  %v797_v50 = vadd.f32 %v1553_v27, %v760_v51 }
 0x170   :  { %v820_v44 = vrot.slane %v1647_v41, 1  ;;  %v821_v8 = vrot.slane %v1647_v41, 2  ;;  %904 = vst.msk [vmem:[%s1738_s5 + $0x8] sm:$0xff] %vm170_vm0, %v866_v46  ;;  %v822_v47 = vrot.slane %v1647_v41, 3  ;;  %v823_v43 = vrot.slane %v1647_v41, 4  ;;  %vm768_vm4 = vmor %vm766_vm3, %vm767_vm2 }
 0x171   :  { %1003 = vrcp.f32 %v1664_v0  ;;  %867 = vst [vmem:[#allocation1] ss:$9 sm:$0xff] %v1647_v41  ;;  %v763_v59 = vsub.f32 1.0, %v762_v17  ;;  %v787_v3 = vand.u32 2147483648, %v1664_v0  ;;  %v785_v14 = vand.u32 2147483647, %v1664_v0 }
 0x172   :  { %868 = vst [vmem:[#allocation1 + $0x1] ss:$9 sm:$0xff] %v820_v44  ;;  %v824_v24 = vrot.slane %v1647_v41, 5  ;;  %v825_v5 = vrot.slane %v1647_v41, 6  ;;  %vm781_vm7 = vweird.f32 %v1664_v0  ;;  %v826_v6 = vrot.slane %v1647_v41, 7 }
 0x173   :  { %869 = vst [vmem:[#allocation1 + $0x2] ss:$9 sm:$0xff] %v821_v8  ;;  %v764_v11 = vmul.f32 %v1002_v32, %v763_v59  ;;  %v827_v15 = vrot.slane %v797_v50, 1  ;;  %v788_v16 = vor.u32 1.1754944e-38, %v787_v3  ;;  %v828_v19 = vrot.slane %v797_v50, 2 }
 0x174   :  { %870 = vst [vmem:[#allocation1 + $0x3] ss:$9 sm:$0xff] %v822_v47  ;;  %vm786_vm9 = vcmp.eq.f32.partialorder %v785_v14, 8.507059e+37  ;;  %v829_v56 = vrot.slane %v797_v50, 3  ;;  %v830_v25 = vrot.slane %v797_v50, 4  ;;  %v831_v33 = vrot.slane %v797_v50, 5 }
 0x175   :  { %871 = vst [vmem:[#allocation1 + $0x4] ss:$9 sm:$0xff] %v823_v43  ;;  %v765_v52 = vadd.f32 %v1002_v32, %v764_v11  ;;  %v832_v42 = vrot.slane %v797_v50, 6  ;;  %v833_v49 = vrot.slane %v797_v50, 7 }
 0x177   :  { %v1004_v48 = vpop.eup %1003  ;;  %v769_v53 = vsel %vm768_vm4, %v1002_v32, %v765_v52  ;;  %v976_v32 = vld [vmem:[%s1737_s4] ss:$0 sm:$0xff] }
 0x178   :  { %v777_v1 = vmul.f32 %v1004_v48, %v1664_v0  ;;  %v774_v31 = vsel %vm771_vm5, %v773_v54, %v769_v53  ;;  %vm782_vm6 = vweird.f32 %v1004_v48 }
 0x179   :  { %v775_v2 = vmul.f32 %v774_v31, %v621_v4  ;;  %vm783_vm8 = vmor %vm781_vm7, %vm782_vm6 }
 0x17a   :  { %v778_v34 = vsub.f32 1.0, %v777_v1 }
 0x17b   :  { %v798_v10 = vadd.f32 %v1553_v27, %v775_v2 }
 0x17c   :  { %v779_v9 = vmul.f32 %v1004_v48, %v778_v34  ;;  %v872_v12 = vld [vmem:[#allocation1] sm:$0xff] }
 0x17d   :  { %873 = vst [vmem:[#allocation1] ss:$9 sm:$0xff] %v824_v24  ;;  %v834_v41 = vrot.slane %v798_v10, 1  ;;  %v835_v29 = vrot.slane %v798_v10, 2  ;;  %v836_v30 = vrot.slane %v798_v10, 3  ;;  %v838_v57 = vrot.slane %v798_v10, 5 }
 0x17e   :  { %v780_v55 = vadd.f32 %v1004_v48, %v779_v9  ;;  %874 = vst [vmem:[#allocation1 + $0x1] ss:$9 sm:$0xff] %v825_v5  ;;  %v839_v35 = vrot.slane %v798_v10, 6  ;;  %v840_v38 = vrot.slane %v798_v10, 7 }
 0x17f   :  { %875 = vst [vmem:[#allocation1 + $0x2] ss:$9 sm:$0xff] %v826_v6 }
 0x180   :  { %v784_v23 = vsel %vm783_vm8, %v1004_v48, %v780_v55  ;;  %876 = vst [vmem:[#allocation1 + $0x3] ss:$9 sm:$0xff] %v797_v50 }
 0x181   :  { %v789_v26 = vsel %vm786_vm9, %v788_v16, %v784_v23  ;;  %877 = vst [vmem:[#allocation1 + $0x4] ss:$9 sm:$0xff] %v827_v15 }
 0x182   :  { %v790_v28 = vmul.f32 %v789_v26, %v622_v20  ;;  %878 = vst [vmem:[#allocation1 + $0x5] ss:$9 sm:$0xff] %v828_v19 }
 0x183   :  { %879 = vst [vmem:[#allocation1 + $0x6] ss:$9 sm:$0xff] %v829_v56 }
 0x184   :  { %v799_v22 = vadd.f32 %v1553_v27, %v790_v28  ;;  %880 = vst [vmem:[#allocation1 + $0x7] ss:$9 sm:$0xff] %v830_v25  ;;  %v837_v27 = vrot.slane %v798_v10, 4 }
 0x185   :  { %906 = vst.msk [vmem:[%s1738_s5 + $0x10] sm:$0x1f] %vm905_vm10, %v872_v12 }
 0x186   :  { %v841_v39 = vrot.slane %v799_v22, 1 }
 0x18b   :  { %v881_v21 = vld [vmem:[#allocation1] sm:$0xff] }
 0x18c   :  { %882 = vst [vmem:[#allocation1] ss:$9 sm:$0xff] %v831_v33 }
 0x18d   :  { %883 = vst [vmem:[#allocation1 + $0x1] ss:$9 sm:$0xff] %v832_v42 }
 0x18e   :  { %884 = vst [vmem:[#allocation1 + $0x2] ss:$9 sm:$0xff] %v833_v49 }
 0x18f   :  { %885 = vst [vmem:[#allocation1 + $0x3] ss:$9 sm:$0xff] %v798_v10 }
 0x190   :  { %886 = vst [vmem:[#allocation1 + $0x4] ss:$9 sm:$0xff] %v834_v41 }
 0x191   :  { %887 = vst [vmem:[#allocation1 + $0x5] ss:$9 sm:$0xff] %v835_v29 }
 0x192   :  { %888 = vst [vmem:[#allocation1 + $0x6] ss:$9 sm:$0xff] %v836_v30 }
 0x193   :  { %889 = vst [vmem:[#allocation1 + $0x7] ss:$9 sm:$0xff] %v837_v27 }
 0x194   :  { %907 = vst.msk [vmem:[%s1738_s5 + $0x18] sm:$0xff] %vm170_vm0, %v881_v21 }
 0x19a   :  { %v890_v36 = vld [vmem:[#allocation1] sm:$0xff] }
 0x19b   :  { %891 = vst [vmem:[#allocation1] ss:$9 sm:$0xff] %v838_v57 }
 0x19c   :  { %892 = vst [vmem:[#allocation1 + $0x1] ss:$9 sm:$0xff] %v839_v35 }
 0x19d   :  { %893 = vst [vmem:[#allocation1 + $0x2] ss:$9 sm:$0xff] %v840_v38 }
 0x19e   :  { %894 = vst [vmem:[#allocation1 + $0x3] ss:$9 sm:$0xff] %v799_v22 }
 0x19f   :  { %895 = vst [vmem:[#allocation1 + $0x4] ss:$9 sm:$0xff] %v841_v39 }
 0x1a0   :  { %908 = vst.msk [vmem:[%s1738_s5 + $0x20] sm:$0xff] %vm170_vm0, %v890_v36 }
 0x1a6   :  { %v896_v40 = vld [vmem:[#allocation1] sm:$0xff] }
 0x1a7   :  { %909 = vst.msk [vmem:[%s1738_s5 + $0x28] sm:$0x1f] %vm905_vm10, %v896_v40 }
 0x1a8   :  { %922 = vst [vmem:[#allocation1] ss:$9 sm:$0xff] %v1557_v63 }
 0x1a9   :  { %924 = vst [vmem:[#allocation1 + $0x1] ss:$9 sm:$0xff] %v824_v24 }
 0x1b0   :  { %v925_v0 = vld [vmem:[#allocation1] sm:$0xff] }
 0x1b1   :  { %970 = vmatmul.msk.f32.vlgmr.msra.gmra.mxu0 %vm170_vm0, %v925_v0 }
 0x22e   :  { %v945_v44 = vpop.f32.mrf.mxu0 }
 0x22f   :  { %v946_v18 = vadd.f32 %v976_v32, %v945_v44 }
 0x231   :  { %949 = vst.msk [vmem:[#allocation2] sm:$0x3] %vm948_vm11, %v946_v18 }
 0x232   :  { %962 = dma.vmem_to_hbm [thread:$0]  %s958_s13, 32, %s960_s16, [#allocation3]  }
 0x233   :  { %1029 = dma.done.wait [#allocation3], 32  }
 0x234   :  { %1030 = vsyncadd [#allocation3], 4294967264 }
 0x235   :  { %969 = vsyncpa [#allocation3], 1 }

// kernel: encoder_y_forward.5
= control target key start
LH: loop header
LB: loop body
LE: loop exit
PB: predicated region body
PF: predicated region fallthrough
CT: control target
= control target key end

     0   :  { %s3489_s27 = smov 0   ;;  %s5186_s0 = inlined_call_operand.vmem [shape: f32[40,256,27], index: 0, kind: input, shape index: {}]   ;;  %s5187_s1 = inlined_call_operand.vmem [shape: f32[40,3], index: 1, kind: input, shape index: {}]   ;;  %s5188_s2 = inlined_call_operand.vmem [shape: f32[27,8], index: 2, kind: input, shape index: {}]   ;;  %s5189_s3 = inlined_call_operand.vmem [shape: f32[1,8], index: 3, kind: input, shape index: {}]   ;;  %s5190_s4 = inlined_call_operand.vmem [shape: f32[11,16], index: 4, kind: input, shape index: {}]   ;;  %s5191_s5 = inlined_call_operand.vmem [shape: f32[1,16], index: 5, kind: input, shape index: {}]   ;;  %s5192_s6 = inlined_call_operand.vmem [shape: f32[16,8], index: 6, kind: input, shape index: {}]   ;;  %s5193_s7 = inlined_call_operand.vmem [shape: f32[1,8], index: 7, kind: input, shape index: {}]   ;;  %s5194_s8 = inlined_call_operand.vmem [shape: f32[40,8], index: 8, kind: output, shape index: {}]  }
   0x1 LB: > { %s3495_s28 = sadd.s32 4294967295, %s3440_s27   ;;  %p3135_p0 = scmp.ge.s32.totalorder %s3440_s27, 1  ;;  %s3440_s27 = sphi %s3489_s27, %s18_s27  }
   0x2   : > { %p273_p1 = scmp.lt.s32.totalorder %s3440_s27, 6 }
   0x4   : > { %p274_p2 = pnand %p3135_p0, %p273_p1 }
   0x6   : > { %277 = sbr.rel (%p274_p2) target bundleno = 1011 (0x3f3), region = 52 }
   0xb   : > { %v585_v0 = vld [vmem:[%s5188_s2 + $0x18] sm:$0x7]  ;;  %vm1359_vm0 = vcmask 1042432   ;;  %v584_v1 = vld [vmem:[%s5188_s2 + $0x10] sm:$0xff]  ;;  %s3136_s11 = sshll.u32 %s3495_s28, 3  ;;  %v583_v2 = vld [vmem:[%s5188_s2 + $0x8] sm:$0xff] }
   0xc   : > { %3141 = vmatpush.msk.msra.mxu0 %vm1359_vm0, %v585_v0  ;;  %3404 = vmatpush.msk.msra.mxu1 %vm1359_vm0, %v585_v0  ;;  %p312_p3 = scmp.lt.s32.totalorder %s3136_s11, 39  ;;  %v582_v3 = vld [vmem:[%s5188_s2] sm:$0xff]  ;;  %vm590_vm1 = vcmask 220160   ;;  %vm2404_vm2 = vcmask 64512   ;;  %p318_p4 = scmp.lt.s32.totalorder %s3495_s28, 4  ;;  %vm2981_vm4 = vcmask 1041409  }
   0xd   : > { %3405 = vmatpush.msk.msra.mxu2 %vm1359_vm0, %v585_v0  ;;  %3406 = vmatpush.msk.msra.mxu3 %vm1359_vm0, %v585_v0  ;;  %s3442_s18 = smov 8   ;;  %vm2983_vm5 = vcmask 1042434   ;;  %vm2985_vm6 = vcmask 1043459   ;;  %vm2987_vm7 = vcmask 1044484   ;;  %vm2989_vm8 = vcmask 1045509  }
   0xe   : > { %1376 = vmatpush.msra.mxu0 %v584_v1  ;;  %3407 = vmatpush.msra.mxu1 %v584_v1  ;;  %s5350_s11 = smov (!%p312_p3, %s3136_s11), 39  ;;  %s5352_s28 = smov (!%p318_p4, %s3495_s28), 4  ;;  %vm2991_vm9 = vcmask 1046534   ;;  %vm2993_vm10 = vcmask 1047559   ;;  %vm3007_vm11 = vcmask 89088   ;;  %vm3041_vm12 = vcmask 130048  }
   0xf   : > { %3408 = vmatpush.msra.mxu2 %v584_v1  ;;  %3409 = vmatpush.msra.mxu3 %v584_v1  ;;  %s3403_s16 = sshll.u32 %s5350_s11, 8  ;;  %s3139_s12 = sshll.u32 %s5352_s28, 3 }
  0x10   : > { %1377 = vmatpush.msra.mxu0 %v583_v2  ;;  %3410 = vmatpush.msra.mxu1 %v583_v2  ;;  %s3519_s19 = scalar_lea.vmem %s5186_s0, %s3403_s16  ;;  %s321_s15 = scalar_lea.vmem %s5187_s1, %s3139_s12 }
  0x11   : > { %3411 = vmatpush.msra.mxu2 %v583_v2  ;;  %3412 = vmatpush.msra.mxu3 %v583_v2  ;;  %v326_v4 = vld [vmem:[%s3519_s19] sm:$0xff]  ;;  %v391_v5 = vld [vmem:[%s3519_s19 + $0x208] sm:$0xff]  ;;  %v517_v7 = vld [vmem:[%s3519_s19 + $0x5f8] sm:$0xff]  ;;  %s325_s29 = scalar_lea.vmem %s5194_s8, %s3139_s12 }
  0x12   : > { %1378 = vmatpush.msra.mxu0 %v582_v3  ;;  %3413 = vmatpush.msra.mxu1 %v582_v3  ;;  %v455_v6 = vld [vmem:[%s3519_s19 + $0x408] sm:$0xff]  ;;  %v392_v9 = vld [vmem:[%s3519_s19 + $0x210] sm:$0xff]  ;;  %v518_v11 = vld [vmem:[%s3519_s19 + $0x600] sm:$0xff] }
  0x13   : > { %3414 = vmatpush.msra.mxu2 %v582_v3  ;;  %3415 = vmatpush.msra.mxu3 %v582_v3  ;;  %v327_v8 = vld [vmem:[%s3519_s19 + $0x8] sm:$0xff]  ;;  %v456_v10 = vld [vmem:[%s3519_s19 + $0x410] sm:$0xff]  ;;  %v393_v13 = vld [vmem:[%s3519_s19 + $0x218] sm:$0xff] }
  0x14   : > { %3142 = vmatmul.msk.f32.vlgmr.msra.gmra.mxu0 %vm590_vm1, %v326_v4  ;;  %3207 = vmatmul.msk.f32.vlgmr.msra.gmra.mxu1 %vm590_vm1, %v391_v5  ;;  %v328_v12 = vld [vmem:[%s3519_s19 + $0x10] sm:$0xff]  ;;  %v457_v14 = vld [vmem:[%s3519_s19 + $0x418] sm:$0xff]  ;;  %v519_v15 = vld [vmem:[%s3519_s19 + $0x608] sm:$0xff] }
  0x15   : > { %3271 = vmatmul.msk.f32.vlgmr.msra.gmra.mxu2 %vm590_vm1, %v455_v6  ;;  %3333 = vmatmul.msk.f32.vlgmr.msra.gmra.mxu3 %vm590_vm1, %v517_v7  ;;  %v329_v16 = vld [vmem:[%s3519_s19 + $0x18] sm:$0xff]  ;;  %v394_v17 = vld [vmem:[%s3519_s19 + $0x220] sm:$0xff]  ;;  %v520_v19 = vld [vmem:[%s3519_s19 + $0x610] sm:$0xff] }
  0x16   : > { %v458_v18 = vld [vmem:[%s3519_s19 + $0x420] sm:$0xff]  ;;  %v395_v21 = vld [vmem:[%s3519_s19 + $0x228] sm:$0xff]  ;;  %v521_v23 = vld [vmem:[%s3519_s19 + $0x618] sm:$0xff] }
  0x17   : > { %v330_v20 = vld [vmem:[%s3519_s19 + $0x20] sm:$0xff]  ;;  %v459_v22 = vld [vmem:[%s3519_s19 + $0x428] sm:$0xff]  ;;  %v396_v25 = vld [vmem:[%s3519_s19 + $0x230] sm:$0xff] }
  0x18   : > { %v331_v24 = vld [vmem:[%s3519_s19 + $0x28] sm:$0xff]  ;;  %v460_v26 = vld [vmem:[%s3519_s19 + $0x430] sm:$0xff]  ;;  %v522_v27 = vld [vmem:[%s3519_s19 + $0x620] sm:$0xff] }
  0x19   : > { %v332_v28 = vld [vmem:[%s3519_s19 + $0x30] sm:$0xff]  ;;  %v397_v29 = vld [vmem:[%s3519_s19 + $0x238] sm:$0xff]  ;;  %v523_v31 = vld [vmem:[%s3519_s19 + $0x628] sm:$0xff] }
  0x1a   : > { %v461_v30 = vld [vmem:[%s3519_s19 + $0x438] sm:$0xff]  ;;  %v398_v33 = vld [vmem:[%s3519_s19 + $0x240] sm:$0xff]  ;;  %v524_v35 = vld [vmem:[%s3519_s19 + $0x630] sm:$0xff] }
  0x1b   : > { %v333_v32 = vld [vmem:[%s3519_s19 + $0x38] sm:$0xff]  ;;  %v462_v34 = vld [vmem:[%s3519_s19 + $0x440] sm:$0xff]  ;;  %v399_v37 = vld [vmem:[%s3519_s19 + $0x248] sm:$0xff] }
  0x1c   : > { %3143 = vmatmul.msk.f32.gmra.mxu0 %vm590_vm1, %v327_v8  ;;  %3208 = vmatmul.msk.f32.gmra.mxu1 %vm590_vm1, %v392_v9  ;;  %v334_v36 = vld [vmem:[%s3519_s19 + $0x40] sm:$0xff]  ;;  %v463_v38 = vld [vmem:[%s3519_s19 + $0x448] sm:$0xff]  ;;  %v525_v39 = vld [vmem:[%s3519_s19 + $0x638] sm:$0xff] }
  0x1d   : > { %3272 = vmatmul.msk.f32.gmra.mxu2 %vm590_vm1, %v456_v10  ;;  %3334 = vmatmul.msk.f32.gmra.mxu3 %vm590_vm1, %v518_v11  ;;  %v335_v40 = vld [vmem:[%s3519_s19 + $0x48] sm:$0xff]  ;;  %v400_v41 = vld [vmem:[%s3519_s19 + $0x250] sm:$0xff]  ;;  %v526_v43 = vld [vmem:[%s3519_s19 + $0x640] sm:$0xff] }
  0x1e   : > { %v464_v42 = vld [vmem:[%s3519_s19 + $0x450] sm:$0xff]  ;;  %v401_v45 = vld [vmem:[%s3519_s19 + $0x258] sm:$0xff]  ;;  %v527_v47 = vld [vmem:[%s3519_s19 + $0x648] sm:$0xff] }
  0x1f   : > { %v336_v44 = vld [vmem:[%s3519_s19 + $0x50] sm:$0xff]  ;;  %v465_v46 = vld [vmem:[%s3519_s19 + $0x458] sm:$0xff]  ;;  %v402_v49 = vld [vmem:[%s3519_s19 + $0x260] sm:$0xff] }
  0x20   : > { %v337_v48 = vld [vmem:[%s3519_s19 + $0x58] sm:$0xff]  ;;  %v466_v50 = vld [vmem:[%s3519_s19 + $0x460] sm:$0xff]  ;;  %v528_v51 = vld [vmem:[%s3519_s19 + $0x650] sm:$0xff] }
  0x21   : > { %v338_v52 = vld [vmem:[%s3519_s19 + $0x60] sm:$0xff]  ;;  %v403_v53 = vld [vmem:[%s3519_s19 + $0x268] sm:$0xff]  ;;  %v529_v55 = vld [vmem:[%s3519_s19 + $0x658] sm:$0xff] }
  0x22   : > { %v467_v54 = vld [vmem:[%s3519_s19 + $0x468] sm:$0xff]  ;;  %v404_v57 = vld [vmem:[%s3519_s19 + $0x270] sm:$0xff]  ;;  %v530_v59 = vld [vmem:[%s3519_s19 + $0x660] sm:$0xff] }
  0x23   : > { %v339_v56 = vld [vmem:[%s3519_s19 + $0x68] sm:$0xff]  ;;  %v468_v58 = vld [vmem:[%s3519_s19 + $0x470] sm:$0xff]  ;;  %v405_v61 = vld [vmem:[%s3519_s19 + $0x278] sm:$0xff] }
  0x24   : > { %3144 = vmatmul.msk.f32.gmra.mxu0 %vm590_vm1, %v328_v12  ;;  %3209 = vmatmul.msk.f32.gmra.mxu1 %vm590_vm1, %v393_v13  ;;  %v340_v60 = vld [vmem:[%s3519_s19 + $0x70] sm:$0xff]  ;;  %v469_v62 = vld [vmem:[%s3519_s19 + $0x478] sm:$0xff]  ;;  %v531_v63 = vld [vmem:[%s3519_s19 + $0x668] sm:$0xff] }
  0x25   : > { %3273 = vmatmul.msk.f32.gmra.mxu2 %vm590_vm1, %v457_v14  ;;  %3335 = vmatmul.msk.f32.gmra.mxu3 %vm590_vm1, %v519_v15  ;;  %v341_v0 = vld [vmem:[%s3519_s19 + $0x78] sm:$0xff]  ;;  %v406_v1 = vld [vmem:[%s3519_s19 + $0x280] sm:$0xff]  ;;  %v532_v3 = vld [vmem:[%s3519_s19 + $0x670] sm:$0xff] }
  0x26   : > { %v470_v2 = vld [vmem:[%s3519_s19 + $0x480] sm:$0xff]  ;;  %v407_v7 = vld [vmem:[%s3519_s19 + $0x288] sm:$0xff]  ;;  %v533_v9 = vld [vmem:[%s3519_s19 + $0x678] sm:$0xff] }
  0x27   : > { %v342_v6 = vld [vmem:[%s3519_s19 + $0x80] sm:$0xff]  ;;  %v471_v8 = vld [vmem:[%s3519_s19 + $0x488] sm:$0xff]  ;;  %v408_v15 = vld [vmem:[%s3519_s19 + $0x290] sm:$0xff] }
  0x28   : > { %v343_v14 = vld [vmem:[%s3519_s19 + $0x88] sm:$0xff] }
  0x2c   : > { %3145 = vmatmul.msk.f32.gmra.mxu0 %vm590_vm1, %v329_v16  ;;  %3210 = vmatmul.msk.f32.gmra.mxu1 %vm590_vm1, %v394_v17  ;;  %v472_v16 = vld [vmem:[%s3519_s19 + $0x490] sm:$0xff]  ;;  %v534_v17 = vld [vmem:[%s3519_s19 + $0x680] sm:$0xff] }
  0x2d   : > { %3274 = vmatmul.msk.f32.gmra.mxu2 %vm590_vm1, %v458_v18  ;;  %3336 = vmatmul.msk.f32.gmra.mxu3 %vm590_vm1, %v520_v19 }
  0x34   : > { %3146 = vmatmul.msk.f32.gmra.mxu0 %vm590_vm1, %v330_v20  ;;  %3211 = vmatmul.msk.f32.gmra.mxu1 %vm590_vm1, %v395_v21  ;;  %v3682_v20 = vld [vmem:[%s5189_s3] ss:$0 sm:$0xff] }
  0x35   : > { %3275 = vmatmul.msk.f32.gmra.mxu2 %vm590_vm1, %v459_v22  ;;  %3337 = vmatmul.msk.f32.gmra.mxu3 %vm590_vm1, %v521_v23  ;;  %v344_v23 = vld [vmem:[%s3519_s19 + $0x90] sm:$0xff] }
  0x3c   : > { %3147 = vmatmul.msk.f32.gmra.mxu0 %vm590_vm1, %v331_v24  ;;  %3212 = vmatmul.msk.f32.gmra.mxu1 %vm590_vm1, %v396_v25  ;;  %v409_v24 = vld [vmem:[%s3519_s19 + $0x298] sm:$0xff] }
  0x3d   : > { %3276 = vmatmul.msk.f32.gmra.mxu2 %vm590_vm1, %v460_v26  ;;  %3338 = vmatmul.msk.f32.gmra.mxu3 %vm590_vm1, %v522_v27  ;;  %v473_v25 = vld [vmem:[%s3519_s19 + $0x498] sm:$0xff]  ;;  %v535_v26 = vld [vmem:[%s3519_s19 + $0x688] sm:$0xff] }
  0x44   : > { %3148 = vmatmul.msk.f32.gmra.mxu0 %vm590_vm1, %v332_v28  ;;  %3213 = vmatmul.msk.f32.gmra.mxu1 %vm590_vm1, %v397_v29 }
  0x45   : > { %3277 = vmatmul.msk.f32.gmra.mxu2 %vm590_vm1, %v461_v30  ;;  %3339 = vmatmul.msk.f32.gmra.mxu3 %vm590_vm1, %v523_v31 }
  0x4c   : > { %3149 = vmatmul.msk.f32.gmra.mxu0 %vm590_vm1, %v333_v32  ;;  %3214 = vmatmul.msk.f32.gmra.mxu1 %vm590_vm1, %v398_v33 }
  0x4d   : > { %3278 = vmatmul.msk.f32.gmra.mxu2 %vm590_vm1, %v462_v34  ;;  %3340 = vmatmul.msk.f32.gmra.mxu3 %vm590_vm1, %v524_v35  ;;  %v345_v34 = vld [vmem:[%s3519_s19 + $0x98] sm:$0xff]  ;;  %v410_v35 = vld [vmem:[%s3519_s19 + $0x2a0] sm:$0xff] }
  0x54   : > { %3150 = vmatmul.msk.f32.gmra.mxu0 %vm590_vm1, %v334_v36  ;;  %3215 = vmatmul.msk.f32.gmra.mxu1 %vm590_vm1, %v399_v37  ;;  %v474_v36 = vld [vmem:[%s3519_s19 + $0x4a0] sm:$0xff]  ;;  %v536_v37 = vld [vmem:[%s3519_s19 + $0x690] sm:$0xff] }
  0x55   : > { %3279 = vmatmul.msk.f32.gmra.mxu2 %vm590_vm1, %v463_v38  ;;  %3341 = vmatmul.msk.f32.gmra.mxu3 %vm590_vm1, %v525_v39 }
  0x5c   : > { %3151 = vmatmul.msk.f32.gmra.mxu0 %vm590_vm1, %v335_v40  ;;  %3216 = vmatmul.msk.f32.gmra.mxu1 %vm590_vm1, %v400_v41 }
  0x5d   : > { %3280 = vmatmul.msk.f32.gmra.mxu2 %vm590_vm1, %v464_v42  ;;  %3342 = vmatmul.msk.f32.gmra.mxu3 %vm590_vm1, %v526_v43 }
  0x64   : > { %3152 = vmatmul.msk.f32.gmra.mxu0 %vm590_vm1, %v336_v44  ;;  %3217 = vmatmul.msk.f32.gmra.mxu1 %vm590_vm1, %v401_v45 }
  0x65   : > { %3281 = vmatmul.msk.f32.gmra.mxu2 %vm590_vm1, %v465_v46  ;;  %3343 = vmatmul.msk.f32.gmra.mxu3 %vm590_vm1, %v527_v47  ;;  %v346_v47 = vld [vmem:[%s3519_s19 + $0xa0] sm:$0xff] }
  0x6c   : > { %3153 = vmatmul.msk.f32.gmra.mxu0 %vm590_vm1, %v337_v48  ;;  %3218 = vmatmul.msk.f32.gmra.mxu1 %vm590_vm1, %v402_v49  ;;  %v411_v48 = vld [vmem:[%s3519_s19 + $0x2a8] sm:$0xff] }
  0x6d   : > { %3282 = vmatmul.msk.f32.gmra.mxu2 %vm590_vm1, %v466_v50  ;;  %3344 = vmatmul.msk.f32.gmra.mxu3 %vm590_vm1, %v528_v51  ;;  %v475_v49 = vld [vmem:[%s3519_s19 + $0x4a8] sm:$0xff]  ;;  %v537_v50 = vld [vmem:[%s3519_s19 + $0x698] sm:$0xff] }
  0x74   : > { %3154 = vmatmul.msk.f32.gmra.mxu0 %vm590_vm1, %v338_v52  ;;  %3219 = vmatmul.msk.f32.gmra.mxu1 %vm590_vm1, %v403_v53 }
  0x75   : > { %3283 = vmatmul.msk.f32.gmra.mxu2 %vm590_vm1, %v467_v54  ;;  %3345 = vmatmul.msk.f32.gmra.mxu3 %vm590_vm1, %v529_v55 }
  0x7c   : > { %3155 = vmatmul.msk.f32.gmra.mxu0 %vm590_vm1, %v339_v56  ;;  %3220 = vmatmul.msk.f32.gmra.mxu1 %vm590_vm1, %v404_v57 }
  0x7d   : > { %3284 = vmatmul.msk.f32.gmra.mxu2 %vm590_vm1, %v468_v58  ;;  %3346 = vmatmul.msk.f32.gmra.mxu3 %vm590_vm1, %v530_v59  ;;  %v347_v59 = vld [vmem:[%s3519_s19 + $0xa8] sm:$0xff] }
  0x84   : > { %3156 = vmatmul.msk.f32.gmra.mxu0 %vm590_vm1, %v340_v60  ;;  %3221 = vmatmul.msk.f32.gmra.mxu1 %vm590_vm1, %v405_v61  ;;  %v412_v60 = vld [vmem:[%s3519_s19 + $0x2b0] sm:$0xff] }
  0x85   : > { %3285 = vmatmul.msk.f32.gmra.mxu2 %vm590_vm1, %v469_v62  ;;  %3347 = vmatmul.msk.f32.gmra.mxu3 %vm590_vm1, %v531_v63  ;;  %v476_v61 = vld [vmem:[%s3519_s19 + $0x4b0] sm:$0xff]  ;;  %v538_v62 = vld [vmem:[%s3519_s19 + $0x6a0] sm:$0xff] }
  0x8c   : > { %3157 = vmatmul.msk.f32.gmra.mxu0 %vm590_vm1, %v341_v0  ;;  %3222 = vmatmul.msk.f32.gmra.mxu1 %vm590_vm1, %v406_v1 }
  0x8d   : > { %3286 = vmatmul.msk.f32.gmra.mxu2 %vm590_vm1, %v470_v2  ;;  %3348 = vmatmul.msk.f32.gmra.mxu3 %vm590_vm1, %v532_v3 }
  0x91   : > { %v3649_v4 = vpop.f32.mrf.mxu0  ;;  %v3651_v5 = vpop.f32.mrf.mxu1 }
  0x94   : > { %3158 = vmatmul.msk.f32.gmra.mxu0 %vm590_vm1, %v342_v6  ;;  %3223 = vmatmul.msk.f32.gmra.mxu1 %vm590_vm1, %v407_v7 }
  0x95   : > { %3287 = vmatmul.msk.f32.gmra.mxu2 %vm590_vm1, %v471_v8  ;;  %3349 = vmatmul.msk.f32.gmra.mxu3 %vm590_vm1, %v533_v9  ;;  %v348_v9 = vld [vmem:[%s3519_s19 + $0xb0] sm:$0xff] }
  0x98   : > { %v3661_v10 = vpop.f32.mrf.mxu2  ;;  %v3663_v11 = vpop.f32.mrf.mxu3 }
  0x99   : > { %v3665_v12 = vpop.f32.mrf.mxu0  ;;  %v3667_v13 = vpop.f32.mrf.mxu1 }
  0x9c   : > { %3159 = vmatmul.msk.f32.gmra.mxu0 %vm590_vm1, %v343_v14  ;;  %3224 = vmatmul.msk.f32.gmra.mxu1 %vm590_vm1, %v408_v15  ;;  %v413_v14 = vld [vmem:[%s3519_s19 + $0x2b8] sm:$0xff] }
  0x9d   : > { %3288 = vmatmul.msk.f32.gmra.mxu2 %vm590_vm1, %v472_v16  ;;  %3350 = vmatmul.msk.f32.gmra.mxu3 %vm590_vm1, %v534_v17  ;;  %v477_v15 = vld [vmem:[%s3519_s19 + $0x4b8] sm:$0xff]  ;;  %v539_v16 = vld [vmem:[%s3519_s19 + $0x6a8] sm:$0xff] }
  0xa0   : > { %v3677_v18 = vpop.f32.mrf.mxu2  ;;  %v1956_v19 = vpop.f32.mrf.mxu3 }
  0xa1   : > { %v3684_v21 = vpop.f32.mrf.mxu0  ;;  %v3686_v22 = vpop.f32.mrf.mxu1  ;;  %v1957_v27 = vadd.f32 %v3682_v20, %v1956_v19 }
  0xa3   : > { %v2340_v28 = vmax.f32 %v1957_v27, 0.0 }
  0xa4   : > { %3160 = vmatmul.msk.f32.gmra.mxu0 %vm590_vm1, %v344_v23  ;;  %3225 = vmatmul.msk.f32.gmra.mxu1 %vm590_vm1, %v409_v24 }
  0xa5   : > { %3289 = vmatmul.msk.f32.gmra.mxu2 %vm590_vm1, %v473_v25  ;;  %3351 = vmatmul.msk.f32.gmra.mxu3 %vm590_vm1, %v535_v26  ;;  %v2819_v38 = vsel %vm2404_vm2, %v2340_v28, 0.0 }
  0xa8   : > { %v3697_v29 = vpop.f32.mrf.mxu2  ;;  %v1959_v30 = vpop.f32.mrf.mxu3 }
  0xa9   : > { %v1960_v31 = vadd.f32 %v3682_v20, %v1959_v30  ;;  %v3700_v32 = vpop.f32.mrf.mxu0  ;;  %v3702_v33 = vpop.f32.mrf.mxu1  ;;  %v349_v30 = vld [vmem:[%s3519_s19 + $0xb8] sm:$0xff] }
  0xab   : > { %v2341_v39 = vmax.f32 %v1960_v31, 0.0  ;;  %v414_v31 = vld [vmem:[%s3519_s19 + $0x2c0] sm:$0xff] }
  0xac   : > { %3161 = vmatmul.msk.f32.gmra.mxu0 %vm590_vm1, %v345_v34  ;;  %3226 = vmatmul.msk.f32.gmra.mxu1 %vm590_vm1, %v410_v35  ;;  %v478_v34 = vld [vmem:[%s3519_s19 + $0x4c0] sm:$0xff]  ;;  %v540_v35 = vld [vmem:[%s3519_s19 + $0x6b0] sm:$0xff] }
  0xad   : > { %v2820_v40 = vsel %vm2404_vm2, %v2341_v39, 0.0  ;;  %3290 = vmatmul.msk.f32.gmra.mxu2 %vm590_vm1, %v474_v36  ;;  %3352 = vmatmul.msk.f32.gmra.mxu3 %vm590_vm1, %v536_v37  ;;  %v3002_v39 = vld [vmem:[%s5190_s4 + $0x8] sm:$0x7] }
  0xae   : > { %v2821_v41 = vadd.f32 %v2820_v40, %v2819_v38  ;;  %3398 = vmatpush.msk.msrb.mxu1 %vm1359_vm0, %v3002_v39 }
  0xb0   : > { %v3714_v42 = vpop.f32.mrf.mxu2  ;;  %v1962_v43 = vpop.f32.mrf.mxu3 }
  0xb1   : > { %v1963_v44 = vadd.f32 %v3682_v20, %v1962_v43  ;;  %v3717_v45 = vpop.f32.mrf.mxu0  ;;  %v3719_v46 = vpop.f32.mrf.mxu1 }
  0xb3   : > { %v2342_v51 = vmax.f32 %v1963_v44, 0.0 }
  0xb4   : > { %3162 = vmatmul.msk.f32.gmra.mxu0 %vm590_vm1, %v346_v47  ;;  %3227 = vmatmul.msk.f32.gmra.mxu1 %vm590_vm1, %v411_v48  ;;  %v350_v48 = vld [vmem:[%s3519_s19 + $0xc0] sm:$0xff] }
  0xb5   : > { %v2822_v52 = vsel %vm2404_vm2, %v2342_v51, 0.0  ;;  %3291 = vmatmul.msk.f32.gmra.mxu2 %vm590_vm1, %v475_v49  ;;  %3353 = vmatmul.msk.f32.gmra.mxu3 %vm590_vm1, %v537_v50  ;;  %v415_v49 = vld [vmem:[%s3519_s19 + $0x2c8] sm:$0xff]  ;;  %v541_v51 = vld [vmem:[%s3519_s19 + $0x6b8] sm:$0xff] }
  0xb6   : > { %v2823_v53 = vadd.f32 %v2822_v52, %v2821_v41  ;;  %v479_v50 = vld [vmem:[%s3519_s19 + $0x4c8] sm:$0xff] }
  0xb8   : > { %v3730_v54 = vpop.f32.mrf.mxu2  ;;  %v1965_v55 = vpop.f32.mrf.mxu3 }
  0xb9   : > { %v1966_v56 = vadd.f32 %v3682_v20, %v1965_v55  ;;  %v3733_v57 = vpop.f32.mrf.mxu0  ;;  %v3735_v58 = vpop.f32.mrf.mxu1 }
  0xbb   : > { %v2343_v63 = vmax.f32 %v1966_v56, 0.0 }
  0xbc   : > { %3163 = vmatmul.msk.f32.gmra.mxu0 %vm590_vm1, %v347_v59  ;;  %3228 = vmatmul.msk.f32.gmra.mxu1 %vm590_vm1, %v412_v60 }
  0xbd   : > { %v2824_v0 = vsel %vm2404_vm2, %v2343_v63, 0.0  ;;  %3292 = vmatmul.msk.f32.gmra.mxu2 %vm590_vm1, %v476_v61  ;;  %3354 = vmatmul.msk.f32.gmra.mxu3 %vm590_vm1, %v538_v62  ;;  %v351_v63 = vld [vmem:[%s3519_s19 + $0xc8] sm:$0xff] }
  0xbe   : > { %v2825_v1 = vadd.f32 %v2824_v0, %v2823_v53  ;;  %v416_v0 = vld [vmem:[%s3519_s19 + $0x2d0] sm:$0xff] }
  0xc0   : > { %v3746_v2 = vpop.f32.mrf.mxu2  ;;  %v1968_v3 = vpop.f32.mrf.mxu3 }
  0xc1   : > { %v1969_v6 = vadd.f32 %v3682_v20, %v1968_v3  ;;  %v3749_v7 = vpop.f32.mrf.mxu0  ;;  %v3751_v8 = vpop.f32.mrf.mxu1  ;;  %v542_v3 = vld [vmem:[%s3519_s19 + $0x6c0] sm:$0xff] }
  0xc3   : > { %v2344_v17 = vmax.f32 %v1969_v6, 0.0 }
  0xc4   : > { %3164 = vmatmul.msk.f32.gmra.mxu0 %vm590_vm1, %v348_v9  ;;  %3229 = vmatmul.msk.f32.gmra.mxu1 %vm590_vm1, %v413_v14 }
  0xc5   : > { %v2826_v19 = vsel %vm2404_vm2, %v2344_v17, 0.0  ;;  %3293 = vmatmul.msk.f32.gmra.mxu2 %vm590_vm1, %v477_v15  ;;  %3355 = vmatmul.msk.f32.gmra.mxu3 %vm590_vm1, %v539_v16 }
  0xc6   : > { %v2827_v23 = vadd.f32 %v2826_v19, %v2825_v1  ;;  %v480_v1 = vld [vmem:[%s3519_s19 + $0x4d0] sm:$0xff] }
  0xc8   : > { %v3762_v24 = vpop.f32.mrf.mxu2  ;;  %v1971_v25 = vpop.f32.mrf.mxu3 }
  0xc9   : > { %v1972_v26 = vadd.f32 %v3682_v20, %v1971_v25  ;;  %v3765_v27 = vpop.f32.mrf.mxu0  ;;  %v3767_v28 = vpop.f32.mrf.mxu1  ;;  %v352_v25 = vld [vmem:[%s3519_s19 + $0xd0] sm:$0xff] }
  0xcb   : > { %v2345_v36 = vmax.f32 %v1972_v26, 0.0  ;;  %v417_v26 = vld [vmem:[%s3519_s19 + $0x2d8] sm:$0xff] }
  0xcc   : > { %3165 = vmatmul.msk.f32.gmra.mxu0 %vm590_vm1, %v349_v30  ;;  %3230 = vmatmul.msk.f32.gmra.mxu1 %vm590_vm1, %v414_v31  ;;  %v481_v30 = vld [vmem:[%s3519_s19 + $0x4d8] sm:$0xff]  ;;  %v543_v31 = vld [vmem:[%s3519_s19 + $0x6c8] sm:$0xff] }
  0xcd   : > { %v2828_v37 = vsel %vm2404_vm2, %v2345_v36, 0.0  ;;  %3294 = vmatmul.msk.f32.gmra.mxu2 %vm590_vm1, %v478_v34  ;;  %3356 = vmatmul.msk.f32.gmra.mxu3 %vm590_vm1, %v540_v35 }
  0xce   : > { %v2829_v38 = vadd.f32 %v2828_v37, %v2827_v23 }
  0xd0   : > { %v3781_v40 = vpop.f32.mrf.mxu2  ;;  %v1974_v41 = vpop.f32.mrf.mxu3 }
  0xd1   : > { %v1975_v43 = vadd.f32 %v3682_v20, %v1974_v41  ;;  %v3785_v44 = vpop.f32.mrf.mxu0  ;;  %v3787_v47 = vpop.f32.mrf.mxu1 }
  0xd3   : > { %v2346_v52 = vmax.f32 %v1975_v43, 0.0 }
  0xd4   : > { %3166 = vmatmul.msk.f32.gmra.mxu0 %vm590_vm1, %v350_v48  ;;  %3231 = vmatmul.msk.f32.gmra.mxu1 %vm590_vm1, %v415_v49  ;;  %v353_v48 = vld [vmem:[%s3519_s19 + $0xd8] sm:$0xff]  ;;  %v418_v49 = vld [vmem:[%s3519_s19 + $0x2e0] sm:$0xff] }
  0xd5   : > { %v2830_v53 = vsel %vm2404_vm2, %v2346_v52, 0.0  ;;  %3295 = vmatmul.msk.f32.gmra.mxu2 %vm590_vm1, %v479_v50  ;;  %3357 = vmatmul.msk.f32.gmra.mxu3 %vm590_vm1, %v541_v51  ;;  %v482_v50 = vld [vmem:[%s3519_s19 + $0x4e0] sm:$0xff]  ;;  %v544_v51 = vld [vmem:[%s3519_s19 + $0x6d0] sm:$0xff] }
  0xd6   : > { %v2831_v55 = vadd.f32 %v2830_v53, %v2829_v38 }
  0xd8   : > { %v3798_v56 = vpop.f32.mrf.mxu2  ;;  %v1977_v59 = vpop.f32.mrf.mxu3 }
  0xd9   : > { %5199 = vst [vmem:[#allocation2_spill] sm:$0xff] %v3798_v56  ;;  %v1978_v60 = vadd.f32 %v3682_v20, %v1977_v59  ;;  %v3801_v61 = vpop.f32.mrf.mxu0  ;;  %v3803_v62 = vpop.f32.mrf.mxu1 }
  0xda   : > { %5200 = vst [vmem:[#allocation3_spill] sm:$0xff] %v3803_v62 }
  0xdb   : > { %v2347_v6 = vmax.f32 %v1978_v60, 0.0 }
  0xdc   : > { %3167 = vmatmul.msk.f32.gmra.mxu0 %vm590_vm1, %v351_v63  ;;  %3232 = vmatmul.msk.f32.gmra.mxu1 %vm590_vm1, %v416_v0 }
  0xdd   : > { %v2832_v9 = vsel %vm2404_vm2, %v2347_v6, 0.0  ;;  %3296 = vmatmul.msk.f32.gmra.mxu2 %vm590_vm1, %v480_v1  ;;  %3358 = vmatmul.msk.f32.gmra.mxu3 %vm590_vm1, %v542_v3  ;;  %v354_v3 = vld [vmem:[%s3519_s19 + $0xe0] sm:$0xff]  ;;  %v419_v6 = vld [vmem:[%s3519_s19 + $0x2e8] sm:$0xff] }
  0xde   : > { %v2833_v14 = vadd.f32 %v2832_v9, %v2831_v55  ;;  %v483_v9 = vld [vmem:[%s3519_s19 + $0x4e8] sm:$0xff] }
  0xe0   : > { %v3814_v15 = vpop.f32.mrf.mxu2  ;;  %v1980_v16 = vpop.f32.mrf.mxu3 }
  0xe1   : > { %5201 = vst [vmem:[#allocation4_spill] sm:$0xff] %v3814_v15  ;;  %v1981_v17 = vadd.f32 %v3682_v20, %v1980_v16  ;;  %v3817_v19 = vpop.f32.mrf.mxu0  ;;  %v3819_v23 = vpop.f32.mrf.mxu1 }
  0xe2   : > { %5202 = vst [vmem:[#allocation5_spill] sm:$0xff] %v3817_v19  ;;  %v572_v19 = vld [vmem:[%s3519_s19 + $0x7b0] sm:$0xff] }
  0xe3   : > { %5203 = vst [vmem:[#allocation6_spill] sm:$0xff] %v3819_v23  ;;  %v2348_v34 = vmax.f32 %v1981_v17, 0.0 }
  0xe4   : > { %3168 = vmatmul.msk.f32.gmra.mxu0 %vm590_vm1, %v352_v25  ;;  %3233 = vmatmul.msk.f32.gmra.mxu1 %vm590_vm1, %v417_v26 }
  0xe5   : > { %v2834_v35 = vsel %vm2404_vm2, %v2348_v34, 0.0  ;;  %3297 = vmatmul.msk.f32.gmra.mxu2 %vm590_vm1, %v481_v30  ;;  %3359 = vmatmul.msk.f32.gmra.mxu3 %vm590_vm1, %v543_v31 }
  0xe6   : > { %v2835_v36 = vadd.f32 %v2834_v35, %v2833_v14  ;;  %v545_v14 = vld [vmem:[%s3519_s19 + $0x6d8] sm:$0xff] }
  0xe8   : > { %v3830_v37 = vpop.f32.mrf.mxu2  ;;  %v1983_v38 = vpop.f32.mrf.mxu3 }
  0xe9   : > { %5204 = vst [vmem:[#allocation7_spill] sm:$0xff] %v3830_v37  ;;  %v1984_v39 = vadd.f32 %v3682_v20, %v1983_v38  ;;  %v3833_v41 = vpop.f32.mrf.mxu0  ;;  %v3835_v43 = vpop.f32.mrf.mxu1  ;;  %v420_v38 = vld [vmem:[%s3519_s19 + $0x2f0] sm:$0xff] }
  0xea   : > { %5205 = vst [vmem:[#allocation8_spill] sm:$0xff] %v3833_v41  ;;  %v508_v41 = vld [vmem:[%s3519_s19 + $0x5b0] sm:$0xff] }
  0xeb   : > { %5206 = vst [vmem:[#allocation9_spill] sm:$0xff] %v3835_v43  ;;  %v2349_v52 = vmax.f32 %v1984_v39, 0.0  ;;  %v484_v39 = vld [vmem:[%s3519_s19 + $0x4f0] sm:$0xff] }
  0xec   : > { %3169 = vmatmul.msk.f32.gmra.mxu0 %vm590_vm1, %v353_v48  ;;  %3234 = vmatmul.msk.f32.gmra.mxu1 %vm590_vm1, %v418_v49  ;;  %v546_v48 = vld [vmem:[%s3519_s19 + $0x6e0] sm:$0xff] }
  0xed   : > { %v2836_v53 = vsel %vm2404_vm2, %v2349_v52, 0.0  ;;  %3298 = vmatmul.msk.f32.gmra.mxu2 %vm590_vm1, %v482_v50  ;;  %3360 = vmatmul.msk.f32.gmra.mxu3 %vm590_vm1, %v544_v51 }
  0xee   : > { %v2837_v55 = vadd.f32 %v2836_v53, %v2835_v36  ;;  %v355_v36 = vld [vmem:[%s3519_s19 + $0xe8] sm:$0xff] }
  0xf0   : > { %v3846_v59 = vpop.f32.mrf.mxu2  ;;  %v1986_v60 = vpop.f32.mrf.mxu3 }
  0xf1   : > { %5207 = vst [vmem:[#allocation10_spill] sm:$0xff] %v3846_v59  ;;  %v1987_v63 = vadd.f32 %v3682_v20, %v1986_v60  ;;  %v3849_v0 = vpop.f32.mrf.mxu0  ;;  %v3851_v1 = vpop.f32.mrf.mxu1  ;;  %v507_v59 = vld [vmem:[%s3519_s19 + $0x5a8] sm:$0xff] }
  0xf2   : > { %5208 = vst [vmem:[#allocation11_spill] sm:$0xff] %v3849_v0  ;;  %v378_v0 = vld [vmem:[%s3519_s19 + $0x1a0] sm:$0xff] }
  0xf3   : > { %5209 = vst [vmem:[#allocation12_spill] sm:$0xff] %v3851_v1  ;;  %v2350_v16 = vmax.f32 %v1987_v63, 0.0 }
  0xf4   : > { %3170 = vmatmul.msk.f32.gmra.mxu0 %vm590_vm1, %v354_v3  ;;  %3235 = vmatmul.msk.f32.gmra.mxu1 %vm590_vm1, %v419_v6  ;;  %v356_v3 = vld [vmem:[%s3519_s19 + $0xf0] sm:$0xff]  ;;  %v421_v6 = vld [vmem:[%s3519_s19 + $0x2f8] sm:$0xff] }
  0xf5   : > { %v2838_v17 = vsel %vm2404_vm2, %v2350_v16, 0.0  ;;  %3299 = vmatmul.msk.f32.gmra.mxu2 %vm590_vm1, %v483_v9  ;;  %3361 = vmatmul.msk.f32.gmra.mxu3 %vm590_vm1, %v545_v14  ;;  %v485_v9 = vld [vmem:[%s3519_s19 + $0x4f8] sm:$0xff]  ;;  %v547_v14 = vld [vmem:[%s3519_s19 + $0x6e8] sm:$0xff] }
  0xf6   : > { %v2839_v25 = vadd.f32 %v2838_v17, %v2837_v55 }
  0xf8   : > { %v3862_v26 = vpop.f32.mrf.mxu2  ;;  %v1989_v30 = vpop.f32.mrf.mxu3 }
  0xf9   : > { %5210 = vst [vmem:[#allocation13_spill] sm:$0xff] %v3862_v26  ;;  %v1990_v31 = vadd.f32 %v3682_v20, %v1989_v30  ;;  %v3865_v34 = vpop.f32.mrf.mxu0  ;;  %v3867_v35 = vpop.f32.mrf.mxu1  ;;  %v506_v26 = vld [vmem:[%s3519_s19 + $0x5a0] sm:$0xff] }
  0xfa   : > { %5211 = vst [vmem:[#allocation14_spill] sm:$0xff] %v3865_v34  ;;  %v377_v34 = vld [vmem:[%s3519_s19 + $0x198] sm:$0xff] }
  0xfb   : > { %5212 = vst [vmem:[#allocation15_spill] sm:$0xff] %v3867_v35  ;;  %v2351_v49 = vmax.f32 %v1990_v31, 0.0 }
  0xfc   : > { %3171 = vmatmul.msk.f32.gmra.mxu0 %vm590_vm1, %v355_v36  ;;  %3236 = vmatmul.msk.f32.gmra.mxu1 %vm590_vm1, %v420_v38 }
  0xfd   : > { %v2840_v50 = vsel %vm2404_vm2, %v2351_v49, 0.0  ;;  %3300 = vmatmul.msk.f32.gmra.mxu2 %vm590_vm1, %v484_v39  ;;  %3362 = vmatmul.msk.f32.gmra.mxu3 %vm590_vm1, %v546_v48  ;;  %v357_v48 = vld [vmem:[%s3519_s19 + $0xf8] sm:$0xff]  ;;  %v422_v49 = vld [vmem:[%s3519_s19 + $0x300] sm:$0xff] }
  0xfe   : > { %v2841_v51 = vadd.f32 %v2840_v50, %v2839_v25  ;;  %v486_v50 = vld [vmem:[%s3519_s19 + $0x500] sm:$0xff] }
 0x100   : > { %v3878_v52 = vpop.f32.mrf.mxu2  ;;  %v1992_v53 = vpop.f32.mrf.mxu3 }
 0x101   : > { %5213 = vst [vmem:[#allocation16_spill] sm:$0xff] %v3878_v52  ;;  %v1993_v55 = vadd.f32 %v3682_v20, %v1992_v53  ;;  %v3881_v60 = vpop.f32.mrf.mxu0  ;;  %v3883_v63 = vpop.f32.mrf.mxu1  ;;  %v548_v53 = vld [vmem:[%s3519_s19 + $0x6f0] sm:$0xff] }
 0x102   : > { %5214 = vst [vmem:[#allocation17_spill] sm:$0xff] %v3881_v60  ;;  %v504_v60 = vld [vmem:[%s3519_s19 + $0x590] sm:$0xff] }
 0x103   : > { %5215 = vst [vmem:[#allocation18_spill] sm:$0xff] %v3883_v63  ;;  %v2352_v16 = vmax.f32 %v1993_v55, 0.0  ;;  %v375_v63 = vld [vmem:[%s3519_s19 + $0x188] sm:$0xff] }
 0x104   : > { %3172 = vmatmul.msk.f32.gmra.mxu0 %vm590_vm1, %v356_v3  ;;  %3237 = vmatmul.msk.f32.gmra.mxu1 %vm590_vm1, %v421_v6 }
 0x105   : > { %v2842_v17 = vsel %vm2404_vm2, %v2352_v16, 0.0  ;;  %3301 = vmatmul.msk.f32.gmra.mxu2 %vm590_vm1, %v485_v9  ;;  %3363 = vmatmul.msk.f32.gmra.mxu3 %vm590_vm1, %v547_v14 }
 0x106   : > { %v2843_v25 = vadd.f32 %v2842_v17, %v2841_v51 }
 0x108   : > { %v3894_v30 = vpop.f32.mrf.mxu2  ;;  %v1995_v31 = vpop.f32.mrf.mxu3 }
 0x109   : > { %5216 = vst [vmem:[#allocation19_spill] sm:$0xff] %v3894_v30  ;;  %v1996_v36 = vadd.f32 %v3682_v20, %v1995_v31  ;;  %v3897_v38 = vpop.f32.mrf.mxu0  ;;  %v3899_v39 = vpop.f32.mrf.mxu1  ;;  %v358_v31 = vld [vmem:[%s3519_s19 + $0x100] sm:$0xff]  ;;  %v565_v30 = vld [vmem:[%s3519_s19 + $0x778] sm:$0xff] }
 0x10a   : > { %5217 = vst [vmem:[#allocation20_spill] sm:$0xff] %v3897_v38 }
 0x10b   : > { %5218 = vst [vmem:[#allocation21_spill] sm:$0xff] %v3899_v39  ;;  %v2353_v55 = vmax.f32 %v1996_v36, 0.0  ;;  %v423_v36 = vld [vmem:[%s3519_s19 + $0x308] sm:$0xff] }
 0x10c   : > { %3173 = vmatmul.msk.f32.gmra.mxu0 %vm590_vm1, %v357_v48  ;;  %3238 = vmatmul.msk.f32.gmra.mxu1 %vm590_vm1, %v422_v49  ;;  %v487_v48 = vld [vmem:[%s3519_s19 + $0x508] sm:$0xff]  ;;  %v549_v49 = vld [vmem:[%s3519_s19 + $0x6f8] sm:$0xff] }
 0x10d   : > { %v2844_v51 = vsel %vm2404_vm2, %v2353_v55, 0.0  ;;  %3302 = vmatmul.msk.f32.gmra.mxu2 %vm590_vm1, %v486_v50  ;;  %3364 = vmatmul.msk.f32.gmra.mxu3 %vm590_vm1, %v548_v53  ;;  %v439_v39 = vld [vmem:[%s3519_s19 + $0x388] sm:$0xff] }
 0x10e   : > { %v2845_v3 = vadd.f32 %v2844_v51, %v2843_v25 }
 0x110   : > { %v3910_v6 = vpop.f32.mrf.mxu2  ;;  %v1998_v9 = vpop.f32.mrf.mxu3 }
 0x111   : > { %5219 = vst [vmem:[#allocation22_spill] sm:$0xff] %v3910_v6  ;;  %v1999_v14 = vadd.f32 %v3682_v20, %v1998_v9  ;;  %v3913_v16 = vpop.f32.mrf.mxu0  ;;  %v3915_v17 = vpop.f32.mrf.mxu1  ;;  %v496_v6 = vld [vmem:[%s3519_s19 + $0x550] sm:$0xff] }
 0x112   : > { %5220 = vst [vmem:[#allocation23_spill] sm:$0xff] %v3913_v16 }
 0x113   : > { %5221 = vst [vmem:[#allocation24_spill] sm:$0xff] %v3915_v17  ;;  %v2354_v50 = vmax.f32 %v1999_v14, 0.0  ;;  %v359_v14 = vld [vmem:[%s3519_s19 + $0x108] sm:$0xff] }
 0x114   : > { %3174 = vmatmul.msk.f32.gmra.mxu0 %vm590_vm1, %v358_v31  ;;  %3239 = vmatmul.msk.f32.gmra.mxu1 %vm590_vm1, %v423_v36  ;;  %v424_v31 = vld [vmem:[%s3519_s19 + $0x310] sm:$0xff] }
 0x115   : > { %v2846_v25 = vsel %vm2404_vm2, %v2354_v50, 0.0  ;;  %3303 = vmatmul.msk.f32.gmra.mxu2 %vm590_vm1, %v487_v48  ;;  %3365 = vmatmul.msk.f32.gmra.mxu3 %vm590_vm1, %v549_v49  ;;  %v488_v36 = vld [vmem:[%s3519_s19 + $0x510] sm:$0xff]  ;;  %v550_v50 = vld [vmem:[%s3519_s19 + $0x700] sm:$0xff] }
 0x116   : > { %v2847_v53 = vadd.f32 %v2846_v25, %v2845_v3 }
 0x118   : > { %v3926_v55 = vpop.f32.mrf.mxu2  ;;  %v2001_v51 = vpop.f32.mrf.mxu3 }
 0x119   : > { %5222 = vst [vmem:[#allocation25_spill] sm:$0xff] %v3926_v55  ;;  %v2002_v9 = vadd.f32 %v3682_v20, %v2001_v51  ;;  %v3929_v17 = vpop.f32.mrf.mxu0  ;;  %v3931_v16 = vpop.f32.mrf.mxu1 }
 0x11a   : > { %5223 = vst [vmem:[#allocation26_spill] sm:$0xff] %v3929_v17 }
 0x11b   : > { %5224 = vst [vmem:[#allocation27_spill] sm:$0xff] %v3931_v16  ;;  %v2355_v48 = vmax.f32 %v2002_v9, 0.0  ;;  %v360_v9 = vld [vmem:[%s3519_s19 + $0x110] sm:$0xff] }
 0x11c   : > { %3175 = vmatmul.msk.f32.gmra.mxu0 %vm590_vm1, %v359_v14  ;;  %3240 = vmatmul.msk.f32.gmra.mxu1 %vm590_vm1, %v424_v31  ;;  %v425_v14 = vld [vmem:[%s3519_s19 + $0x318] sm:$0xff] }
 0x11d   : > { %v2848_v3 = vsel %vm2404_vm2, %v2355_v48, 0.0  ;;  %3304 = vmatmul.msk.f32.gmra.mxu2 %vm590_vm1, %v488_v36  ;;  %3366 = vmatmul.msk.f32.gmra.mxu3 %vm590_vm1, %v550_v50  ;;  %v489_v31 = vld [vmem:[%s3519_s19 + $0x518] sm:$0xff]  ;;  %v551_v48 = vld [vmem:[%s3519_s19 + $0x708] sm:$0xff] }
 0x11e   : > { %v2849_v49 = vadd.f32 %v2848_v3, %v2847_v53 }
 0x120   : > { %v3942_v25 = vpop.f32.mrf.mxu2  ;;  %v2004_v51 = vpop.f32.mrf.mxu3 }
 0x121   : > { %5225 = vst [vmem:[#allocation28_spill] sm:$0xff] %v3942_v25  ;;  %v2005_v16 = vadd.f32 %v3682_v20, %v2004_v51  ;;  %v3945_v55 = vpop.f32.mrf.mxu0  ;;  %v3947_v17 = vpop.f32.mrf.mxu1 }
 0x122   : > { %5226 = vst [vmem:[#allocation29_spill] sm:$0xff] %v3945_v55 }
 0x123   : > { %5227 = vst [vmem:[#allocation30_spill] sm:$0xff] %v3947_v17  ;;  %v2356_v36 = vmax.f32 %v2005_v16, 0.0  ;;  %v361_v16 = vld [vmem:[%s3519_s19 + $0x118] sm:$0xff] }
 0x124   : > { %3176 = vmatmul.msk.f32.gmra.mxu0 %vm590_vm1, %v360_v9  ;;  %3241 = vmatmul.msk.f32.gmra.mxu1 %vm590_vm1, %v425_v14  ;;  %v426_v9 = vld [vmem:[%s3519_s19 + $0x320] sm:$0xff] }
 0x125   : > { %v2850_v53 = vsel %vm2404_vm2, %v2356_v36, 0.0  ;;  %3305 = vmatmul.msk.f32.gmra.mxu2 %vm590_vm1, %v489_v31  ;;  %3367 = vmatmul.msk.f32.gmra.mxu3 %vm590_vm1, %v551_v48  ;;  %v490_v14 = vld [vmem:[%s3519_s19 + $0x520] sm:$0xff]  ;;  %v552_v36 = vld [vmem:[%s3519_s19 + $0x710] sm:$0xff] }
 0x126   : > { %v2851_v50 = vadd.f32 %v2850_v53, %v2849_v49 }
 0x128   : > { %v3958_v3 = vpop.f32.mrf.mxu2  ;;  %v2007_v51 = vpop.f32.mrf.mxu3 }
 0x129   : > { %5228 = vst [vmem:[#allocation31_spill] sm:$0xff] %v3958_v3  ;;  %v2008_v17 = vadd.f32 %v3682_v20, %v2007_v51  ;;  %v3961_v25 = vpop.f32.mrf.mxu0  ;;  %v3963_v55 = vpop.f32.mrf.mxu1 }
 0x12a   : > { %5229 = vst [vmem:[#allocation32_spill] sm:$0xff] %v3961_v25 }
 0x12b   : > { %5230 = vst [vmem:[#allocation33_spill] sm:$0xff] %v3963_v55  ;;  %v2357_v31 = vmax.f32 %v2008_v17, 0.0  ;;  %v362_v17 = vld [vmem:[%s3519_s19 + $0x120] sm:$0xff] }
 0x12c   : > { %3177 = vmatmul.msk.f32.gmra.mxu0 %vm590_vm1, %v361_v16  ;;  %3242 = vmatmul.msk.f32.gmra.mxu1 %vm590_vm1, %v426_v9  ;;  %v427_v16 = vld [vmem:[%s3519_s19 + $0x328] sm:$0xff] }
 0x12d   : > { %v2852_v49 = vsel %vm2404_vm2, %v2357_v31, 0.0  ;;  %3306 = vmatmul.msk.f32.gmra.mxu2 %vm590_vm1, %v490_v14  ;;  %3368 = vmatmul.msk.f32.gmra.mxu3 %vm590_vm1, %v552_v36  ;;  %v491_v9 = vld [vmem:[%s3519_s19 + $0x528] sm:$0xff]  ;;  %v553_v31 = vld [vmem:[%s3519_s19 + $0x718] sm:$0xff] }
 0x12e   : > { %v2853_v48 = vadd.f32 %v2852_v49, %v2851_v50 }
 0x130   : > { %v3974_v53 = vpop.f32.mrf.mxu2  ;;  %v2010_v51 = vpop.f32.mrf.mxu3 }
 0x131   : > { %5231 = vst [vmem:[#allocation34_spill] sm:$0xff] %v3974_v53  ;;  %v2011_v55 = vadd.f32 %v3682_v20, %v2010_v51  ;;  %v3977_v25 = vpop.f32.mrf.mxu0  ;;  %v3979_v3 = vpop.f32.mrf.mxu1 }
 0x132   : > { %5232 = vst [vmem:[#allocation35_spill] sm:$0xff] %v3977_v25 }
 0x133   : > { %5233 = vst [vmem:[#allocation36_spill] sm:$0xff] %v3979_v3  ;;  %v2358_v14 = vmax.f32 %v2011_v55, 0.0  ;;  %v363_v55 = vld [vmem:[%s3519_s19 + $0x128] sm:$0xff] }
 0x134   : > { %3178 = vmatmul.msk.f32.gmra.mxu0 %vm590_vm1, %v362_v17  ;;  %3243 = vmatmul.msk.f32.gmra.mxu1 %vm590_vm1, %v427_v16  ;;  %v428_v17 = vld [vmem:[%s3519_s19 + $0x330] sm:$0xff] }
 0x135   : > { %v2854_v50 = vsel %vm2404_vm2, %v2358_v14, 0.0  ;;  %3307 = vmatmul.msk.f32.gmra.mxu2 %vm590_vm1, %v491_v9  ;;  %3369 = vmatmul.msk.f32.gmra.mxu3 %vm590_vm1, %v553_v31  ;;  %v492_v16 = vld [vmem:[%s3519_s19 + $0x530] sm:$0xff]  ;;  %v554_v14 = vld [vmem:[%s3519_s19 + $0x720] sm:$0xff] }
 0x136   : > { %v2855_v36 = vadd.f32 %v2854_v50, %v2853_v48 }
 0x138   : > { %v3990_v49 = vpop.f32.mrf.mxu2  ;;  %v2013_v51 = vpop.f32.mrf.mxu3 }
 0x139   : > { %5234 = vst [vmem:[#allocation37_spill] sm:$0xff] %v3990_v49  ;;  %v2014_v3 = vadd.f32 %v3682_v20, %v2013_v51  ;;  %v3993_v53 = vpop.f32.mrf.mxu0  ;;  %v3995_v25 = vpop.f32.mrf.mxu1 }
 0x13a   : > { %5235 = vst [vmem:[#allocation38_spill] sm:$0xff] %v3993_v53 }
 0x13b   : > { %5236 = vst [vmem:[#allocation39_spill] sm:$0xff] %v3995_v25  ;;  %v2359_v9 = vmax.f32 %v2014_v3, 0.0  ;;  %v364_v3 = vld [vmem:[%s3519_s19 + $0x130] sm:$0xff] }
 0x13c   : > { %3179 = vmatmul.msk.f32.gmra.mxu0 %vm590_vm1, %v363_v55  ;;  %3244 = vmatmul.msk.f32.gmra.mxu1 %vm590_vm1, %v428_v17  ;;  %v429_v55 = vld [vmem:[%s3519_s19 + $0x338] sm:$0xff] }
 0x13d   : > { %v2856_v48 = vsel %vm2404_vm2, %v2359_v9, 0.0  ;;  %3308 = vmatmul.msk.f32.gmra.mxu2 %vm590_vm1, %v492_v16  ;;  %3370 = vmatmul.msk.f32.gmra.mxu3 %vm590_vm1, %v554_v14  ;;  %v493_v17 = vld [vmem:[%s3519_s19 + $0x538] sm:$0xff]  ;;  %v555_v9 = vld [vmem:[%s3519_s19 + $0x728] sm:$0xff] }
 0x13e   : > { %v2857_v31 = vadd.f32 %v2856_v48, %v2855_v36 }
 0x140   : > { %v4006_v50 = vpop.f32.mrf.mxu2  ;;  %v2016_v51 = vpop.f32.mrf.mxu3 }
 0x141   : > { %5237 = vst [vmem:[#allocation40_spill] sm:$0xff] %v4006_v50  ;;  %v2017_v25 = vadd.f32 %v3682_v20, %v2016_v51  ;;  %v4009_v49 = vpop.f32.mrf.mxu0  ;;  %v4011_v53 = vpop.f32.mrf.mxu1 }
 0x142   : > { %5238 = vst [vmem:[#allocation41_spill] sm:$0xff] %v4009_v49 }
 0x143   : > { %5239 = vst [vmem:[#allocation42_spill] sm:$0xff] %v4011_v53  ;;  %v2360_v16 = vmax.f32 %v2017_v25, 0.0  ;;  %v365_v25 = vld [vmem:[%s3519_s19 + $0x138] sm:$0xff] }
 0x144   : > { %3180 = vmatmul.msk.f32.gmra.mxu0 %vm590_vm1, %v364_v3  ;;  %3245 = vmatmul.msk.f32.gmra.mxu1 %vm590_vm1, %v429_v55  ;;  %v430_v3 = vld [vmem:[%s3519_s19 + $0x340] sm:$0xff] }
 0x145   : > { %v2858_v36 = vsel %vm2404_vm2, %v2360_v16, 0.0  ;;  %3309 = vmatmul.msk.f32.gmra.mxu2 %vm590_vm1, %v493_v17  ;;  %3371 = vmatmul.msk.f32.gmra.mxu3 %vm590_vm1, %v555_v9  ;;  %v494_v55 = vld [vmem:[%s3519_s19 + $0x540] sm:$0xff]  ;;  %v556_v16 = vld [vmem:[%s3519_s19 + $0x730] sm:$0xff] }
 0x146   : > { %v2859_v14 = vadd.f32 %v2858_v36, %v2857_v31 }
 0x148   : > { %v4022_v48 = vpop.f32.mrf.mxu2  ;;  %v2019_v51 = vpop.f32.mrf.mxu3 }
 0x149   : > { %5240 = vst [vmem:[#allocation43_spill] sm:$0xff] %v4022_v48  ;;  %v2020_v53 = vadd.f32 %v3682_v20, %v2019_v51  ;;  %v4025_v50 = vpop.f32.mrf.mxu0  ;;  %v4027_v49 = vpop.f32.mrf.mxu1 }
 0x14a   : > { %5241 = vst [vmem:[#allocation44_spill] sm:$0xff] %v4025_v50 }
 0x14b   : > { %5242 = vst [vmem:[#allocation45_spill] sm:$0xff] %v4027_v49  ;;  %v2361_v17 = vmax.f32 %v2020_v53, 0.0  ;;  %v366_v53 = vld [vmem:[%s3519_s19 + $0x140] sm:$0xff] }
 0x14c   : > { %3181 = vmatmul.msk.f32.gmra.mxu0 %vm590_vm1, %v365_v25  ;;  %3246 = vmatmul.msk.f32.gmra.mxu1 %vm590_vm1, %v430_v3  ;;  %v431_v25 = vld [vmem:[%s3519_s19 + $0x348] sm:$0xff] }
 0x14d   : > { %v2860_v31 = vsel %vm2404_vm2, %v2361_v17, 0.0  ;;  %3310 = vmatmul.msk.f32.gmra.mxu2 %vm590_vm1, %v494_v55  ;;  %3372 = vmatmul.msk.f32.gmra.mxu3 %vm590_vm1, %v556_v16  ;;  %v495_v3 = vld [vmem:[%s3519_s19 + $0x548] sm:$0xff]  ;;  %v557_v17 = vld [vmem:[%s3519_s19 + $0x738] sm:$0xff] }
 0x14e   : > { %v2861_v9 = vadd.f32 %v2860_v31, %v2859_v14 }
 0x150   : > { %v4038_v36 = vpop.f32.mrf.mxu2  ;;  %v2022_v51 = vpop.f32.mrf.mxu3 }
 0x151   : > { %5243 = vst [vmem:[#allocation46_spill] sm:$0xff] %v4038_v36  ;;  %v2023_v49 = vadd.f32 %v3682_v20, %v2022_v51  ;;  %v4041_v48 = vpop.f32.mrf.mxu0  ;;  %v4043_v50 = vpop.f32.mrf.mxu1 }
 0x152   : > { %5244 = vst [vmem:[#allocation47_spill] sm:$0xff] %v4041_v48 }
 0x153   : > { %5245 = vst [vmem:[#allocation48_spill] sm:$0xff] %v4043_v50  ;;  %v2362_v55 = vmax.f32 %v2023_v49, 0.0  ;;  %v367_v49 = vld [vmem:[%s3519_s19 + $0x148] sm:$0xff] }
 0x154   : > { %3182 = vmatmul.msk.f32.gmra.mxu0 %vm590_vm1, %v366_v53  ;;  %3247 = vmatmul.msk.f32.gmra.mxu1 %vm590_vm1, %v431_v25  ;;  %v432_v53 = vld [vmem:[%s3519_s19 + $0x350] sm:$0xff]  ;;  %v558_v25 = vld [vmem:[%s3519_s19 + $0x740] sm:$0xff] }
 0x155   : > { %v2862_v14 = vsel %vm2404_vm2, %v2362_v55, 0.0  ;;  %3311 = vmatmul.msk.f32.gmra.mxu2 %vm590_vm1, %v495_v3  ;;  %3373 = vmatmul.msk.f32.gmra.mxu3 %vm590_vm1, %v557_v17  ;;  %v3036_v17 = vld [vmem:[%s5192_s6 + $0x8] sm:$0xff] }
 0x156   : > { %v2863_v16 = vadd.f32 %v2862_v14, %v2861_v9  ;;  %3059 = vmatpush.msrb.mxu2 %v3036_v17 }
 0x158   : > { %v4054_v31 = vpop.f32.mrf.mxu2  ;;  %v2025_v51 = vpop.f32.mrf.mxu3 }
 0x159   : > { %5246 = vst [vmem:[#allocation49_spill] sm:$0xff] %v4054_v31  ;;  %v2026_v50 = vadd.f32 %v3682_v20, %v2025_v51  ;;  %v4057_v36 = vpop.f32.mrf.mxu0  ;;  %v4059_v48 = vpop.f32.mrf.mxu1 }
 0x15a   : > { %5247 = vst [vmem:[#allocation50_spill] sm:$0xff] %v4057_v36 }
 0x15b   : > { %5248 = vst [vmem:[#allocation51_spill] sm:$0xff] %v4059_v48  ;;  %v2363_v55 = vmax.f32 %v2026_v50, 0.0 }
 0x15c   : > { %3183 = vmatmul.msk.f32.gmra.mxu0 %vm590_vm1, %v367_v49  ;;  %3248 = vmatmul.msk.f32.gmra.mxu1 %vm590_vm1, %v432_v53 }
 0x15d   : > { %v2864_v9 = vsel %vm2404_vm2, %v2363_v55, 0.0  ;;  %3312 = vmatmul.msk.f32.gmra.mxu2 %vm590_vm1, %v496_v6  ;;  %3374 = vmatmul.msk.f32.gmra.mxu3 %vm590_vm1, %v558_v25  ;;  %v368_v55 = vld [vmem:[%s3519_s19 + $0x150] sm:$0xff]  ;;  %v433_v6 = vld [vmem:[%s3519_s19 + $0x358] sm:$0xff] }
 0x15e   : > { %v2865_v3 = vadd.f32 %v2864_v9, %v2863_v16  ;;  %v497_v25 = vld [vmem:[%s3519_s19 + $0x558] sm:$0xff]  ;;  %v559_v16 = vld [vmem:[%s3519_s19 + $0x748] sm:$0xff] }
 0x160   : > { %v4073_v14 = vpop.f32.mrf.mxu2  ;;  %v2028_v50 = vpop.f32.mrf.mxu3 }
 0x161   : > { %5249 = vst [vmem:[#allocation52_spill] sm:$0xff] %v4073_v14  ;;  %v2029_v51 = vadd.f32 %v3682_v20, %v2028_v50  ;;  %v4076_v49 = vpop.f32.mrf.mxu0  ;;  %v4078_v53 = vpop.f32.mrf.mxu1 }
 0x162   : > { %5250 = vst [vmem:[#allocation53_spill] sm:$0xff] %v4076_v49 }
 0x163   : > { %5251 = vst [vmem:[#allocation54_spill] sm:$0xff] %v4078_v53  ;;  %v2364_v9 = vmax.f32 %v2029_v51, 0.0  ;;  %v369_v51 = vld [vmem:[%s3519_s19 + $0x158] sm:$0xff] }
 0x164   : > { %3184 = vmatmul.msk.f32.gmra.mxu0 %vm590_vm1, %v368_v55  ;;  %3249 = vmatmul.msk.f32.gmra.mxu1 %vm590_vm1, %v433_v6  ;;  %v434_v55 = vld [vmem:[%s3519_s19 + $0x360] sm:$0xff] }
 0x165   : > { %v2866_v17 = vsel %vm2404_vm2, %v2364_v9, 0.0  ;;  %3313 = vmatmul.msk.f32.gmra.mxu2 %vm590_vm1, %v497_v25  ;;  %3375 = vmatmul.msk.f32.gmra.mxu3 %vm590_vm1, %v559_v16  ;;  %v498_v6 = vld [vmem:[%s3519_s19 + $0x560] sm:$0xff]  ;;  %v560_v9 = vld [vmem:[%s3519_s19 + $0x750] sm:$0xff] }
 0x166   : > { %v2867_v50 = vadd.f32 %v2866_v17, %v2865_v3 }
 0x168   : > { %v4089_v53 = vpop.f32.mrf.mxu2  ;;  %v2031_v49 = vpop.f32.mrf.mxu3 }
 0x169   : > { %5252 = vst [vmem:[#allocation55_spill] sm:$0xff] %v4089_v53  ;;  %v2032_v14 = vadd.f32 %v3682_v20, %v2031_v49  ;;  %v4092_v48 = vpop.f32.mrf.mxu0  ;;  %v4094_v31 = vpop.f32.mrf.mxu1 }
 0x16a   : > { %5253 = vst [vmem:[#allocation56_spill] sm:$0xff] %v4092_v48 }
 0x16b   : > { %5254 = vst [vmem:[#allocation57_spill] sm:$0xff] %v4094_v31  ;;  %v2365_v25 = vmax.f32 %v2032_v14, 0.0  ;;  %v370_v14 = vld [vmem:[%s3519_s19 + $0x160] sm:$0xff] }
 0x16c   : > { %3185 = vmatmul.msk.f32.gmra.mxu0 %vm590_vm1, %v369_v51  ;;  %3250 = vmatmul.msk.f32.gmra.mxu1 %vm590_vm1, %v434_v55  ;;  %v435_v51 = vld [vmem:[%s3519_s19 + $0x368] sm:$0xff] }
 0x16d   : > { %v2868_v3 = vsel %vm2404_vm2, %v2365_v25, 0.0  ;;  %3314 = vmatmul.msk.f32.gmra.mxu2 %vm590_vm1, %v498_v6  ;;  %3376 = vmatmul.msk.f32.gmra.mxu3 %vm590_vm1, %v560_v9  ;;  %v499_v55 = vld [vmem:[%s3519_s19 + $0x568] sm:$0xff]  ;;  %v561_v25 = vld [vmem:[%s3519_s19 + $0x758] sm:$0xff] }
 0x16e   : > { %v2869_v49 = vadd.f32 %v2868_v3, %v2867_v50 }
 0x170   : > { %v4105_v16 = vpop.f32.mrf.mxu2  ;;  %v2034_v17 = vpop.f32.mrf.mxu3 }
 0x171   : > { %5255 = vst [vmem:[#allocation58_spill] sm:$0xff] %v4105_v16  ;;  %v2035_v31 = vadd.f32 %v3682_v20, %v2034_v17  ;;  %v4108_v53 = vpop.f32.mrf.mxu0  ;;  %v4110_v48 = vpop.f32.mrf.mxu1 }
 0x172   : > { %5256 = vst [vmem:[#allocation59_spill] sm:$0xff] %v4108_v53 }
 0x173   : > { %5257 = vst [vmem:[#allocation60_spill] sm:$0xff] %v4110_v48  ;;  %v2366_v6 = vmax.f32 %v2035_v31, 0.0  ;;  %v371_v31 = vld [vmem:[%s3519_s19 + $0x168] sm:$0xff] }
 0x174   : > { %3186 = vmatmul.msk.f32.gmra.mxu0 %vm590_vm1, %v370_v14  ;;  %3251 = vmatmul.msk.f32.gmra.mxu1 %vm590_vm1, %v435_v51  ;;  %v436_v14 = vld [vmem:[%s3519_s19 + $0x370] sm:$0xff] }
 0x175   : > { %v2870_v50 = vsel %vm2404_vm2, %v2366_v6, 0.0  ;;  %3315 = vmatmul.msk.f32.gmra.mxu2 %vm590_vm1, %v499_v55  ;;  %3377 = vmatmul.msk.f32.gmra.mxu3 %vm590_vm1, %v561_v25  ;;  %v500_v51 = vld [vmem:[%s3519_s19 + $0x570] sm:$0xff]  ;;  %v562_v6 = vld [vmem:[%s3519_s19 + $0x760] sm:$0xff] }
 0x176   : > { %v2871_v9 = vadd.f32 %v2870_v50, %v2869_v49 }
 0x178   : > { %v4121_v3 = vpop.f32.mrf.mxu2  ;;  %v2037_v17 = vpop.f32.mrf.mxu3 }
 0x179   : > { %5258 = vst [vmem:[#allocation61_spill] sm:$0xff] %v4121_v3  ;;  %v2038_v48 = vadd.f32 %v3682_v20, %v2037_v17  ;;  %v4124_v16 = vpop.f32.mrf.mxu0  ;;  %v4126_v53 = vpop.f32.mrf.mxu1 }
 0x17a   : > { %5259 = vst [vmem:[#allocation62_spill] sm:$0xff] %v4124_v16 }
 0x17b   : > { %5260 = vst [vmem:[#allocation63_spill] sm:$0xff] %v4126_v53  ;;  %v2367_v55 = vmax.f32 %v2038_v48, 0.0  ;;  %v372_v48 = vld [vmem:[%s3519_s19 + $0x170] sm:$0xff] }
 0x17c   : > { %3187 = vmatmul.msk.f32.gmra.mxu0 %vm590_vm1, %v371_v31  ;;  %3252 = vmatmul.msk.f32.gmra.mxu1 %vm590_vm1, %v436_v14  ;;  %v437_v31 = vld [vmem:[%s3519_s19 + $0x378] sm:$0xff] }
 0x17d   : > { %v2872_v49 = vsel %vm2404_vm2, %v2367_v55, 0.0  ;;  %3316 = vmatmul.msk.f32.gmra.mxu2 %vm590_vm1, %v500_v51  ;;  %3378 = vmatmul.msk.f32.gmra.mxu3 %vm590_vm1, %v562_v6  ;;  %v501_v14 = vld [vmem:[%s3519_s19 + $0x578] sm:$0xff]  ;;  %v563_v55 = vld [vmem:[%s3519_s19 + $0x768] sm:$0xff] }
 0x17e   : > { %v2873_v25 = vadd.f32 %v2872_v49, %v2871_v9 }
 0x180   : > { %v4137_v50 = vpop.f32.mrf.mxu2  ;;  %v2040_v17 = vpop.f32.mrf.mxu3 }
 0x181   : > { %5261 = vst [vmem:[#allocation64_spill] sm:$0xff] %v4137_v50  ;;  %v2041_v53 = vadd.f32 %v3682_v20, %v2040_v17  ;;  %v4140_v3 = vpop.f32.mrf.mxu0  ;;  %v4142_v16 = vpop.f32.mrf.mxu1 }
 0x182   : > { %5262 = vst [vmem:[#allocation65_spill] sm:$0xff] %v4140_v3 }
 0x183   : > { %5263 = vst [vmem:[#allocation66_spill] sm:$0xff] %v4142_v16  ;;  %v2368_v51 = vmax.f32 %v2041_v53, 0.0  ;;  %v373_v53 = vld [vmem:[%s3519_s19 + $0x178] sm:$0xff] }
 0x184   : > { %3188 = vmatmul.msk.f32.gmra.mxu0 %vm590_vm1, %v372_v48  ;;  %3253 = vmatmul.msk.f32.gmra.mxu1 %vm590_vm1, %v437_v31  ;;  %v438_v48 = vld [vmem:[%s3519_s19 + $0x380] sm:$0xff] }
 0x185   : > { %v2874_v9 = vsel %vm2404_vm2, %v2368_v51, 0.0  ;;  %3317 = vmatmul.msk.f32.gmra.mxu2 %vm590_vm1, %v501_v14  ;;  %3379 = vmatmul.msk.f32.gmra.mxu3 %vm590_vm1, %v563_v55  ;;  %v502_v31 = vld [vmem:[%s3519_s19 + $0x580] sm:$0xff]  ;;  %v564_v51 = vld [vmem:[%s3519_s19 + $0x770] sm:$0xff] }
 0x186   : > { %v2875_v6 = vadd.f32 %v2874_v9, %v2873_v25 }
 0x188   : > { %v4153_v49 = vpop.f32.mrf.mxu2  ;;  %v2043_v17 = vpop.f32.mrf.mxu3 }
 0x189   : > { %5264 = vst [vmem:[#allocation67_spill] sm:$0xff] %v4153_v49  ;;  %v2044_v16 = vadd.f32 %v3682_v20, %v2043_v17  ;;  %v4156_v50 = vpop.f32.mrf.mxu0  ;;  %v4158_v3 = vpop.f32.mrf.mxu1 }
 0x18a   : > { %5265 = vst [vmem:[#allocation68_spill] sm:$0xff] %v4156_v50 }
 0x18b   : > { %v2369_v14 = vmax.f32 %v2044_v16, 0.0  ;;  %v374_v16 = vld [vmem:[%s3519_s19 + $0x180] sm:$0xff] }
 0x18c   : > { %3189 = vmatmul.msk.f32.gmra.mxu0 %vm590_vm1, %v373_v53  ;;  %3254 = vmatmul.msk.f32.gmra.mxu1 %vm590_vm1, %v438_v48  ;;  %v503_v53 = vld [vmem:[%s3519_s19 + $0x588] sm:$0xff] }
 0x18d   : > { %v2876_v25 = vsel %vm2404_vm2, %v2369_v14, 0.0  ;;  %3318 = vmatmul.msk.f32.gmra.mxu2 %vm590_vm1, %v502_v31  ;;  %3380 = vmatmul.msk.f32.gmra.mxu3 %vm590_vm1, %v564_v51 }
 0x18e   : > { %v2877_v55 = vadd.f32 %v2876_v25, %v2875_v6 }
 0x190   : > { %v1860_v9 = vpop.f32.mrf.mxu2  ;;  %v2046_v17 = vpop.f32.mrf.mxu3 }
 0x191   : > { %v2047_v49 = vadd.f32 %v3682_v20, %v2046_v17  ;;  %v4170_v50 = vpop.f32.mrf.mxu0  ;;  %v4172_v36 = vpop.f32.mrf.mxu1  ;;  %v1861_v48 = vadd.f32 %v3682_v20, %v1860_v9 }
 0x193   : > { %v2370_v31 = vmax.f32 %v2047_v49, 0.0  ;;  %v2308_v14 = vmax.f32 %v1861_v48, 0.0 }
 0x194   : > { %3190 = vmatmul.msk.f32.gmra.mxu0 %vm590_vm1, %v374_v16  ;;  %3255 = vmatmul.msk.f32.gmra.mxu1 %vm590_vm1, %v439_v39  ;;  %v440_v39 = vld [vmem:[%s3519_s19 + $0x390] sm:$0xff] }
 0x195   : > { %v2878_v6 = vsel %vm2404_vm2, %v2370_v31, 0.0  ;;  %3319 = vmatmul.msk.f32.gmra.mxu2 %vm590_vm1, %v503_v53  ;;  %3381 = vmatmul.msk.f32.gmra.mxu3 %vm590_vm1, %v565_v30  ;;  %v566_v31 = vld [vmem:[%s3519_s19 + $0x780] sm:$0xff]  ;;  %v2750_v53 = vsel %vm2404_vm2, %v2308_v14, 0.0 }
 0x196   : > { %v2879_v51 = vadd.f32 %v2878_v6, %v2877_v55 }
 0x198   : > { %v1863_v25 = vpop.f32.mrf.mxu2  ;;  %v2049_v17 = vpop.f32.mrf.mxu3 }
 0x199   : > { %v1864_v9 = vadd.f32 %v3682_v20, %v1863_v25  ;;  %v2050_v49 = vadd.f32 %v3682_v20, %v2049_v17  ;;  %v4186_v38 = vpop.f32.mrf.mxu0  ;;  %v4188_v16 = vpop.f32.mrf.mxu1 }
 0x19b   : > { %v2309_v52 = vmax.f32 %v1864_v9, 0.0  ;;  %v2371_v30 = vmax.f32 %v2050_v49, 0.0  ;;  %v376_v49 = vld [vmem:[%s3519_s19 + $0x190] sm:$0xff] }
 0x19c   : > { %3191 = vmatmul.msk.f32.gmra.mxu0 %vm590_vm1, %v375_v63  ;;  %3256 = vmatmul.msk.f32.gmra.mxu1 %vm590_vm1, %v440_v39  ;;  %v4206_v63 = vld [vmem:[%s5189_s3] ss:$0 sm:$0xff]  ;;  %v505_v39 = vld [vmem:[%s3519_s19 + $0x598] sm:$0xff] }
 0x19d   : > { %v2751_v20 = vsel %vm2404_vm2, %v2309_v52, 0.0  ;;  %v2880_v55 = vsel %vm2404_vm2, %v2371_v30, 0.0  ;;  %3320 = vmatmul.msk.f32.gmra.mxu2 %vm590_vm1, %v504_v60  ;;  %3382 = vmatmul.msk.f32.gmra.mxu3 %vm590_vm1, %v566_v31  ;;  %v441_v60 = vld [vmem:[%s3519_s19 + $0x398] sm:$0xff]  ;;  %v567_v31 = vld [vmem:[%s3519_s19 + $0x788] sm:$0xff] }
 0x19e   : > { %v2752_v48 = vadd.f32 %v2751_v20, %v2750_v53  ;;  %v4201_v6 = vadd.f32 %v2880_v55, %v2879_v51 }
 0x1a0   : > { %5266 = vst [vmem:[#allocation69_spill] sm:$0xff] %v4201_v6  ;;  %v1866_v14 = vpop.f32.mrf.mxu2  ;;  %v2052_v25 = vpop.f32.mrf.mxu3 }
 0x1a1   : > { %v1867_v17 = vadd.f32 %v4206_v63, %v1866_v14  ;;  %v4209_v9 = vpop.f32.mrf.mxu0  ;;  %v4211_v52 = vpop.f32.mrf.mxu1  ;;  %v2053_v53 = vadd.f32 %v4206_v63, %v2052_v25 }
 0x1a2   : > { %v1483_v23 = vadd.f32 %v4206_v63, %v4209_v9 }
 0x1a3   : > { %v2310_v51 = vmax.f32 %v1867_v17, 0.0  ;;  %v2372_v55 = vmax.f32 %v2053_v53, 0.0 }
 0x1a4   : > { %3192 = vmatmul.msk.f32.gmra.mxu0 %vm590_vm1, %v376_v49  ;;  %3257 = vmatmul.msk.f32.gmra.mxu1 %vm590_vm1, %v441_v60  ;;  %v442_v60 = vld [vmem:[%s3519_s19 + $0x3a0] sm:$0xff] }
 0x1a5   : > { %v2753_v30 = vsel %vm2404_vm2, %v2310_v51, 0.0  ;;  %3321 = vmatmul.msk.f32.gmra.mxu2 %vm590_vm1, %v505_v39  ;;  %3383 = vmatmul.msk.f32.gmra.mxu3 %vm590_vm1, %v567_v31  ;;  %v568_v51 = vld [vmem:[%s3519_s19 + $0x790] sm:$0xff]  ;;  %v2888_v39 = vsel %vm2404_vm2, %v2372_v55, 0.0 }
 0x1a6   : > { %v2754_v20 = vadd.f32 %v2753_v30, %v2752_v48 }
 0x1a8   : > { %v1869_v14 = vpop.f32.mrf.mxu2  ;;  %v2055_v6 = vpop.f32.mrf.mxu3 }
 0x1a9   : > { %v1870_v17 = vadd.f32 %v4206_v63, %v1869_v14  ;;  %v2056_v25 = vadd.f32 %v4206_v63, %v2055_v6  ;;  %v4225_v35 = vpop.f32.mrf.mxu0  ;;  %v4227_v49 = vpop.f32.mrf.mxu1 }
 0x1ab   : > { %v2311_v1 = vmax.f32 %v1870_v17, 0.0  ;;  %v2373_v48 = vmax.f32 %v2056_v25, 0.0 }
 0x1ac   : > { %3193 = vmatmul.msk.f32.gmra.mxu0 %vm590_vm1, %v377_v34  ;;  %3258 = vmatmul.msk.f32.gmra.mxu1 %vm590_vm1, %v442_v60 }
 0x1ad   : > { %v2755_v6 = vsel %vm2404_vm2, %v2311_v1, 0.0  ;;  %v2889_v31 = vsel %vm2404_vm2, %v2373_v48, 0.0  ;;  %3322 = vmatmul.msk.f32.gmra.mxu2 %vm590_vm1, %v506_v26  ;;  %3384 = vmatmul.msk.f32.gmra.mxu3 %vm590_vm1, %v568_v51  ;;  %v443_v1 = vld [vmem:[%s3519_s19 + $0x3a8] sm:$0xff]  ;;  %v569_v48 = vld [vmem:[%s3519_s19 + $0x798] sm:$0xff] }
 0x1ae   : > { %v2756_v53 = vadd.f32 %v2755_v6, %v2754_v20  ;;  %v2890_v30 = vadd.f32 %v2889_v31, %v2888_v39 }
 0x1b0   : > { %v1872_v55 = vpop.f32.mrf.mxu2  ;;  %v2058_v14 = vpop.f32.mrf.mxu3 }
 0x1b1   : > { %v1873_v17 = vadd.f32 %v4206_v63, %v1872_v55  ;;  %v2059_v34 = vadd.f32 %v4206_v63, %v2058_v14  ;;  %v4242_v25 = vpop.f32.mrf.mxu0  ;;  %v4244_v60 = vpop.f32.mrf.mxu1 }
 0x1b3   : > { %v2312_v43 = vmax.f32 %v1873_v17, 0.0  ;;  %v2374_v26 = vmax.f32 %v2059_v34, 0.0 }
 0x1b4   : > { %3194 = vmatmul.msk.f32.gmra.mxu0 %vm590_vm1, %v378_v0  ;;  %3259 = vmatmul.msk.f32.gmra.mxu1 %vm590_vm1, %v443_v1  ;;  %v379_v1 = vld [vmem:[%s3519_s19 + $0x1a8] sm:$0xff] }
 0x1b5   : > { %v2757_v20 = vsel %vm2404_vm2, %v2312_v43, 0.0  ;;  %v2891_v51 = vsel %vm2404_vm2, %v2374_v26, 0.0  ;;  %3323 = vmatmul.msk.f32.gmra.mxu2 %vm590_vm1, %v507_v59  ;;  %3385 = vmatmul.msk.f32.gmra.mxu3 %vm590_vm1, %v569_v48  ;;  %v444_v43 = vld [vmem:[%s3519_s19 + $0x3b0] sm:$0xff]  ;;  %v570_v26 = vld [vmem:[%s3519_s19 + $0x7a0] sm:$0xff] }
 0x1b6   : > { %v2758_v39 = vadd.f32 %v2757_v20, %v2756_v53  ;;  %v2892_v6 = vadd.f32 %v2891_v51, %v2890_v30  ;;  %v1669_v51 = vadd.f32 %v4206_v63, %v4158_v3  ;;  %v571_v3 = vld [vmem:[%s3519_s19 + $0x7a8] sm:$0xff] }
 0x1b8   : > { %v1875_v31 = vpop.f32.mrf.mxu2  ;;  %v2061_v55 = vpop.f32.mrf.mxu3 }
 0x1b9   : > { %v1876_v14 = vadd.f32 %v4206_v63, %v1875_v31  ;;  %v2062_v0 = vadd.f32 %v4206_v63, %v2061_v55  ;;  %v4258_v17 = vpop.f32.mrf.mxu0  ;;  %v4260_v34 = vpop.f32.mrf.mxu1  ;;  %v1672_v31 = vadd.f32 %v4206_v63, %v4172_v36  ;;  %v1675_v36 = vadd.f32 %v4206_v63, %v4188_v16 }
 0x1bb   : > { %v2313_v37 = vmax.f32 %v1876_v14, 0.0  ;;  %v2375_v59 = vmax.f32 %v2062_v0, 0.0  ;;  %v2246_v9 = vmax.f32 %v1675_v36, 0.0  ;;  %v381_v36 = vld [vmem:[%s3519_s19 + $0x1b8] sm:$0xff] }
 0x1bc   : > { %3195 = vmatmul.msk.f32.gmra.mxu0 %vm590_vm1, %v379_v1  ;;  %3260 = vmatmul.msk.f32.gmra.mxu1 %vm590_vm1, %v444_v43  ;;  %v380_v43 = vld [vmem:[%s3519_s19 + $0x1b0] sm:$0xff] }
 0x1bd   : > { %v2759_v53 = vsel %vm2404_vm2, %v2313_v37, 0.0  ;;  %v2893_v30 = vsel %vm2404_vm2, %v2375_v59, 0.0  ;;  %3324 = vmatmul.msk.f32.gmra.mxu2 %vm590_vm1, %v508_v41  ;;  %3386 = vmatmul.msk.f32.gmra.mxu3 %vm590_vm1, %v570_v26  ;;  %v445_v26 = vld [vmem:[%s3519_s19 + $0x3b8] sm:$0xff] }
 0x1be   : > { %v2760_v48 = vadd.f32 %v2759_v53, %v2758_v39  ;;  %v2894_v20 = vadd.f32 %v2893_v30, %v2892_v6  ;;  %v1480_v39 = vadd.f32 %v4206_v63, %v4186_v38  ;;  %v509_v6 = vld [vmem:[%s3519_s19 + $0x5b8] sm:$0xff]  ;;  %v2244_v30 = vmax.f32 %v1669_v51, 0.0 }
 0x1bf   : > { %v1678_v38 = vadd.f32 %v4206_v63, %v4211_v52  ;;  %v1486_v51 = vadd.f32 %v4206_v63, %v4225_v35  ;;  %v1681_v52 = vadd.f32 %v4206_v63, %v4227_v49 }
 0x1c0   : > { %v1878_v55 = vpop.f32.mrf.mxu2  ;;  %v2064_v14 = vpop.f32.mrf.mxu3 }
 0x1c1   : > { %v1879_v37 = vadd.f32 %v4206_v63, %v1878_v55  ;;  %v2065_v0 = vadd.f32 %v4206_v63, %v2064_v14  ;;  %v4278_v1 = vpop.f32.mrf.mxu0  ;;  %v4280_v41 = vpop.f32.mrf.mxu1  ;;  %v1477_v55 = vadd.f32 %v4206_v63, %v4170_v50  ;;  %v2245_v14 = vmax.f32 %v1672_v31, 0.0 }
 0x1c2   : > { %v2181_v50 = vmax.f32 %v1480_v39, 0.0 }
 0x1c3   : > { %v2314_v59 = vmax.f32 %v1879_v37, 0.0  ;;  %v2376_v53 = vmax.f32 %v2065_v0, 0.0  ;;  %v2612_v0 = vsel %vm2404_vm2, %v2244_v30, 0.0  ;;  %v510_v30 = vld [vmem:[%s3519_s19 + $0x5c0] sm:$0xff] }
 0x1c4   : > { %3196 = vmatmul.msk.f32.gmra.mxu0 %vm590_vm1, %v380_v43  ;;  %3261 = vmatmul.msk.f32.gmra.mxu1 %vm590_vm1, %v445_v26  ;;  %v2180_v43 = vmax.f32 %v1477_v55, 0.0  ;;  %v2613_v26 = vsel %vm2404_vm2, %v2245_v14, 0.0  ;;  %v2475_v49 = vsel %vm2404_vm2, %v2181_v50, 0.0  ;;  %v2615_v55 = vsel %vm2404_vm2, %v2246_v9, 0.0 }
 0x1c5   : > { %v2761_v15 = vsel %vm2404_vm2, %v2314_v59, 0.0  ;;  %v2895_v16 = vsel %vm2404_vm2, %v2376_v53, 0.0  ;;  %3325 = vmatmul.msk.f32.gmra.mxu2 %vm590_vm1, %v509_v6  ;;  %3387 = vmatmul.msk.f32.gmra.mxu3 %vm590_vm1, %v571_v3  ;;  %v2182_v3 = vmax.f32 %v1483_v23, 0.0  ;;  %v2247_v59 = vmax.f32 %v1678_v38, 0.0  ;;  %v446_v53 = vld [vmem:[%s3519_s19 + $0x3c0] sm:$0xff] }
 0x1c6   : > { %v2762_v31 = vadd.f32 %v2761_v15, %v2760_v48  ;;  %v2896_v37 = vadd.f32 %v2895_v16, %v2894_v20  ;;  %v2183_v16 = vmax.f32 %v1486_v51, 0.0  ;;  %v2248_v14 = vmax.f32 %v1681_v52, 0.0 }
 0x1c7   : > { %v2614_v23 = vadd.f32 %v2613_v26, %v2612_v0  ;;  %v1489_v38 = vadd.f32 %v4206_v63, %v4242_v25  ;;  %v2474_v50 = vsel %vm2404_vm2, %v2180_v43, 0.0  ;;  %v2477_v51 = vsel %vm2404_vm2, %v2182_v3, 0.0 }
 0x1c8   : > { %v1881_v6 = vpop.f32.mrf.mxu2  ;;  %v2067_v39 = vpop.f32.mrf.mxu3  ;;  %v2617_v9 = vsel %vm2404_vm2, %v2247_v59, 0.0  ;;  %v2476_v25 = vadd.f32 %v2475_v49, %v2474_v50  ;;  %v1492_v43 = vadd.f32 %v4206_v63, %v4258_v17  ;;  %v1687_v3 = vadd.f32 %v4206_v63, %v4260_v34  ;;  %v511_v50 = vld [vmem:[%s3519_s19 + $0x5c8] sm:$0xff] }
 0x1c9   : > { %v1882_v35 = vadd.f32 %v4206_v63, %v1881_v6  ;;  %v2068_v15 = vadd.f32 %v4206_v63, %v2067_v39  ;;  %v1497_v48 = vpop.f32.mrf.mxu0  ;;  %v1692_v20 = vpop.f32.mrf.mxu1  ;;  %v1684_v6 = vadd.f32 %v4206_v63, %v4244_v60  ;;  %v2616_v0 = vadd.f32 %v2615_v55, %v2614_v23 }
 0x1ca   : > { %v2479_v60 = vsel %vm2404_vm2, %v2183_v16, 0.0  ;;  %v2619_v39 = vsel %vm2404_vm2, %v2248_v14, 0.0  ;;  %v2478_v59 = vadd.f32 %v2477_v51, %v2476_v25  ;;  %v573_v51 = vld [vmem:[%s3519_s19 + $0x7b8] sm:$0xff] }
 0x1cb   : > { %v2315_v62 = vmax.f32 %v1882_v35, 0.0  ;;  %v2377_v56 = vmax.f32 %v2068_v15, 0.0  ;;  %v2618_v35 = vadd.f32 %v2617_v9, %v2616_v0  ;;  %v2249_v15 = vmax.f32 %v1684_v6, 0.0 }
 0x1cc   : > { %3197 = vmatmul.msk.f32.gmra.mxu0 %vm590_vm1, %v381_v36  ;;  %3262 = vmatmul.msk.f32.gmra.mxu1 %vm590_vm1, %v446_v53  ;;  %v2480_v55 = vadd.f32 %v2479_v60, %v2478_v59  ;;  %v2185_v9 = vmax.f32 %v1492_v43, 0.0  ;;  %v1693_v60 = vadd.f32 %v4206_v63, %v1692_v20 }
 0x1cd   : > { %v2897_v52 = vsel %vm2404_vm2, %v2377_v56, 0.0  ;;  %3326 = vmatmul.msk.f32.gmra.mxu2 %vm590_vm1, %v510_v30  ;;  %3388 = vmatmul.msk.f32.gmra.mxu3 %vm590_vm1, %v572_v19  ;;  %v2763_v56 = vsel %vm2404_vm2, %v2315_v62, 0.0  ;;  %v3001_v19 = vld [vmem:[%s5190_s4] sm:$0xff]  ;;  %v447_v30 = vld [vmem:[%s3519_s19 + $0x3c8] sm:$0xff]  ;;  %v2620_v14 = vadd.f32 %v2619_v39, %v2618_v35  ;;  %v2621_v0 = vsel %vm2404_vm2, %v2249_v15, 0.0 }
 0x1ce   : > { %v2898_v26 = vadd.f32 %v2897_v52, %v2896_v37  ;;  %v2184_v37 = vmax.f32 %v1489_v38, 0.0  ;;  %3029 = vmatpush.msrb.mxu1 %v3001_v19  ;;  %v382_v62 = vld [vmem:[%s3519_s19 + $0x1c0] sm:$0xff]  ;;  %v2764_v23 = vadd.f32 %v2763_v56, %v2762_v31  ;;  %v2250_v52 = vmax.f32 %v1687_v3, 0.0 }
 0x1cf   : > { %v1495_v19 = vadd.f32 %v4206_v63, %v4278_v1  ;;  %v1498_v31 = vadd.f32 %v4206_v63, %v1497_v48  ;;  %v2483_v59 = vsel %vm2404_vm2, %v2185_v9, 0.0 }
 0x1d0   : > { %v1884_v36 = vpop.f32.mrf.mxu2  ;;  %v2070_v53 = vpop.f32.mrf.mxu3  ;;  %v2481_v25 = vsel %vm2404_vm2, %v2184_v37, 0.0  ;;  %v2623_v48 = vsel %vm2404_vm2, %v2250_v52, 0.0  ;;  %v512_v52 = vld [vmem:[%s3519_s19 + $0x5d0] sm:$0xff] }
 0x1d1   : > { %v1885_v17 = vadd.f32 %v4206_v63, %v1884_v36  ;;  %v2071_v49 = vadd.f32 %v4206_v63, %v2070_v53  ;;  %v1500_v34 = vpop.f32.mrf.mxu0  ;;  %v1695_v16 = vpop.f32.mrf.mxu1  ;;  %v1690_v36 = vadd.f32 %v4206_v63, %v4280_v41  ;;  %v2482_v56 = vadd.f32 %v2481_v25, %v2480_v55 }
 0x1d2   : > { %v2622_v41 = vadd.f32 %v2621_v0, %v2620_v14  ;;  %v2186_v35 = vmax.f32 %v1495_v19, 0.0  ;;  %v1501_v37 = vadd.f32 %v4206_v63, %v1500_v34  ;;  %v1696_v15 = vadd.f32 %v4206_v63, %v1695_v16  ;;  %v574_v34 = vld [vmem:[%s3519_s19 + $0x7c0] sm:$0xff] }
 0x1d3   : > { %v2316_v38 = vmax.f32 %v1885_v17, 0.0  ;;  %v2378_v6 = vmax.f32 %v2071_v49, 0.0  ;;  %v2251_v20 = vmax.f32 %v1690_v36, 0.0  ;;  %v2187_v49 = vmax.f32 %v1498_v31, 0.0 }
 0x1d4   : > { %3198 = vmatmul.msk.f32.gmra.mxu0 %vm590_vm1, %v382_v62  ;;  %3263 = vmatmul.msk.f32.gmra.mxu1 %vm590_vm1, %v447_v30  ;;  %v2624_v16 = vadd.f32 %v2623_v48, %v2622_v41  ;;  %v2485_v0 = vsel %vm2404_vm2, %v2186_v35, 0.0  ;;  %v2188_v36 = vmax.f32 %v1501_v37, 0.0  ;;  %v2253_v31 = vmax.f32 %v1696_v15, 0.0 }
 0x1d5   : > { %v2765_v39 = vsel %vm2404_vm2, %v2316_v38, 0.0  ;;  %v2899_v43 = vsel %vm2404_vm2, %v2378_v6, 0.0  ;;  %3327 = vmatmul.msk.f32.gmra.mxu2 %vm590_vm1, %v511_v50  ;;  %3389 = vmatmul.msk.f32.gmra.mxu3 %vm590_vm1, %v573_v51  ;;  %v448_v50 = vld [vmem:[%s3519_s19 + $0x3d0] sm:$0xff]  ;;  %v2484_v38 = vadd.f32 %v2483_v59, %v2482_v56  ;;  %v2625_v19 = vsel %vm2404_vm2, %v2251_v20, 0.0 }
 0x1d6   : > { %v2766_v1 = vadd.f32 %v2765_v39, %v2764_v23  ;;  %v2900_v3 = vadd.f32 %v2899_v43, %v2898_v26  ;;  %v2252_v26 = vmax.f32 %v1693_v60, 0.0  ;;  %v383_v23 = vld [vmem:[%s3519_s19 + $0x1c8] sm:$0xff]  ;;  %v2487_v60 = vsel %vm2404_vm2, %v2187_v49, 0.0 }
 0x1d7   : > { %v2486_v20 = vadd.f32 %v2485_v0, %v2484_v38  ;;  %v2626_v37 = vadd.f32 %v2625_v19, %v2624_v16  ;;  %v2489_v15 = vsel %vm2404_vm2, %v2188_v36, 0.0  ;;  %v575_v38 = vld [vmem:[%s3519_s19 + $0x7c8] sm:$0xff] }
 0x1d8   : > { %v1887_v53 = vpop.f32.mrf.mxu2  ;;  %v2073_v17 = vpop.f32.mrf.mxu3  ;;  %v2627_v39 = vsel %vm2404_vm2, %v2252_v26, 0.0 }
 0x1d9   : > { %v1888_v62 = vadd.f32 %v4206_v63, %v1887_v53  ;;  %v2074_v30 = vadd.f32 %v4206_v63, %v2073_v17  ;;  %v1503_v55 = vpop.f32.mrf.mxu0  ;;  %v1698_v14 = vpop.f32.mrf.mxu1  ;;  %v2629_v53 = vsel %vm2404_vm2, %v2253_v31, 0.0  ;;  %v2488_v26 = vadd.f32 %v2487_v60, %v2486_v20 }
 0x1da   : > { %v1504_v51 = vadd.f32 %v4206_v63, %v1503_v55  ;;  %v1699_v9 = vadd.f32 %v4206_v63, %v1698_v14  ;;  %v384_v14 = vld [vmem:[%s3519_s19 + $0x1d0] sm:$0xff] }
 0x1db   : > { %v2317_v6 = vmax.f32 %v1888_v62, 0.0  ;;  %v2379_v25 = vmax.f32 %v2074_v30, 0.0  ;;  %v2628_v62 = vadd.f32 %v2627_v39, %v2626_v37  ;;  %v2490_v16 = vadd.f32 %v2489_v15, %v2488_v26 }
 0x1dc   : > { %3199 = vmatmul.msk.f32.gmra.mxu0 %vm590_vm1, %v383_v23  ;;  %3264 = vmatmul.msk.f32.gmra.mxu1 %vm590_vm1, %v448_v50  ;;  %v2189_v48 = vmax.f32 %v1504_v51, 0.0  ;;  %v2254_v35 = vmax.f32 %v1699_v9, 0.0  ;;  %v449_v23 = vld [vmem:[%s3519_s19 + $0x3d8] sm:$0xff] }
 0x1dd   : > { %v2767_v43 = vsel %vm2404_vm2, %v2317_v6, 0.0  ;;  %v2901_v56 = vsel %vm2404_vm2, %v2379_v25, 0.0  ;;  %3328 = vmatmul.msk.f32.gmra.mxu2 %vm590_vm1, %v512_v52  ;;  %3390 = vmatmul.msk.f32.gmra.mxu3 %vm590_vm1, %v574_v34  ;;  %v513_v34 = vld [vmem:[%s3519_s19 + $0x5d8] sm:$0xff]  ;;  %v2630_v6 = vadd.f32 %v2629_v53, %v2628_v62 }
 0x1de   : > { %v2768_v41 = vadd.f32 %v2767_v43, %v2766_v1  ;;  %v2902_v59 = vadd.f32 %v2901_v56, %v2900_v3  ;;  %v2491_v50 = vsel %vm2404_vm2, %v2189_v48, 0.0  ;;  %v2631_v51 = vsel %vm2404_vm2, %v2254_v35, 0.0 }
 0x1df   : > { %v2492_v31 = vadd.f32 %v2491_v50, %v2490_v16  ;;  %v2632_v60 = vadd.f32 %v2631_v51, %v2630_v6 }
 0x1e0   : > { %v1890_v17 = vpop.f32.mrf.mxu2  ;;  %v2076_v49 = vpop.f32.mrf.mxu3 }
 0x1e1   : > { %v1891_v30 = vadd.f32 %v4206_v63, %v1890_v17  ;;  %v2077_v1 = vadd.f32 %v4206_v63, %v2076_v49  ;;  %v1506_v3 = vpop.f32.mrf.mxu0  ;;  %v1701_v55 = vpop.f32.mrf.mxu1 }
 0x1e2   : > { %v1507_v9 = vadd.f32 %v4206_v63, %v1506_v3  ;;  %v1702_v52 = vadd.f32 %v4206_v63, %v1701_v55  ;;  %v450_v3 = vld [vmem:[%s3519_s19 + $0x3e0] sm:$0xff] }
 0x1e3   : > { %v2318_v25 = vmax.f32 %v1891_v30, 0.0  ;;  %v2380_v0 = vmax.f32 %v2077_v1, 0.0  ;;  %v385_v1 = vld [vmem:[%s3519_s19 + $0x1d8] sm:$0xff]  ;;  %v514_v55 = vld [vmem:[%s3519_s19 + $0x5e0] sm:$0xff] }
 0x1e4   : > { %v2190_v19 = vmax.f32 %v1507_v9, 0.0  ;;  %v2255_v36 = vmax.f32 %v1702_v52, 0.0  ;;  %3200 = vmatmul.msk.f32.gmra.mxu0 %vm590_vm1, %v384_v14  ;;  %3265 = vmatmul.msk.f32.gmra.mxu1 %vm590_vm1, %v449_v23  ;;  %v576_v14 = vld [vmem:[%s3519_s19 + $0x7d0] sm:$0xff] }
 0x1e5   : > { %v2769_v39 = vsel %vm2404_vm2, %v2318_v25, 0.0  ;;  %v2903_v43 = vsel %vm2404_vm2, %v2380_v0, 0.0  ;;  %3329 = vmatmul.msk.f32.gmra.mxu2 %vm590_vm1, %v513_v34  ;;  %3391 = vmatmul.msk.f32.gmra.mxu3 %vm590_vm1, %v575_v38 }
 0x1e6   : > { %v2770_v56 = vadd.f32 %v2769_v39, %v2768_v41  ;;  %v2904_v48 = vadd.f32 %v2903_v43, %v2902_v59  ;;  %v2493_v35 = vsel %vm2404_vm2, %v2190_v19, 0.0  ;;  %v2633_v20 = vsel %vm2404_vm2, %v2255_v36, 0.0 }
 0x1e7   : > { %v2494_v37 = vadd.f32 %v2493_v35, %v2492_v31  ;;  %v2634_v15 = vadd.f32 %v2633_v20, %v2632_v60  ;;  %v386_v20 = vld [vmem:[%s3519_s19 + $0x1e0] sm:$0xff] }
 0x1e8   : > { %v1893_v53 = vpop.f32.mrf.mxu2  ;;  %v2079_v17 = vpop.f32.mrf.mxu3 }
 0x1e9   : > { %v1894_v49 = vadd.f32 %v4206_v63, %v1893_v53  ;;  %v2080_v26 = vadd.f32 %v4206_v63, %v2079_v17  ;;  %v1509_v62 = vpop.f32.mrf.mxu0  ;;  %v1704_v30 = vpop.f32.mrf.mxu1  ;;  %v451_v53 = vld [vmem:[%s3519_s19 + $0x3e8] sm:$0xff] }
 0x1ea   : > { %v1510_v41 = vadd.f32 %v4206_v63, %v1509_v62  ;;  %v1705_v59 = vadd.f32 %v4206_v63, %v1704_v30  ;;  %v515_v17 = vld [vmem:[%s3519_s19 + $0x5e8] sm:$0xff] }
 0x1eb   : > { %v2319_v23 = vmax.f32 %v1894_v49, 0.0  ;;  %v2381_v50 = vmax.f32 %v2080_v26, 0.0  ;;  %v577_v49 = vld [vmem:[%s3519_s19 + $0x7d8] sm:$0xff] }
 0x1ec   : > { %v2191_v51 = vmax.f32 %v1510_v41, 0.0  ;;  %v2256_v9 = vmax.f32 %v1705_v59, 0.0  ;;  %3201 = vmatmul.msk.f32.gmra.mxu0 %vm590_vm1, %v385_v1  ;;  %3266 = vmatmul.msk.f32.gmra.mxu1 %vm590_vm1, %v450_v3 }
 0x1ed   : > { %v2771_v52 = vsel %vm2404_vm2, %v2319_v23, 0.0  ;;  %v2905_v34 = vsel %vm2404_vm2, %v2381_v50, 0.0  ;;  %3330 = vmatmul.msk.f32.gmra.mxu2 %vm590_vm1, %v514_v55  ;;  %3392 = vmatmul.msk.f32.gmra.mxu3 %vm590_vm1, %v576_v14 }
 0x1ee   : > { %v2772_v38 = vadd.f32 %v2771_v52, %v2770_v56  ;;  %v2906_v16 = vadd.f32 %v2905_v34, %v2904_v48  ;;  %v2495_v6 = vsel %vm2404_vm2, %v2191_v51, 0.0  ;;  %v2635_v25 = vsel %vm2404_vm2, %v2256_v9, 0.0 }
 0x1ef   : > { %v2496_v0 = vadd.f32 %v2495_v6, %v2494_v37  ;;  %v2636_v19 = vadd.f32 %v2635_v25, %v2634_v15  ;;  %v387_v25 = vld [vmem:[%s3519_s19 + $0x1e8] sm:$0xff] }
 0x1f0   : > { %v1896_v36 = vpop.f32.mrf.mxu2  ;;  %v2082_v31 = vpop.f32.mrf.mxu3 }
 0x1f1   : > { %v1897_v60 = vadd.f32 %v4206_v63, %v1896_v36  ;;  %v2083_v39 = vadd.f32 %v4206_v63, %v2082_v31  ;;  %v1512_v43 = vpop.f32.mrf.mxu0  ;;  %v1707_v35 = vpop.f32.mrf.mxu1  ;;  %v452_v36 = vld [vmem:[%s3519_s19 + $0x3f0] sm:$0xff] }
 0x1f2   : > { %v1513_v56 = vadd.f32 %v4206_v63, %v1512_v43  ;;  %v1708_v48 = vadd.f32 %v4206_v63, %v1707_v35  ;;  %v516_v31 = vld [vmem:[%s3519_s19 + $0x5f0] sm:$0xff] }
 0x1f3   : > { %v2320_v26 = vmax.f32 %v1897_v60, 0.0  ;;  %v2382_v62 = vmax.f32 %v2083_v39, 0.0  ;;  %v578_v60 = vld [vmem:[%s3519_s19 + $0x7e0] sm:$0xff] }
 0x1f4   : > { %v2192_v37 = vmax.f32 %v1513_v56, 0.0  ;;  %v2257_v15 = vmax.f32 %v1708_v48, 0.0  ;;  %3202 = vmatmul.msk.f32.gmra.mxu0 %vm590_vm1, %v386_v20  ;;  %3267 = vmatmul.msk.f32.gmra.mxu1 %vm590_vm1, %v451_v53 }
 0x1f5   : > { %v2773_v30 = vsel %vm2404_vm2, %v2320_v26, 0.0  ;;  %v2907_v1 = vsel %vm2404_vm2, %v2382_v62, 0.0  ;;  %3331 = vmatmul.msk.f32.gmra.mxu2 %vm590_vm1, %v515_v17  ;;  %3393 = vmatmul.msk.f32.gmra.mxu3 %vm590_vm1, %v577_v49 }
 0x1f6   : > { %v2774_v3 = vadd.f32 %v2773_v30, %v2772_v38  ;;  %v2908_v41 = vadd.f32 %v2907_v1, %v2906_v16  ;;  %v2497_v59 = vsel %vm2404_vm2, %v2192_v37, 0.0  ;;  %v2637_v55 = vsel %vm2404_vm2, %v2257_v15, 0.0 }
 0x1f7   : > { %v2498_v14 = vadd.f32 %v2497_v59, %v2496_v0  ;;  %v2638_v23 = vadd.f32 %v2637_v55, %v2636_v19  ;;  %v388_v55 = vld [vmem:[%s3519_s19 + $0x1f0] sm:$0xff] }
 0x1f8   : > { %v1899_v50 = vpop.f32.mrf.mxu2  ;;  %v2085_v51 = vpop.f32.mrf.mxu3 }
 0x1f9   : > { %v1900_v9 = vadd.f32 %v4206_v63, %v1899_v50  ;;  %v2086_v52 = vadd.f32 %v4206_v63, %v2085_v51  ;;  %v1515_v34 = vpop.f32.mrf.mxu0  ;;  %v1710_v6 = vpop.f32.mrf.mxu1  ;;  %v453_v50 = vld [vmem:[%s3519_s19 + $0x3f8] sm:$0xff]  ;;  %v579_v51 = vld [vmem:[%s3519_s19 + $0x7e8] sm:$0xff] }
 0x1fa   : > { %v1516_v38 = vadd.f32 %v4206_v63, %v1515_v34  ;;  %v1711_v16 = vadd.f32 %v4206_v63, %v1710_v6 }
 0x1fb   : > { %v2321_v39 = vmax.f32 %v1900_v9, 0.0  ;;  %v2383_v43 = vmax.f32 %v2086_v52, 0.0 }
 0x1fc   : > { %v2193_v0 = vmax.f32 %v1516_v38, 0.0  ;;  %v2258_v19 = vmax.f32 %v1711_v16, 0.0  ;;  %3203 = vmatmul.msk.f32.gmra.mxu0 %vm590_vm1, %v387_v25  ;;  %3268 = vmatmul.msk.f32.gmra.mxu1 %vm590_vm1, %v452_v36 }
 0x1fd   : > { %v2775_v35 = vsel %vm2404_vm2, %v2321_v39, 0.0  ;;  %v2909_v20 = vsel %vm2404_vm2, %v2383_v43, 0.0  ;;  %3332 = vmatmul.msk.f32.gmra.mxu2 %vm590_vm1, %v516_v31  ;;  %3394 = vmatmul.msk.f32.gmra.mxu3 %vm590_vm1, %v578_v60 }
 0x1fe   : > { %v2776_v53 = vadd.f32 %v2775_v35, %v2774_v3  ;;  %v2910_v56 = vadd.f32 %v2909_v20, %v2908_v41  ;;  %v2499_v48 = vsel %vm2404_vm2, %v2193_v0, 0.0  ;;  %v2639_v17 = vsel %vm2404_vm2, %v2258_v19, 0.0 }
 0x1ff   : > { %v2500_v49 = vadd.f32 %v2499_v48, %v2498_v14  ;;  %v2640_v26 = vadd.f32 %v2639_v17, %v2638_v23  ;;  %v389_v48 = vld [vmem:[%s3519_s19 + $0x1f8] sm:$0xff]  ;;  %v454_v17 = vld [vmem:[%s3519_s19 + $0x400] sm:$0xff] }
 0x200   : > { %v1902_v62 = vpop.f32.mrf.mxu2  ;;  %v2088_v37 = vpop.f32.mrf.mxu3 }
 0x201   : > { %v1903_v15 = vadd.f32 %v4206_v63, %v1902_v62  ;;  %v2089_v30 = vadd.f32 %v4206_v63, %v2088_v37  ;;  %v1518_v1 = vpop.f32.mrf.mxu0  ;;  %v1713_v59 = vpop.f32.mrf.mxu1  ;;  %v580_v62 = vld [vmem:[%s3519_s19 + $0x7f0] sm:$0xff] }
 0x202   : > { %v1519_v3 = vadd.f32 %v4206_v63, %v1518_v1  ;;  %v1714_v41 = vadd.f32 %v4206_v63, %v1713_v59 }
 0x203   : > { %v2322_v9 = vmax.f32 %v1903_v15, 0.0  ;;  %v2384_v52 = vmax.f32 %v2089_v30, 0.0 }
 0x204   : > { %v2194_v34 = vmax.f32 %v1519_v3, 0.0  ;;  %v2259_v14 = vmax.f32 %v1714_v41, 0.0  ;;  %3204 = vmatmul.msk.f32.gmra.mxu0 %vm590_vm1, %v388_v55  ;;  %3269 = vmatmul.msk.f32.gmra.mxu1 %vm590_vm1, %v453_v50 }
 0x205   : > { %v2777_v23 = vsel %vm2404_vm2, %v2322_v9, 0.0  ;;  %v2911_v6 = vsel %vm2404_vm2, %v2384_v52, 0.0  ;;  %3395 = vmatmul.msk.f32.gmra.mxu3 %vm590_vm1, %v579_v51 }
 0x206   : > { %v2778_v25 = vadd.f32 %v2777_v23, %v2776_v53  ;;  %v2912_v36 = vadd.f32 %v2911_v6, %v2910_v56  ;;  %v2501_v38 = vsel %vm2404_vm2, %v2194_v34, 0.0  ;;  %v2641_v16 = vsel %vm2404_vm2, %v2259_v14, 0.0 }
 0x207   : > { %v2502_v31 = vadd.f32 %v2501_v38, %v2500_v49  ;;  %v2642_v60 = vadd.f32 %v2641_v16, %v2640_v26  ;;  %v390_v38 = vld [vmem:[%s3519_s19 + $0x200] sm:$0xff] }
 0x208   : > { %v1905_v39 = vpop.f32.mrf.mxu2  ;;  %v2091_v43 = vpop.f32.mrf.mxu3 }
 0x209   : > { %v1906_v0 = vadd.f32 %v4206_v63, %v1905_v39  ;;  %v2092_v19 = vadd.f32 %v4206_v63, %v2091_v43  ;;  %v1521_v35 = vpop.f32.mrf.mxu0  ;;  %v1716_v20 = vpop.f32.mrf.mxu1 }
 0x20a   : > { %v1522_v53 = vadd.f32 %v4206_v63, %v1521_v35  ;;  %v1717_v56 = vadd.f32 %v4206_v63, %v1716_v20 }
 0x20b   : > { %v2323_v37 = vmax.f32 %v1906_v0, 0.0  ;;  %v2385_v15 = vmax.f32 %v2092_v19, 0.0 }
 0x20c   : > { %v2195_v30 = vmax.f32 %v1522_v53, 0.0  ;;  %v2260_v49 = vmax.f32 %v1717_v56, 0.0  ;;  %3205 = vmatmul.msk.f32.gmra.mxu0 %vm590_vm1, %v389_v48  ;;  %3270 = vmatmul.msk.f32.gmra.mxu1 %vm590_vm1, %v454_v17 }
 0x20d   : > { %v2779_v26 = vsel %vm2404_vm2, %v2323_v37, 0.0  ;;  %v2913_v1 = vsel %vm2404_vm2, %v2385_v15, 0.0  ;;  %3396 = vmatmul.msk.f32.gmra.mxu3 %vm590_vm1, %v580_v62 }
 0x20e   : > { %v2780_v59 = vadd.f32 %v2779_v26, %v2778_v25  ;;  %v2914_v55 = vadd.f32 %v2913_v1, %v2912_v36  ;;  %v2503_v50 = vsel %vm2404_vm2, %v2195_v30, 0.0  ;;  %v2643_v3 = vsel %vm2404_vm2, %v2260_v49, 0.0  ;;  %v581_v36 = vld [vmem:[%s3519_s19 + $0x7f8] sm:$0xff] }
 0x20f   : > { %v2504_v41 = vadd.f32 %v2503_v50, %v2502_v31  ;;  %v2644_v51 = vadd.f32 %v2643_v3, %v2642_v60 }
 0x210   : > { %v1908_v9 = vpop.f32.mrf.mxu2  ;;  %v2094_v52 = vpop.f32.mrf.mxu3 }
 0x211   : > { %v1909_v34 = vadd.f32 %v4206_v63, %v1908_v9  ;;  %v2095_v14 = vadd.f32 %v4206_v63, %v2094_v52  ;;  %v1524_v23 = vpop.f32.mrf.mxu0  ;;  %v1719_v6 = vpop.f32.mrf.mxu1 }
 0x212   : > { %v1525_v16 = vadd.f32 %v4206_v63, %v1524_v23  ;;  %v1720_v25 = vadd.f32 %v4206_v63, %v1719_v6 }
 0x213   : > { %v2324_v39 = vmax.f32 %v1909_v34, 0.0  ;;  %v2386_v43 = vmax.f32 %v2095_v14, 0.0 }
 0x214   : > { %v2196_v0 = vmax.f32 %v1525_v16, 0.0  ;;  %v2261_v19 = vmax.f32 %v1720_v25, 0.0  ;;  %3206 = vmatmul.msk.f32.gmra.mxu0 %vm590_vm1, %v390_v38 }
 0x215   : > { %v2781_v31 = vsel %vm2404_vm2, %v2324_v39, 0.0  ;;  %v2915_v60 = vsel %vm2404_vm2, %v2386_v43, 0.0  ;;  %3397 = vmatmul.msk.f32.gmra.mxu3 %vm590_vm1, %v581_v36 }
 0x216   : > { %v2782_v35 = vadd.f32 %v2781_v31, %v2780_v59  ;;  %v2916_v20 = vadd.f32 %v2915_v60, %v2914_v55  ;;  %v2505_v48 = vsel %vm2404_vm2, %v2196_v0, 0.0  ;;  %v2645_v17 = vsel %vm2404_vm2, %v2261_v19, 0.0 }
 0x217   : > { %v2506_v53 = vadd.f32 %v2505_v48, %v2504_v41  ;;  %v2646_v56 = vadd.f32 %v2645_v17, %v2644_v51 }
 0x218   : > { %v1911_v62 = vpop.f32.mrf.mxu2  ;;  %v2097_v37 = vpop.f32.mrf.mxu3 }
 0x219   : > { %v1912_v15 = vadd.f32 %v4206_v63, %v1911_v62  ;;  %v2098_v30 = vadd.f32 %v4206_v63, %v2097_v37  ;;  %v1527_v49 = vpop.f32.mrf.mxu0  ;;  %v1722_v26 = vpop.f32.mrf.mxu1 }
 0x21a   : > { %v1528_v1 = vadd.f32 %v4206_v63, %v1527_v49  ;;  %v1723_v50 = vadd.f32 %v4206_v63, %v1722_v26 }
 0x21b   : > { %v2325_v59 = vmax.f32 %v1912_v15, 0.0  ;;  %v2387_v55 = vmax.f32 %v2098_v30, 0.0 }
 0x21c   : > { %v2197_v3 = vmax.f32 %v1528_v1, 0.0  ;;  %v2262_v9 = vmax.f32 %v1723_v50, 0.0 }
 0x21d   : > { %v2783_v52 = vsel %vm2404_vm2, %v2325_v59, 0.0  ;;  %v2917_v41 = vsel %vm2404_vm2, %v2387_v55, 0.0 }
 0x21e   : > { %v2784_v51 = vadd.f32 %v2783_v52, %v2782_v35  ;;  %v2918_v34 = vadd.f32 %v2917_v41, %v2916_v20  ;;  %v2507_v14 = vsel %vm2404_vm2, %v2197_v3, 0.0  ;;  %v2647_v23 = vsel %vm2404_vm2, %v2262_v9, 0.0 }
 0x21f   : > { %v2508_v6 = vadd.f32 %v2507_v14, %v2506_v53  ;;  %v2648_v38 = vadd.f32 %v2647_v23, %v2646_v56 }
 0x220   : > { %v1914_v16 = vpop.f32.mrf.mxu2  ;;  %v2100_v25 = vpop.f32.mrf.mxu3 }
 0x221   : > { %v1915_v36 = vadd.f32 %v4206_v63, %v1914_v16  ;;  %v2101_v39 = vadd.f32 %v4206_v63, %v2100_v25  ;;  %v1530_v43 = vpop.f32.mrf.mxu0  ;;  %v1725_v0 = vpop.f32.mrf.mxu1 }
 0x222   : > { %v1531_v19 = vadd.f32 %v4206_v63, %v1530_v43  ;;  %v1726_v31 = vadd.f32 %v4206_v63, %v1725_v0 }
 0x223   : > { %v2326_v60 = vmax.f32 %v1915_v36, 0.0  ;;  %v2388_v35 = vmax.f32 %v2101_v39, 0.0 }
 0x224   : > { %v2198_v20 = vmax.f32 %v1531_v19, 0.0  ;;  %v2263_v48 = vmax.f32 %v1726_v31, 0.0 }
 0x225   : > { %v2785_v17 = vsel %vm2404_vm2, %v2326_v60, 0.0  ;;  %v2919_v53 = vsel %vm2404_vm2, %v2388_v35, 0.0 }
 0x226   : > { %v2786_v56 = vadd.f32 %v2785_v17, %v2784_v51  ;;  %v2920_v62 = vadd.f32 %v2919_v53, %v2918_v34  ;;  %v2509_v37 = vsel %vm2404_vm2, %v2198_v20, 0.0  ;;  %v2649_v15 = vsel %vm2404_vm2, %v2263_v48, 0.0 }
 0x227   : > { %v2510_v30 = vadd.f32 %v2509_v37, %v2508_v6  ;;  %v2650_v49 = vadd.f32 %v2649_v15, %v2648_v38 }
 0x228   : > { %v1917_v26 = vpop.f32.mrf.mxu2  ;;  %v2103_v1 = vpop.f32.mrf.mxu3 }
 0x229   : > { %v1918_v50 = vadd.f32 %v4206_v63, %v1917_v26  ;;  %v2104_v59 = vadd.f32 %v4206_v63, %v2103_v1  ;;  %v1533_v55 = vpop.f32.mrf.mxu0  ;;  %v1728_v3 = vpop.f32.mrf.mxu1 }
 0x22a   : > { %v1534_v9 = vadd.f32 %v4206_v63, %v1533_v55  ;;  %v1729_v52 = vadd.f32 %v4206_v63, %v1728_v3 }
 0x22b   : > { %v2327_v41 = vmax.f32 %v1918_v50, 0.0  ;;  %v2389_v51 = vmax.f32 %v2104_v59, 0.0 }
 0x22c   : > { %v2199_v34 = vmax.f32 %v1534_v9, 0.0  ;;  %v2264_v14 = vmax.f32 %v1729_v52, 0.0 }
 0x22d   : > { %v2787_v23 = vsel %vm2404_vm2, %v2327_v41, 0.0  ;;  %v2921_v6 = vsel %vm2404_vm2, %v2389_v51, 0.0 }
 0x22e   : > { %v4510_v38 = vadd.f32 %v2787_v23, %v2786_v56  ;;  %v2922_v16 = vadd.f32 %v2921_v6, %v2920_v62  ;;  %v2511_v25 = vsel %vm2404_vm2, %v2199_v34, 0.0  ;;  %v2651_v36 = vsel %vm2404_vm2, %v2264_v14, 0.0 }
 0x22f   : > { %v2512_v39 = vadd.f32 %v2511_v25, %v2510_v30  ;;  %v2652_v43 = vadd.f32 %v2651_v36, %v2650_v49 }
 0x230   : > { %v4514_v0 = vpop.f32.mrf.mxu2  ;;  %v2106_v19 = vpop.f32.mrf.mxu3 }
 0x231   : > { %v2107_v31 = vadd.f32 %v4206_v63, %v2106_v19  ;;  %v1536_v60 = vpop.f32.mrf.mxu0  ;;  %v1731_v35 = vpop.f32.mrf.mxu1 }
 0x232   : > { %v1537_v20 = vadd.f32 %v4206_v63, %v1536_v60  ;;  %v1732_v48 = vadd.f32 %v4206_v63, %v1731_v35 }
 0x233   : > { %v2390_v17 = vmax.f32 %v2107_v31, 0.0 }
 0x234   : > { %v2200_v53 = vmax.f32 %v1537_v20, 0.0  ;;  %v2265_v56 = vmax.f32 %v1732_v48, 0.0 }
 0x235   : > { %v2923_v62 = vsel %vm2404_vm2, %v2390_v17, 0.0 }
 0x236   : > { %v2924_v37 = vadd.f32 %v2923_v62, %v2922_v16  ;;  %v2513_v15 = vsel %vm2404_vm2, %v2200_v53, 0.0  ;;  %v2653_v30 = vsel %vm2404_vm2, %v2265_v56, 0.0 }
 0x237   : > { %v2514_v49 = vadd.f32 %v2513_v15, %v2512_v39  ;;  %v2654_v26 = vadd.f32 %v2653_v30, %v2652_v43  ;;  %v4533_v39 = vld [vmem:[%s5189_s3] ss:$0 sm:$0xff] }
 0x238   : > { %v4522_v1 = vpop.f32.mrf.mxu2  ;;  %v2109_v50 = vpop.f32.mrf.mxu3  ;;  %v1576_v31 = vadd.f32 %v4533_v39, %v3651_v5  ;;  %v1384_v60 = vadd.f32 %v4533_v39, %v3665_v12  ;;  %v1768_v17 = vadd.f32 %v4533_v39, %v3661_v10  ;;  %v1954_v56 = vadd.f32 %v4533_v39, %v3663_v11 }
 0x239   : > { %v2110_v59 = vadd.f32 %v4206_v63, %v2109_v50  ;;  %v1539_v55 = vpop.f32.mrf.mxu0  ;;  %v1734_v3 = vpop.f32.mrf.mxu1  ;;  %v1579_v5 = vadd.f32 %v4533_v39, %v3667_v13  ;;  %v1387_v10 = vadd.f32 %v4533_v39, %v3684_v21 }
 0x23a   : > { %v1540_v9 = vadd.f32 %v4206_v63, %v1539_v55  ;;  %v1735_v52 = vadd.f32 %v4206_v63, %v1734_v3  ;;  %v1381_v63 = vadd.f32 %v4533_v39, %v3649_v4  ;;  %v2213_v30 = vmax.f32 %v1576_v31, 0.0 }
 0x23b   : > { %v2391_v41 = vmax.f32 %v2110_v59, 0.0  ;;  %v2277_v50 = vmax.f32 %v1768_v17, 0.0  ;;  %v2339_v13 = vmax.f32 %v1954_v56, 0.0  ;;  %v2214_v3 = vmax.f32 %v1579_v5, 0.0 }
 0x23c   : > { %v2201_v51 = vmax.f32 %v1540_v9, 0.0  ;;  %v2266_v34 = vmax.f32 %v1735_v52, 0.0  ;;  %v1393_v56 = vadd.f32 %v4533_v39, %v3717_v45  ;;  %v1396_v45 = vadd.f32 %v4533_v39, %v3733_v57 }
 0x23d   : > { %v2925_v14 = vsel %vm2404_vm2, %v2391_v41, 0.0  ;;  %v1771_v41 = vadd.f32 %v4533_v39, %v3677_v18  ;;  %v1582_v18 = vadd.f32 %v4533_v39, %v3686_v22  ;;  %v4581_v31 = vsel %vm2404_vm2, %v2339_v13, 0.0 }
 0x23e   : > { %v2926_v23 = vadd.f32 %v2925_v14, %v2924_v37  ;;  %v2515_v6 = vsel %vm2404_vm2, %v2201_v51, 0.0  ;;  %v2655_v16 = vsel %vm2404_vm2, %v2266_v34, 0.0  ;;  %v2148_v37 = vmax.f32 %v1381_v63, 0.0 }
 0x23f   : > { %v2516_v25 = vadd.f32 %v2515_v6, %v2514_v49  ;;  %v2656_v36 = vadd.f32 %v2655_v16, %v2654_v26  ;;  %v2149_v49 = vmax.f32 %v1384_v60, 0.0  ;;  %v1390_v51 = vadd.f32 %v4533_v39, %v3700_v32 }
 0x240   : > { %v4537_v43 = vpop.f32.mrf.mxu2  ;;  %v2112_v19 = vpop.f32.mrf.mxu3  ;;  %v2405_v34 = vsel %vm2404_vm2, %v2148_v37, 0.0  ;;  %v4568_v14 = vsel %vm2404_vm2, %v2213_v30, 0.0  ;;  %v2150_v6 = vmax.f32 %v1387_v10, 0.0  ;;  %v1774_v32 = vadd.f32 %v4533_v39, %v3697_v29 }
 0x241   : > { %v2113_v35 = vadd.f32 %v4533_v39, %v2112_v19  ;;  %v1542_v20 = vpop.f32.mrf.mxu0  ;;  %v1737_v48 = vpop.f32.mrf.mxu1  ;;  %v4578_v19 = vsel %vm2404_vm2, %v2277_v50, 0.0  ;;  %v4584_v60 = vsel %vm2404_vm2, %v2214_v3, 0.0  ;;  %v2278_v22 = vmax.f32 %v1771_v41, 0.0 }
 0x242   : > { %v1543_v53 = vadd.f32 %v4533_v39, %v1542_v20  ;;  %v1738_v4 = vadd.f32 %v4533_v39, %v1737_v48  ;;  %v2151_v20 = vmax.f32 %v1390_v51, 0.0  ;;  %v2215_v5 = vmax.f32 %v1582_v18, 0.0 }
 0x243   : > { %v2392_v62 = vmax.f32 %v2113_v35, 0.0  ;;  %v1585_v35 = vadd.f32 %v4533_v39, %v3702_v33  ;;  %v4603_v10 = vsel %vm2404_vm2, %v2278_v22, 0.0  ;;  %v1591_v13 = vadd.f32 %v4533_v39, %v3735_v58 }
 0x244   : > { %v2202_v12 = vmax.f32 %v1543_v53, 0.0  ;;  %v2267_v15 = vmax.f32 %v1738_v4, 0.0  ;;  %v2408_v53 = vsel %vm2404_vm2, %v2150_v6, 0.0  ;;  %v1777_v4 = vadd.f32 %v4533_v39, %v3714_v42 }
 0x245   : > { %v2927_v26 = vsel %vm2404_vm2, %v2392_v62, 0.0  ;;  %v2279_v62 = vmax.f32 %v1774_v32, 0.0  ;;  %v2410_v42 = vsel %vm2404_vm2, %v2151_v20, 0.0  ;;  %v1399_v57 = vadd.f32 %v4533_v39, %v3749_v7 }
 0x246   : > { %v4555_v59 = vadd.f32 %v2927_v26, %v2926_v23  ;;  %v2517_v11 = vsel %vm2404_vm2, %v2202_v12, 0.0  ;;  %v2657_v55 = vsel %vm2404_vm2, %v2267_v15, 0.0  ;;  %v2406_v23 = vsel %vm2404_vm2, %v2149_v49, 0.0 }
 0x247   : > { %v2518_v9 = vadd.f32 %v2517_v11, %v2516_v25  ;;  %v2658_v52 = vadd.f32 %v2657_v55, %v2656_v36  ;;  %v2407_v17 = vadd.f32 %v2406_v23, %v2405_v34  ;;  %v2216_v12 = vmax.f32 %v1585_v35, 0.0 }
 0x248   : > { %5267 = vst [vmem:[#allocation70_spill] sm:$0xff] %v4555_v59  ;;  %v4563_v21 = vpop.f32.mrf.mxu2  ;;  %v1588_v15 = vadd.f32 %v4533_v39, %v3719_v46  ;;  %v2280_v11 = vmax.f32 %v1777_v4, 0.0  ;;  %v2152_v55 = vmax.f32 %v1393_v56, 0.0  ;;  %v1780_v46 = vadd.f32 %v4533_v39, %v3730_v54  ;;  %v3035_v56 = vld [vmem:[%s5192_s6] sm:$0xff] }
 0x249   : > { %v1545_v16 = vpop.f32.mrf.mxu0  ;;  %v1740_v25 = vpop.f32.mrf.mxu1  ;;  %v2409_v26 = vadd.f32 %v2408_v53, %v2407_v17  ;;  %v4623_v34 = vsel %vm2404_vm2, %v2279_v62, 0.0  ;;  %v4626_v54 = vsel %vm2404_vm2, %v2216_v12, 0.0  ;;  %v2153_v6 = vmax.f32 %v1396_v45, 0.0  ;;  %3060 = vmatpush.msrb.mxu2 %v3035_v56 }
 0x24a   : > { %v1546_v36 = vadd.f32 %v4533_v39, %v1545_v16  ;;  %v1741_v63 = vadd.f32 %v4533_v39, %v1740_v25  ;;  %v2217_v58 = vmax.f32 %v1588_v15, 0.0  ;;  %v1783_v7 = vadd.f32 %v4533_v39, %v3746_v2 }
 0x24b   : > { %v2411_v23 = vadd.f32 %v2410_v42, %v2409_v26  ;;  %v4636_v18 = vsel %vm2404_vm2, %v2280_v11, 0.0  ;;  %v2412_v32 = vsel %vm2404_vm2, %v2152_v55, 0.0  ;;  %v2154_v35 = vmax.f32 %v1399_v57, 0.0 }
 0x24c   : > { %v2203_v48 = vmax.f32 %v1546_v36, 0.0  ;;  %v2268_v29 = vmax.f32 %v1741_v63, 0.0  ;;  %v2281_v36 = vmax.f32 %v1780_v46, 0.0  ;;  %v2218_v63 = vmax.f32 %v1591_v13, 0.0 }
 0x24d   : > { %v1402_v22 = vadd.f32 %v4533_v39, %v3765_v27  ;;  %v4644_v2 = vsel %vm2404_vm2, %v2217_v58, 0.0  ;;  %v1594_v17 = vadd.f32 %v4533_v39, %v3751_v8  ;;  %v2413_v27 = vadd.f32 %v2412_v32, %v2411_v23 }
 0x24e   : > { %v2519_v33 = vsel %vm2404_vm2, %v2203_v48, 0.0  ;;  %v2659_v37 = vsel %vm2404_vm2, %v2268_v29, 0.0  ;;  %v2972_v29 = vld [vmem:[%s321_s15] sm:$0xff]  ;;  %v2282_v62 = vmax.f32 %v1783_v7, 0.0  ;;  %v4659_v8 = vsel %vm2404_vm2, %v2281_v36, 0.0 }
 0x24f   : > { %v2520_v30 = vadd.f32 %v2519_v33, %v2518_v9  ;;  %v2660_v49 = vadd.f32 %v2659_v37, %v2658_v52  ;;  %v4616_v52 = vsel %vm2404_vm2, %v2215_v5, 0.0  ;;  %2997 = vrot.lane.b32.xlu0 %v2972_v29, %s3442_s18  ;;  %v2414_v5 = vsel %vm2404_vm2, %v2153_v6, 0.0  ;;  %v4654_v37 = vpop.f32.mrf.mxu3  ;;  %v5270_v29 = vld [vmem:[#allocation5_spill] sm:$0xff] }
 0x250   : > { %v4608_v50 = vpop.f32.mrf.mxu2  ;;  %v1405_v33 = vadd.f32 %v4533_v39, %v3785_v44  ;;  %v4662_v15 = vsel %vm2404_vm2, %v2218_v63, 0.0  ;;  %v2416_v44 = vsel %vm2404_vm2, %v2154_v35, 0.0  ;;  %v2155_v45 = vmax.f32 %v1402_v22, 0.0 }
 0x251   : > { %v1548_v3 = vpop.f32.mrf.mxu0  ;;  %v1743_v9 = vpop.f32.mrf.mxu1  ;;  %v2415_v46 = vadd.f32 %v2414_v5, %v2413_v27  ;;  %v2219_v13 = vmax.f32 %v1594_v17, 0.0  ;;  %v1408_v6 = vadd.f32 %v4533_v39, %v3801_v61  ;;  %v1411_v17 = vadd.f32 %v4533_v39, %v5270_v29 }
 0x252   : > { %v1549_v41 = vadd.f32 %v4533_v39, %v1548_v3  ;;  %v1744_v51 = vadd.f32 %v4533_v39, %v1743_v9  ;;  %v1789_v3 = vadd.f32 %v4533_v39, %v3781_v40  ;;  %v4676_v9 = vsel %vm2404_vm2, %v2282_v62, 0.0 }
 0x253   : > { %v2418_v7 = vsel %vm2404_vm2, %v2155_v45, 0.0  ;;  %v4686_v22 = vsel %vm2404_vm2, %v2219_v13, 0.0  ;;  %v2157_v62 = vmax.f32 %v1408_v6, 0.0  ;;  %v5273_v6 = vld [vmem:[#allocation7_spill] sm:$0xff] }
 0x254   : > { %v2204_v16 = vmax.f32 %v1549_v41, 0.0  ;;  %v2269_v25 = vmax.f32 %v1744_v51, 0.0  ;;  %v2417_v51 = vadd.f32 %v2416_v44, %v2415_v46  ;;  %v2284_v32 = vmax.f32 %v1789_v3, 0.0 }
 0x256   : > { %v2521_v20 = vsel %vm2404_vm2, %v2204_v16, 0.0  ;;  %v2661_v48 = vsel %vm2404_vm2, %v2269_v25, 0.0  ;;  %v5268_v16 = vld [vmem:[#allocation2_spill] sm:$0xff]  ;;  %v2419_v5 = vadd.f32 %v2418_v7, %v2417_v51  ;;  %v4710_v46 = vsel %vm2404_vm2, %v2284_v32, 0.0 }
 0x257   : > { %v2522_v53 = vadd.f32 %v2521_v20, %v2520_v30  ;;  %v2662_v4 = vadd.f32 %v2661_v48, %v2660_v49  ;;  %v1786_v30 = vadd.f32 %v4533_v39, %v3762_v24  ;;  %v1597_v49 = vadd.f32 %v4533_v39, %v3767_v28  ;;  %v5269_v48 = vld [vmem:[#allocation3_spill] sm:$0xff]  ;;  %v4702_v44 = vpop.f32.mrf.mxu3 }
 0x258   : > { %v4656_v12 = vpop.f32.mrf.mxu2  ;;  %v1600_v24 = vadd.f32 %v4533_v39, %v3787_v47  ;;  %v2156_v28 = vmax.f32 %v1405_v33, 0.0  ;;  %v1792_v40 = vadd.f32 %v4533_v39, %v5268_v16  ;;  %v1603_v61 = vadd.f32 %v4533_v39, %v5269_v48  ;;  %v5274_v16 = vld [vmem:[#allocation8_spill] sm:$0xff] }
 0x259   : > { %v1551_v26 = vpop.f32.mrf.mxu0  ;;  %v1746_v42 = vpop.f32.mrf.mxu1  ;;  %v2283_v23 = vmax.f32 %v1786_v30, 0.0  ;;  %v2220_v58 = vmax.f32 %v1597_v49, 0.0  ;;  %v2422_v51 = vsel %vm2404_vm2, %v2157_v62, 0.0  ;;  %v1798_v7 = vadd.f32 %v4533_v39, %v5273_v6 }
 0x25a   : > { %v1552_v11 = vadd.f32 %v4533_v39, %v1551_v26  ;;  %v1747_v55 = vadd.f32 %v4533_v39, %v1746_v42  ;;  %v2221_v36 = vmax.f32 %v1600_v24, 0.0  ;;  %v2420_v20 = vsel %vm2404_vm2, %v2156_v28, 0.0  ;;  %v5272_v26 = vld [vmem:[#allocation6_spill] sm:$0xff] }
 0x25b   : > { %v4696_v27 = vsel %vm2404_vm2, %v2283_v23, 0.0  ;;  %v2285_v49 = vmax.f32 %v1792_v40, 0.0  ;;  %v1606_v42 = vadd.f32 %v4533_v39, %v5272_v26  ;;  %v2421_v13 = vadd.f32 %v2420_v20, %v2419_v5 }
 0x25c   : > { %v2205_v57 = vmax.f32 %v1552_v11, 0.0  ;;  %v2270_v41 = vmax.f32 %v1747_v55, 0.0  ;;  %v4707_v55 = vsel %vm2404_vm2, %v2220_v58, 0.0  ;;  %v4713_v3 = vsel %vm2404_vm2, %v2221_v36, 0.0  ;;  %v5275_v36 = vld [vmem:[#allocation9_spill] sm:$0xff] }
 0x25d   : > { %v2222_v24 = vmax.f32 %v1603_v61, 0.0  ;;  %v2158_v28 = vmax.f32 %v1411_v17, 0.0  ;;  %v1414_v58 = vadd.f32 %v4533_v39, %v5274_v16  ;;  %v4721_v40 = vsel %vm2404_vm2, %v2285_v49, 0.0 }
 0x25e   : > { %v2523_v25 = vsel %vm2404_vm2, %v2205_v57, 0.0  ;;  %v2663_v47 = vsel %vm2404_vm2, %v2270_v41, 0.0  ;;  %v1609_v20 = vadd.f32 %v4533_v39, %v5275_v36  ;;  %v1921_v48 = vadd.f32 %v4533_v39, %v4514_v0 }
 0x25f   : > { %v2524_v63 = vadd.f32 %v2523_v25, %v2522_v53  ;;  %v2664_v35 = vadd.f32 %v2663_v47, %v2662_v4  ;;  %v5271_v53 = vld [vmem:[#allocation4_spill] sm:$0xff]  ;;  %v2223_v25 = vmax.f32 %v1606_v42, 0.0  ;;  %v2423_v17 = vadd.f32 %v2422_v51, %v2421_v13 }
 0x260   : > { %v4693_v56 = vpop.f32.mrf.mxu2  ;;  %v1795_v4 = vadd.f32 %v4533_v39, %v5271_v53  ;;  %v4730_v5 = vsel %vm2404_vm2, %v2222_v24, 0.0  ;;  %v2424_v62 = vsel %vm2404_vm2, %v2158_v28, 0.0  ;;  %v5276_v53 = vld [vmem:[#allocation10_spill] sm:$0xff]  ;;  %v2287_v49 = vmax.f32 %v1798_v7, 0.0  ;;  %v4751_v7 = vpop.f32.mrf.mxu3 }
 0x261   : > { %v1554_v33 = vpop.f32.mrf.mxu0  ;;  %v1749_v30 = vpop.f32.mrf.mxu1  ;;  %v2159_v26 = vmax.f32 %v1414_v58, 0.0  ;;  %v1924_v0 = vadd.f32 %v4533_v39, %v4522_v1  ;;  %v4741_v42 = vsel %vm2404_vm2, %v2223_v25, 0.0  ;;  %v2425_v28 = vadd.f32 %v2424_v62, %v2423_v17  ;;  %v5278_v1 = vld [vmem:[#allocation12_spill] sm:$0xff] }
 0x262   : > { %v1555_v45 = vadd.f32 %v4533_v39, %v1554_v33  ;;  %v1750_v11 = vadd.f32 %v4533_v39, %v1749_v30  ;;  %v2286_v23 = vmax.f32 %v1795_v4, 0.0  ;;  %v1801_v4 = vadd.f32 %v4533_v39, %v5276_v53 }
 0x263   : > { %v1927_v51 = vadd.f32 %v4533_v39, %v4537_v43  ;;  %v1612_v6 = vadd.f32 %v4533_v39, %v5278_v1  ;;  %v4754_v25 = vsel %vm2404_vm2, %v2287_v49, 0.0  ;;  %v1930_v36 = vadd.f32 %v4533_v39, %v4563_v21  ;;  %v5280_v1 = vld [vmem:[#allocation14_spill] sm:$0xff] }
 0x264   : > { %v2206_v57 = vmax.f32 %v1555_v45, 0.0  ;;  %v2271_v41 = vmax.f32 %v1750_v11, 0.0  ;;  %v4736_v30 = vsel %vm2404_vm2, %v2286_v23, 0.0  ;;  %v5277_v45 = vld [vmem:[#allocation11_spill] sm:$0xff]  ;;  %v2288_v23 = vmax.f32 %v1801_v4, 0.0 }
 0x265   : > { %v1417_v11 = vadd.f32 %v4533_v39, %v5277_v45  ;;  %v1933_v43 = vadd.f32 %v4533_v39, %v4608_v50  ;;  %v2330_v53 = vmax.f32 %v1927_v51, 0.0  ;;  %v2225_v21 = vmax.f32 %v1612_v6, 0.0  ;;  %v5279_v45 = vld [vmem:[#allocation13_spill] sm:$0xff] }
 0x266   : > { %v2525_v47 = vsel %vm2404_vm2, %v2206_v57, 0.0  ;;  %v2665_v32 = vsel %vm2404_vm2, %v2271_v41, 0.0  ;;  %v2224_v57 = vmax.f32 %v1609_v20, 0.0  ;;  %v2328_v41 = vmax.f32 %v1921_v48, 0.0 }
 0x267   : > { %v2526_v61 = vadd.f32 %v2525_v47, %v2524_v63  ;;  %v2666_v29 = vadd.f32 %v2665_v32, %v2664_v35  ;;  %v2426_v47 = vsel %vm2404_vm2, %v2159_v26, 0.0  ;;  %v2329_v32 = vmax.f32 %v1924_v0, 0.0 }
 0x268   : > { %v1941_v33 = vpop.f32.mrf.mxu2  ;;  %v2160_v20 = vmax.f32 %v1417_v11, 0.0  ;;  %v2789_v62 = vsel %vm2404_vm2, %v2328_v41, 0.0  ;;  %v4765_v26 = vsel %vm2404_vm2, %v2224_v57, 0.0  ;;  %v4768_v0 = vsel %vm2404_vm2, %v2288_v23, 0.0 }
 0x269   : > { %v1557_v63 = vpop.f32.mrf.mxu0  ;;  %v1752_v35 = vpop.f32.mrf.mxu1  ;;  %v1804_v50 = vadd.f32 %v4533_v39, %v5279_v45  ;;  %v2791_v11 = vsel %vm2404_vm2, %v2329_v32, 0.0  ;;  %v2332_v57 = vmax.f32 %v1933_v43, 0.0  ;;  %v1420_v6 = vadd.f32 %v4533_v39, %v5280_v1  ;;  %v5282_v1 = vld [vmem:[#allocation16_spill] sm:$0xff] }
 0x26a   : > { %v1558_v13 = vadd.f32 %v4533_v39, %v1557_v63  ;;  %v1753_v24 = vadd.f32 %v4533_v39, %v1752_v35  ;;  %v2427_v63 = vadd.f32 %v2426_v47, %v2425_v28  ;;  %v2790_v28 = vadd.f32 %v2789_v62, %v4510_v38 }
 0x26b   : > { %v2428_v23 = vsel %vm2404_vm2, %v2160_v20, 0.0  ;;  %v2289_v43 = vmax.f32 %v1804_v50, 0.0  ;;  %v1942_v20 = vadd.f32 %v4533_v39, %v1941_v33  ;;  %v2797_v45 = vsel %vm2404_vm2, %v2332_v57, 0.0 }
 0x26c   : > { %v2207_v16 = vmax.f32 %v1558_v13, 0.0  ;;  %v2272_v58 = vmax.f32 %v1753_v24, 0.0  ;;  %v2331_v13 = vmax.f32 %v1930_v36, 0.0  ;;  %v1936_v24 = vadd.f32 %v4533_v39, %v4656_v12  ;;  %v5281_v12 = vld [vmem:[#allocation15_spill] sm:$0xff] }
 0x26d   : > { %v1615_v47 = vadd.f32 %v4533_v39, %v5281_v12  ;;  %v2792_v32 = vadd.f32 %v2791_v11, %v2790_v28  ;;  %v2429_v50 = vadd.f32 %v2428_v23, %v2427_v63  ;;  %v1807_v57 = vadd.f32 %v4533_v39, %v5282_v1 }
 0x26e   : > { %v2527_v48 = vsel %vm2404_vm2, %v2207_v16, 0.0  ;;  %v2667_v17 = vsel %vm2404_vm2, %v2272_v58, 0.0  ;;  %v2793_v16 = vsel %vm2404_vm2, %v2330_v53, 0.0  ;;  %v1939_v58 = vadd.f32 %v4533_v39, %v4693_v56 }
 0x26f   : > { %v2528_v4 = vadd.f32 %v2527_v48, %v2526_v61  ;;  %v2668_v49 = vadd.f32 %v2667_v17, %v2666_v29  ;;  %v2795_v48 = vsel %vm2404_vm2, %v2331_v13, 0.0  ;;  %v2333_v17 = vmax.f32 %v1936_v24, 0.0 }
 0x270   : > { %v1944_v35 = vpop.f32.mrf.mxu2  ;;  %v2794_v62 = vadd.f32 %v2793_v16, %v2792_v32  ;;  %v4795_v13 = vsel %vm2404_vm2, %v2225_v21, 0.0  ;;  %v2161_v24 = vmax.f32 %v1420_v6, 0.0  ;;  %v2335_v12 = vmax.f32 %v1942_v20, 0.0 }
 0x271   : > { %v1560_v61 = vpop.f32.mrf.mxu0  ;;  %v1755_v29 = vpop.f32.mrf.mxu1  ;;  %v1945_v11 = vadd.f32 %v4533_v39, %v1944_v35  ;;  %v2799_v16 = vsel %vm2404_vm2, %v2333_v17, 0.0  ;;  %v5283_v35 = vld [vmem:[#allocation17_spill] sm:$0xff]  ;;  %v4806_v23 = vsel %vm2404_vm2, %v2289_v43, 0.0  ;;  %v2226_v6 = vmax.f32 %v1615_v47, 0.0  ;;  %v5284_v17 = vld [vmem:[#allocation18_spill] sm:$0xff] }
 0x272   : > { %v1561_v41 = vadd.f32 %v4533_v39, %v1560_v61  ;;  %v1756_v51 = vadd.f32 %v4533_v39, %v1755_v29  ;;  %v4789_v61 = vpop.f32.mrf.mxu3  ;;  %v2334_v29 = vmax.f32 %v1939_v58, 0.0  ;;  %v2796_v33 = vadd.f32 %v2795_v48, %v2794_v62 }
 0x273   : > { %v2336_v48 = vmax.f32 %v1945_v11, 0.0  ;;  %v1618_v20 = vadd.f32 %v4533_v39, %v5284_v17 }
 0x274   : > { %v2208_v38 = vmax.f32 %v1561_v41, 0.0  ;;  %v2273_v36 = vmax.f32 %v1756_v51, 0.0 }
 0x276   : > { %v2529_v53 = vsel %vm2404_vm2, %v2208_v38, 0.0  ;;  %v2669_v56 = vsel %vm2404_vm2, %v2273_v36, 0.0  ;;  %v2801_v36 = vsel %vm2404_vm2, %v2334_v29, 0.0  ;;  %v5285_v29 = vld [vmem:[#allocation20_spill] sm:$0xff] }
 0x277   : > { %v2530_v28 = vadd.f32 %v2529_v53, %v2528_v4  ;;  %v2670_v41 = vadd.f32 %v2669_v56, %v2668_v49  ;;  %v1423_v4 = vadd.f32 %v4533_v39, %v5283_v35  ;;  %v2798_v49 = vadd.f32 %v2797_v45, %v2796_v33 }
 0x278   : > { %v1947_v51 = vpop.f32.mrf.mxu2  ;;  %v2290_v45 = vmax.f32 %v1807_v57, 0.0  ;;  %v2803_v33 = vsel %vm2404_vm2, %v2335_v12, 0.0  ;;  %v1426_v11 = vadd.f32 %v4533_v39, %v5285_v29  ;;  %v2805_v35 = vsel %vm2404_vm2, %v2336_v48, 0.0  ;;  %v5287_v48 = vld [vmem:[#allocation21_spill] sm:$0xff] }
 0x279   : > { %v1948_v32 = vadd.f32 %v4533_v39, %v1947_v51  ;;  %v1563_v58 = vpop.f32.mrf.mxu0  ;;  %v1758_v38 = vpop.f32.mrf.mxu1  ;;  %v2800_v62 = vadd.f32 %v2799_v16, %v2798_v49  ;;  %v2430_v51 = vsel %vm2404_vm2, %v2161_v24, 0.0  ;;  %v4819_v24 = vsel %vm2404_vm2, %v2226_v6, 0.0 }
 0x27a   : > { %v1564_v63 = vadd.f32 %v4533_v39, %v1563_v58  ;;  %v1759_v21 = vadd.f32 %v4533_v39, %v1758_v38  ;;  %v2162_v58 = vmax.f32 %v1423_v4, 0.0  ;;  %v2227_v57 = vmax.f32 %v1618_v20, 0.0 }
 0x27b   : > { %v2337_v1 = vmax.f32 %v1948_v32, 0.0  ;;  %v2802_v38 = vadd.f32 %v2801_v36, %v2800_v62  ;;  %v4821_v32 = vpop.f32.mrf.mxu3  ;;  %v5286_v36 = vld [vmem:[#allocation19_spill] sm:$0xff]  ;;  %v1621_v6 = vadd.f32 %v4533_v39, %v5287_v48 }
 0x27c   : > { %v2209_v53 = vmax.f32 %v1564_v63, 0.0  ;;  %v2274_v56 = vmax.f32 %v1759_v21, 0.0  ;;  %v2431_v63 = vadd.f32 %v2430_v51, %v2429_v50  ;;  %v4824_v21 = vsel %vm2404_vm2, %v2290_v45, 0.0 }
 0x27d   : > { %v2804_v12 = vadd.f32 %v2803_v33, %v2802_v38  ;;  %v1810_v17 = vadd.f32 %v4533_v39, %v5286_v36  ;;  %v2807_v62 = vsel %vm2404_vm2, %v2337_v1, 0.0  ;;  %v2432_v51 = vsel %vm2404_vm2, %v2162_v58, 0.0  ;;  %v5288_v33 = vld [vmem:[#allocation22_spill] sm:$0xff]  ;;  %v5289_v1 = vld [vmem:[#allocation23_spill] sm:$0xff] }
 0x27e   : > { %v2531_v43 = vsel %vm2404_vm2, %v2209_v53, 0.0  ;;  %v2671_v47 = vsel %vm2404_vm2, %v2274_v56, 0.0  ;;  %v2163_v45 = vmax.f32 %v1426_v11, 0.0  ;;  %v1813_v38 = vadd.f32 %v4533_v39, %v5288_v33 }
 0x27f   : > { %v2532_v16 = vadd.f32 %v2531_v43, %v2530_v28  ;;  %v2672_v49 = vadd.f32 %v2671_v47, %v2670_v41  ;;  %v2806_v20 = vadd.f32 %v2805_v35, %v2804_v12  ;;  %v1429_v47 = vadd.f32 %v4533_v39, %v5289_v1  ;;  %v5290_v12 = vld [vmem:[#allocation26_spill] sm:$0xff]  ;;  %v5291_v1 = vld [vmem:[#allocation24_spill] sm:$0xff] }
 0x280   : > { %v1950_v4 = vpop.f32.mrf.mxu2  ;;  %v4840_v48 = vsel %vm2404_vm2, %v2227_v57, 0.0  ;;  %v2291_v35 = vmax.f32 %v1810_v17, 0.0  ;;  %v2228_v11 = vmax.f32 %v1621_v6, 0.0  ;;  %v2433_v59 = vadd.f32 %v2432_v51, %v2431_v63  ;;  %v5295_v51 = vld [vmem:[#allocation27_spill] sm:$0xff] }
 0x281   : > { %v1951_v28 = vadd.f32 %v4533_v39, %v1950_v4  ;;  %v1566_v41 = vpop.f32.mrf.mxu0  ;;  %v1761_v50 = vpop.f32.mrf.mxu1  ;;  %v2808_v29 = vadd.f32 %v2807_v62, %v2806_v20  ;;  %v1624_v62 = vadd.f32 %v4533_v39, %v5291_v1  ;;  %v2434_v57 = vsel %vm2404_vm2, %v2163_v45, 0.0  ;;  %v5297_v45 = vld [vmem:[#allocation29_spill] sm:$0xff] }
 0x282   : > { %v1567_v53 = vadd.f32 %v4533_v39, %v1566_v41  ;;  %v1762_v56 = vadd.f32 %v4533_v39, %v1761_v50  ;;  %v1432_v41 = vadd.f32 %v4533_v39, %v5290_v12  ;;  %v2292_v17 = vmax.f32 %v1813_v38, 0.0 }
 0x283   : > { %v2338_v43 = vmax.f32 %v1951_v28, 0.0  ;;  %v4856_v6 = vsel %vm2404_vm2, %v2291_v35, 0.0  ;;  %v1435_v38 = vadd.f32 %v4533_v39, %v5297_v45 }
 0x284   : > { %v2210_v4 = vmax.f32 %v1567_v53, 0.0  ;;  %v2275_v36 = vmax.f32 %v1762_v56, 0.0  ;;  %v2164_v56 = vmax.f32 %v1429_v47, 0.0  ;;  %v2165_v63 = vmax.f32 %v1432_v41, 0.0  ;;  %v5299_v41 = vld [vmem:[#allocation28_spill] sm:$0xff] }
 0x285   : > { %v2809_v58 = vsel %vm2404_vm2, %v2338_v43, 0.0  ;;  %v5294_v43 = vld [vmem:[#allocation25_spill] sm:$0xff] }
 0x286   : > { %v2810_v50 = vadd.f32 %v2809_v58, %v2808_v29  ;;  %v2533_v33 = vsel %vm2404_vm2, %v2210_v4, 0.0  ;;  %v2673_v28 = vsel %vm2404_vm2, %v2275_v36, 0.0  ;;  %v1816_v29 = vadd.f32 %v4533_v39, %v5294_v43 }
 0x287   : > { %v2534_v20 = vadd.f32 %v2533_v33, %v2532_v16  ;;  %v4849_v53 = vadd.f32 %v2673_v28, %v2672_v49  ;;  %v1627_v4 = vadd.f32 %v4533_v39, %v5295_v51  ;;  %v4863_v36 = vsel %vm2404_vm2, %v2228_v11, 0.0  ;;  %v5300_v28 = vld [vmem:[#allocation30_spill] sm:$0xff] }
 0x288   : > { %v4853_v12 = vadd.f32 %v4581_v31, %v2810_v50  ;;  %5296 = vst [vmem:[#allocation5_spill] sm:$0xff] %v4863_v36  ;;  %v4867_v31 = vpop.f32.mrf.mxu3  ;;  %v2435_v58 = vadd.f32 %v2434_v57, %v2433_v59  ;;  %v2229_v50 = vmax.f32 %v1624_v62, 0.0  ;;  %v1819_v33 = vadd.f32 %v4533_v39, %v5299_v41  ;;  %v5302_v57 = vld [vmem:[#allocation32_spill] sm:$0xff] }
 0x289   : > { %5292 = vst [vmem:[#allocation2_spill] sm:$0xff] %v4849_v53  ;;  %v1569_v16 = vpop.f32.mrf.mxu0  ;;  %v1764_v49 = vpop.f32.mrf.mxu1  ;;  %v1630_v1 = vadd.f32 %v4533_v39, %v5300_v28  ;;  %v4876_v11 = vsel %vm2404_vm2, %v2292_v17, 0.0  ;;  %v2436_v43 = vsel %vm2404_vm2, %v2164_v56, 0.0  ;;  %v2230_v53 = vmax.f32 %v1627_v4, 0.0  ;;  %v5304_v4 = vld [vmem:[#allocation33_spill] sm:$0xff] }
 0x28a   : > { %5293 = vst [vmem:[#allocation3_spill] sm:$0xff] %v4853_v12  ;;  %v1570_v47 = vadd.f32 %v4533_v39, %v1569_v16  ;;  %v1765_v35 = vadd.f32 %v4533_v39, %v1764_v49  ;;  %v2293_v12 = vmax.f32 %v1816_v29, 0.0  ;;  %v2438_v16 = vsel %vm2404_vm2, %v2165_v63, 0.0  ;;  %v5301_v49 = vld [vmem:[#allocation31_spill] sm:$0xff] }
 0x28b   : > { %5298 = vst [vmem:[#allocation4_spill] sm:$0xff] %v4867_v31  ;;  %v1822_v59 = vadd.f32 %v4533_v39, %v5301_v49  ;;  %v2166_v62 = vmax.f32 %v1435_v38, 0.0  ;;  %v1438_v41 = vadd.f32 %v4533_v39, %v5302_v57  ;;  %v2294_v36 = vmax.f32 %v1819_v33, 0.0 }
 0x28c   : > { %v2211_v51 = vmax.f32 %v1570_v47, 0.0  ;;  %v2276_v45 = vmax.f32 %v1765_v35, 0.0  ;;  %v2231_v31 = vmax.f32 %v1630_v1, 0.0  ;;  %v2437_v47 = vadd.f32 %v2436_v43, %v2435_v58  ;;  %v5305_v35 = vld [vmem:[#allocation35_spill] sm:$0xff] }
 0x28d   : > { %v4890_v63 = vsel %vm2404_vm2, %v2229_v50, 0.0  ;;  %v1633_v38 = vadd.f32 %v4533_v39, %v5304_v4  ;;  %v1441_v49 = vadd.f32 %v4533_v39, %v5305_v35  ;;  %v4900_v33 = vsel %vm2404_vm2, %v2230_v53, 0.0  ;;  %v5308_v4 = vld [vmem:[#allocation38_spill] sm:$0xff] }
 0x28e   : > { %v2535_v28 = vsel %vm2404_vm2, %v2211_v51, 0.0  ;;  %v2681_v17 = vsel %vm2404_vm2, %v2276_v45, 0.0  ;;  %v4897_v51 = vsel %vm2404_vm2, %v2293_v12, 0.0  ;;  %v2439_v58 = vadd.f32 %v2438_v16, %v2437_v47  ;;  %v5306_v12 = vld [vmem:[#allocation34_spill] sm:$0xff] }
 0x28f   : > { %v4886_v56 = vadd.f32 %v2535_v28, %v2534_v20  ;;  %v2683_v29 = vadd.f32 %v4578_v19, %v2681_v17  ;;  %v2295_v20 = vmax.f32 %v1822_v59, 0.0  ;;  %v2440_v50 = vsel %vm2404_vm2, %v2166_v62, 0.0 }
 0x290   : > { %v2167_v43 = vmax.f32 %v1438_v41, 0.0  ;;  %v4906_v57 = vsel %vm2404_vm2, %v2294_v36, 0.0  ;;  %v4909_v28 = vsel %vm2404_vm2, %v2231_v31, 0.0  ;;  %v1825_v53 = vadd.f32 %v4533_v39, %v5306_v12  ;;  %v4916_v62 = vpop.f32.mrf.mxu3 }
 0x291   : > { %5303 = vst [vmem:[#allocation6_spill] sm:$0xff] %v4886_v56  ;;  %v2685_v1 = vadd.f32 %v4603_v10, %v2683_v29  ;;  %v1572_v19 = vpop.f32.mrf.mxu0  ;;  %v2232_v17 = vmax.f32 %v1633_v38, 0.0  ;;  %v2168_v10 = vmax.f32 %v1441_v49, 0.0  ;;  %v5307_v29 = vld [vmem:[#allocation36_spill] sm:$0xff]  ;;  %v2441_v47 = vadd.f32 %v2440_v50, %v2439_v58  ;;  %v5310_v49 = vld [vmem:[#allocation39_spill] sm:$0xff]  ;;  %v5311_v58 = vld [vmem:[#allocation41_spill] sm:$0xff] }
 0x292   : > { %v1573_v45 = vadd.f32 %v4533_v39, %v1572_v19  ;;  %v1636_v16 = vadd.f32 %v4533_v39, %v5307_v29  ;;  %v4919_v36 = vsel %vm2404_vm2, %v2295_v20, 0.0  ;;  %v1444_v31 = vadd.f32 %v4533_v39, %v5308_v4  ;;  %v5313_v4 = vld [vmem:[#allocation40_spill] sm:$0xff]  ;;  %v5314_v56 = vld [vmem:[#allocation42_spill] sm:$0xff] }
 0x293   : > { %v2687_v59 = vadd.f32 %v4623_v34, %v2685_v1  ;;  %v2442_v19 = vsel %vm2404_vm2, %v2167_v43, 0.0  ;;  %v5309_v34 = vld [vmem:[#allocation37_spill] sm:$0xff]  ;;  %v1639_v1 = vadd.f32 %v4533_v39, %v5310_v49  ;;  %v1447_v20 = vadd.f32 %v4533_v39, %v5311_v58 }
 0x294   : > { %v2212_v41 = vmax.f32 %v1573_v45, 0.0  ;;  %v1828_v38 = vadd.f32 %v4533_v39, %v5309_v34  ;;  %v2296_v45 = vmax.f32 %v1825_v53, 0.0  ;;  %v2444_v43 = vsel %vm2404_vm2, %v2168_v10, 0.0 }
 0x295   : > { %v2689_v35 = vadd.f32 %v4636_v18, %v2687_v59  ;;  %v4935_v18 = vsel %vm2404_vm2, %v2232_v17, 0.0  ;;  %v2233_v59 = vmax.f32 %v1636_v16, 0.0  ;;  %v1831_v34 = vadd.f32 %v4533_v39, %v5313_v4 }
 0x296   : > { %v2543_v12 = vsel %vm2404_vm2, %v2212_v41, 0.0  ;;  %5312 = vst [vmem:[#allocation7_spill] sm:$0xff] %v4935_v18  ;;  %v2169_v49 = vmax.f32 %v1444_v31, 0.0  ;;  %v1642_v53 = vadd.f32 %v4533_v39, %v5314_v56  ;;  %v4947_v10 = vsel %vm2404_vm2, %v2296_v45, 0.0 }
 0x297   : > { %v2691_v50 = vadd.f32 %v4659_v8, %v2689_v35  ;;  %v2545_v29 = vadd.f32 %v4568_v14, %v2543_v12  ;;  %v2443_v8 = vadd.f32 %v2442_v19, %v2441_v47  ;;  %v2297_v35 = vmax.f32 %v1828_v38, 0.0  ;;  %v5315_v12 = vld [vmem:[#allocation44_spill] sm:$0xff] }
 0x298   : > { %v2234_v14 = vmax.f32 %v1639_v1, 0.0  ;;  %v1450_v17 = vadd.f32 %v4533_v39, %v5315_v12  ;;  %v2170_v16 = vmax.f32 %v1447_v20, 0.0  ;;  %v4952_v56 = vsel %vm2404_vm2, %v2233_v59, 0.0  ;;  %v5320_v12 = vld [vmem:[#allocation50_spill] sm:$0xff] }
 0x299   : > { %v2693_v41 = vadd.f32 %v4676_v9, %v2691_v50  ;;  %v2547_v58 = vadd.f32 %v4584_v60, %v2545_v29  ;;  %v2445_v18 = vadd.f32 %v2444_v43, %v2443_v8  ;;  %v2298_v9 = vmax.f32 %v1831_v34, 0.0  ;;  %v5316_v60 = vld [vmem:[#allocation43_spill] sm:$0xff]  ;;  %v5317_v50 = vld [vmem:[#allocation45_spill] sm:$0xff]  ;;  %v4967_v43 = vpop.f32.mrf.mxu3  ;;  %v5319_v8 = vld [vmem:[#allocation46_spill] sm:$0xff] }
 0x29a   : > { %v1834_v47 = vadd.f32 %v4533_v39, %v5316_v60  ;;  %v2446_v19 = vsel %vm2404_vm2, %v2169_v49, 0.0  ;;  %v2235_v38 = vmax.f32 %v1642_v53, 0.0  ;;  %v4960_v20 = vsel %vm2404_vm2, %v2297_v35, 0.0  ;;  %v5318_v34 = vld [vmem:[#allocation47_spill] sm:$0xff] }
 0x29b   : > { %v2695_v4 = vadd.f32 %v4696_v27, %v2693_v41  ;;  %v2549_v31 = vadd.f32 %v4616_v52, %v2547_v58  ;;  %v4963_v52 = vsel %vm2404_vm2, %v2234_v14, 0.0  ;;  %v2171_v27 = vmax.f32 %v1450_v17, 0.0 }
 0x29c   : > { %v1645_v29 = vadd.f32 %v4533_v39, %v5317_v50  ;;  %v2448_v59 = vsel %vm2404_vm2, %v2170_v16, 0.0  ;;  %v1453_v49 = vadd.f32 %v4533_v39, %v5318_v34  ;;  %v2447_v53 = vadd.f32 %v2446_v19, %v2445_v18  ;;  %v5325_v34 = vld [vmem:[#allocation53_spill] sm:$0xff] }
 0x29d   : > { %v2697_v1 = vadd.f32 %v4710_v46, %v2695_v4  ;;  %v2551_v45 = vadd.f32 %v4626_v54, %v2549_v31  ;;  %v4975_v41 = vsel %vm2404_vm2, %v2298_v9, 0.0  ;;  %v2299_v58 = vmax.f32 %v1834_v47, 0.0  ;;  %v5321_v31 = vld [vmem:[#allocation48_spill] sm:$0xff]  ;;  %v5322_v47 = vld [vmem:[#allocation49_spill] sm:$0xff] }
 0x29e   : > { %v1837_v35 = vadd.f32 %v4533_v39, %v5319_v8  ;;  %v4980_v14 = vsel %vm2404_vm2, %v2235_v38, 0.0  ;;  %v1456_v17 = vadd.f32 %v4533_v39, %v5320_v12  ;;  %v2449_v4 = vadd.f32 %v2448_v59, %v2447_v53 }
 0x29f   : > { %v2699_v46 = vadd.f32 %v4721_v40, %v2697_v1  ;;  %v2553_v54 = vadd.f32 %v4644_v2, %v2551_v45  ;;  %v2450_v2 = vsel %vm2404_vm2, %v2171_v27, 0.0  ;;  %v2236_v18 = vmax.f32 %v1645_v29, 0.0  ;;  %v5324_v27 = vld [vmem:[#allocation52_spill] sm:$0xff] }
 0x2a0   : > { %v1648_v9 = vadd.f32 %v4533_v39, %v5321_v31  ;;  %v2172_v60 = vmax.f32 %v1453_v49, 0.0  ;;  %v1840_v19 = vadd.f32 %v4533_v39, %v5322_v47  ;;  %v4994_v45 = vsel %vm2404_vm2, %v2299_v58, 0.0  ;;  %v5326_v58 = vld [vmem:[#allocation54_spill] sm:$0xff] }
 0x2a1   : > { %v2701_v16 = vadd.f32 %v4736_v30, %v2699_v46  ;;  %v2555_v40 = vadd.f32 %v4662_v15, %v2553_v54  ;;  %v2300_v30 = vmax.f32 %v1837_v35, 0.0  ;;  %v5323_v15 = vld [vmem:[#allocation51_spill] sm:$0xff]  ;;  %v1843_v29 = vadd.f32 %v4533_v39, %v5324_v27 }
 0x2a2   : > { %v1651_v50 = vadd.f32 %v4533_v39, %v5323_v15  ;;  %v2173_v59 = vmax.f32 %v1456_v17, 0.0  ;;  %v1459_v49 = vadd.f32 %v4533_v39, %v5325_v34  ;;  %v2451_v54 = vadd.f32 %v2450_v2, %v2449_v4  ;;  %v5327_v4 = vld [vmem:[#allocation56_spill] sm:$0xff] }
 0x2a3   : > { %v2703_v38 = vadd.f32 %v4754_v25, %v2701_v16  ;;  %v2557_v1 = vadd.f32 %v4686_v22, %v2555_v40  ;;  %v5005_v22 = vsel %vm2404_vm2, %v2236_v18, 0.0  ;;  %v2237_v53 = vmax.f32 %v1648_v9, 0.0  ;;  %v5017_v18 = vpop.f32.mrf.mxu3 }
 0x2a4   : > { %v1654_v8 = vadd.f32 %v4533_v39, %v5326_v58  ;;  %v2452_v35 = vsel %vm2404_vm2, %v2172_v60, 0.0  ;;  %v2301_v12 = vmax.f32 %v1840_v19, 0.0  ;;  %v5013_v40 = vsel %vm2404_vm2, %v2300_v30, 0.0 }
 0x2a5   : > { %v2705_v46 = vadd.f32 %v4768_v0, %v2703_v38  ;;  %v2559_v25 = vadd.f32 %v4707_v55, %v2557_v1  ;;  %v2238_v0 = vmax.f32 %v1651_v50, 0.0  ;;  %v2302_v55 = vmax.f32 %v1843_v29, 0.0 }
 0x2a6   : > { %v1462_v2 = vadd.f32 %v4533_v39, %v5327_v4  ;;  %v2454_v31 = vsel %vm2404_vm2, %v2173_v59, 0.0  ;;  %v2174_v9 = vmax.f32 %v1459_v49, 0.0  ;;  %v2239_v19 = vmax.f32 %v1654_v8, 0.0 }
 0x2a7   : > { %v2707_v17 = vadd.f32 %v4806_v23, %v2705_v46  ;;  %v2561_v16 = vadd.f32 %v4713_v3, %v2559_v25  ;;  %v2453_v23 = vadd.f32 %v2452_v35, %v2451_v54  ;;  %v5328_v3 = vld [vmem:[#allocation55_spill] sm:$0xff]  ;;  %v2116_v1 = vadd.f32 %v4533_v39, %v4654_v37 }
 0x2a8   : > { %v1846_v38 = vadd.f32 %v4533_v39, %v5328_v3  ;;  %v5027_v30 = vsel %vm2404_vm2, %v2237_v53, 0.0  ;;  %v5030_v15 = vsel %vm2404_vm2, %v2301_v12, 0.0  ;;  %v5038_v29 = vsel %vm2404_vm2, %v2302_v55, 0.0  ;;  %v5329_v25 = vld [vmem:[#allocation59_spill] sm:$0xff]  ;;  %v5330_v12 = vld [vmem:[#allocation57_spill] sm:$0xff] }
 0x2a9   : > { %v2709_v60 = vadd.f32 %v4824_v21, %v2707_v17  ;;  %v2563_v47 = vadd.f32 %v4730_v5, %v2561_v16  ;;  %v2455_v27 = vadd.f32 %v2454_v31, %v2453_v23  ;;  %v5035_v5 = vsel %vm2404_vm2, %v2238_v0, 0.0  ;;  %v5331_v17 = vld [vmem:[#allocation58_spill] sm:$0xff] }
 0x2aa   : > { %v2175_v59 = vmax.f32 %v1462_v2, 0.0  ;;  %v2456_v37 = vsel %vm2404_vm2, %v2174_v9, 0.0  ;;  %v2119_v34 = vadd.f32 %v4533_v39, %v4702_v44  ;;  %v1465_v54 = vadd.f32 %v4533_v39, %v5329_v25 }
 0x2ab   : > { %v2711_v50 = vadd.f32 %v4856_v6, %v2709_v60  ;;  %v2565_v21 = vadd.f32 %v4741_v42, %v2563_v47  ;;  %v5046_v6 = vsel %vm2404_vm2, %v2239_v19, 0.0  ;;  %v2303_v42 = vmax.f32 %v1846_v38, 0.0  ;;  %v2142_v9 = vpop.f32.mrf.mxu3  ;;  %v5332_v19 = vld [vmem:[#allocation62_spill] sm:$0xff]  ;;  %v5333_v38 = vld [vmem:[#allocation4_spill] sm:$0xff] }
 0x2ac   : > { %v2393_v53 = vmax.f32 %v2116_v1, 0.0  ;;  %v2122_v58 = vadd.f32 %v4533_v39, %v4751_v7  ;;  %v2457_v44 = vadd.f32 %v2456_v37, %v2455_v27  ;;  %v5061_v16 = vadd.f32 %v4533_v39, %v5331_v17  ;;  %v5335_v37 = vld [vmem:[#allocation65_spill] sm:$0xff] }
 0x2ad   : > { %v2713_v49 = vadd.f32 %v4876_v11, %v2711_v50  ;;  %v2567_v46 = vadd.f32 %v4765_v26, %v2565_v21  ;;  %v2458_v11 = vsel %vm2404_vm2, %v2175_v59, 0.0  ;;  %v5057_v26 = vadd.f32 %v4533_v39, %v5330_v12  ;;  %v5334_v59 = vld [vmem:[#allocation5_spill] sm:$0xff] }
 0x2ae   : > { %v2394_v0 = vmax.f32 %v2119_v34, 0.0  ;;  %v2125_v55 = vadd.f32 %v4533_v39, %v4789_v61  ;;  %v2176_v4 = vmax.f32 %v1465_v54, 0.0  ;;  %v3443_v2 = vmov 256.0  }
 0x2af   : > { %v2715_v8 = vadd.f32 %v4897_v51, %v2713_v49  ;;  %v2569_v35 = vadd.f32 %v4795_v13, %v2567_v46  ;;  %v5068_v13 = vsel %vm2404_vm2, %v2303_v42, 0.0  ;;  %3429 = vrcp.f32 %v3443_v2  ;;  %v5336_v49 = vld [vmem:[#allocation70_spill] sm:$0xff] }
 0x2b0   : > { %v2929_v31 = vsel %vm2404_vm2, %v2393_v53, 0.0  ;;  %v2395_v60 = vmax.f32 %v2122_v58, 0.0  ;;  %v2128_v47 = vadd.f32 %v4533_v39, %v4821_v32  ;;  %v1468_v3 = vadd.f32 %v4533_v39, %v5332_v19 }
 0x2b1   : > { %v2717_v7 = vadd.f32 %v4906_v57, %v2715_v8  ;;  %v2571_v51 = vadd.f32 %v4819_v24, %v2569_v35  ;;  %v2459_v57 = vadd.f32 %v2458_v11, %v2457_v44  ;;  %v2304_v24 = vmax.f32 %v5061_v16, 0.0  ;;  %v5337_v8 = vld [vmem:[#allocation68_spill] sm:$0xff] }
 0x2b2   : > { %v2131_v1 = vadd.f32 %v4533_v39, %v5333_v38  ;;  %v2931_v50 = vsel %vm2404_vm2, %v2394_v0, 0.0  ;;  %v2396_v21 = vmax.f32 %v2125_v55, 0.0  ;;  %v2930_v46 = vadd.f32 %v2929_v31, %v5336_v49  ;;  %v5339_v38 = vld [vmem:[#allocation61_spill] sm:$0xff] }
 0x2b3   : > { %v2719_v23 = vadd.f32 %v4919_v36, %v2717_v7  ;;  %v2573_v61 = vadd.f32 %v4840_v48, %v2571_v51  ;;  %v2460_v36 = vsel %vm2404_vm2, %v2176_v4, 0.0  ;;  %v5087_v48 = vld [vmem:[%s5189_s3] ss:$0 sm:$0xff]  ;;  %v2933_v42 = vsel %vm2404_vm2, %v2395_v60, 0.0 }
 0x2b4   : > { %v1471_v34 = vadd.f32 %v5087_v48, %v5335_v37  ;;  %v2134_v39 = vadd.f32 %v5087_v48, %v4916_v62  ;;  %v2177_v58 = vmax.f32 %v1468_v3, 0.0  ;;  %v1474_v35 = vadd.f32 %v5087_v48, %v5337_v8 }
 0x2b5   : > { %v2721_v27 = vadd.f32 %v4947_v10, %v2719_v23  ;;  %v2575_v32 = vadd.f32 %v5334_v59, %v2573_v61  ;;  %v2397_v10 = vmax.f32 %v2128_v47, 0.0  ;;  %v5097_v53 = vpop.eup %3429  ;;  %v2932_v44 = vadd.f32 %v2931_v50, %v2930_v46 }
 0x2b6   : > { %v2398_v11 = vmax.f32 %v2131_v1, 0.0  ;;  %v2935_v12 = vsel %vm2404_vm2, %v2396_v21, 0.0  ;;  %v2137_v62 = vadd.f32 %v5087_v48, %v4967_v43  ;;  %v2178_v55 = vmax.f32 %v1471_v34, 0.0 }
 0x2b7   : > { %v2577_v25 = vadd.f32 %v4890_v63, %v2575_v32  ;;  %v2723_v54 = vadd.f32 %v4960_v20, %v2721_v27  ;;  %v2461_v63 = vadd.f32 %v2460_v36, %v2459_v57  ;;  %v2934_v20 = vadd.f32 %v2933_v42, %v2932_v44  ;;  %v5338_v57 = vld [vmem:[#allocation7_spill] sm:$0xff]  ;;  %v5340_v32 = vld [vmem:[#allocation64_spill] sm:$0xff] }
 0x2b8   : > { %v2399_v7 = vmax.f32 %v2134_v39, 0.0  ;;  %v2937_v51 = vsel %vm2404_vm2, %v2397_v10, 0.0  ;;  %v2140_v4 = vadd.f32 %v5087_v48, %v5017_v18  ;;  %v2462_v60 = vsel %vm2404_vm2, %v2177_v58, 0.0  ;;  %v5341_v10 = vld [vmem:[#allocation67_spill] sm:$0xff] }
 0x2b9   : > { %v2579_v17 = vadd.f32 %v4900_v33, %v2577_v25  ;;  %v2725_v0 = vadd.f32 %v4975_v41, %v2723_v54  ;;  %v2179_v43 = vmax.f32 %v1474_v35, 0.0  ;;  %v2936_v47 = vadd.f32 %v2935_v12, %v2934_v20  ;;  %v2145_v41 = vpop.f32.mrf.mxu3  ;;  %v5342_v12 = vld [vmem:[#allocation60_spill] sm:$0xff] }
 0x2ba   : > { %v2939_v33 = vsel %vm2404_vm2, %v2398_v11, 0.0  ;;  %v2400_v23 = vmax.f32 %v2137_v62, 0.0  ;;  %v2143_v61 = vadd.f32 %v5087_v48, %v2142_v9  ;;  %v1852_v18 = vadd.f32 %v5087_v48, %v5339_v38 }
 0x2bb   : > { %v2581_v2 = vadd.f32 %v4909_v28, %v2579_v17  ;;  %v2727_v31 = vadd.f32 %v4994_v45, %v2725_v0  ;;  %v2464_v28 = vsel %vm2404_vm2, %v2178_v55, 0.0  ;;  %v2938_v45 = vadd.f32 %v2937_v51, %v2936_v47 }
 0x2bc   : > { %v2941_v1 = vsel %vm2404_vm2, %v2399_v7, 0.0  ;;  %v2401_v50 = vmax.f32 %v2140_v4, 0.0  ;;  %v2146_v27 = vadd.f32 %v5087_v48, %v2145_v41  ;;  %v2463_v9 = vadd.f32 %v2462_v60, %v2461_v63 }
 0x2bd   : > { %v2583_v19 = vadd.f32 %v5338_v57, %v2581_v2  ;;  %v2729_v3 = vadd.f32 %v5013_v40, %v2727_v31  ;;  %v1855_v36 = vadd.f32 %v5087_v48, %v5340_v32  ;;  %v2466_v40 = vsel %vm2404_vm2, %v2179_v43, 0.0  ;;  %v5344_v2 = vld [vmem:[#allocation63_spill] sm:$0xff]  ;;  %v5346_v57 = vld [vmem:[#allocation2_spill] sm:$0xff] }
 0x2be   : > { %v2940_v37 = vadd.f32 %v2939_v33, %v2938_v45  ;;  %v2943_v34 = vsel %vm2404_vm2, %v2400_v23, 0.0  ;;  %v2402_v49 = vmax.f32 %v2143_v61, 0.0  ;;  %v2305_v42 = vmax.f32 %v1852_v18, 0.0  ;;  %v5345_v33 = vld [vmem:[#allocation66_spill] sm:$0xff] }
 0x2bf   : > { %v2585_v21 = vadd.f32 %v4952_v56, %v2583_v19  ;;  %v2731_v59 = vadd.f32 %v5030_v15, %v2729_v3  ;;  %v2465_v56 = vadd.f32 %v2464_v28, %v2463_v9  ;;  %v1858_v25 = vadd.f32 %v5087_v48, %v5341_v10 }
 0x2c0   : > { %v2942_v15 = vadd.f32 %v2941_v1, %v2940_v37  ;;  %v2945_v54 = vsel %vm2404_vm2, %v2401_v50, 0.0  ;;  %v2403_v58 = vmax.f32 %v2146_v27, 0.0  ;;  %v2736_v44 = vsel %vm2404_vm2, %v2304_v24, 0.0  ;;  %v5348_v27 = vld [vmem:[#allocation69_spill] sm:$0xff] }
 0x2c1   : > { %v2587_v46 = vadd.f32 %v4963_v52, %v2585_v21  ;;  %v2733_v39 = vadd.f32 %v5038_v29, %v2731_v59  ;;  %v2306_v52 = vmax.f32 %v1855_v36, 0.0  ;;  %v2467_v11 = vadd.f32 %v2466_v40, %v2465_v56 }
 0x2c2   : > { %v2944_v29 = vadd.f32 %v2943_v34, %v2942_v15  ;;  %v1660_v62 = vadd.f32 %v5087_v48, %v5342_v12  ;;  %v2947_v17 = vsel %vm2404_vm2, %v2402_v49, 0.0  ;;  %v2738_v55 = vsel %vm2404_vm2, %v2305_v42, 0.0 }
 0x2c3   : > { %v2589_v8 = vadd.f32 %v4980_v14, %v2587_v46  ;;  %v2735_v35 = vadd.f32 %v5068_v13, %v2733_v39  ;;  %v2307_v14 = vmax.f32 %v1858_v25, 0.0  ;;  %v5343_v13 = vld [vmem:[#allocation6_spill] sm:$0xff]  ;;  %v2240_v16 = vmax.f32 %v5057_v26, 0.0 }
 0x2c4   : > { %v2946_v20 = vadd.f32 %v2945_v54, %v2944_v29  ;;  %v2537_v7 = vrot.slane %v5343_v13, 4  ;;  %v2949_v24 = vsel %vm2404_vm2, %v2403_v58, 0.0  ;;  %v1663_v31 = vadd.f32 %v5087_v48, %v5344_v2 }
 0x2c5   : > { %v2591_v0 = vadd.f32 %v5005_v22, %v2589_v8  ;;  %v2737_v63 = vadd.f32 %v2736_v44, %v2735_v35  ;;  %v2740_v60 = vsel %vm2404_vm2, %v2306_v52, 0.0  ;;  %v2468_v22 = vrot.slane %v2467_v11, 4 }
 0x2c6   : > { %v2948_v43 = vadd.f32 %v2947_v17, %v2946_v20  ;;  %v2241_v47 = vmax.f32 %v1660_v62, 0.0  ;;  %v1666_v41 = vadd.f32 %v5087_v48, %v5345_v33  ;;  %v2742_v26 = vsel %vm2404_vm2, %v2307_v14, 0.0  ;;  %v5347_v48 = vld [vmem:[#allocation3_spill] sm:$0xff] }
 0x2c7   : > { %v2593_v51 = vadd.f32 %v5027_v30, %v2591_v0  ;;  %v2739_v4 = vadd.f32 %v2738_v55, %v2737_v63  ;;  %v2675_v19 = vrot.slane %v5346_v57, 4  ;;  %v2538_v30 = vadd.f32 %v2537_v7, %v5343_v13 }
 0x2c8   : > { %v2950_v3 = vadd.f32 %v2949_v24, %v2948_v43  ;;  %v2598_v38 = vsel %vm2404_vm2, %v2240_v16, 0.0  ;;  %v2242_v45 = vmax.f32 %v1663_v31, 0.0  ;;  %v2469_v1 = vadd.f32 %v2468_v22, %v2467_v11 }
 0x2c9   : > { %v2595_v23 = vadd.f32 %v5035_v5, %v2593_v51  ;;  %v2741_v61 = vadd.f32 %v2740_v60, %v2739_v4  ;;  %v2958_v50 = vmul.f32 256.0, %v5097_v53  ;;  %v2813_v21 = vrot.slane %v5347_v48, 4 }
 0x2ca   : > { %v2600_v5 = vsel %vm2404_vm2, %v2241_v47, 0.0  ;;  %v2882_v59 = vrot.slane %v5348_v27, 4  ;;  %v2243_v36 = vmax.f32 %v1666_v41, 0.0  ;;  %v2676_v40 = vadd.f32 %v2675_v19, %v5346_v57 }
 0x2cb   : > { %v2597_v18 = vadd.f32 %v5046_v6, %v2595_v23  ;;  %v2743_v28 = vadd.f32 %v2742_v26, %v2741_v61  ;;  %v2539_v37 = vrot.slane %v2538_v30, 2  ;;  %v2951_v34 = vrot.slane %v2950_v3, 4 }
 0x2cc   : > { %v2602_v46 = vsel %vm2404_vm2, %v2242_v45, 0.0  ;;  %v2470_v39 = vrot.slane %v2469_v1, 2  ;;  %v2814_v42 = vadd.f32 %v2813_v21, %v5347_v48  ;;  %v2959_v56 = vsub.f32 1.0, %v2958_v50 }
 0x2cd   : > { %v2599_v9 = vadd.f32 %v2598_v38, %v2597_v18  ;;  %v2744_v32 = vrot.slane %v2743_v28, 4  ;;  %v2883_v10 = vadd.f32 %v2882_v59, %v5348_v27  ;;  %v2604_v15 = vsel %vm2404_vm2, %v2243_v36, 0.0 }
 0x2ce   : > { %v2677_v54 = vrot.slane %v2676_v40, 2  ;;  %v2540_v58 = vadd.f32 %v2539_v37, %v2538_v30  ;;  %v2952_v8 = vadd.f32 %v2951_v34, %v2950_v3  ;;  %v2471_v52 = vadd.f32 %v2470_v39, %v2469_v1  ;;  %v3427_v34 = vld [vmem:[%s5191_s5] ss:$0 sm:$0xff] }
 0x2cf   : > { %v2601_v49 = vadd.f32 %v2600_v5, %v2599_v9  ;;  %v2745_v6 = vadd.f32 %v2744_v32, %v2743_v28  ;;  %v2815_v11 = vrot.slane %v2814_v42, 2  ;;  %v2960_v29 = vmul.f32 %v5097_v53, %v2959_v56  ;;  %v2998_v32 = vpop.permute.xlu0 %2997  ;;  %v3428_v39 = vld [vmem:[%s5193_s7] ss:$0 sm:$0xff] }
 0x2d0   : > { %v2884_v12 = vrot.slane %v2883_v10, 2  ;;  %v2678_v17 = vadd.f32 %v2677_v54, %v2676_v40  ;;  %v2541_v0 = vrot.slane %v2540_v58, 1  ;;  %v2953_v63 = vrot.slane %v2952_v8, 2 }
 0x2d1   : > { %v2603_v25 = vadd.f32 %v2602_v46, %v2601_v49  ;;  %v2746_v44 = vrot.slane %v2745_v6, 2  ;;  %v2472_v20 = vrot.slane %v2471_v52, 1  ;;  %v2816_v13 = vadd.f32 %v2815_v11, %v2814_v42 }
 0x2d2   : > { %v2961_v7 = vadd.f32 %v5097_v53, %v2960_v29  ;;  %v2885_v16 = vadd.f32 %v2884_v12, %v2883_v10  ;;  %vm2962_vm3 = vweird.f32 %v5097_v53  ;;  %v2679_v51 = vrot.slane %v2678_v17, 1 }
 0x2d3   : > { %v2605_v35 = vadd.f32 %v2604_v15, %v2603_v25  ;;  %v2747_v14 = vadd.f32 %v2746_v44, %v2745_v6  ;;  %v2542_v4 = vadd.f32 %v2541_v0, %v2540_v58  ;;  %v2954_v2 = vadd.f32 %v2953_v63, %v2952_v8 }
 0x2d4   : > { %v2473_v22 = vadd.f32 %v2472_v20, %v2471_v52  ;;  %v2817_v43 = vrot.slane %v2816_v13, 1  ;;  %v2963_v47 = vsel %vm2962_vm3, %v5097_v53, %v2961_v7  ;;  %v2886_v33 = vrot.slane %v2885_v16, 1 }
 0x2d5   : > { %v2606_v62 = vrot.slane %v2605_v35, 4  ;;  %v2748_v60 = vrot.slane %v2747_v14, 1  ;;  %v2680_v23 = vadd.f32 %v2679_v51, %v2678_v17  ;;  %v2965_v61 = vmul.f32 %v2963_v47, %v2542_v4 }
 0x2d6   : > { %v2955_v26 = vrot.slane %v2954_v2, 1  ;;  %v2964_v30 = vmul.f32 %v2963_v47, %v2473_v22  ;;  %v2818_v3 = vadd.f32 %v2817_v43, %v2816_v13  ;;  %v2887_v38 = vadd.f32 %v2886_v33, %v2885_v16 }
 0x2d7   : > { %v2607_v55 = vadd.f32 %v2606_v62, %v2605_v35  ;;  %v2749_v19 = vadd.f32 %v2748_v60, %v2747_v14  ;;  %v2967_v28 = vmul.f32 %v2963_v47, %v2680_v23 }
 0x2d8   : > { %v2982_v45 = vsel %vm2981_vm4, %v2965_v61, %v2964_v30  ;;  %v2956_v1 = vadd.f32 %v2955_v26, %v2954_v2  ;;  %v2969_v48 = vmul.f32 %v2963_v47, %v2818_v3  ;;  %v2970_v5 = vmul.f32 %v2963_v47, %v2887_v38 }
 0x2d9   : > { %v2608_v24 = vrot.slane %v2607_v55, 2  ;;  %v2968_v50 = vmul.f32 %v2963_v47, %v2749_v19 }
 0x2da   : > { %v2971_v59 = vmul.f32 %v2963_v47, %v2956_v1 }
 0x2db   : > { %v2609_v31 = vadd.f32 %v2608_v24, %v2607_v55 }
 0x2dd   : > { %v2610_v41 = vrot.slane %v2609_v31, 1 }
 0x2df   : > { %v2611_v57 = vadd.f32 %v2610_v41, %v2609_v31 }
 0x2e1   : > { %v2966_v18 = vmul.f32 %v2963_v47, %v2611_v57 }
 0x2e3   : > { %v2984_v53 = vsel %vm2983_vm5, %v2966_v18, %v2982_v45 }
 0x2e4   : > { %v2986_v21 = vsel %vm2985_vm6, %v2967_v28, %v2984_v53 }
 0x2e5   : > { %v2988_v27 = vsel %vm2987_vm7, %v2968_v50, %v2986_v21 }
 0x2e6   : > { %v2990_v9 = vsel %vm2989_vm8, %v2969_v48, %v2988_v27 }
 0x2e7   : > { %v2992_v36 = vsel %vm2991_vm9, %v2970_v5, %v2990_v9 }
 0x2e8   : > { %v2994_v40 = vsel %vm2993_vm10, %v2971_v59, %v2992_v36 }
 0x2e9   : > { %v3000_v37 = vsel %vm2404_vm2, %v2994_v40, %v2998_v32 }
 0x2ea   : > { %3399 = vmatmul.msk.f32.vlgmr.msrb.gmra.mxu1 %vm3007_vm11, %v3000_v37 }
 0x367   : > { %v3031_v49 = vpop.f32.mrf.mxu1 }
 0x368   : > { %v3032_v6 = vadd.f32 %v3427_v34, %v3031_v49 }
 0x36a   : > { %v3034_v46 = vmax.f32 %v3032_v6, 0.0 }
 0x36c   : > { %3400 = vmatmul.msk.f32.vlgmr.msrb.gmra.mxu2 %vm3041_vm12, %v3034_v46 }
 0x3ef   : > { %v3062_v42 = vpop.f32.mrf.mxu2 }
 0x3f0   : > { %v3063_v56 = vadd.f32 %v3428_v39, %v3062_v42 }
 0x3f2   : > { %3065 = vst.msk [vmem:[%s325_s29] sm:$0xff] %vm2404_vm2, %v3063_v56 }
 0x3f3 PF: > { %s18_s27 = sadd.s32 1, %s3440_s27  }
 0x3f4   : > { %p15_p5 = scmp.ge.s32.totalorder %s18_s27, 7  }
 0x3f6   :  { %17 = sbr.rel (!%p15_p5) target bundleno = 1 (0x1), region = 85 }

</bundles_post_ra>
